<compile_context>
chip_gen: v5e
topology: v5e:2x2
jax: 0.10.0
libtpu: 0.0.40
codegen_flags: <defaults>
</compile_context>

<pallas_src>
import functools

import numpy as np
import jax
import jax.numpy as jnp
from jax import lax
from jax.experimental import pallas as pl
from jax.experimental.pallas import tpu as pltpu

# ---------------------------------------------------------------------------
# Module constants (mirroring reasoning_id.py)
# ---------------------------------------------------------------------------
concept2id_name = {
    '连接线接线头(terminal)_power': 0,
    '电源负极接线柱(cathode)_power': 1,
    '其他(others)': 2,
}
rel2id = {'uncon': 0, 'con': 1}

MAX_OBJ = 60              # max_obj_num
PAD_OBJ = 128             # object axis padded to a full vreg lane width
MAX_CONCEPT_PAD = 8       # only 3 concepts exist; 8 keeps the table tiny
HID = 32                  # hidden width of the (synthetic) OnClassify_v1 MLP
MAX_STEPS = 16            # fixed DSL program capacity (padded with NOPs)

# op codes for the fused executor kernel
OP_NOP = 0
OP_OBJECTS = 1
OP_FILTER_NAME = 2
OP_FILTER_INDEX = 3
OP_RELATE = 4
OP_COUNT = 5
OP_INTERSECT = 6
OP_UNION = 7
OP_AND = 8
OP_OR = 9
OP_EXIST = 10

OP_CODES = {
    'objects': OP_OBJECTS,
    'filter_name': OP_FILTER_NAME,
    'filter_index': OP_FILTER_INDEX,
    'relate': OP_RELATE,
    'count': OP_COUNT,
    'intersect': OP_INTERSECT,
    'union': OP_UNION,
    'and': OP_AND,
    'or': OP_OR,
    'exist': OP_EXIST,
}
SCALAR_OPS = ('count', 'exist')

# packed int32 SMEM parameter layout
IP_OPS = 0                      # ops[t]        at [0, MAX_STEPS)
IP_PRM = MAX_STEPS              # prm[t]        at [MAX_STEPS, 2*MAX_STEPS)
IP_N = 2 * MAX_STEPS            # number of valid objects
IP_THR = IP_N + 1               # 1 -> 'test' mode thresholding
IP_NSTEPS = IP_N + 2            # actual program length
IP_INFER = IP_N + 3             # 1 -> 'infer' mode (per-step scores needed)
IPARAMS_LEN = IP_N + 4

_vmem = functools.partial(pl.BlockSpec, memory_space=pltpu.MemorySpace.VMEM)
_smem = functools.partial(pl.BlockSpec, memory_space=pltpu.MemorySpace.SMEM)


# ---------------------------------------------------------------------------
# Fused kernel: relate-matrix init (pair MLP) + DSL program executor
# ---------------------------------------------------------------------------
def _fused_kernel(iparams_ref, w2b2_ref, feat_ref, featT_ref, w1a_ref, b1_ref,
                  w1bT_ref, concept_ref, ans_ref, scores_ref, rel_ref, buf_ref):
    """Single-launch forward pass.

    iparams_ref : SMEM (IPARAMS_LEN,) int32  [ops | prm | n | thr | n_steps | infer]
    w2b2_ref    : SMEM (HID+1,) f32          [w2[:,0] | b2[0]]
    feat_ref    : (PAD_OBJ, 4)  per-object [x1, y1, w, h]
    featT_ref   : (4, PAD_OBJ)  same, transposed (lane-dense)
    w1a_ref     : (4, HID)  first-layer weights acting on object a
    b1_ref      : (1, HID)
    w1bT_ref    : (HID, 4)  first-layer weights acting on object b (transposed)
    concept_ref : (MAX_CONCEPT_PAD, 1, PAD_OBJ) concept masks (attribute 0 = name)
    ans_ref     : (1, PAD_OBJ) final buffer entry
    scores_ref  : (1, PAD_OBJ) per-step exist() scores (lane t = step t, infer only)
    rel_ref     : VMEM scratch (PAD_OBJ, PAD_OBJ)  con-classifier matrix
    buf_ref     : VMEM scratch (MAX_STEPS, 1, PAD_OBJ)  the 'buffer' list

    # TODO(synk): OnClassify_v1 is not defined in the source repo; it is
    # approximated here by a deterministic 2-layer MLP with sigmoid output.
    # TODO(synk): scalar results (count/exist) are stored broadcast over the
    # first MAX_OBJ lanes; a count-of-a-count degenerate program would differ
    # from PyTorch (accepted restriction).
    """
    n = iparams_ref[IP_N]
    use_thr = iparams_ref[IP_THR]
    n_steps = iparams_ref[IP_NSTEPS]
    infer = iparams_ref[IP_INFER]

    # ---- Prologue: pairwise box classifier -> relate matrix (stays in VMEM) ----
    a_pre = jnp.dot(feat_ref[...], w1a_ref[...],
                    preferred_element_type=jnp.float32) + b1_ref[...]      # (PAD, HID)
    b_preT = jnp.dot(w1bT_ref[...], featT_ref[...],
                     preferred_element_type=jnp.float32)                   # (HID, PAD)

    # rank-1 accumulation over hidden units: every temporary is a lane-dense
    # (128,128) tile, no cross-lane reductions, no 3-D intermediates.
    acc = jnp.zeros((PAD_OBJ, PAD_OBJ), jnp.float32)
    for k in range(HID):
        acc = acc + w2b2_ref[k] * jnp.maximum(
            a_pre[:, k:k + 1] + b_preT[k:k + 1, :], 0.0)
    con = jax.nn.sigmoid(acc + w2b2_ref[HID])                              # (PAD, PAD)

    row = lax.broadcasted_iota(jnp.int32, (PAD_OBJ, PAD_OBJ), 0)
    col = lax.broadcasted_iota(jnp.int32, (PAD_OBJ, PAD_OBJ), 1)
    valid = (row < n) & (col < n) & (row != col)
    rel = jnp.where(valid, con, 0.0)
    rel = jnp.where(use_thr > 0,
                    jnp.where(valid & (con >= 0.1), 1.0, 0.0),
                    rel)
    rel_ref[...] = rel          # relate_matrix[0]; [1] is its transpose (not stored)

    # ---- Executor: run the DSL program with a dynamic trip count ----
    lane = lax.broadcasted_iota(jnp.int32, (1, PAD_OBJ), 1)
    validf = (lane < MAX_OBJ).astype(jnp.float32)
    buf_ref[...] = jnp.zeros((MAX_STEPS, 1, PAD_OBJ), jnp.float32)

    def step(t, carry):
        prev, scores = carry
        op = iparams_ref[IP_OPS + t]
        prm = iparams_ref[IP_PRM + t]

        other = buf_ref[jnp.clip(prm, 0, MAX_STEPS - 1)]                   # (1, PAD)
        crow = concept_ref[jnp.clip(prm, 0, MAX_CONCEPT_PAD - 1)]          # (1, PAD)

        # count/exist reductions only when that op is actually executed
        s_sum, s_max = lax.cond(
            (op == OP_COUNT) | (op == OP_EXIST),
            lambda p: (jnp.sum(p), jnp.max(p)),
            lambda p: (jnp.zeros((), jnp.float32), jnp.zeros((), jnp.float32)),
            prev)

        # relate matvec only for real relate steps; rel^T is never materialised,
        # the contraction side is chosen instead.
        def _relate(p):
            def _dim0(q):   # rel2id['uncon'] == 0 -> relate_matrix[0] = rel
                return lax.dot_general(q, rel_ref[...], (((1,), (0,)), ((), ())),
                                       preferred_element_type=jnp.float32)

            def _dim1(q):   # rel2id['con'] == 1 -> relate_matrix[1] = rel^T
                return lax.dot_general(q, rel_ref[...], (((1,), (1,)), ((), ())),
                                       preferred_element_type=jnp.float32)

            return lax.cond(prm == 0, _dim0, _dim1, p)

        relate_out = lax.cond(op == OP_RELATE, _relate,
                              lambda p: jnp.zeros((1, PAD_OBJ), jnp.float32),
                              prev)

        res = prev                                                         # OP_NOP
        res = jnp.where(op == OP_OBJECTS, validf, res)
        res = jnp.where(op == OP_FILTER_NAME, prev * crow, res)
        res = jnp.where(op == OP_FILTER_INDEX,
                        prev * (lane == prm).astype(jnp.float32), res)
        res = jnp.where(op == OP_RELATE, relate_out, res)
        res = jnp.where(op == OP_COUNT, validf * s_sum, res)
        res = jnp.where(op == OP_EXIST, validf * s_max, res)
        res = jnp.where((op == OP_INTERSECT) | (op == OP_AND),
                        jnp.minimum(prev, other), res)
        res = jnp.where((op == OP_UNION) | (op == OP_OR),
                        jnp.maximum(prev, other), res)

        buf_ref[t] = res
        scores = lax.cond(infer > 0,
                          lambda s: jnp.where(lane == t, jnp.max(res), s),
                          lambda s: s,
                          scores)
        return res, scores

    zero_row = jnp.zeros((1, PAD_OBJ), jnp.float32)
    prev, scores = lax.fori_loop(0, n_steps, step, (zero_row, zero_row))

    ans_ref[...] = prev
    scores_ref[...] = scores


@jax.jit
def _forward_fused(iparams, w2b2, feat, featT, w1a, b1, w1bT, concept0):
    return pl.pallas_call(
        _fused_kernel,
        out_shape=(jax.ShapeDtypeStruct((1, PAD_OBJ), jnp.float32),
                   jax.ShapeDtypeStruct((1, PAD_OBJ), jnp.float32)),
        in_specs=[_smem(), _smem(),
                  _vmem(), _vmem(), _vmem(), _vmem(), _vmem(), _vmem()],
        out_specs=(_vmem(), _vmem()),
        scratch_shapes=[pltpu.VMEM((PAD_OBJ, PAD_OBJ), jnp.float32),
                        pltpu.VMEM((MAX_STEPS, 1, PAD_OBJ), jnp.float32)],
    )(iparams, w2b2, feat, featT, w1a, b1, w1bT, concept0)


# ---------------------------------------------------------------------------
# Host-side glue (string lookups, program encoding) + module classes
# ---------------------------------------------------------------------------
def _encode_program(dcl_op_list):
    ops = np.zeros((MAX_STEPS,), np.int32)
    prm = np.zeros((MAX_STEPS,), np.int32)
    meta = []
    t = 0
    for tmp in dcl_op_list:
        op = tmp['op']
        param = tmp['param']
        if op not in OP_CODES:
            print('[!!!ERROR!!!] operator not exist!')
            continue
        if t >= MAX_STEPS:
            raise ValueError('program longer than MAX_STEPS=%d' % MAX_STEPS)
        if op == 'filter_name':
            p = concept2id_name[param]
        elif op == 'relate':
            p = rel2id[param]
        elif op in ('filter_index', 'intersect', 'union', 'and', 'or'):
            p = int(param)
        else:
            p = 0
        ops[t] = OP_CODES[op]
        prm[t] = p
        meta.append((op, param))
        t += 1
    return ops, prm, meta


class ExecutorJax:
    """Holds persistent device-resident MLP params and per-forward tables."""

    def __init__(self, params):
        w1, b1, w2, b2 = [np.asarray(p, np.float32) for p in params]
        self.w1a = jnp.asarray(w1[:4, :])                                  # (4, HID)
        self.w1bT = jnp.asarray(np.ascontiguousarray(w1[4:8, :].T))        # (HID, 4)
        self.b1 = jnp.asarray(b1.reshape(1, HID))
        self.w2b2 = jnp.asarray(
            np.concatenate([w2[:, 0].reshape(-1), b2.reshape(-1)[:1]]))    # (HID+1,)
        self.concept0 = None
        self.feat = None
        self.featT = None
        self.n = 0
        self.use_thr = 0

    def init(self, ann, mode):
        n = min(MAX_OBJ, len(ann))
        self.n = n
        # concept matrix, attribute 0 (name): string lookups stay on host (glue).
        cm0 = np.zeros((MAX_CONCEPT_PAD, 1, PAD_OBJ), np.float32)
        for oi in range(n):
            ci = concept2id_name[ann[oi]['name']]
            if ci < MAX_CONCEPT_PAD:
                cm0[ci, 0, oi] = 1.0
        # (concept_matrix[1] == eye in the original is never used by forward ops.)
        feat = np.zeros((PAD_OBJ, 4), np.float32)      # [x1, y1, w, h] per object
        for i in range(n):
            x1, y1, x2, y2 = [float(v) for v in ann[i]['box']]
            feat[i] = [x1, y1, x2 - x1, y2 - y1]
        self.concept0 = jnp.asarray(cm0)
        self.feat = jnp.asarray(feat)
        self.featT = jnp.asarray(np.ascontiguousarray(feat.T))
        self.use_thr = 1 if mode == 'test' else 0


class Reasoning:
    """JAX/Pallas port of the PyTorch Reasoning module (forward pass only)."""

    def __init__(self, params):
        self.exec = ExecutorJax(params)
        # TODO(synk): ImageTool (cv2 / XML / PIL drawing) is file+image I/O with
        # no Pallas equivalent and is not used by forward(); omitted.

    def forward(self, dcl_op_list, img, ann, mode):
        ex = self.exec
        ex.init(ann, mode)
        ops, prm, meta = _encode_program(dcl_op_list)
        if not meta:
            raise ValueError('empty program')

        iparams = np.zeros((IPARAMS_LEN,), np.int32)
        iparams[IP_OPS:IP_OPS + MAX_STEPS] = ops
        iparams[IP_PRM:IP_PRM + MAX_STEPS] = prm
        iparams[IP_N] = ex.n
        iparams[IP_THR] = ex.use_thr
        iparams[IP_NSTEPS] = len(meta)
        iparams[IP_INFER] = 1 if mode == 'infer' else 0

        ans_row, scores_row = _forward_fused(
            jnp.asarray(iparams), ex.w2b2, ex.feat, ex.featT,
            ex.w1a, ex.b1, ex.w1bT, ex.concept0)

        if mode == 'infer':
            # single device->host readback of all step scores (the original
            # synced on every op with a blocking .data access).
            sc = np.asarray(scores_row)[0]
            flag_neg = False
            for t, (op, param) in enumerate(meta):
                print('[INFO]', op, param, end=' ')
                if sc[t] <= 0.5 and not flag_neg:
                    print('<---- Bad Step!', end=' ')
                    flag_neg = True
                print('')

        last_op = meta[-1][0]
        if last_op in SCALAR_OPS:
            return ans_row[0, 0]
        return ans_row[0, :MAX_OBJ]


# ---------------------------------------------------------------------------
# Pure numpy reference (same math, no Pallas) for verification
# ---------------------------------------------------------------------------
def _ref_matrices(ann, params, mode):
    w1, b1, w2, b2 = [np.asarray(p, np.float32) for p in params]
    n = min(MAX_OBJ, len(ann))
    cm0 = np.zeros((len(concept2id_name), MAX_OBJ), np.float32)
    for oi in range(n):
        cm0[concept2id_name[ann[oi]['name']], oi] = 1.0
    boxes = np.zeros((MAX_OBJ, 4), np.float32)
    for i in range(n):
        boxes[i] = np.asarray(ann[i]['box'], np.float32)
    feat = np.stack([boxes[:, 0], boxes[:, 1],
                     boxes[:, 2] - boxes[:, 0],
                     boxes[:, 3] - boxes[:, 1]], axis=-1)
    pa = np.repeat(feat[:, None, :], MAX_OBJ, axis=1)
    pb = np.repeat(feat[None, :, :], MAX_OBJ, axis=0)
    pair = np.concatenate([pa, pb], axis=-1).reshape(MAX_OBJ * MAX_OBJ, 8)
    h = np.maximum(pair @ w1 + b1, 0.0)
    y = 1.0 / (1.0 + np.exp(-(h @ w2 + b2)))
    con = y[:, 0].reshape(MAX_OBJ, MAX_OBJ)
    valid = np.zeros((MAX_OBJ, MAX_OBJ), np.float32)
    valid[:n, :n] = 1.0
    np.fill_diagonal(valid, 0.0)
    rel0 = con * valid
    if mode == 'test':
        rel0 = (rel0 >= 0.1).astype(np.float32) * valid
    rm = np.zeros((2, MAX_OBJ, MAX_OBJ), np.float32)
    rm[0] = rel0
    rm[1] = rel0.T
    return cm0, rm, con, valid


def ref_forward(dcl_op_list, ann, mode, params):
    cm0, rm, _, _ = _ref_matrices(ann, params, mode)
    buf = []
    for tmp in dcl_op_list:
        op, param = tmp['op'], tmp['param']
        if op == 'objects':
            buf.append(np.ones(MAX_OBJ, np.float32))
        elif op == 'filter_name':
            buf.append(buf[-1] * cm0[concept2id_name[param]])
        elif op == 'filter_index':
            m = np.zeros(MAX_OBJ, np.float32)
            m[param] = 1.0
            buf.append(buf[-1] * m)
        elif op == 'relate':
            buf.append((rm[rel2id[param]] * buf[-1][:, None]).sum(-2))
        elif op == 'count':
            buf.append(buf[-1].sum())
        elif op in ('intersect', 'and'):
            buf.append(np.minimum(buf[-1], buf[param]))
        elif op in ('union', 'or'):
            buf.append(np.maximum(buf[-1], buf[param]))
        elif op == 'exist':
            buf.append(buf[-1].max())
    return buf[-1]


# ---------------------------------------------------------------------------
# Main
# ---------------------------------------------------------------------------
if __name__ == "__main__":
    key = jax.random.PRNGKey(0)
    k1, k2, k3, k4, k5 = jax.random.split(key, 5)

    # Deterministic synthetic parameters for the pairwise box classifier.
    w1 = 0.05 * jax.random.normal(k1, (8, HID), jnp.float32)
    b1 = 0.05 * jax.random.normal(k2, (1, HID), jnp.float32)
    w2 = 0.05 * jax.random.normal(k3, (HID, 2), jnp.float32)
    b2 = 0.05 * jax.random.normal(k4, (1, 2), jnp.float32)
    params = (w1, b1, w2, b2)

    # Small synthetic annotation list (6 objects with deterministic boxes).
    names = list(concept2id_name.keys())
    n_obj = 6
    raw = np.asarray(jax.random.randint(k5, (n_obj, 4), 0, 50))
    ann = []
    for i in range(n_obj):
        x1, y1, dw, dh = [int(v) for v in raw[i]]
        ann.append({'box': [x1, y1, x1 + dw + 1, y1 + dh + 1],
                    'name': names[i % len(names)]})

    terminal = '连接线接线头(terminal)_power'
    cathode = '电源负极接线柱(cathode)_power'

    prog_scalar = [
        {'op': 'objects', 'param': None},          # 0
        {'op': 'filter_name', 'param': terminal},  # 1
        {'op': 'relate', 'param': 'con'},          # 2
        {'op': 'filter_name', 'param': cathode},   # 3
        {'op': 'union', 'param': 1},               # 4
        {'op': 'filter_index', 'param': 2},        # 5
        {'op': 'intersect', 'param': 4},           # 6
        {'op': 'exist', 'param': None},            # 7
    ]
    prog_vector = [
        {'op': 'objects', 'param': None},          # 0
        {'op': 'filter_name', 'param': terminal},  # 1
        {'op': 'relate', 'param': 'con'},          # 2
        {'op': 'filter_name', 'param': cathode},   # 3
        {'op': 'or', 'param': 1},                  # 4
        {'op': 'and', 'param': 2},                 # 5
        {'op': 'relate', 'param': 'uncon'},        # 6
    ]
    prog_count = [
        {'op': 'objects', 'param': None},
        {'op': 'filter_name', 'param': terminal},
        {'op': 'relate', 'param': 'con'},
        {'op': 'count', 'param': None},
    ]

    model = Reasoning(params)

    out1 = jax.block_until_ready(model.forward(prog_scalar, None, ann, 'train'))
    ref1 = ref_forward(prog_scalar, ann, 'train', params)
    assert np.allclose(np.asarray(out1), np.asarray(ref1),
                       atol=1e-3, rtol=1e-3), (out1, ref1)

    out2 = jax.block_until_ready(model.forward(prog_vector, None, ann, 'train'))
    ref2 = ref_forward(prog_vector, ann, 'train', params)
    assert np.allclose(np.asarray(out2), np.asarray(ref2),
                       atol=1e-3, rtol=1e-3), (out2, ref2)

    # 'test' mode exercises the >= 0.1 threshold; only assert exact agreement
    # when the decision margin is comfortably above fp32 matmul noise.
    _, _, con_ref, valid_ref = _ref_matrices(ann, params, 'test')
    margin = float(np.min(np.abs(con_ref[valid_ref > 0] - 0.1))) if valid_ref.any() else 1.0
    out3 = jax.block_until_ready(model.forward(prog_count, None, ann, 'test'))
    if margin > 1e-3:
        ref3 = ref_forward(prog_count, ann, 'test', params)
        assert np.allclose(np.asarray(out3), np.asarray(ref3),
                           atol=1e-3, rtol=1e-3), (out3, ref3)

    print("KERNEL_OK")
</pallas_src>

<mosaic_0001>
module attributes {stable_mosaic.version = 11 : i64} {
  func.func @_fused_kernel(%arg0: memref<36xi32, #tpu.memory_space<smem>>, %arg1: memref<33xf32, #tpu.memory_space<smem>>, %arg2: memref<128x4xf32, #tpu.memory_space<vmem>>, %arg3: memref<4x128xf32, #tpu.memory_space<vmem>>, %arg4: memref<4x32xf32, #tpu.memory_space<vmem>>, %arg5: memref<1x32xf32, #tpu.memory_space<vmem>>, %arg6: memref<32x4xf32, #tpu.memory_space<vmem>>, %arg7: memref<8x1x128xf32, #tpu.memory_space<vmem>>, %arg8: memref<1x128xf32, #tpu.memory_space<vmem>>, %arg9: memref<1x128xf32, #tpu.memory_space<vmem>>, %arg10: memref<128x128xf32, #tpu.memory_space<vmem>>, %arg11: memref<16x1x128xf32, #tpu.memory_space<vmem>>) attributes {dimension_semantics = [], scalar_prefetch = 0 : i64, scratch_operands = 2 : i64, tpu.core_type = #tpu.core_type<tc>} {
    %c32 = arith.constant 32 : index
    %0 = memref.load %arg0[%c32] : memref<36xi32, #tpu.memory_space<smem>>
    %c33 = arith.constant 33 : index
    %1 = memref.load %arg0[%c33] : memref<36xi32, #tpu.memory_space<smem>>
    %c34 = arith.constant 34 : index
    %2 = memref.load %arg0[%c34] : memref<36xi32, #tpu.memory_space<smem>>
    %c35 = arith.constant 35 : index
    %3 = memref.load %arg0[%c35] : memref<36xi32, #tpu.memory_space<smem>>
    %c0 = arith.constant 0 : index
    %c0_0 = arith.constant 0 : index
    %4 = vector.load %arg2[%c0, %c0_0] : memref<128x4xf32, #tpu.memory_space<vmem>>, vector<128x4xf32>
    %c0_1 = arith.constant 0 : index
    %c0_2 = arith.constant 0 : index
    %5 = vector.load %arg4[%c0_1, %c0_2] : memref<4x32xf32, #tpu.memory_space<vmem>>, vector<4x32xf32>
    %cst = arith.constant dense<0.000000e+00> : vector<128x32xf32>
    %6 = tpu.matmul %4, %5, %cst {dimension_numbers = #tpu.dot_dimension_numbers<[1], [0], [0], [1], [0, 0, 1, 1], [], []>} : vector<128x4xf32>, vector<4x32xf32>, vector<128x32xf32> -> vector<128x32xf32>
    %c0_3 = arith.constant 0 : index
    %c0_4 = arith.constant 0 : index
    %7 = vector.load %arg5[%c0_3, %c0_4] : memref<1x32xf32, #tpu.memory_space<vmem>>, vector<1x32xf32>
    %8 = vector.broadcast %7 : vector<1x32xf32> to vector<128x32xf32>
    %9 = arith.addf %6, %8 : vector<128x32xf32>
    %c0_5 = arith.constant 0 : index
    %c0_6 = arith.constant 0 : index
    %10 = vector.load %arg6[%c0_5, %c0_6] : memref<32x4xf32, #tpu.memory_space<vmem>>, vector<32x4xf32>
    %c0_7 = arith.constant 0 : index
    %c0_8 = arith.constant 0 : index
    %11 = vector.load %arg3[%c0_7, %c0_8] : memref<4x128xf32, #tpu.memory_space<vmem>>, vector<4x128xf32>
    %cst_9 = arith.constant dense<0.000000e+00> : vector<32x128xf32>
    %12 = tpu.matmul %10, %11, %cst_9 {dimension_numbers = #tpu.dot_dimension_numbers<[1], [0], [0], [1], [0, 0, 1, 1], [], []>} : vector<32x4xf32>, vector<4x128xf32>, vector<32x128xf32> -> vector<32x128xf32>
    %cst_10 = arith.constant 0.000000e+00 : f32
    %13 = vector.broadcast %cst_10 : f32 to vector<128x128xf32>
    %c0_11 = arith.constant 0 : index
    %14 = memref.load %arg1[%c0_11] : memref<33xf32, #tpu.memory_space<smem>>
    %15 = vector.extract_strided_slice %9 {offsets = [0, 0], sizes = [128, 1], strides = [1, 1]} : vector<128x32xf32> to vector<128x1xf32>
    %16 = vector.extract_strided_slice %12 {offsets = [0, 0], sizes = [1, 128], strides = [1, 1]} : vector<32x128xf32> to vector<1x128xf32>
    %17 = vector.broadcast %15 : vector<128x1xf32> to vector<128x128xf32>
    %18 = vector.broadcast %16 : vector<1x128xf32> to vector<128x128xf32>
    %19 = arith.addf %17, %18 : vector<128x128xf32>
    %cst_12 = arith.constant 0.000000e+00 : f32
    %20 = vector.broadcast %cst_12 : f32 to vector<128x128xf32>
    %21 = arith.maximumf %19, %20 : vector<128x128xf32>
    %22 = vector.broadcast %14 : f32 to vector<128x128xf32>
    %23 = arith.mulf %22, %21 : vector<128x128xf32>
    %24 = arith.addf %13, %23 : vector<128x128xf32>
    %c1 = arith.constant 1 : index
    %25 = memref.load %arg1[%c1] : memref<33xf32, #tpu.memory_space<smem>>
    %26 = vector.extract_strided_slice %9 {offsets = [0, 1], sizes = [128, 1], strides = [1, 1]} : vector<128x32xf32> to vector<128x1xf32>
    %27 = vector.extract_strided_slice %12 {offsets = [1, 0], sizes = [1, 128], strides = [1, 1]} : vector<32x128xf32> to vector<1x128xf32>
    %28 = vector.broadcast %26 : vector<128x1xf32> to vector<128x128xf32>
    %29 = vector.broadcast %27 : vector<1x128xf32> to vector<128x128xf32>
    %30 = arith.addf %28, %29 : vector<128x128xf32>
    %cst_13 = arith.constant 0.000000e+00 : f32
    %31 = vector.broadcast %cst_13 : f32 to vector<128x128xf32>
    %32 = arith.maximumf %30, %31 : vector<128x128xf32>
    %33 = vector.broadcast %25 : f32 to vector<128x128xf32>
    %34 = arith.mulf %33, %32 : vector<128x128xf32>
    %35 = arith.addf %24, %34 : vector<128x128xf32>
    %c2 = arith.constant 2 : index
    %36 = memref.load %arg1[%c2] : memref<33xf32, #tpu.memory_space<smem>>
    %37 = vector.extract_strided_slice %9 {offsets = [0, 2], sizes = [128, 1], strides = [1, 1]} : vector<128x32xf32> to vector<128x1xf32>
    %38 = vector.extract_strided_slice %12 {offsets = [2, 0], sizes = [1, 128], strides = [1, 1]} : vector<32x128xf32> to vector<1x128xf32>
    %39 = vector.broadcast %37 : vector<128x1xf32> to vector<128x128xf32>
    %40 = vector.broadcast %38 : vector<1x128xf32> to vector<128x128xf32>
    %41 = arith.addf %39, %40 : vector<128x128xf32>
    %cst_14 = arith.constant 0.000000e+00 : f32
    %42 = vector.broadcast %cst_14 : f32 to vector<128x128xf32>
    %43 = arith.maximumf %41, %42 : vector<128x128xf32>
    %44 = vector.broadcast %36 : f32 to vector<128x128xf32>
    %45 = arith.mulf %44, %43 : vector<128x128xf32>
    %46 = arith.addf %35, %45 : vector<128x128xf32>
    %c3 = arith.constant 3 : index
    %47 = memref.load %arg1[%c3] : memref<33xf32, #tpu.memory_space<smem>>
    %48 = vector.extract_strided_slice %9 {offsets = [0, 3], sizes = [128, 1], strides = [1, 1]} : vector<128x32xf32> to vector<128x1xf32>
    %49 = vector.extract_strided_slice %12 {offsets = [3, 0], sizes = [1, 128], strides = [1, 1]} : vector<32x128xf32> to vector<1x128xf32>
    %50 = vector.broadcast %48 : vector<128x1xf32> to vector<128x128xf32>
    %51 = vector.broadcast %49 : vector<1x128xf32> to vector<128x128xf32>
    %52 = arith.addf %50, %51 : vector<128x128xf32>
    %cst_15 = arith.constant 0.000000e+00 : f32
    %53 = vector.broadcast %cst_15 : f32 to vector<128x128xf32>
    %54 = arith.maximumf %52, %53 : vector<128x128xf32>
    %55 = vector.broadcast %47 : f32 to vector<128x128xf32>
    %56 = arith.mulf %55, %54 : vector<128x128xf32>
    %57 = arith.addf %46, %56 : vector<128x128xf32>
    %c4 = arith.constant 4 : index
    %58 = memref.load %arg1[%c4] : memref<33xf32, #tpu.memory_space<smem>>
    %59 = vector.extract_strided_slice %9 {offsets = [0, 4], sizes = [128, 1], strides = [1, 1]} : vector<128x32xf32> to vector<128x1xf32>
    %60 = vector.extract_strided_slice %12 {offsets = [4, 0], sizes = [1, 128], strides = [1, 1]} : vector<32x128xf32> to vector<1x128xf32>
    %61 = vector.broadcast %59 : vector<128x1xf32> to vector<128x128xf32>
    %62 = vector.broadcast %60 : vector<1x128xf32> to vector<128x128xf32>
    %63 = arith.addf %61, %62 : vector<128x128xf32>
    %cst_16 = arith.constant 0.000000e+00 : f32
    %64 = vector.broadcast %cst_16 : f32 to vector<128x128xf32>
    %65 = arith.maximumf %63, %64 : vector<128x128xf32>
    %66 = vector.broadcast %58 : f32 to vector<128x128xf32>
    %67 = arith.mulf %66, %65 : vector<128x128xf32>
    %68 = arith.addf %57, %67 : vector<128x128xf32>
    %c5 = arith.constant 5 : index
    %69 = memref.load %arg1[%c5] : memref<33xf32, #tpu.memory_space<smem>>
    %70 = vector.extract_strided_slice %9 {offsets = [0, 5], sizes = [128, 1], strides = [1, 1]} : vector<128x32xf32> to vector<128x1xf32>
    %71 = vector.extract_strided_slice %12 {offsets = [5, 0], sizes = [1, 128], strides = [1, 1]} : vector<32x128xf32> to vector<1x128xf32>
    %72 = vector.broadcast %70 : vector<128x1xf32> to vector<128x128xf32>
    %73 = vector.broadcast %71 : vector<1x128xf32> to vector<128x128xf32>
    %74 = arith.addf %72, %73 : vector<128x128xf32>
    %cst_17 = arith.constant 0.000000e+00 : f32
    %75 = vector.broadcast %cst_17 : f32 to vector<128x128xf32>
    %76 = arith.maximumf %74, %75 : vector<128x128xf32>
    %77 = vector.broadcast %69 : f32 to vector<128x128xf32>
    %78 = arith.mulf %77, %76 : vector<128x128xf32>
    %79 = arith.addf %68, %78 : vector<128x128xf32>
    %c6 = arith.constant 6 : index
    %80 = memref.load %arg1[%c6] : memref<33xf32, #tpu.memory_space<smem>>
    %81 = vector.extract_strided_slice %9 {offsets = [0, 6], sizes = [128, 1], strides = [1, 1]} : vector<128x32xf32> to vector<128x1xf32>
    %82 = vector.extract_strided_slice %12 {offsets = [6, 0], sizes = [1, 128], strides = [1, 1]} : vector<32x128xf32> to vector<1x128xf32>
    %83 = vector.broadcast %81 : vector<128x1xf32> to vector<128x128xf32>
    %84 = vector.broadcast %82 : vector<1x128xf32> to vector<128x128xf32>
    %85 = arith.addf %83, %84 : vector<128x128xf32>
    %cst_18 = arith.constant 0.000000e+00 : f32
    %86 = vector.broadcast %cst_18 : f32 to vector<128x128xf32>
    %87 = arith.maximumf %85, %86 : vector<128x128xf32>
    %88 = vector.broadcast %80 : f32 to vector<128x128xf32>
    %89 = arith.mulf %88, %87 : vector<128x128xf32>
    %90 = arith.addf %79, %89 : vector<128x128xf32>
    %c7 = arith.constant 7 : index
    %91 = memref.load %arg1[%c7] : memref<33xf32, #tpu.memory_space<smem>>
    %92 = vector.extract_strided_slice %9 {offsets = [0, 7], sizes = [128, 1], strides = [1, 1]} : vector<128x32xf32> to vector<128x1xf32>
    %93 = vector.extract_strided_slice %12 {offsets = [7, 0], sizes = [1, 128], strides = [1, 1]} : vector<32x128xf32> to vector<1x128xf32>
    %94 = vector.broadcast %92 : vector<128x1xf32> to vector<128x128xf32>
    %95 = vector.broadcast %93 : vector<1x128xf32> to vector<128x128xf32>
    %96 = arith.addf %94, %95 : vector<128x128xf32>
    %cst_19 = arith.constant 0.000000e+00 : f32
    %97 = vector.broadcast %cst_19 : f32 to vector<128x128xf32>
    %98 = arith.maximumf %96, %97 : vector<128x128xf32>
    %99 = vector.broadcast %91 : f32 to vector<128x128xf32>
    %100 = arith.mulf %99, %98 : vector<128x128xf32>
    %101 = arith.addf %90, %100 : vector<128x128xf32>
    %c8 = arith.constant 8 : index
    %102 = memref.load %arg1[%c8] : memref<33xf32, #tpu.memory_space<smem>>
    %103 = vector.extract_strided_slice %9 {offsets = [0, 8], sizes = [128, 1], strides = [1, 1]} : vector<128x32xf32> to vector<128x1xf32>
    %104 = vector.extract_strided_slice %12 {offsets = [8, 0], sizes = [1, 128], strides = [1, 1]} : vector<32x128xf32> to vector<1x128xf32>
    %105 = vector.broadcast %103 : vector<128x1xf32> to vector<128x128xf32>
    %106 = vector.broadcast %104 : vector<1x128xf32> to vector<128x128xf32>
    %107 = arith.addf %105, %106 : vector<128x128xf32>
    %cst_20 = arith.constant 0.000000e+00 : f32
    %108 = vector.broadcast %cst_20 : f32 to vector<128x128xf32>
    %109 = arith.maximumf %107, %108 : vector<128x128xf32>
    %110 = vector.broadcast %102 : f32 to vector<128x128xf32>
    %111 = arith.mulf %110, %109 : vector<128x128xf32>
    %112 = arith.addf %101, %111 : vector<128x128xf32>
    %c9 = arith.constant 9 : index
    %113 = memref.load %arg1[%c9] : memref<33xf32, #tpu.memory_space<smem>>
    %114 = vector.extract_strided_slice %9 {offsets = [0, 9], sizes = [128, 1], strides = [1, 1]} : vector<128x32xf32> to vector<128x1xf32>
    %115 = vector.extract_strided_slice %12 {offsets = [9, 0], sizes = [1, 128], strides = [1, 1]} : vector<32x128xf32> to vector<1x128xf32>
    %116 = vector.broadcast %114 : vector<128x1xf32> to vector<128x128xf32>
    %117 = vector.broadcast %115 : vector<1x128xf32> to vector<128x128xf32>
    %118 = arith.addf %116, %117 : vector<128x128xf32>
    %cst_21 = arith.constant 0.000000e+00 : f32
    %119 = vector.broadcast %cst_21 : f32 to vector<128x128xf32>
    %120 = arith.maximumf %118, %119 : vector<128x128xf32>
    %121 = vector.broadcast %113 : f32 to vector<128x128xf32>
    %122 = arith.mulf %121, %120 : vector<128x128xf32>
    %123 = arith.addf %112, %122 : vector<128x128xf32>
    %c10 = arith.constant 10 : index
    %124 = memref.load %arg1[%c10] : memref<33xf32, #tpu.memory_space<smem>>
    %125 = vector.extract_strided_slice %9 {offsets = [0, 10], sizes = [128, 1], strides = [1, 1]} : vector<128x32xf32> to vector<128x1xf32>
    %126 = vector.extract_strided_slice %12 {offsets = [10, 0], sizes = [1, 128], strides = [1, 1]} : vector<32x128xf32> to vector<1x128xf32>
    %127 = vector.broadcast %125 : vector<128x1xf32> to vector<128x128xf32>
    %128 = vector.broadcast %126 : vector<1x128xf32> to vector<128x128xf32>
    %129 = arith.addf %127, %128 : vector<128x128xf32>
    %cst_22 = arith.constant 0.000000e+00 : f32
    %130 = vector.broadcast %cst_22 : f32 to vector<128x128xf32>
    %131 = arith.maximumf %129, %130 : vector<128x128xf32>
    %132 = vector.broadcast %124 : f32 to vector<128x128xf32>
    %133 = arith.mulf %132, %131 : vector<128x128xf32>
    %134 = arith.addf %123, %133 : vector<128x128xf32>
    %c11 = arith.constant 11 : index
    %135 = memref.load %arg1[%c11] : memref<33xf32, #tpu.memory_space<smem>>
    %136 = vector.extract_strided_slice %9 {offsets = [0, 11], sizes = [128, 1], strides = [1, 1]} : vector<128x32xf32> to vector<128x1xf32>
    %137 = vector.extract_strided_slice %12 {offsets = [11, 0], sizes = [1, 128], strides = [1, 1]} : vector<32x128xf32> to vector<1x128xf32>
    %138 = vector.broadcast %136 : vector<128x1xf32> to vector<128x128xf32>
    %139 = vector.broadcast %137 : vector<1x128xf32> to vector<128x128xf32>
    %140 = arith.addf %138, %139 : vector<128x128xf32>
    %cst_23 = arith.constant 0.000000e+00 : f32
    %141 = vector.broadcast %cst_23 : f32 to vector<128x128xf32>
    %142 = arith.maximumf %140, %141 : vector<128x128xf32>
    %143 = vector.broadcast %135 : f32 to vector<128x128xf32>
    %144 = arith.mulf %143, %142 : vector<128x128xf32>
    %145 = arith.addf %134, %144 : vector<128x128xf32>
    %c12 = arith.constant 12 : index
    %146 = memref.load %arg1[%c12] : memref<33xf32, #tpu.memory_space<smem>>
    %147 = vector.extract_strided_slice %9 {offsets = [0, 12], sizes = [128, 1], strides = [1, 1]} : vector<128x32xf32> to vector<128x1xf32>
    %148 = vector.extract_strided_slice %12 {offsets = [12, 0], sizes = [1, 128], strides = [1, 1]} : vector<32x128xf32> to vector<1x128xf32>
    %149 = vector.broadcast %147 : vector<128x1xf32> to vector<128x128xf32>
    %150 = vector.broadcast %148 : vector<1x128xf32> to vector<128x128xf32>
    %151 = arith.addf %149, %150 : vector<128x128xf32>
    %cst_24 = arith.constant 0.000000e+00 : f32
    %152 = vector.broadcast %cst_24 : f32 to vector<128x128xf32>
    %153 = arith.maximumf %151, %152 : vector<128x128xf32>
    %154 = vector.broadcast %146 : f32 to vector<128x128xf32>
    %155 = arith.mulf %154, %153 : vector<128x128xf32>
    %156 = arith.addf %145, %155 : vector<128x128xf32>
    %c13 = arith.constant 13 : index
    %157 = memref.load %arg1[%c13] : memref<33xf32, #tpu.memory_space<smem>>
    %158 = vector.extract_strided_slice %9 {offsets = [0, 13], sizes = [128, 1], strides = [1, 1]} : vector<128x32xf32> to vector<128x1xf32>
    %159 = vector.extract_strided_slice %12 {offsets = [13, 0], sizes = [1, 128], strides = [1, 1]} : vector<32x128xf32> to vector<1x128xf32>
    %160 = vector.broadcast %158 : vector<128x1xf32> to vector<128x128xf32>
    %161 = vector.broadcast %159 : vector<1x128xf32> to vector<128x128xf32>
    %162 = arith.addf %160, %161 : vector<128x128xf32>
    %cst_25 = arith.constant 0.000000e+00 : f32
    %163 = vector.broadcast %cst_25 : f32 to vector<128x128xf32>
    %164 = arith.maximumf %162, %163 : vector<128x128xf32>
    %165 = vector.broadcast %157 : f32 to vector<128x128xf32>
    %166 = arith.mulf %165, %164 : vector<128x128xf32>
    %167 = arith.addf %156, %166 : vector<128x128xf32>
    %c14 = arith.constant 14 : index
    %168 = memref.load %arg1[%c14] : memref<33xf32, #tpu.memory_space<smem>>
    %169 = vector.extract_strided_slice %9 {offsets = [0, 14], sizes = [128, 1], strides = [1, 1]} : vector<128x32xf32> to vector<128x1xf32>
    %170 = vector.extract_strided_slice %12 {offsets = [14, 0], sizes = [1, 128], strides = [1, 1]} : vector<32x128xf32> to vector<1x128xf32>
    %171 = vector.broadcast %169 : vector<128x1xf32> to vector<128x128xf32>
    %172 = vector.broadcast %170 : vector<1x128xf32> to vector<128x128xf32>
    %173 = arith.addf %171, %172 : vector<128x128xf32>
    %cst_26 = arith.constant 0.000000e+00 : f32
    %174 = vector.broadcast %cst_26 : f32 to vector<128x128xf32>
    %175 = arith.maximumf %173, %174 : vector<128x128xf32>
    %176 = vector.broadcast %168 : f32 to vector<128x128xf32>
    %177 = arith.mulf %176, %175 : vector<128x128xf32>
    %178 = arith.addf %167, %177 : vector<128x128xf32>
    %c15 = arith.constant 15 : index
    %179 = memref.load %arg1[%c15] : memref<33xf32, #tpu.memory_space<smem>>
    %180 = vector.extract_strided_slice %9 {offsets = [0, 15], sizes = [128, 1], strides = [1, 1]} : vector<128x32xf32> to vector<128x1xf32>
    %181 = vector.extract_strided_slice %12 {offsets = [15, 0], sizes = [1, 128], strides = [1, 1]} : vector<32x128xf32> to vector<1x128xf32>
    %182 = vector.broadcast %180 : vector<128x1xf32> to vector<128x128xf32>
    %183 = vector.broadcast %181 : vector<1x128xf32> to vector<128x128xf32>
    %184 = arith.addf %182, %183 : vector<128x128xf32>
    %cst_27 = arith.constant 0.000000e+00 : f32
    %185 = vector.broadcast %cst_27 : f32 to vector<128x128xf32>
    %186 = arith.maximumf %184, %185 : vector<128x128xf32>
    %187 = vector.broadcast %179 : f32 to vector<128x128xf32>
    %188 = arith.mulf %187, %186 : vector<128x128xf32>
    %189 = arith.addf %178, %188 : vector<128x128xf32>
    %c16 = arith.constant 16 : index
    %190 = memref.load %arg1[%c16] : memref<33xf32, #tpu.memory_space<smem>>
    %191 = vector.extract_strided_slice %9 {offsets = [0, 16], sizes = [128, 1], strides = [1, 1]} : vector<128x32xf32> to vector<128x1xf32>
    %192 = vector.extract_strided_slice %12 {offsets = [16, 0], sizes = [1, 128], strides = [1, 1]} : vector<32x128xf32> to vector<1x128xf32>
    %193 = vector.broadcast %191 : vector<128x1xf32> to vector<128x128xf32>
    %194 = vector.broadcast %192 : vector<1x128xf32> to vector<128x128xf32>
    %195 = arith.addf %193, %194 : vector<128x128xf32>
    %cst_28 = arith.constant 0.000000e+00 : f32
    %196 = vector.broadcast %cst_28 : f32 to vector<128x128xf32>
    %197 = arith.maximumf %195, %196 : vector<128x128xf32>
    %198 = vector.broadcast %190 : f32 to vector<128x128xf32>
    %199 = arith.mulf %198, %197 : vector<128x128xf32>
    %200 = arith.addf %189, %199 : vector<128x128xf32>
    %c17 = arith.constant 17 : index
    %201 = memref.load %arg1[%c17] : memref<33xf32, #tpu.memory_space<smem>>
    %202 = vector.extract_strided_slice %9 {offsets = [0, 17], sizes = [128, 1], strides = [1, 1]} : vector<128x32xf32> to vector<128x1xf32>
    %203 = vector.extract_strided_slice %12 {offsets = [17, 0], sizes = [1, 128], strides = [1, 1]} : vector<32x128xf32> to vector<1x128xf32>
    %204 = vector.broadcast %202 : vector<128x1xf32> to vector<128x128xf32>
    %205 = vector.broadcast %203 : vector<1x128xf32> to vector<128x128xf32>
    %206 = arith.addf %204, %205 : vector<128x128xf32>
    %cst_29 = arith.constant 0.000000e+00 : f32
    %207 = vector.broadcast %cst_29 : f32 to vector<128x128xf32>
    %208 = arith.maximumf %206, %207 : vector<128x128xf32>
    %209 = vector.broadcast %201 : f32 to vector<128x128xf32>
    %210 = arith.mulf %209, %208 : vector<128x128xf32>
    %211 = arith.addf %200, %210 : vector<128x128xf32>
    %c18 = arith.constant 18 : index
    %212 = memref.load %arg1[%c18] : memref<33xf32, #tpu.memory_space<smem>>
    %213 = vector.extract_strided_slice %9 {offsets = [0, 18], sizes = [128, 1], strides = [1, 1]} : vector<128x32xf32> to vector<128x1xf32>
    %214 = vector.extract_strided_slice %12 {offsets = [18, 0], sizes = [1, 128], strides = [1, 1]} : vector<32x128xf32> to vector<1x128xf32>
    %215 = vector.broadcast %213 : vector<128x1xf32> to vector<128x128xf32>
    %216 = vector.broadcast %214 : vector<1x128xf32> to vector<128x128xf32>
    %217 = arith.addf %215, %216 : vector<128x128xf32>
    %cst_30 = arith.constant 0.000000e+00 : f32
    %218 = vector.broadcast %cst_30 : f32 to vector<128x128xf32>
    %219 = arith.maximumf %217, %218 : vector<128x128xf32>
    %220 = vector.broadcast %212 : f32 to vector<128x128xf32>
    %221 = arith.mulf %220, %219 : vector<128x128xf32>
    %222 = arith.addf %211, %221 : vector<128x128xf32>
    %c19 = arith.constant 19 : index
    %223 = memref.load %arg1[%c19] : memref<33xf32, #tpu.memory_space<smem>>
    %224 = vector.extract_strided_slice %9 {offsets = [0, 19], sizes = [128, 1], strides = [1, 1]} : vector<128x32xf32> to vector<128x1xf32>
    %225 = vector.extract_strided_slice %12 {offsets = [19, 0], sizes = [1, 128], strides = [1, 1]} : vector<32x128xf32> to vector<1x128xf32>
    %226 = vector.broadcast %224 : vector<128x1xf32> to vector<128x128xf32>
    %227 = vector.broadcast %225 : vector<1x128xf32> to vector<128x128xf32>
    %228 = arith.addf %226, %227 : vector<128x128xf32>
    %cst_31 = arith.constant 0.000000e+00 : f32
    %229 = vector.broadcast %cst_31 : f32 to vector<128x128xf32>
    %230 = arith.maximumf %228, %229 : vector<128x128xf32>
    %231 = vector.broadcast %223 : f32 to vector<128x128xf32>
    %232 = arith.mulf %231, %230 : vector<128x128xf32>
    %233 = arith.addf %222, %232 : vector<128x128xf32>
    %c20 = arith.constant 20 : index
    %234 = memref.load %arg1[%c20] : memref<33xf32, #tpu.memory_space<smem>>
    %235 = vector.extract_strided_slice %9 {offsets = [0, 20], sizes = [128, 1], strides = [1, 1]} : vector<128x32xf32> to vector<128x1xf32>
    %236 = vector.extract_strided_slice %12 {offsets = [20, 0], sizes = [1, 128], strides = [1, 1]} : vector<32x128xf32> to vector<1x128xf32>
    %237 = vector.broadcast %235 : vector<128x1xf32> to vector<128x128xf32>
    %238 = vector.broadcast %236 : vector<1x128xf32> to vector<128x128xf32>
    %239 = arith.addf %237, %238 : vector<128x128xf32>
    %cst_32 = arith.constant 0.000000e+00 : f32
    %240 = vector.broadcast %cst_32 : f32 to vector<128x128xf32>
    %241 = arith.maximumf %239, %240 : vector<128x128xf32>
    %242 = vector.broadcast %234 : f32 to vector<128x128xf32>
    %243 = arith.mulf %242, %241 : vector<128x128xf32>
    %244 = arith.addf %233, %243 : vector<128x128xf32>
    %c21 = arith.constant 21 : index
    %245 = memref.load %arg1[%c21] : memref<33xf32, #tpu.memory_space<smem>>
    %246 = vector.extract_strided_slice %9 {offsets = [0, 21], sizes = [128, 1], strides = [1, 1]} : vector<128x32xf32> to vector<128x1xf32>
    %247 = vector.extract_strided_slice %12 {offsets = [21, 0], sizes = [1, 128], strides = [1, 1]} : vector<32x128xf32> to vector<1x128xf32>
    %248 = vector.broadcast %246 : vector<128x1xf32> to vector<128x128xf32>
    %249 = vector.broadcast %247 : vector<1x128xf32> to vector<128x128xf32>
    %250 = arith.addf %248, %249 : vector<128x128xf32>
    %cst_33 = arith.constant 0.000000e+00 : f32
    %251 = vector.broadcast %cst_33 : f32 to vector<128x128xf32>
    %252 = arith.maximumf %250, %251 : vector<128x128xf32>
    %253 = vector.broadcast %245 : f32 to vector<128x128xf32>
    %254 = arith.mulf %253, %252 : vector<128x128xf32>
    %255 = arith.addf %244, %254 : vector<128x128xf32>
    %c22 = arith.constant 22 : index
    %256 = memref.load %arg1[%c22] : memref<33xf32, #tpu.memory_space<smem>>
    %257 = vector.extract_strided_slice %9 {offsets = [0, 22], sizes = [128, 1], strides = [1, 1]} : vector<128x32xf32> to vector<128x1xf32>
    %258 = vector.extract_strided_slice %12 {offsets = [22, 0], sizes = [1, 128], strides = [1, 1]} : vector<32x128xf32> to vector<1x128xf32>
    %259 = vector.broadcast %257 : vector<128x1xf32> to vector<128x128xf32>
    %260 = vector.broadcast %258 : vector<1x128xf32> to vector<128x128xf32>
    %261 = arith.addf %259, %260 : vector<128x128xf32>
    %cst_34 = arith.constant 0.000000e+00 : f32
    %262 = vector.broadcast %cst_34 : f32 to vector<128x128xf32>
    %263 = arith.maximumf %261, %262 : vector<128x128xf32>
    %264 = vector.broadcast %256 : f32 to vector<128x128xf32>
    %265 = arith.mulf %264, %263 : vector<128x128xf32>
    %266 = arith.addf %255, %265 : vector<128x128xf32>
    %c23 = arith.constant 23 : index
    %267 = memref.load %arg1[%c23] : memref<33xf32, #tpu.memory_space<smem>>
    %268 = vector.extract_strided_slice %9 {offsets = [0, 23], sizes = [128, 1], strides = [1, 1]} : vector<128x32xf32> to vector<128x1xf32>
    %269 = vector.extract_strided_slice %12 {offsets = [23, 0], sizes = [1, 128], strides = [1, 1]} : vector<32x128xf32> to vector<1x128xf32>
    %270 = vector.broadcast %268 : vector<128x1xf32> to vector<128x128xf32>
    %271 = vector.broadcast %269 : vector<1x128xf32> to vector<128x128xf32>
    %272 = arith.addf %270, %271 : vector<128x128xf32>
    %cst_35 = arith.constant 0.000000e+00 : f32
    %273 = vector.broadcast %cst_35 : f32 to vector<128x128xf32>
    %274 = arith.maximumf %272, %273 : vector<128x128xf32>
    %275 = vector.broadcast %267 : f32 to vector<128x128xf32>
    %276 = arith.mulf %275, %274 : vector<128x128xf32>
    %277 = arith.addf %266, %276 : vector<128x128xf32>
    %c24 = arith.constant 24 : index
    %278 = memref.load %arg1[%c24] : memref<33xf32, #tpu.memory_space<smem>>
    %279 = vector.extract_strided_slice %9 {offsets = [0, 24], sizes = [128, 1], strides = [1, 1]} : vector<128x32xf32> to vector<128x1xf32>
    %280 = vector.extract_strided_slice %12 {offsets = [24, 0], sizes = [1, 128], strides = [1, 1]} : vector<32x128xf32> to vector<1x128xf32>
    %281 = vector.broadcast %279 : vector<128x1xf32> to vector<128x128xf32>
    %282 = vector.broadcast %280 : vector<1x128xf32> to vector<128x128xf32>
    %283 = arith.addf %281, %282 : vector<128x128xf32>
    %cst_36 = arith.constant 0.000000e+00 : f32
    %284 = vector.broadcast %cst_36 : f32 to vector<128x128xf32>
    %285 = arith.maximumf %283, %284 : vector<128x128xf32>
    %286 = vector.broadcast %278 : f32 to vector<128x128xf32>
    %287 = arith.mulf %286, %285 : vector<128x128xf32>
    %288 = arith.addf %277, %287 : vector<128x128xf32>
    %c25 = arith.constant 25 : index
    %289 = memref.load %arg1[%c25] : memref<33xf32, #tpu.memory_space<smem>>
    %290 = vector.extract_strided_slice %9 {offsets = [0, 25], sizes = [128, 1], strides = [1, 1]} : vector<128x32xf32> to vector<128x1xf32>
    %291 = vector.extract_strided_slice %12 {offsets = [25, 0], sizes = [1, 128], strides = [1, 1]} : vector<32x128xf32> to vector<1x128xf32>
    %292 = vector.broadcast %290 : vector<128x1xf32> to vector<128x128xf32>
    %293 = vector.broadcast %291 : vector<1x128xf32> to vector<128x128xf32>
    %294 = arith.addf %292, %293 : vector<128x128xf32>
    %cst_37 = arith.constant 0.000000e+00 : f32
    %295 = vector.broadcast %cst_37 : f32 to vector<128x128xf32>
    %296 = arith.maximumf %294, %295 : vector<128x128xf32>
    %297 = vector.broadcast %289 : f32 to vector<128x128xf32>
    %298 = arith.mulf %297, %296 : vector<128x128xf32>
    %299 = arith.addf %288, %298 : vector<128x128xf32>
    %c26 = arith.constant 26 : index
    %300 = memref.load %arg1[%c26] : memref<33xf32, #tpu.memory_space<smem>>
    %301 = vector.extract_strided_slice %9 {offsets = [0, 26], sizes = [128, 1], strides = [1, 1]} : vector<128x32xf32> to vector<128x1xf32>
    %302 = vector.extract_strided_slice %12 {offsets = [26, 0], sizes = [1, 128], strides = [1, 1]} : vector<32x128xf32> to vector<1x128xf32>
    %303 = vector.broadcast %301 : vector<128x1xf32> to vector<128x128xf32>
    %304 = vector.broadcast %302 : vector<1x128xf32> to vector<128x128xf32>
    %305 = arith.addf %303, %304 : vector<128x128xf32>
    %cst_38 = arith.constant 0.000000e+00 : f32
    %306 = vector.broadcast %cst_38 : f32 to vector<128x128xf32>
    %307 = arith.maximumf %305, %306 : vector<128x128xf32>
    %308 = vector.broadcast %300 : f32 to vector<128x128xf32>
    %309 = arith.mulf %308, %307 : vector<128x128xf32>
    %310 = arith.addf %299, %309 : vector<128x128xf32>
    %c27 = arith.constant 27 : index
    %311 = memref.load %arg1[%c27] : memref<33xf32, #tpu.memory_space<smem>>
    %312 = vector.extract_strided_slice %9 {offsets = [0, 27], sizes = [128, 1], strides = [1, 1]} : vector<128x32xf32> to vector<128x1xf32>
    %313 = vector.extract_strided_slice %12 {offsets = [27, 0], sizes = [1, 128], strides = [1, 1]} : vector<32x128xf32> to vector<1x128xf32>
    %314 = vector.broadcast %312 : vector<128x1xf32> to vector<128x128xf32>
    %315 = vector.broadcast %313 : vector<1x128xf32> to vector<128x128xf32>
    %316 = arith.addf %314, %315 : vector<128x128xf32>
    %cst_39 = arith.constant 0.000000e+00 : f32
    %317 = vector.broadcast %cst_39 : f32 to vector<128x128xf32>
    %318 = arith.maximumf %316, %317 : vector<128x128xf32>
    %319 = vector.broadcast %311 : f32 to vector<128x128xf32>
    %320 = arith.mulf %319, %318 : vector<128x128xf32>
    %321 = arith.addf %310, %320 : vector<128x128xf32>
    %c28 = arith.constant 28 : index
    %322 = memref.load %arg1[%c28] : memref<33xf32, #tpu.memory_space<smem>>
    %323 = vector.extract_strided_slice %9 {offsets = [0, 28], sizes = [128, 1], strides = [1, 1]} : vector<128x32xf32> to vector<128x1xf32>
    %324 = vector.extract_strided_slice %12 {offsets = [28, 0], sizes = [1, 128], strides = [1, 1]} : vector<32x128xf32> to vector<1x128xf32>
    %325 = vector.broadcast %323 : vector<128x1xf32> to vector<128x128xf32>
    %326 = vector.broadcast %324 : vector<1x128xf32> to vector<128x128xf32>
    %327 = arith.addf %325, %326 : vector<128x128xf32>
    %cst_40 = arith.constant 0.000000e+00 : f32
    %328 = vector.broadcast %cst_40 : f32 to vector<128x128xf32>
    %329 = arith.maximumf %327, %328 : vector<128x128xf32>
    %330 = vector.broadcast %322 : f32 to vector<128x128xf32>
    %331 = arith.mulf %330, %329 : vector<128x128xf32>
    %332 = arith.addf %321, %331 : vector<128x128xf32>
    %c29 = arith.constant 29 : index
    %333 = memref.load %arg1[%c29] : memref<33xf32, #tpu.memory_space<smem>>
    %334 = vector.extract_strided_slice %9 {offsets = [0, 29], sizes = [128, 1], strides = [1, 1]} : vector<128x32xf32> to vector<128x1xf32>
    %335 = vector.extract_strided_slice %12 {offsets = [29, 0], sizes = [1, 128], strides = [1, 1]} : vector<32x128xf32> to vector<1x128xf32>
    %336 = vector.broadcast %334 : vector<128x1xf32> to vector<128x128xf32>
    %337 = vector.broadcast %335 : vector<1x128xf32> to vector<128x128xf32>
    %338 = arith.addf %336, %337 : vector<128x128xf32>
    %cst_41 = arith.constant 0.000000e+00 : f32
    %339 = vector.broadcast %cst_41 : f32 to vector<128x128xf32>
    %340 = arith.maximumf %338, %339 : vector<128x128xf32>
    %341 = vector.broadcast %333 : f32 to vector<128x128xf32>
    %342 = arith.mulf %341, %340 : vector<128x128xf32>
    %343 = arith.addf %332, %342 : vector<128x128xf32>
    %c30 = arith.constant 30 : index
    %344 = memref.load %arg1[%c30] : memref<33xf32, #tpu.memory_space<smem>>
    %345 = vector.extract_strided_slice %9 {offsets = [0, 30], sizes = [128, 1], strides = [1, 1]} : vector<128x32xf32> to vector<128x1xf32>
    %346 = vector.extract_strided_slice %12 {offsets = [30, 0], sizes = [1, 128], strides = [1, 1]} : vector<32x128xf32> to vector<1x128xf32>
    %347 = vector.broadcast %345 : vector<128x1xf32> to vector<128x128xf32>
    %348 = vector.broadcast %346 : vector<1x128xf32> to vector<128x128xf32>
    %349 = arith.addf %347, %348 : vector<128x128xf32>
    %cst_42 = arith.constant 0.000000e+00 : f32
    %350 = vector.broadcast %cst_42 : f32 to vector<128x128xf32>
    %351 = arith.maximumf %349, %350 : vector<128x128xf32>
    %352 = vector.broadcast %344 : f32 to vector<128x128xf32>
    %353 = arith.mulf %352, %351 : vector<128x128xf32>
    %354 = arith.addf %343, %353 : vector<128x128xf32>
    %c31 = arith.constant 31 : index
    %355 = memref.load %arg1[%c31] : memref<33xf32, #tpu.memory_space<smem>>
    %356 = vector.extract_strided_slice %9 {offsets = [0, 31], sizes = [128, 1], strides = [1, 1]} : vector<128x32xf32> to vector<128x1xf32>
    %357 = vector.extract_strided_slice %12 {offsets = [31, 0], sizes = [1, 128], strides = [1, 1]} : vector<32x128xf32> to vector<1x128xf32>
    %358 = vector.broadcast %356 : vector<128x1xf32> to vector<128x128xf32>
    %359 = vector.broadcast %357 : vector<1x128xf32> to vector<128x128xf32>
    %360 = arith.addf %358, %359 : vector<128x128xf32>
    %cst_43 = arith.constant 0.000000e+00 : f32
    %361 = vector.broadcast %cst_43 : f32 to vector<128x128xf32>
    %362 = arith.maximumf %360, %361 : vector<128x128xf32>
    %363 = vector.broadcast %355 : f32 to vector<128x128xf32>
    %364 = arith.mulf %363, %362 : vector<128x128xf32>
    %365 = arith.addf %354, %364 : vector<128x128xf32>
    %c32_44 = arith.constant 32 : index
    %366 = memref.load %arg1[%c32_44] : memref<33xf32, #tpu.memory_space<smem>>
    %367 = vector.broadcast %366 : f32 to vector<128x128xf32>
    %368 = arith.addf %365, %367 : vector<128x128xf32>
    %369 = arith.negf %368 : vector<128x128xf32>
    %370 = math.exp %369 : vector<128x128xf32>
    %cst_45 = arith.constant 1.000000e+00 : f32
    %371 = vector.broadcast %cst_45 : f32 to vector<128x128xf32>
    %372 = arith.addf %371, %370 : vector<128x128xf32>
    %373 = arith.divf %371, %372 : vector<128x128xf32>
    %374 = tpu.iota {dimensions = array<i32: 0>} : vector<128x128xi32>
    %375 = tpu.iota {dimensions = array<i32: 1>} : vector<128x128xi32>
    %376 = vector.broadcast %0 : i32 to vector<128x128xi32>
    %377 = arith.cmpi slt, %374, %376 : vector<128x128xi32>
    %378 = vector.broadcast %0 : i32 to vector<128x128xi32>
    %379 = arith.cmpi slt, %375, %378 : vector<128x128xi32>
    %380 = arith.andi %377, %379 : vector<128x128xi1>
    %381 = arith.cmpi ne, %374, %375 : vector<128x128xi32>
    %382 = arith.andi %380, %381 : vector<128x128xi1>
    %cst_46 = arith.constant 0.000000e+00 : f32
    %383 = vector.broadcast %cst_46 : f32 to vector<128x128xf32>
    %384 = arith.select %382, %373, %383 : vector<128x128xi1>, vector<128x128xf32>
    %c0_i32 = arith.constant 0 : i32
    %385 = arith.cmpi sgt, %1, %c0_i32 : i32
    %cst_47 = arith.constant 1.000000e-01 : f32
    %386 = vector.broadcast %cst_47 : f32 to vector<128x128xf32>
    %387 = arith.cmpf oge, %373, %386 : vector<128x128xf32>
    %388 = arith.andi %382, %387 : vector<128x128xi1>
    %cst_48 = arith.constant 1.000000e+00 : f32
    %cst_49 = arith.constant 0.000000e+00 : f32
    %389 = vector.broadcast %cst_48 : f32 to vector<128x128xf32>
    %390 = vector.broadcast %cst_49 : f32 to vector<128x128xf32>
    %391 = arith.select %388, %389, %390 : vector<128x128xi1>, vector<128x128xf32>
    %392 = arith.select %385, %391, %384 : vector<128x128xf32>
    %c0_50 = arith.constant 0 : index
    %c0_51 = arith.constant 0 : index
    %393 = vector.load %arg10[%c0_50, %c0_51] : memref<128x128xf32, #tpu.memory_space<vmem>>, vector<128x128xf32>
    tpu.vector_store %arg10[%c0_50, %c0_51], %392 {strides = array<i32>} : memref<128x128xf32, #tpu.memory_space<vmem>>, vector<128x128xf32>,
    %394 = tpu.iota {dimensions = array<i32: 1>} : vector<1x128xi32>
    %c60_i32 = arith.constant 60 : i32
    %395 = vector.broadcast %c60_i32 : i32 to vector<1x128xi32>
    %396 = arith.cmpi slt, %394, %395 : vector<1x128xi32>
    %397 = arith.extui %396 : vector<1x128xi1> to vector<1x128xi32>
    %398 = arith.sitofp %397 : vector<1x128xi32> to vector<1x128xf32>
    %cst_52 = arith.constant 0.000000e+00 : f32
    %399 = vector.broadcast %cst_52 : f32 to vector<16x1x128xf32>
    %c0_53 = arith.constant 0 : index
    %c0_54 = arith.constant 0 : index
    %c0_55 = arith.constant 0 : index
    %400 = vector.load %arg11[%c0_53, %c0_54, %c0_55] : memref<16x1x128xf32, #tpu.memory_space<vmem>>, vector<16x1x128xf32>
    tpu.vector_store %arg11[%c0_53, %c0_54, %c0_55], %399 {strides = array<i32>} : memref<16x1x128xf32, #tpu.memory_space<vmem>>, vector<16x1x128xf32>,
    %cst_56 = arith.constant 0.000000e+00 : f32
    %401 = vector.broadcast %cst_56 : f32 to vector<1x128xf32>
    %c0_i32_57 = arith.constant 0 : i32
    %402 = arith.subi %2, %c0_i32_57 : i32
    %403 = arith.addi %c0_i32_57, %402 : i32
    %c1_i32 = arith.constant 1 : i32
    %404:2 = scf.for %arg12 = %c0_i32_57 to %403 step %c1_i32 iter_args(%arg13 = %401, %arg14 = %401) -> (vector<1x128xf32>, vector<1x128xf32>)  : i32 {
      %c0_i32_62 = arith.constant 0 : i32
      %407 = arith.addi %c0_i32_62, %arg12 : i32
      %408 = arith.index_cast %407 : i32 to index
      %409 = memref.load %arg0[%408] : memref<36xi32, #tpu.memory_space<smem>>
      %c16_i32 = arith.constant 16 : i32
      %410 = arith.addi %c16_i32, %arg12 : i32
      %411 = arith.index_cast %410 : i32 to index
      %412 = memref.load %arg0[%411] : memref<36xi32, #tpu.memory_space<smem>>
      %c0_i32_63 = arith.constant 0 : i32
      %c15_i32 = arith.constant 15 : i32
      %413 = arith.maxsi %c0_i32_63, %412 : i32
      %414 = arith.minsi %c15_i32, %413 : i32
      %415 = arith.index_cast %414 : i32 to index
      %c0_64 = arith.constant 0 : index
      %c0_65 = arith.constant 0 : index
      %416 = vector.load %arg11[%415, %c0_64, %c0_65] : memref<16x1x128xf32, #tpu.memory_space<vmem>>, vector<1x1x128xf32>
      %417 = vector.shape_cast %416 : vector<1x1x128xf32> to vector<1x128xf32>
      %c0_i32_66 = arith.constant 0 : i32
      %c7_i32 = arith.constant 7 : i32
      %418 = arith.maxsi %c0_i32_66, %412 : i32
      %419 = arith.minsi %c7_i32, %418 : i32
      %420 = arith.index_cast %419 : i32 to index
      %c0_67 = arith.constant 0 : index
      %c0_68 = arith.constant 0 : index
      %421 = vector.load %arg7[%420, %c0_67, %c0_68] : memref<8x1x128xf32, #tpu.memory_space<vmem>>, vector<1x1x128xf32>
      %422 = vector.shape_cast %421 : vector<1x1x128xf32> to vector<1x128xf32>
      %c5_i32 = arith.constant 5 : i32
      %423 = arith.cmpi eq, %409, %c5_i32 : i32
      %c10_i32 = arith.constant 10 : i32
      %424 = arith.cmpi eq, %409, %c10_i32 : i32
      %425 = arith.ori %423, %424 : i1
      %426 = arith.extui %425 : i1 to i32
      %c0_i32_69 = arith.constant 0 : i32
      %427 = arith.cmpi ne, %426, %c0_i32_69 : i32
      %428:2 = scf.if %427 -> (f32, f32) {
        %473 = vector.shape_cast %arg13 : vector<1x128xf32> to vector<1x1x128xf32>
        %cst_80 = arith.constant dense<0.000000e+00> : vector<1xf32>
        %474 = vector.multi_reduction <add>, %473, %cst_80 [1, 2] : vector<1x1x128xf32> to vector<1xf32>
        %475 = vector.shape_cast %474 : vector<1xf32> to vector<1x1x1xf32>
        %476 = vector.extract %475[0, 0, 0] : f32 from vector<1x1x1xf32>
        %477 = vector.shape_cast %arg13 : vector<1x128xf32> to vector<1x1x128xf32>
        %cst_81 = arith.constant dense<0xFF800000> : vector<1xf32>
        %478 = vector.multi_reduction <maximumf>, %477, %cst_81 [1, 2] : vector<1x1x128xf32> to vector<1xf32>
        %479 = vector.shape_cast %478 : vector<1xf32> to vector<1x1x1xf32>
        %480 = vector.extract %479[0, 0, 0] : f32 from vector<1x1x1xf32>
        scf.yield %476, %480 : f32, f32
      } else {
        %cst_80 = arith.constant 0.000000e+00 : f32
        %cst_81 = arith.constant 0.000000e+00 : f32
        scf.yield %cst_80, %cst_81 : f32, f32
      }
      %c4_i32 = arith.constant 4 : i32
      %429 = arith.cmpi eq, %409, %c4_i32 : i32
      %430 = arith.extui %429 : i1 to i32
      %c0_i32_70 = arith.constant 0 : i32
      %431 = arith.cmpi ne, %430, %c0_i32_70 : i32
      %432 = scf.if %431 -> (vector<1x128xf32>) {
        %c0_i32_80 = arith.constant 0 : i32
        %473 = arith.cmpi eq, %412, %c0_i32_80 : i32
        %474 = arith.extui %473 : i1 to i32
        %c0_i32_81 = arith.constant 0 : i32
        %475 = arith.cmpi ne, %474, %c0_i32_81 : i32
        %476 = scf.if %475 -> (vector<1x128xf32>) {
          %c0_82 = arith.constant 0 : index
          %c0_83 = arith.constant 0 : index
          %477 = vector.load %arg10[%c0_82, %c0_83] : memref<128x128xf32, #tpu.memory_space<vmem>>, vector<128x128xf32>
          %cst_84 = arith.constant dense<0.000000e+00> : vector<1x128xf32>
          %478 = tpu.matmul %arg13, %477, %cst_84 {dimension_numbers = #tpu.dot_dimension_numbers<[1], [0], [0], [1], [0, 0, 1, 1], [], []>} : vector<1x128xf32>, vector<128x128xf32>, vector<1x128xf32> -> vector<1x128xf32>
          scf.yield %478 : vector<1x128xf32>
        } else {
          %c0_82 = arith.constant 0 : index
          %c0_83 = arith.constant 0 : index
          %477 = vector.load %arg10[%c0_82, %c0_83] : memref<128x128xf32, #tpu.memory_space<vmem>>, vector<128x128xf32>
          %cst_84 = arith.constant dense<0.000000e+00> : vector<1x128xf32>
          %478 = tpu.matmul %arg13, %477, %cst_84 {dimension_numbers = #tpu.dot_dimension_numbers<[1], [1], [0], [0], [0, 0, 1, 0], [], []>} : vector<1x128xf32>, vector<128x128xf32>, vector<1x128xf32> -> vector<1x128xf32>
          scf.yield %478 : vector<1x128xf32>
        }
        scf.yield %476 : vector<1x128xf32>
      } else {
        %cst_80 = arith.constant 0.000000e+00 : f32
        %473 = vector.broadcast %cst_80 : f32 to vector<1x128xf32>
        scf.yield %473 : vector<1x128xf32>
      }
      %c1_i32_71 = arith.constant 1 : i32
      %433 = arith.cmpi eq, %409, %c1_i32_71 : i32
      %434 = arith.select %433, %398, %arg13 : vector<1x128xf32>
      %c2_i32 = arith.constant 2 : i32
      %435 = arith.cmpi eq, %409, %c2_i32 : i32
      %436 = arith.mulf %arg13, %422 : vector<1x128xf32>
      %437 = arith.select %435, %436, %434 : vector<1x128xf32>
      %c3_i32 = arith.constant 3 : i32
      %438 = arith.cmpi eq, %409, %c3_i32 : i32
      %439 = vector.broadcast %412 : i32 to vector<1x128xi32>
      %440 = arith.cmpi eq, %394, %439 : vector<1x128xi32>
      %441 = arith.extui %440 : vector<1x128xi1> to vector<1x128xi32>
      %442 = arith.sitofp %441 : vector<1x128xi32> to vector<1x128xf32>
      %443 = arith.mulf %arg13, %442 : vector<1x128xf32>
      %444 = arith.select %438, %443, %437 : vector<1x128xf32>
      %c4_i32_72 = arith.constant 4 : i32
      %445 = arith.cmpi eq, %409, %c4_i32_72 : i32
      %446 = arith.select %445, %432, %444 : vector<1x128xf32>
      %c5_i32_73 = arith.constant 5 : i32
      %447 = arith.cmpi eq, %409, %c5_i32_73 : i32
      %448 = vector.broadcast %428#0 : f32 to vector<1x128xf32>
      %449 = arith.mulf %398, %448 : vector<1x128xf32>
      %450 = arith.select %447, %449, %446 : vector<1x128xf32>
      %c10_i32_74 = arith.constant 10 : i32
      %451 = arith.cmpi eq, %409, %c10_i32_74 : i32
      %452 = vector.broadcast %428#1 : f32 to vector<1x128xf32>
      %453 = arith.mulf %398, %452 : vector<1x128xf32>
      %454 = arith.select %451, %453, %450 : vector<1x128xf32>
      %c6_i32 = arith.constant 6 : i32
      %455 = arith.cmpi eq, %409, %c6_i32 : i32
      %c8_i32 = arith.constant 8 : i32
      %456 = arith.cmpi eq, %409, %c8_i32 : i32
      %457 = arith.ori %455, %456 : i1
      %458 = arith.minimumf %arg13, %417 : vector<1x128xf32>
      %459 = arith.select %457, %458, %454 : vector<1x128xf32>
      %c7_i32_75 = arith.constant 7 : i32
      %460 = arith.cmpi eq, %409, %c7_i32_75 : i32
      %c9_i32 = arith.constant 9 : i32
      %461 = arith.cmpi eq, %409, %c9_i32 : i32
      %462 = arith.ori %460, %461 : i1
      %463 = arith.maximumf %arg13, %417 : vector<1x128xf32>
      %464 = arith.select %462, %463, %459 : vector<1x128xf32>
      %465 = arith.index_cast %arg12 : i32 to index
      %c0_76 = arith.constant 0 : index
      %c0_77 = arith.constant 0 : index
      %466 = vector.load %arg11[%465, %c0_76, %c0_77] : memref<16x1x128xf32, #tpu.memory_space<vmem>>, vector<1x1x128xf32>
      %467 = vector.shape_cast %466 : vector<1x1x128xf32> to vector<1x128xf32>
      %468 = vector.shape_cast %464 : vector<1x128xf32> to vector<1x1x128xf32>
      tpu.vector_store %arg11[%465, %c0_76, %c0_77], %468 {strides = array<i32>} : memref<16x1x128xf32, #tpu.memory_space<vmem>>, vector<1x1x128xf32>,
      %c0_i32_78 = arith.constant 0 : i32
      %469 = arith.cmpi sgt, %3, %c0_i32_78 : i32
      %470 = arith.extui %469 : i1 to i32
      %c0_i32_79 = arith.constant 0 : i32
      %471 = arith.cmpi ne, %470, %c0_i32_79 : i32
      %472 = scf.if %471 -> (vector<1x128xf32>) {
        %473 = vector.broadcast %arg12 : i32 to vector<1x128xi32>
        %474 = arith.cmpi eq, %394, %473 : vector<1x128xi32>
        %475 = vector.shape_cast %464 : vector<1x128xf32> to vector<1x1x128xf32>
        %cst_80 = arith.constant dense<0xFF800000> : vector<1xf32>
        %476 = vector.multi_reduction <maximumf>, %475, %cst_80 [1, 2] : vector<1x1x128xf32> to vector<1xf32>
        %477 = vector.shape_cast %476 : vector<1xf32> to vector<1x1x1xf32>
        %478 = vector.extract %477[0, 0, 0] : f32 from vector<1x1x1xf32>
        %479 = vector.broadcast %478 : f32 to vector<1x128xf32>
        %480 = arith.select %474, %479, %arg14 : vector<1x128xi1>, vector<1x128xf32>
        scf.yield %480 : vector<1x128xf32>
      } else {
        scf.yield %arg14 : vector<1x128xf32>
      }
      scf.yield %464, %472 : vector<1x128xf32>, vector<1x128xf32>
    }
    %c0_58 = arith.constant 0 : index
    %c0_59 = arith.constant 0 : index
    %405 = vector.load %arg8[%c0_58, %c0_59] : memref<1x128xf32, #tpu.memory_space<vmem>>, vector<1x128xf32>
    tpu.vector_store %arg8[%c0_58, %c0_59], %404#0 {strides = array<i32>} : memref<1x128xf32, #tpu.memory_space<vmem>>, vector<1x128xf32>,
    %c0_60 = arith.constant 0 : index
    %c0_61 = arith.constant 0 : index
    %406 = vector.load %arg9[%c0_60, %c0_61] : memref<1x128xf32, #tpu.memory_space<vmem>>, vector<1x128xf32>
    tpu.vector_store %arg9[%c0_60, %c0_61], %404#1 {strides = array<i32>} : memref<1x128xf32, #tpu.memory_space<vmem>>, vector<1x128xf32>,
    return
  }
}

</mosaic_0001>

<bundles_post_ra>
// kernel: _forward_fused.1
= control target key start
LH: loop header
LB: loop body
LE: loop exit
PB: predicated region body
PF: predicated region fallthrough
CT: control target
= control target key end

     0   :  { %15 = vsyncpa [#allocation6], 0  ;;  %s10867_s0 = inlined_call_operand.vmem [shape: s32[36], index: 0, kind: input, shape index: {}]   ;;  %s10868_s1 = inlined_call_operand.vmem [shape: f32[33], index: 1, kind: input, shape index: {}]   ;;  %s10869_s2 = inlined_call_operand.vmem [shape: f32[128,4], index: 2, kind: input, shape index: {}]   ;;  %s10870_s3 = inlined_call_operand.vmem [shape: f32[4,128], index: 3, kind: input, shape index: {}]   ;;  %s10871_s4 = inlined_call_operand.vmem [shape: f32[4,32], index: 4, kind: input, shape index: {}]   ;;  %s10872_s5 = inlined_call_operand.vmem [shape: f32[1,32], index: 5, kind: input, shape index: {}]   ;;  %s10873_s6 = inlined_call_operand.vmem [shape: f32[32,4], index: 6, kind: input, shape index: {}]   ;;  %s10874_s7 = inlined_call_operand.vmem [shape: f32[8,1,128], index: 7, kind: input, shape index: {}]   ;;  %s10875_s8 = inlined_call_operand.hbm [shape: f32[1,128], index: 8, kind: output, shape index: {0}]   ;;  %s10876_s9 = inlined_call_operand.hbm [shape: f32[1,128], index: 9, kind: output, shape index: {1}]  }
   0x1   :  { %16 = vsyncpa [#allocation8], 0 }
   0x2   :  { %17 = vsyncpa [#allocation5], 0 }
   0x3   :  { %18 = vsyncpa [#allocation11], 0  ;;  %s24_s11 = sshll.u32 %s10867_s0, 4  ;;  %s33_s14 = sshll.u32 %s10868_s1, 4  ;;  %s25_s11 = int_to_ptr.vmem [resolvable:$true] %s24_s11  ;;  %s34_s14 = int_to_ptr.vmem [resolvable:$true] %s33_s14 }
   0x4   :  { %s5876_s15 = smov [#allocation4]   ;;  %s5877_s16 = smov [#allocation7]  }
   0x5   :  { %27 = dma.vmem_to_smem %s25_s11, 16, %s5876_s15, [#allocation6]  }
   0x6   :  { %36 = dma.vmem_to_smem %s34_s14, 16, %s5877_s16, [#allocation8]  }
   0x7   :  { %5824 = dma.done.wait [#allocation6], 16  }
   0x8   :  { %5825 = vsyncadd [#allocation6], 4294967280 }
   0x9   :  { %5826 = dma.done.wait [#allocation8], 16  }
   0xa   :  { %5827 = vsyncadd [#allocation8], 4294967280 }
   0xb   :  { %57 = sfence }
   0xc   :  { %s5970_s17 = sld [smem:[#allocation4 + $0x22]]  ;;  %v78_v0 = vld [vmem:[%s10871_s4] sm:$0xf]  ;;  %vm132_vm0 = vcmask 1043456   ;;  %vm83_vm1 = vcmask 31744   ;;  %v67_v2 = vld [vmem:[%s10869_s2 + $0x28] sm:$0xff] }
   0xd   :  { %v62_v1 = vld [vmem:[%s10869_s2] sm:$0xff]  ;;  %s5978_s1 = sld [smem:[#allocation4 + $0x23]]  ;;  %5262 = vmatpush.msk.msra.mxu0 %vm132_vm0, %v78_v0  ;;  %5352 = vmatpush.msk.msra.mxu1 %vm132_vm0, %v78_v0  ;;  %v73_v3 = vld [vmem:[%s10869_s2 + $0x58] sm:$0xff]  ;;  %v68_v4 = vld [vmem:[%s10869_s2 + $0x30] sm:$0xff]  ;;  %v5878_v16 = vmov 1   ;;  %v5879_v17 = vmov 0  }
   0xe   :  { %5263 = vmatmul.msk.f32.vlgmr.msra.gmra.mxu0 %vm83_vm1, %v62_v1  ;;  %5268 = vmatmul.msk.f32.vlgmr.msra.gmra.mxu1 %vm83_vm1, %v67_v2  ;;  %v205_v5 = vld [vmem:[%s10870_s3] sm:$0xf]  ;;  %v63_v6 = vld [vmem:[%s10869_s2 + $0x8] sm:$0xff]  ;;  %v69_v8 = vld [vmem:[%s10869_s2 + $0x38] sm:$0xff]  ;;  %v5880_v26 = vmov 3   ;;  %v5881_v27 = vmov 2  }
   0xf   :  { %5354 = vmatpush.msk.msra.mxu3 %vm132_vm0, %v78_v0  ;;  %5353 = vmatpush.msk.msra.mxu2 %vm132_vm0, %v78_v0  ;;  %v201_v7 = vld [vmem:[%s10873_s6] sm:$0xff]  ;;  %v64_v10 = vld [vmem:[%s10869_s2 + $0x10] sm:$0xff]  ;;  %v75_v12 = vld [vmem:[%s10869_s2 + $0x68] sm:$0xff]  ;;  %s5284_s14 = sld [smem:[#allocation7 + $0x1]] }
  0x10   :  { %5274 = vmatmul.msk.f32.vlgmr.msra.gmra.mxu3 %vm83_vm1, %v73_v3  ;;  %5269 = vmatmul.msk.f32.vlgmr.msra.gmra.mxu2 %vm83_vm1, %v68_v4  ;;  %v74_v9 = vld [vmem:[%s10869_s2 + $0x60] sm:$0xff]  ;;  %v65_v13 = vld [vmem:[%s10869_s2 + $0x18] sm:$0xff]  ;;  %v76_v14 = vld [vmem:[%s10869_s2 + $0x70] sm:$0xff]  ;;  %s250_s3 = sld [smem:[#allocation7]] }
  0x11   :  { %5279 = vmatpush.msk.msrb.mxu1 %vm132_vm0, %v205_v5  ;;  %v70_v11 = vld [vmem:[%s10869_s2 + $0x40] sm:$0xff]  ;;  %v71_v15 = vld [vmem:[%s10869_s2 + $0x48] sm:$0xff]  ;;  %5506 = vset.pattern.permute.xlu1 %v5878_v16  ;;  %v77_v18 = vld [vmem:[%s10869_s2 + $0x78] sm:$0xff]  ;;  %s5285_s15 = sld [smem:[#allocation7 + $0x2]] }
  0x12   :  { %5505 = vset.pattern.permute.xlu2 %v5879_v17  ;;  %5504 = vset.pattern.permute.xlu0 %v5879_v17  ;;  %v66_v19 = vld [vmem:[%s10869_s2 + $0x20] sm:$0xff]  ;;  %v72_v21 = vld [vmem:[%s10869_s2 + $0x50] sm:$0xff]  ;;  %s7058_s16 = sld [smem:[#allocation7 + $0x3]]  ;;  %p5333_p1 = scmp.le.s32.totalorder %s5970_s17, 0 }
  0x13   :  { %v6055_v20 = vld [vmem:[%s10872_s5] ss:$0 sm:$0xff]  ;;  %s7377_s0 = sld [smem:[#allocation7 + $0x5]] }
  0x14   :  { %s7467_s20 = sld [smem:[#allocation7 + $0x6]] }
  0x15   :  { %s7578_s21 = sld [smem:[#allocation7 + $0x7]] }
  0x16   :  { %5264 = vmatmul.msk.f32.gmra.mxu0 %vm83_vm1, %v63_v6  ;;  %5280 = vmatmul.msk.f32.vlgmr.msrb.gmra.mxu1 %vm83_vm1, %v201_v7  ;;  %s7666_s22 = sld [smem:[#allocation7 + $0x8]] }
  0x17   :  { %s7750_s23 = sld [smem:[#allocation7 + $0x9]] }
  0x18   :  { %5270 = vmatmul.msk.f32.gmra.mxu2 %vm83_vm1, %v69_v8  ;;  %5275 = vmatmul.msk.f32.gmra.mxu3 %vm83_vm1, %v74_v9  ;;  %s7848_s24 = sld [smem:[#allocation7 + $0xa]] }
  0x19   :  { %s7931_s4 = sld [smem:[#allocation7 + $0xb]] }
  0x1a   :  { %s8031_s25 = sld [smem:[#allocation7 + $0xc]] }
  0x1b   :  { %s8125_s26 = sld [smem:[#allocation7 + $0xd]] }
  0x1c   :  { %s8223_s27 = sld [smem:[#allocation7 + $0xe]] }
  0x1d   :  { %s8335_s28 = sld [smem:[#allocation7 + $0xf]] }
  0x1e   :  { %5265 = vmatmul.msk.f32.gmra.mxu0 %vm83_vm1, %v64_v10  ;;  %s8438_s29 = sld [smem:[#allocation7 + $0x10]] }
  0x1f   :  { %s8528_s30 = sld [smem:[#allocation7 + $0x11]] }
  0x20   :  { %5271 = vmatmul.msk.f32.gmra.mxu2 %vm83_vm1, %v70_v11  ;;  %5276 = vmatmul.msk.f32.gmra.mxu3 %vm83_vm1, %v75_v12  ;;  %s8636_s10 = sld [smem:[#allocation7 + $0x12]] }
  0x21   :  { %s8746_s11 = sld [smem:[#allocation7 + $0x13]] }
  0x22   :  { %s8821_s2 = sld [smem:[#allocation7 + $0x14]] }
  0x23   :  { %s8929_s5 = sld [smem:[#allocation7 + $0x15]] }
  0x24   :  { %s9034_s12 = sld [smem:[#allocation7 + $0x16]] }
  0x25   :  { %s9123_s13 = sld [smem:[#allocation7 + $0x17]] }
  0x26   :  { %5266 = vmatmul.msk.f32.gmra.mxu0 %vm83_vm1, %v65_v13  ;;  %s5311_s18 = sld [smem:[#allocation7 + $0x1c]] }
  0x27   :  { %s5312_s19 = sld [smem:[#allocation7 + $0x1d]] }
  0x28   :  { %5277 = vmatmul.msk.f32.gmra.mxu3 %vm83_vm1, %v76_v14  ;;  %5272 = vmatmul.msk.f32.gmra.mxu2 %vm83_vm1, %v71_v15 }
  0x2e   :  { %5267 = vmatmul.msk.f32.gmra.mxu0 %vm83_vm1, %v66_v19 }
  0x30   :  { %5278 = vmatmul.msk.f32.gmra.mxu3 %vm83_vm1, %v77_v18  ;;  %5273 = vmatmul.msk.f32.gmra.mxu2 %vm83_vm1, %v72_v21 }
  0x8b   :  { %v153_v22 = vpop.f32.mrf.mxu0  ;;  %v168_v23 = vpop.f32.mrf.mxu1 }
  0x8c   :  { %v6062_v24 = vadd.f32 %v6055_v20, %v153_v22  ;;  %v6065_v25 = vadd.f32 %v6055_v20, %v168_v23 }
  0x8e   :  { %11008 = vst [vmem:[#allocation16_spill] sm:$0xff] %v6062_v24  ;;  %278 = vperm.xlu2 %5505, %v6065_v25   ;;  %399 = vperm.xlu1 %5506, %v6062_v24  }
  0x8f   :  { %11009 = vst [vmem:[#allocation17_spill] sm:$0xff] %v6065_v25  ;;  %253 = vperm.xlu0 %5504, %v6062_v24  }
  0x93   :  { %v186_v28 = vpop.f32.mrf.mxu3  ;;  %v171_v30 = vpop.f32.mrf.mxu2 }
  0x94   :  { %v6076_v29 = vadd.f32 %v6055_v20, %v186_v28  ;;  %v6082_v31 = vadd.f32 %v6055_v20, %v171_v30  ;;  %v156_v32 = vpop.f32.mrf.mxu0 }
  0x95   :  { %v6091_v33 = vadd.f32 %v6055_v20, %v156_v32 }
  0x96   :  { %5508 = vset.pattern.permute.xlu2 %v5880_v26  ;;  %419 = vperm.xlu1 %5506, %v6065_v25   ;;  %11010 = vst [vmem:[#allocation18_spill] sm:$0xff] %v6076_v29 }
  0x97   :  { %5507 = vset.pattern.permute.xlu0 %v5881_v27  ;;  %661 = vperm.xlu2 %5508, %v6062_v24   ;;  %11011 = vst [vmem:[#allocation19_spill] sm:$0xff] %v6082_v31 }
  0x98   :  { %530 = vperm.xlu0 %5507, %v6062_v24   ;;  %11012 = vst [vmem:[#allocation20_spill] sm:$0xff] %v6091_v33 }
  0x9b   :  { %v174_v34 = vpop.f32.mrf.mxu2  ;;  %v189_v36 = vpop.f32.mrf.mxu3 }
  0x9c   :  { %v6099_v35 = vadd.f32 %v6055_v20, %v174_v34  ;;  %v6108_v37 = vadd.f32 %v6055_v20, %v189_v36  ;;  %v159_v38 = vpop.f32.mrf.mxu0  ;;  %v5883_v36 = vmov 5  }
  0x9d   :  { %v6122_v39 = vadd.f32 %v6055_v20, %v159_v38 }
  0x9e   :  { %443 = vperm.xlu1 %5506, %v6076_v29   ;;  %11013 = vst [vmem:[#allocation21_spill] sm:$0xff] %v6099_v35 }
  0x9f   :  { %681 = vperm.xlu2 %5508, %v6065_v25   ;;  %11014 = vst [vmem:[#allocation22_spill] sm:$0xff] %v6108_v37 }
  0xa0   :  { %550 = vperm.xlu0 %5507, %v6065_v25   ;;  %11015 = vst [vmem:[#allocation23_spill] sm:$0xff] %v6122_v39 }
  0xa3   :  { %v177_v40 = vpop.f32.mrf.mxu2  ;;  %v192_v41 = vpop.f32.mrf.mxu3 }
  0xa4   :  { %v6136_v42 = vadd.f32 %v6055_v20, %v177_v40  ;;  %v6139_v43 = vadd.f32 %v6055_v20, %v192_v41  ;;  %v162_v46 = vpop.f32.mrf.mxu0 }
  0xa5   :  { %v6165_v48 = vadd.f32 %v6055_v20, %v162_v46 }
  0xa6   :  { %5512 = vset.pattern.permute.xlu1 %v5881_v27  ;;  %11016 = vst [vmem:[#allocation24_spill] sm:$0xff] %v6136_v42 }
  0xa7   :  { %5510 = vset.pattern.permute.xlu2 %v5879_v17  ;;  %554 = vperm.xlu1 %5512, %v6082_v31   ;;  %11017 = vst [vmem:[#allocation25_spill] sm:$0xff] %v6139_v43 }
  0xa8   :  { %5509 = vset.pattern.permute.xlu0 %v5879_v17  ;;  %308 = vperm.xlu2 %5510, %v6076_v29   ;;  %11018 = vst [vmem:[#allocation26_spill] sm:$0xff] %v6165_v48 }
  0xa9   :  { %283 = vperm.xlu0 %5509, %v6082_v31  }
  0xab   :  { %v195_v51 = vpop.f32.mrf.mxu3  ;;  %v180_v54 = vpop.f32.mrf.mxu2 }
  0xac   :  { %v6179_v53 = vadd.f32 %v6055_v20, %v195_v51  ;;  %v6182_v55 = vadd.f32 %v6055_v20, %v180_v54  ;;  %v165_v0 = vpop.f32.mrf.mxu0 }
  0xad   :  { %v6221_v2 = vadd.f32 %v6055_v20, %v165_v0 }
  0xae   :  { %11019 = vst [vmem:[#allocation27_spill] sm:$0xff] %v6179_v53 }
  0xaf   :  { %534 = vperm.xlu1 %5512, %v6091_v33   ;;  %11020 = vst [vmem:[#allocation28_spill] sm:$0xff] %v6182_v55 }
  0xb0   :  { %5511 = vset.pattern.permute.xlu2 %v5878_v16  ;;  %11021 = vst [vmem:[#allocation29_spill] sm:$0xff] %v6221_v2 }
  0xb1   :  { %5513 = vset.pattern.permute.xlu0 %v5881_v27  ;;  %423 = vperm.xlu2 %5511, %v6082_v31  }
  0xb2   :  { %574 = vperm.xlu0 %5513, %v6076_v29  }
  0xb3   :  { %v198_v3 = vpop.f32.mrf.mxu3  ;;  %v183_v8 = vpop.f32.mrf.mxu2 }
  0xb4   :  { %v6226_v5 = vadd.f32 %v6055_v20, %v198_v3  ;;  %v6241_v10 = vadd.f32 %v6055_v20, %v183_v8  ;;  %v5882_v20 = vmov 4  }
  0xb6   :  { %11022 = vst [vmem:[#allocation30_spill] sm:$0xff] %v6226_v5 }
  0xb7   :  { %5519 = vset.pattern.permute.xlu1 %v5879_v17  ;;  %11023 = vst [vmem:[#allocation31_spill] sm:$0xff] %v6241_v10 }
  0xb8   :  { %288 = vperm.xlu1 %5519, %v6099_v35  }
  0xb9   :  { %5515 = vset.pattern.permute.xlu2 %v5880_v26 }
  0xba   :  { %5514 = vset.pattern.permute.xlu0 %v5880_v26  ;;  %705 = vperm.xlu2 %5515, %v6076_v29  }
  0xbb   :  { %685 = vperm.xlu0 %5514, %v6082_v31  }
  0xc0   :  { %5523 = vset.pattern.permute.xlu1 %v5881_v27 }
  0xc1   :  { %578 = vperm.xlu1 %5523, %v6108_v37  }
  0xc2   :  { %5517 = vset.pattern.permute.xlu2 %v5878_v16 }
  0xc3   :  { %5516 = vset.pattern.permute.xlu0 %v5879_v17  ;;  %403 = vperm.xlu2 %5517, %v6091_v33  }
  0xc4   :  { %258 = vperm.xlu0 %5516, %v6091_v33  }
  0xc9   :  { %5524 = vset.pattern.permute.xlu1 %v5880_v26 }
  0xca   :  { %689 = vperm.xlu1 %5524, %v6099_v35  }
  0xcb   :  { %447 = vperm.xlu2 %5517, %v6108_v37  }
  0xcc   :  { %5518 = vset.pattern.permute.xlu0 %v5880_v26 }
  0xcd   :  { %665 = vperm.xlu0 %5518, %v6091_v33  }
  0xd2   :  { %5526 = vset.pattern.permute.xlu1 %v5879_v17 }
  0xd3   :  { %5522 = vset.pattern.permute.xlu2 %v5881_v27  ;;  %263 = vperm.xlu1 %5526, %v6122_v39  }
  0xd4   :  { %558 = vperm.xlu2 %5522, %v6099_v35  }
  0xd5   :  { %5520 = vset.pattern.permute.xlu0 %v5879_v17 }
  0xd6   :  { %313 = vperm.xlu0 %5520, %v6108_v37  }
  0xdb   :  { %5528 = vset.pattern.permute.xlu1 %v5880_v26 }
  0xdc   :  { %538 = vperm.xlu2 %5522, %v6122_v39   ;;  %669 = vperm.xlu1 %5528, %v6122_v39  }
  0xde   :  { %5521 = vset.pattern.permute.xlu0 %v5878_v16 }
  0xdf   :  { %427 = vperm.xlu0 %5521, %v6099_v35  }
  0xe4   :  { %5529 = vset.pattern.permute.xlu2 %v5879_v17  ;;  %5530 = vset.pattern.permute.xlu1 %v5879_v17 }
  0xe5   :  { %293 = vperm.xlu2 %5529, %v6136_v42   ;;  %318 = vperm.xlu1 %5530, %v6139_v43  }
  0xe7   :  { %5525 = vset.pattern.permute.xlu0 %v5880_v26 }
  0xe8   :  { %709 = vperm.xlu0 %5525, %v6108_v37   ;;  %v6147_v44 = vpop.permute.xlu2 %278 }
  0xed   :  { %5533 = vset.pattern.permute.xlu2 %v5881_v27  ;;  %5531 = vset.pattern.permute.xlu1 %v5878_v16 }
  0xee   :  { %582 = vperm.xlu2 %5533, %v6139_v43   ;;  %431 = vperm.xlu1 %5531, %v6136_v42  }
  0xf0   :  { %5527 = vset.pattern.permute.xlu0 %v5878_v16 }
  0xf1   :  { %407 = vperm.xlu0 %5527, %v6122_v39   ;;  %v6155_v45 = vpop.permute.xlu2 %661 }
  0xf6   :  { %5534 = vset.pattern.permute.xlu2 %v5880_v26  ;;  %5535 = vset.pattern.permute.xlu1 %v5880_v26 }
  0xf7   :  { %693 = vperm.xlu2 %5534, %v6136_v42   ;;  %713 = vperm.xlu1 %5535, %v6139_v43  }
  0xf9   :  { %451 = vperm.xlu0 %5527, %v6139_v43   ;;  %v6162_v47 = vpop.permute.xlu2 %681 }
  0xff   :  { %673 = vperm.xlu2 %5534, %v6165_v48   ;;  %5536 = vset.pattern.permute.xlu1 %v5879_v17 }
 0x100   :  { %268 = vperm.xlu1 %5536, %v6165_v48   ;;  %v6170_v49 = vpop.permute.xlu1 %399 }
 0x101   :  { %5532 = vset.pattern.permute.xlu0 %v5881_v27  ;;  %v6173_v50 = vpop.permute.xlu0 %253 }
 0x102   :  { %562 = vperm.xlu0 %5532, %v6136_v42   ;;  %v6176_v52 = vpop.permute.xlu2 %308 }
 0x107   :  { %5540 = vset.pattern.permute.xlu2 %v5879_v17 }
 0x108   :  { %323 = vperm.xlu2 %5540, %v6179_v53   ;;  %5537 = vset.pattern.permute.xlu1 %v5878_v16  ;;  %v6187_v56 = vpop.permute.xlu1 %419 }
 0x109   :  { %411 = vperm.xlu1 %5537, %v6165_v48  }
 0x10a   :  { %5539 = vset.pattern.permute.xlu0 %v5879_v17  ;;  %v6191_v57 = vpop.permute.xlu0 %530 }
 0x10b   :  { %298 = vperm.xlu0 %5539, %v6182_v55   ;;  %v6194_v58 = vpop.permute.xlu2 %423 }
 0x110   :  { %5541 = vset.pattern.permute.xlu2 %v5878_v16  ;;  %v6197_v59 = vpop.permute.xlu1 %443 }
 0x111   :  { %435 = vperm.xlu2 %5541, %v6182_v55   ;;  %5538 = vset.pattern.permute.xlu1 %v5881_v27 }
 0x112   :  { %v6201_v60 = vpop.permute.xlu0 %550  ;;  %542 = vperm.xlu1 %5538, %v6165_v48  }
 0x113   :  { %5544 = vset.pattern.permute.xlu0 %v5881_v27 }
 0x114   :  { %586 = vperm.xlu0 %5544, %v6179_v53   ;;  %v6206_v61 = vpop.permute.xlu2 %705 }
 0x119   :  { %5546 = vset.pattern.permute.xlu2 %v5880_v26  ;;  %v6209_v62 = vpop.permute.xlu1 %554 }
 0x11a   :  { %717 = vperm.xlu2 %5546, %v6179_v53   ;;  %5542 = vset.pattern.permute.xlu1 %v5878_v16 }
 0x11b   :  { %v6213_v63 = vpop.permute.xlu0 %283  ;;  %455 = vperm.xlu1 %5542, %v6179_v53  }
 0x11c   :  { %5545 = vset.pattern.permute.xlu0 %v5880_v26 }
 0x11d   :  { %697 = vperm.xlu0 %5545, %v6182_v55   ;;  %v6218_v1 = vpop.permute.xlu2 %403 }
 0x121   :  { %v6223_v4 = vpop.permute.xlu1 %534 }
 0x122   :  { %5547 = vset.pattern.permute.xlu2 %v5879_v17 }
 0x123   :  { %273 = vperm.xlu2 %5547, %v6221_v2   ;;  %5543 = vset.pattern.permute.xlu1 %v5881_v27 }
 0x124   :  { %v6231_v6 = vpop.permute.xlu0 %574  ;;  %566 = vperm.xlu1 %5543, %v6182_v55  }
 0x125   :  { %5552 = vset.pattern.permute.xlu0 %v5879_v17  ;;  %v6235_v7 = vpop.permute.xlu2 %447 }
 0x126   :  { %328 = vperm.xlu0 %5552, %v6226_v5  }
 0x12a   :  { %v6238_v9 = vpop.permute.xlu1 %288 }
 0x12b   :  { %5548 = vset.pattern.permute.xlu2 %v5878_v16 }
 0x12c   :  { %415 = vperm.xlu2 %5548, %v6221_v2   ;;  %5550 = vset.pattern.permute.xlu1 %v5880_v26 }
 0x12d   :  { %v6246_v11 = vpop.permute.xlu0 %685  ;;  %677 = vperm.xlu1 %5550, %v6221_v2  }
 0x12e   :  { %5553 = vset.pattern.permute.xlu0 %v5878_v16  ;;  %v6250_v12 = vpop.permute.xlu2 %558 }
 0x12f   :  { %439 = vperm.xlu0 %5553, %v6241_v10  }
 0x133   :  { %v6253_v13 = vpop.permute.xlu1 %578 }
 0x134   :  { %5549 = vset.pattern.permute.xlu2 %v5881_v27 }
 0x135   :  { %546 = vperm.xlu2 %5549, %v6221_v2   ;;  %5551 = vset.pattern.permute.xlu1 %v5879_v17 }
 0x136   :  { %v6258_v14 = vpop.permute.xlu0 %258  ;;  %303 = vperm.xlu1 %5551, %v6241_v10   ;;  %v6261_v15 = vpop.permute.xlu2 %538 }
 0x137   :  { %5558 = vset.pattern.permute.xlu0 %v5880_v26 }
 0x138   :  { %721 = vperm.xlu0 %5558, %v6226_v5  }
 0x13c   :  { %v6265_v18 = vpop.permute.xlu1 %689 }
 0x13d   :  { %5554 = vset.pattern.permute.xlu2 %v5878_v16 }
 0x13e   :  { %459 = vperm.xlu2 %5554, %v6226_v5   ;;  %5556 = vset.pattern.permute.xlu1 %v5881_v27 }
 0x13f   :  { %v6270_v19 = vpop.permute.xlu0 %665  ;;  %590 = vperm.xlu1 %5556, %v6226_v5   ;;  %v6273_v17 = vpop.permute.xlu2 %293 }
 0x140   :  { %5561 = vset.pattern.permute.xlu0 %v5882_v20 }
 0x141   :  { %800 = vperm.xlu0 %5561, %v6122_v39  }
 0x145   :  { %v6276_v21 = vpop.permute.xlu1 %263 }
 0x146   :  { %5555 = vset.pattern.permute.xlu2 %v5881_v27 }
 0x147   :  { %570 = vperm.xlu2 %5555, %v6241_v10   ;;  %5557 = vset.pattern.permute.xlu1 %v5880_v26 }
 0x148   :  { %v6281_v16 = vpop.permute.xlu0 %313  ;;  %v6283_v22 = vpop.permute.xlu2 %582  ;;  %701 = vperm.xlu1 %5557, %v6241_v10  }
 0x149   :  { %820 = vperm.xlu0 %5561, %v6099_v35  }
 0x14e   :  { %v6287_v23 = vpop.permute.xlu1 %669 }
 0x14f   :  { %5560 = vset.pattern.permute.xlu2 %v5882_v20 }
 0x150   :  { %796 = vperm.xlu2 %5560, %v6091_v33   ;;  %5559 = vset.pattern.permute.xlu1 %v5882_v20 }
 0x151   :  { %832 = vperm.xlu0 %5561, %v6241_v10   ;;  %v6291_v27 = vpop.permute.xlu0 %427  ;;  %v6293_v28 = vpop.permute.xlu2 %693  ;;  %792 = vperm.xlu1 %5559, %v6062_v24  }
 0x157   :  { %v6296_v26 = vpop.permute.xlu1 %318 }
 0x158   :  { %808 = vperm.xlu2 %5560, %v6221_v2  }
 0x159   :  { %844 = vperm.xlu0 %5561, %v6139_v43   ;;  %804 = vperm.xlu1 %5559, %v6165_v48   ;;  %v6303_v32 = vpop.permute.xlu2 %673 }
 0x15a   :  { %v6301_v30 = vpop.permute.xlu0 %709 }
 0x160   :  { %816 = vperm.xlu2 %5560, %v6082_v31   ;;  %v6306_v34 = vpop.permute.xlu1 %431 }
 0x161   :  { %11024 = vst [vmem:[#allocation32_spill] sm:$0xff] %v6306_v34  ;;  %5562 = vset.pattern.permute.xlu0 %v5883_v36  ;;  %812 = vperm.xlu1 %5559, %v6065_v25  }
 0x162   :  { %923 = vperm.xlu0 %5562, %v6062_v24   ;;  %v6310_v38 = vpop.permute.xlu2 %323 }
 0x163   :  { %11025 = vst [vmem:[#allocation33_spill] sm:$0xff] %v6310_v38  ;;  %v6312_v40 = vpop.permute.xlu0 %407 }
 0x168   :  { %828 = vperm.xlu2 %5560, %v6182_v55  }
 0x169   :  { %824 = vperm.xlu1 %5559, %v6136_v42   ;;  %v6316_v41 = vpop.permute.xlu1 %713 }
 0x16a   :  { %11026 = vst [vmem:[#allocation34_spill] sm:$0xff] %v6316_v41  ;;  %943 = vperm.xlu0 %5562, %v6065_v25  }
 0x16b   :  { %v6319_v46 = vpop.permute.xlu2 %435  ;;  %v6321_v51 = vpop.permute.xlu0 %451 }
 0x16c   :  { %11027 = vst [vmem:[#allocation35_spill] sm:$0xff] %v6319_v46 }
 0x16d   :  { %11028 = vst [vmem:[#allocation36_spill] sm:$0xff] %v6321_v51 }
 0x170   :  { %840 = vperm.xlu2 %5560, %v6108_v37  }
 0x171   :  { %836 = vperm.xlu1 %5559, %v6076_v29  }
 0x172   :  { %955 = vperm.xlu0 %5562, %v6136_v42   ;;  %v6326_v54 = vpop.permute.xlu1 %268 }
 0x173   :  { %11029 = vst [vmem:[#allocation37_spill] sm:$0xff] %v6326_v54 }
 0x174   :  { %v6328_v0 = vpop.permute.xlu2 %717  ;;  %v6330_v3 = vpop.permute.xlu0 %562 }
 0x175   :  { %11030 = vst [vmem:[#allocation38_spill] sm:$0xff] %v6328_v0 }
 0x176   :  { %11031 = vst [vmem:[#allocation39_spill] sm:$0xff] %v6330_v3 }
 0x178   :  { %852 = vperm.xlu2 %5560, %v6226_v5  }
 0x179   :  { %848 = vperm.xlu1 %5559, %v6179_v53  }
 0x17a   :  { %967 = vperm.xlu0 %5562, %v6076_v29  }
 0x17b   :  { %v6335_v8 = vpop.permute.xlu1 %411 }
 0x17c   :  { %11032 = vst [vmem:[#allocation40_spill] sm:$0xff] %v6335_v8  ;;  %v5884_v8 = vmov 6  }
 0x17d   :  { %v6337_v20 = vpop.permute.xlu2 %273  ;;  %v6339_v46 = vpop.permute.xlu0 %298 }
 0x17e   :  { %11033 = vst [vmem:[#allocation41_spill] sm:$0xff] %v6337_v20 }
 0x17f   :  { %11034 = vst [vmem:[#allocation42_spill] sm:$0xff] %v6339_v46 }
 0x180   :  { %5564 = vset.pattern.permute.xlu2 %v5883_v36 }
 0x181   :  { %931 = vperm.xlu2 %5564, %v6122_v39   ;;  %5563 = vset.pattern.permute.xlu1 %v5883_v36 }
 0x182   :  { %979 = vperm.xlu0 %5562, %v6179_v53   ;;  %927 = vperm.xlu1 %5563, %v6091_v33  }
 0x184   :  { %v6344_v0 = vpop.permute.xlu1 %542 }
 0x185   :  { %11035 = vst [vmem:[#allocation43_spill] sm:$0xff] %v6344_v0 }
 0x186   :  { %v6346_v54 = vpop.permute.xlu2 %415  ;;  %v6348_v41 = vpop.permute.xlu0 %586 }
 0x187   :  { %11036 = vst [vmem:[#allocation44_spill] sm:$0xff] %v6346_v54 }
 0x188   :  { %11037 = vst [vmem:[#allocation45_spill] sm:$0xff] %v6348_v41 }
 0x189   :  { %939 = vperm.xlu2 %5564, %v6221_v2  }
 0x18a   :  { %5566 = vset.pattern.permute.xlu0 %v5884_v8  ;;  %935 = vperm.xlu1 %5563, %v6165_v48  }
 0x18b   :  { %1058 = vperm.xlu0 %5566, %v6091_v33  }
 0x18d   :  { %v6353_v20 = vpop.permute.xlu1 %455 }
 0x18e   :  { %11038 = vst [vmem:[#allocation46_spill] sm:$0xff] %v6353_v20 }
 0x18f   :  { %v6355_v36 = vpop.permute.xlu0 %697  ;;  %v6357_v46 = vpop.permute.xlu2 %546 }
 0x190   :  { %11039 = vst [vmem:[#allocation47_spill] sm:$0xff] %v6355_v36 }
 0x191   :  { %11040 = vst [vmem:[#allocation48_spill] sm:$0xff] %v6357_v46  ;;  %951 = vperm.xlu2 %5564, %v6099_v35  }
 0x192   :  { %947 = vperm.xlu1 %5563, %v6082_v31  }
 0x193   :  { %1078 = vperm.xlu0 %5566, %v6082_v31  }
 0x196   :  { %v6362_v41 = vpop.permute.xlu1 %566 }
 0x197   :  { %11041 = vst [vmem:[#allocation49_spill] sm:$0xff] %v6362_v41 }
 0x198   :  { %v6364_v54 = vpop.permute.xlu2 %459  ;;  %v6366_v0 = vpop.permute.xlu0 %328 }
 0x199   :  { %11042 = vst [vmem:[#allocation50_spill] sm:$0xff] %v6364_v54  ;;  %963 = vperm.xlu2 %5564, %v6241_v10  }
 0x19a   :  { %11043 = vst [vmem:[#allocation51_spill] sm:$0xff] %v6366_v0  ;;  %959 = vperm.xlu1 %5563, %v6182_v55   ;;  %v202_v0 = vld [vmem:[%s10873_s6 + $0x8] sm:$0xff] }
 0x19b   :  { %1090 = vperm.xlu0 %5566, %v6182_v55   ;;  %5281 = vmatmul.msk.f32.gmra.mxu1 %vm83_vm1, %v202_v0 }
 0x19f   :  { %v6371_v36 = vpop.permute.xlu1 %677 }
 0x1a0   :  { %11044 = vst [vmem:[#allocation52_spill] sm:$0xff] %v6371_v36 }
 0x1a1   :  { %975 = vperm.xlu2 %5564, %v6139_v43   ;;  %v6374_v46 = vpop.permute.xlu2 %570  ;;  %v6376_v20 = vpop.permute.xlu0 %439 }
 0x1a2   :  { %11045 = vst [vmem:[#allocation53_spill] sm:$0xff] %v6374_v46  ;;  %971 = vperm.xlu1 %5563, %v6108_v37  }
 0x1a3   :  { %11046 = vst [vmem:[#allocation54_spill] sm:$0xff] %v6376_v20  ;;  %1102 = vperm.xlu0 %5566, %v6108_v37  }
 0x1a8   :  { %v6383_v54 = vpop.permute.xlu1 %303 }
 0x1a9   :  { %11047 = vst [vmem:[#allocation55_spill] sm:$0xff] %v6383_v54  ;;  %5565 = vset.pattern.permute.xlu2 %v5884_v8  ;;  %v5885_v54 = vmov 7  }
 0x1aa   :  { %1054 = vperm.xlu2 %5565, %v6062_v24   ;;  %v6387_v36 = vpop.permute.xlu2 %796  ;;  %983 = vperm.xlu1 %5563, %v6226_v5   ;;  %v6390_v46 = vpop.permute.xlu0 %721 }
 0x1ab   :  { %11048 = vst [vmem:[#allocation56_spill] sm:$0xff] %v6387_v36  ;;  %1114 = vperm.xlu0 %5566, %v6226_v5  }
 0x1ac   :  { %11049 = vst [vmem:[#allocation57_spill] sm:$0xff] %v6390_v46 }
 0x1b1   :  { %v6393_v20 = vpop.permute.xlu1 %590 }
 0x1b2   :  { %11050 = vst [vmem:[#allocation58_spill] sm:$0xff] %v6393_v20  ;;  %1066 = vperm.xlu2 %5565, %v6165_v48   ;;  %v6396_v41 = vpop.permute.xlu2 %808  ;;  %5567 = vset.pattern.permute.xlu1 %v5884_v8 }
 0x1b3   :  { %11051 = vst [vmem:[#allocation59_spill] sm:$0xff] %v6396_v41  ;;  %5570 = vset.pattern.permute.xlu0 %v5885_v54  ;;  %v6398_v0 = vpop.permute.xlu0 %800  ;;  %1062 = vperm.xlu1 %5567, %v6122_v39  }
 0x1b4   :  { %11052 = vst [vmem:[#allocation60_spill] sm:$0xff] %v6398_v0  ;;  %1193 = vperm.xlu0 %5570, %v6122_v39  }
 0x1ba   :  { %1074 = vperm.xlu2 %5565, %v6065_v25   ;;  %v6403_v46 = vpop.permute.xlu2 %816  ;;  %v6405_v36 = vpop.permute.xlu1 %701 }
 0x1bb   :  { %11053 = vst [vmem:[#allocation61_spill] sm:$0xff] %v6403_v46  ;;  %v6407_v20 = vpop.permute.xlu0 %820  ;;  %1070 = vperm.xlu1 %5567, %v6221_v2  }
 0x1bc   :  { %11054 = vst [vmem:[#allocation62_spill] sm:$0xff] %v6405_v36  ;;  %1213 = vperm.xlu0 %5570, %v6099_v35  }
 0x1bd   :  { %11055 = vst [vmem:[#allocation63_spill] sm:$0xff] %v6407_v20 }
 0x1c2   :  { %1086 = vperm.xlu2 %5565, %v6136_v42   ;;  %v6412_v8 = vpop.permute.xlu2 %828 }
 0x1c3   :  { %11056 = vst [vmem:[#allocation64_spill] sm:$0xff] %v6412_v8  ;;  %v6414_v0 = vpop.permute.xlu0 %832  ;;  %1082 = vperm.xlu1 %5567, %v6099_v35   ;;  %v6417_v41 = vpop.permute.xlu1 %792  ;;  %v5886_v8 = vmov 8  }
 0x1c4   :  { %11057 = vst [vmem:[#allocation65_spill] sm:$0xff] %v6414_v0  ;;  %1225 = vperm.xlu0 %5570, %v6241_v10  }
 0x1c5   :  { %11058 = vst [vmem:[#allocation66_spill] sm:$0xff] %v6417_v41 }
 0x1ca   :  { %1098 = vperm.xlu2 %5565, %v6076_v29   ;;  %v6421_v36 = vpop.permute.xlu2 %840 }
 0x1cb   :  { %11059 = vst [vmem:[#allocation67_spill] sm:$0xff] %v6421_v36  ;;  %v6423_v20 = vpop.permute.xlu0 %844  ;;  %1094 = vperm.xlu1 %5567, %v6241_v10   ;;  %v6426_v46 = vpop.permute.xlu1 %804 }
 0x1cc   :  { %11060 = vst [vmem:[#allocation68_spill] sm:$0xff] %v6423_v20  ;;  %1237 = vperm.xlu0 %5570, %v6139_v43  }
 0x1cd   :  { %11061 = vst [vmem:[#allocation69_spill] sm:$0xff] %v6426_v46 }
 0x1d2   :  { %1110 = vperm.xlu2 %5565, %v6179_v53   ;;  %v6430_v0 = vpop.permute.xlu2 %852 }
 0x1d3   :  { %11062 = vst [vmem:[#allocation70_spill] sm:$0xff] %v6430_v0  ;;  %1106 = vperm.xlu1 %5567, %v6139_v43   ;;  %v6433_v41 = vpop.permute.xlu1 %812 }
 0x1d4   :  { %11063 = vst [vmem:[#allocation71_spill] sm:$0xff] %v6433_v41  ;;  %5571 = vset.pattern.permute.xlu0 %v5886_v8  ;;  %v6435_v38 = vpop.permute.xlu0 %923 }
 0x1d5   :  { %11064 = vst [vmem:[#allocation72_spill] sm:$0xff] %v6435_v38  ;;  %1316 = vperm.xlu0 %5571, %v6062_v24  }
 0x1da   :  { %5569 = vset.pattern.permute.xlu2 %v5885_v54 }
 0x1db   :  { %1189 = vperm.xlu2 %5569, %v6091_v33   ;;  %v6439_v46 = vpop.permute.xlu2 %931  ;;  %5568 = vset.pattern.permute.xlu1 %v5885_v54  ;;  %v6441_v20 = vpop.permute.xlu1 %824 }
 0x1dc   :  { %11065 = vst [vmem:[#allocation73_spill] sm:$0xff] %v6439_v46  ;;  %v6443_v36 = vpop.permute.xlu0 %943  ;;  %1185 = vperm.xlu1 %5568, %v6062_v24  }
 0x1dd   :  { %11066 = vst [vmem:[#allocation74_spill] sm:$0xff] %v6441_v20  ;;  %1336 = vperm.xlu0 %5571, %v6065_v25  }
 0x1de   :  { %11067 = vst [vmem:[#allocation75_spill] sm:$0xff] %v6443_v36 }
 0x1e3   :  { %1201 = vperm.xlu2 %5569, %v6221_v2   ;;  %v6448_v41 = vpop.permute.xlu2 %939  ;;  %v6450_v38 = vpop.permute.xlu1 %836 }
 0x1e4   :  { %11068 = vst [vmem:[#allocation76_spill] sm:$0xff] %v6448_v41  ;;  %v6452_v0 = vpop.permute.xlu0 %955  ;;  %1197 = vperm.xlu1 %5568, %v6165_v48  }
 0x1e5   :  { %11069 = vst [vmem:[#allocation77_spill] sm:$0xff] %v6450_v38  ;;  %1348 = vperm.xlu0 %5571, %v6136_v42  }
 0x1e6   :  { %11070 = vst [vmem:[#allocation78_spill] sm:$0xff] %v6452_v0 }
 0x1eb   :  { %1209 = vperm.xlu2 %5569, %v6082_v31   ;;  %v6457_v54 = vpop.permute.xlu2 %951  ;;  %v6459_v36 = vpop.permute.xlu1 %848 }
 0x1ec   :  { %11071 = vst [vmem:[#allocation79_spill] sm:$0xff] %v6457_v54  ;;  %v6461_v20 = vpop.permute.xlu0 %967  ;;  %1205 = vperm.xlu1 %5568, %v6065_v25   ;;  %v5887_v54 = vmov 9  }
 0x1ed   :  { %11072 = vst [vmem:[#allocation80_spill] sm:$0xff] %v6459_v36  ;;  %1360 = vperm.xlu0 %5571, %v6076_v29  }
 0x1ee   :  { %11073 = vst [vmem:[#allocation81_spill] sm:$0xff] %v6461_v20 }
 0x1f3   :  { %1221 = vperm.xlu2 %5569, %v6182_v55   ;;  %v6466_v38 = vpop.permute.xlu2 %963 }
 0x1f4   :  { %11074 = vst [vmem:[#allocation82_spill] sm:$0xff] %v6466_v38  ;;  %v6468_v0 = vpop.permute.xlu0 %979  ;;  %1217 = vperm.xlu1 %5568, %v6136_v42   ;;  %v6471_v41 = vpop.permute.xlu1 %927 }
 0x1f5   :  { %11075 = vst [vmem:[#allocation83_spill] sm:$0xff] %v6468_v0  ;;  %1372 = vperm.xlu0 %5571, %v6179_v53  }
 0x1f6   :  { %11076 = vst [vmem:[#allocation84_spill] sm:$0xff] %v6471_v41 }
 0x1fb   :  { %1233 = vperm.xlu2 %5569, %v6108_v37   ;;  %v6475_v36 = vpop.permute.xlu2 %975 }
 0x1fc   :  { %11077 = vst [vmem:[#allocation85_spill] sm:$0xff] %v6475_v36  ;;  %1229 = vperm.xlu1 %5568, %v6076_v29   ;;  %v6478_v20 = vpop.permute.xlu1 %935 }
 0x1fd   :  { %11078 = vst [vmem:[#allocation86_spill] sm:$0xff] %v6478_v20  ;;  %5575 = vset.pattern.permute.xlu0 %v5887_v54  ;;  %v6480_v46 = vpop.permute.xlu0 %1058 }
 0x1fe   :  { %11079 = vst [vmem:[#allocation87_spill] sm:$0xff] %v6480_v46  ;;  %1451 = vperm.xlu0 %5575, %v6091_v33  }
 0x203   :  { %1245 = vperm.xlu2 %5569, %v6226_v5  }
 0x204   :  { %v6484_v0 = vpop.permute.xlu2 %1054  ;;  %1241 = vperm.xlu1 %5568, %v6179_v53   ;;  %v6487_v41 = vpop.permute.xlu1 %947 }
 0x205   :  { %11080 = vst [vmem:[#allocation88_spill] sm:$0xff] %v6484_v0  ;;  %v6489_v38 = vpop.permute.xlu0 %1078 }
 0x206   :  { %11081 = vst [vmem:[#allocation89_spill] sm:$0xff] %v6487_v41  ;;  %1471 = vperm.xlu0 %5575, %v6082_v31  }
 0x207   :  { %11082 = vst [vmem:[#allocation90_spill] sm:$0xff] %v6489_v38 }
 0x20b   :  { %5573 = vset.pattern.permute.xlu2 %v5886_v8 }
 0x20c   :  { %1324 = vperm.xlu2 %5573, %v6122_v39   ;;  %v6493_v20 = vpop.permute.xlu2 %1066  ;;  %5572 = vset.pattern.permute.xlu1 %v5886_v8  ;;  %v6495_v46 = vpop.permute.xlu1 %959 }
 0x20d   :  { %11083 = vst [vmem:[#allocation91_spill] sm:$0xff] %v6493_v20  ;;  %v6497_v36 = vpop.permute.xlu0 %1090  ;;  %1320 = vperm.xlu1 %5572, %v6091_v33  }
 0x20e   :  { %11084 = vst [vmem:[#allocation92_spill] sm:$0xff] %v6495_v46  ;;  %1483 = vperm.xlu0 %5575, %v6182_v55  }
 0x20f   :  { %11085 = vst [vmem:[#allocation93_spill] sm:$0xff] %v6497_v36 }
 0x214   :  { %1332 = vperm.xlu2 %5573, %v6221_v2   ;;  %v6502_v0 = vpop.permute.xlu2 %1074  ;;  %v6504_v38 = vpop.permute.xlu1 %971 }
 0x215   :  { %11086 = vst [vmem:[#allocation94_spill] sm:$0xff] %v6502_v0  ;;  %v6506_v41 = vpop.permute.xlu0 %1102  ;;  %1328 = vperm.xlu1 %5572, %v6165_v48  }
 0x216   :  { %11087 = vst [vmem:[#allocation95_spill] sm:$0xff] %v6504_v38  ;;  %1495 = vperm.xlu0 %5575, %v6108_v37   ;;  %v5888_v38 = vmov 10  }
 0x217   :  { %11088 = vst [vmem:[#allocation96_spill] sm:$0xff] %v6506_v41 }
 0x21c   :  { %1344 = vperm.xlu2 %5573, %v6099_v35   ;;  %v6511_v8 = vpop.permute.xlu2 %1086  ;;  %v6513_v36 = vpop.permute.xlu1 %983 }
 0x21d   :  { %11089 = vst [vmem:[#allocation97_spill] sm:$0xff] %v6511_v8  ;;  %v6515_v20 = vpop.permute.xlu0 %1114  ;;  %1340 = vperm.xlu1 %5572, %v6082_v31  }
 0x21e   :  { %11090 = vst [vmem:[#allocation98_spill] sm:$0xff] %v6513_v36  ;;  %1507 = vperm.xlu0 %5575, %v6226_v5  }
 0x21f   :  { %11091 = vst [vmem:[#allocation99_spill] sm:$0xff] %v6515_v20 }
 0x224   :  { %1356 = vperm.xlu2 %5573, %v6241_v10   ;;  %v6520_v0 = vpop.permute.xlu2 %1098 }
 0x225   :  { %11092 = vst [vmem:[#allocation100_spill] sm:$0xff] %v6520_v0  ;;  %1352 = vperm.xlu1 %5572, %v6182_v55   ;;  %v6523_v41 = vpop.permute.xlu1 %1062 }
 0x226   :  { %11093 = vst [vmem:[#allocation101_spill] sm:$0xff] %v6523_v41  ;;  %5579 = vset.pattern.permute.xlu0 %v5888_v38  ;;  %v6525_v46 = vpop.permute.xlu0 %1193 }
 0x227   :  { %11094 = vst [vmem:[#allocation102_spill] sm:$0xff] %v6525_v46  ;;  %1586 = vperm.xlu0 %5579, %v6122_v39  }
 0x22c   :  { %1368 = vperm.xlu2 %5573, %v6139_v43   ;;  %v6529_v20 = vpop.permute.xlu2 %1110 }
 0x22d   :  { %11095 = vst [vmem:[#allocation103_spill] sm:$0xff] %v6529_v20  ;;  %1364 = vperm.xlu1 %5572, %v6108_v37   ;;  %v6532_v8 = vpop.permute.xlu1 %1070 }
 0x22e   :  { %11096 = vst [vmem:[#allocation104_spill] sm:$0xff] %v6532_v8  ;;  %v6534_v36 = vpop.permute.xlu0 %1213 }
 0x22f   :  { %11097 = vst [vmem:[#allocation105_spill] sm:$0xff] %v6534_v36  ;;  %1606 = vperm.xlu0 %5579, %v6099_v35  }
 0x234   :  { %5574 = vset.pattern.permute.xlu2 %v5887_v54 }
 0x235   :  { %1447 = vperm.xlu2 %5574, %v6062_v24   ;;  %v6538_v41 = vpop.permute.xlu2 %1189  ;;  %1376 = vperm.xlu1 %5572, %v6226_v5   ;;  %v6541_v46 = vpop.permute.xlu1 %1082 }
 0x236   :  { %11098 = vst [vmem:[#allocation106_spill] sm:$0xff] %v6538_v41  ;;  %v6543_v0 = vpop.permute.xlu0 %1225 }
 0x237   :  { %11099 = vst [vmem:[#allocation107_spill] sm:$0xff] %v6541_v46  ;;  %1618 = vperm.xlu0 %5579, %v6241_v10   ;;  %v10877_v46 = vmov 11  }
 0x238   :  { %11100 = vst [vmem:[#allocation108_spill] sm:$0xff] %v6543_v0 }
 0x23d   :  { %1459 = vperm.xlu2 %5574, %v6165_v48   ;;  %v6547_v8 = vpop.permute.xlu2 %1201  ;;  %5576 = vset.pattern.permute.xlu1 %v5887_v54  ;;  %v6549_v36 = vpop.permute.xlu1 %1094 }
 0x23e   :  { %11101 = vst [vmem:[#allocation109_spill] sm:$0xff] %v6547_v8  ;;  %v6551_v20 = vpop.permute.xlu0 %1237  ;;  %1455 = vperm.xlu1 %5576, %v6122_v39  }
 0x23f   :  { %11102 = vst [vmem:[#allocation110_spill] sm:$0xff] %v6549_v36  ;;  %1630 = vperm.xlu0 %5579, %v6139_v43  }
 0x240   :  { %11103 = vst [vmem:[#allocation111_spill] sm:$0xff] %v6551_v20 }
 0x245   :  { %1467 = vperm.xlu2 %5574, %v6065_v25   ;;  %v6556_v41 = vpop.permute.xlu2 %1209  ;;  %v6558_v0 = vpop.permute.xlu1 %1106 }
 0x246   :  { %11104 = vst [vmem:[#allocation112_spill] sm:$0xff] %v6556_v41  ;;  %1463 = vperm.xlu1 %5576, %v6221_v2  }
 0x247   :  { %11105 = vst [vmem:[#allocation113_spill] sm:$0xff] %v6558_v0  ;;  %5580 = vset.pattern.permute.xlu0 %v10877_v46  ;;  %v6562_v54 = vpop.permute.xlu0 %1316 }
 0x248   :  { %11106 = vst [vmem:[#allocation114_spill] sm:$0xff] %v6562_v54  ;;  %1709 = vperm.xlu0 %5580, %v6062_v24  }
 0x24d   :  { %1479 = vperm.xlu2 %5574, %v6136_v42   ;;  %v6566_v20 = vpop.permute.xlu2 %1221 }
 0x24e   :  { %11107 = vst [vmem:[#allocation115_spill] sm:$0xff] %v6566_v20  ;;  %1475 = vperm.xlu1 %5576, %v6099_v35   ;;  %v6569_v8 = vpop.permute.xlu1 %1185 }
 0x24f   :  { %11108 = vst [vmem:[#allocation116_spill] sm:$0xff] %v6569_v8  ;;  %v6571_v41 = vpop.permute.xlu0 %1336 }
 0x250   :  { %11109 = vst [vmem:[#allocation117_spill] sm:$0xff] %v6571_v41  ;;  %1729 = vperm.xlu0 %5580, %v6065_v25  }
 0x255   :  { %1491 = vperm.xlu2 %5574, %v6076_v29   ;;  %v6575_v0 = vpop.permute.xlu2 %1233 }
 0x256   :  { %11110 = vst [vmem:[#allocation118_spill] sm:$0xff] %v6575_v0  ;;  %1487 = vperm.xlu1 %5576, %v6241_v10   ;;  %v6578_v46 = vpop.permute.xlu1 %1197 }
 0x257   :  { %11111 = vst [vmem:[#allocation119_spill] sm:$0xff] %v6578_v46  ;;  %v6580_v54 = vpop.permute.xlu0 %1348 }
 0x258   :  { %11112 = vst [vmem:[#allocation120_spill] sm:$0xff] %v6580_v54  ;;  %1741 = vperm.xlu0 %5580, %v6136_v42  }
 0x25d   :  { %1503 = vperm.xlu2 %5574, %v6179_v53   ;;  %v6584_v20 = vpop.permute.xlu2 %1245 }
 0x25e   :  { %11113 = vst [vmem:[#allocation121_spill] sm:$0xff] %v6584_v20  ;;  %1499 = vperm.xlu1 %5576, %v6139_v43   ;;  %v6587_v41 = vpop.permute.xlu1 %1205 }
 0x25f   :  { %11114 = vst [vmem:[#allocation122_spill] sm:$0xff] %v6587_v41  ;;  %v6589_v8 = vpop.permute.xlu0 %1360  ;;  %v10879_v41 = vmov 12  }
 0x260   :  { %11115 = vst [vmem:[#allocation123_spill] sm:$0xff] %v6589_v8  ;;  %1753 = vperm.xlu0 %5580, %v6076_v29  }
 0x265   :  { %5578 = vset.pattern.permute.xlu2 %v5888_v38 }
 0x266   :  { %1582 = vperm.xlu2 %5578, %v6091_v33   ;;  %v6593_v46 = vpop.permute.xlu2 %1324  ;;  %5577 = vset.pattern.permute.xlu1 %v5888_v38  ;;  %v6595_v54 = vpop.permute.xlu1 %1217 }
 0x267   :  { %11116 = vst [vmem:[#allocation124_spill] sm:$0xff] %v6593_v46  ;;  %v6597_v0 = vpop.permute.xlu0 %1372  ;;  %1578 = vperm.xlu1 %5577, %v6062_v24  }
 0x268   :  { %11117 = vst [vmem:[#allocation125_spill] sm:$0xff] %v6595_v54  ;;  %1765 = vperm.xlu0 %5580, %v6179_v53  }
 0x269   :  { %11118 = vst [vmem:[#allocation126_spill] sm:$0xff] %v6597_v0 }
 0x26e   :  { %1594 = vperm.xlu2 %5578, %v6221_v2   ;;  %v6602_v20 = vpop.permute.xlu2 %1332  ;;  %v6604_v8 = vpop.permute.xlu1 %1229 }
 0x26f   :  { %11119 = vst [vmem:[#allocation127_spill] sm:$0xff] %v6602_v20  ;;  %1590 = vperm.xlu1 %5577, %v6165_v48  }
 0x270   :  { %11120 = vst [vmem:[#allocation128_spill] sm:$0xff] %v6604_v8  ;;  %5584 = vset.pattern.permute.xlu0 %v10879_v41  ;;  %v6608_v38 = vpop.permute.xlu0 %1451 }
 0x271   :  { %11121 = vst [vmem:[#allocation129_spill] sm:$0xff] %v6608_v38  ;;  %1844 = vperm.xlu0 %5584, %v6091_v33  }
 0x276   :  { %1602 = vperm.xlu2 %5578, %v6082_v31   ;;  %v6612_v0 = vpop.permute.xlu2 %1344  ;;  %v6614_v46 = vpop.permute.xlu1 %1241 }
 0x277   :  { %11122 = vst [vmem:[#allocation130_spill] sm:$0xff] %v6612_v0  ;;  %1598 = vperm.xlu1 %5577, %v6065_v25  }
 0x278   :  { %11123 = vst [vmem:[#allocation131_spill] sm:$0xff] %v6614_v46  ;;  %v6617_v20 = vpop.permute.xlu0 %1471 }
 0x279   :  { %11124 = vst [vmem:[#allocation132_spill] sm:$0xff] %v6617_v20  ;;  %1864 = vperm.xlu0 %5584, %v6082_v31  }
 0x27e   :  { %1614 = vperm.xlu2 %5578, %v6182_v55   ;;  %v6621_v8 = vpop.permute.xlu2 %1356 }
 0x27f   :  { %11125 = vst [vmem:[#allocation133_spill] sm:$0xff] %v6621_v8  ;;  %1610 = vperm.xlu1 %5577, %v6136_v42   ;;  %v6624_v41 = vpop.permute.xlu1 %1320 }
 0x280   :  { %11126 = vst [vmem:[#allocation134_spill] sm:$0xff] %v6624_v41  ;;  %v6626_v38 = vpop.permute.xlu0 %1483 }
 0x281   :  { %11127 = vst [vmem:[#allocation135_spill] sm:$0xff] %v6626_v38  ;;  %1876 = vperm.xlu0 %5584, %v6182_v55  }
 0x286   :  { %1626 = vperm.xlu2 %5578, %v6108_v37   ;;  %v6630_v0 = vpop.permute.xlu2 %1368 }
 0x287   :  { %11128 = vst [vmem:[#allocation136_spill] sm:$0xff] %v6630_v0  ;;  %1622 = vperm.xlu1 %5577, %v6076_v29   ;;  %v6633_v20 = vpop.permute.xlu1 %1328  ;;  %v11134_v0 = vmov 11  }
 0x288   :  { %11129 = vst [vmem:[#allocation137_spill] sm:$0xff] %v6633_v20  ;;  %v6635_v46 = vpop.permute.xlu0 %1495 }
 0x289   :  { %11130 = vst [vmem:[#allocation138_spill] sm:$0xff] %v6635_v46  ;;  %1888 = vperm.xlu0 %5584, %v6108_v37  }
 0x28e   :  { %1638 = vperm.xlu2 %5578, %v6226_v5  }
 0x28f   :  { %v6639_v8 = vpop.permute.xlu2 %1447  ;;  %1634 = vperm.xlu1 %5577, %v6179_v53   ;;  %v6642_v38 = vpop.permute.xlu1 %1340 }
 0x290   :  { %11131 = vst [vmem:[#allocation139_spill] sm:$0xff] %v6639_v8  ;;  %v6645_v41 = vpop.permute.xlu0 %1507  ;;  %v10881_v8 = vmov 13  }
 0x291   :  { %11132 = vst [vmem:[#allocation140_spill] sm:$0xff] %v6642_v38  ;;  %1900 = vperm.xlu0 %5584, %v6226_v5  }
 0x292   :  { %11133 = vst [vmem:[#allocation141_spill] sm:$0xff] %v6645_v41 }
 0x296   :  { %5582 = vset.pattern.permute.xlu2 %v11134_v0 }
 0x297   :  { %1717 = vperm.xlu2 %5582, %v6122_v39   ;;  %v6649_v20 = vpop.permute.xlu2 %1459  ;;  %5581 = vset.pattern.permute.xlu1 %v11134_v0  ;;  %v6652_v46 = vpop.permute.xlu1 %1352 }
 0x298   :  { %11135 = vst [vmem:[#allocation142_spill] sm:$0xff] %v6649_v20  ;;  %1713 = vperm.xlu1 %5581, %v6091_v33  }
 0x299   :  { %11136 = vst [vmem:[#allocation143_spill] sm:$0xff] %v6652_v46  ;;  %5588 = vset.pattern.permute.xlu0 %v10881_v8  ;;  %v6657_v38 = vpop.permute.xlu0 %1586  ;;  %v10883_v46 = vmov 14  }
 0x29a   :  { %1979 = vperm.xlu0 %5588, %v6122_v39   ;;  %11137 = vst [vmem:[#allocation144_spill] sm:$0xff] %v6657_v38 }
 0x29f   :  { %1725 = vperm.xlu2 %5582, %v6221_v2   ;;  %v6660_v41 = vpop.permute.xlu2 %1467  ;;  %v6662_v54 = vpop.permute.xlu1 %1364 }
 0x2a0   :  { %11138 = vst [vmem:[#allocation145_spill] sm:$0xff] %v6660_v41  ;;  %1721 = vperm.xlu1 %5581, %v6165_v48  }
 0x2a1   :  { %11139 = vst [vmem:[#allocation146_spill] sm:$0xff] %v6662_v54  ;;  %v6666_v0 = vpop.permute.xlu0 %1606 }
 0x2a2   :  { %1999 = vperm.xlu0 %5588, %v6099_v35   ;;  %11140 = vst [vmem:[#allocation147_spill] sm:$0xff] %v6666_v0 }
 0x2a7   :  { %1737 = vperm.xlu2 %5582, %v6099_v35   ;;  %v6669_v20 = vpop.permute.xlu2 %1479  ;;  %v6671_v8 = vpop.permute.xlu1 %1376 }
 0x2a8   :  { %11141 = vst [vmem:[#allocation148_spill] sm:$0xff] %v6669_v20  ;;  %1733 = vperm.xlu1 %5581, %v6082_v31  }
 0x2a9   :  { %11142 = vst [vmem:[#allocation149_spill] sm:$0xff] %v6671_v8  ;;  %v6678_v41 = vpop.permute.xlu0 %1618 }
 0x2aa   :  { %2011 = vperm.xlu0 %5588, %v6241_v10   ;;  %11144 = vst [vmem:[#allocation151_spill] sm:$0xff] %v6678_v41 }
 0x2af   :  { %1749 = vperm.xlu2 %5582, %v6241_v10   ;;  %v6676_v38 = vpop.permute.xlu2 %1491 }
 0x2b0   :  { %11143 = vst [vmem:[#allocation150_spill] sm:$0xff] %v6676_v38  ;;  %1745 = vperm.xlu1 %5581, %v6182_v55   ;;  %v6681_v54 = vpop.permute.xlu1 %1455  ;;  %v11149_v38 = vmov 12  }
 0x2b1   :  { %11145 = vst [vmem:[#allocation152_spill] sm:$0xff] %v6681_v54  ;;  %v6690_v8 = vpop.permute.xlu0 %1630 }
 0x2b2   :  { %2023 = vperm.xlu0 %5588, %v6139_v43   ;;  %11148 = vst [vmem:[#allocation155_spill] sm:$0xff] %v6690_v8 }
 0x2b7   :  { %1761 = vperm.xlu2 %5582, %v6139_v43   ;;  %v6685_v0 = vpop.permute.xlu2 %1503 }
 0x2b8   :  { %11146 = vst [vmem:[#allocation153_spill] sm:$0xff] %v6685_v0  ;;  %1757 = vperm.xlu1 %5581, %v6108_v37   ;;  %v6688_v20 = vpop.permute.xlu1 %1463 }
 0x2b9   :  { %11147 = vst [vmem:[#allocation154_spill] sm:$0xff] %v6688_v20 }
 0x2ba   :  { %5589 = vset.pattern.permute.xlu0 %v10883_v46  ;;  %v6702_v20 = vpop.permute.xlu0 %1709 }
 0x2bb   :  { %2102 = vperm.xlu0 %5589, %v6062_v24   ;;  %11152 = vst [vmem:[#allocation158_spill] sm:$0xff] %v6702_v20 }
 0x2bf   :  { %5583 = vset.pattern.permute.xlu2 %v11149_v38 }
 0x2c0   :  { %1840 = vperm.xlu2 %5583, %v6062_v24   ;;  %v6696_v41 = vpop.permute.xlu2 %1582  ;;  %1769 = vperm.xlu1 %5581, %v6226_v5   ;;  %v6699_v0 = vpop.permute.xlu1 %1475 }
 0x2c1   :  { %11150 = vst [vmem:[#allocation156_spill] sm:$0xff] %v6696_v41 }
 0x2c2   :  { %11151 = vst [vmem:[#allocation157_spill] sm:$0xff] %v6699_v0  ;;  %v6712_v41 = vpop.permute.xlu0 %1729 }
 0x2c3   :  { %2122 = vperm.xlu0 %5589, %v6065_v25   ;;  %11155 = vst [vmem:[#allocation161_spill] sm:$0xff] %v6712_v41  ;;  %v10885_v41 = vmov 15  }
 0x2c8   :  { %1852 = vperm.xlu2 %5583, %v6165_v48   ;;  %v6705_v8 = vpop.permute.xlu2 %1594  ;;  %5585 = vset.pattern.permute.xlu1 %v11149_v38  ;;  %v6708_v46 = vpop.permute.xlu1 %1487 }
 0x2c9   :  { %11153 = vst [vmem:[#allocation159_spill] sm:$0xff] %v6705_v8  ;;  %1848 = vperm.xlu1 %5585, %v6122_v39  }
 0x2ca   :  { %11154 = vst [vmem:[#allocation160_spill] sm:$0xff] %v6708_v46  ;;  %v6721_v8 = vpop.permute.xlu0 %1741  ;;  %v10889_v46 = vmov 17  }
 0x2cb   :  { %2134 = vperm.xlu0 %5589, %v6136_v42   ;;  %11158 = vst [vmem:[#allocation164_spill] sm:$0xff] %v6721_v8 }
 0x2d0   :  { %1860 = vperm.xlu2 %5583, %v6065_v25   ;;  %v6715_v0 = vpop.permute.xlu2 %1602  ;;  %v6717_v54 = vpop.permute.xlu1 %1499 }
 0x2d1   :  { %11156 = vst [vmem:[#allocation162_spill] sm:$0xff] %v6715_v0  ;;  %1856 = vperm.xlu1 %5585, %v6221_v2   ;;  %v203_v0 = vld [vmem:[%s10873_s6 + $0x10] sm:$0xff] }
 0x2d2   :  { %11157 = vst [vmem:[#allocation163_spill] sm:$0xff] %v6717_v54  ;;  %5282 = vmatmul.msk.f32.gmra.mxu1 %vm83_vm1, %v203_v0 }
 0x2d3   :  { %2146 = vperm.xlu0 %5589, %v6076_v29  }
 0x2d8   :  { %1872 = vperm.xlu2 %5583, %v6136_v42   ;;  %v6724_v38 = vpop.permute.xlu2 %1614 }
 0x2d9   :  { %11159 = vst [vmem:[#allocation165_spill] sm:$0xff] %v6724_v38  ;;  %1868 = vperm.xlu1 %5585, %v6099_v35   ;;  %v6727_v20 = vpop.permute.xlu1 %1578  ;;  %v6740_v38 = vpop.permute.xlu0 %1753 }
 0x2da   :  { %11160 = vst [vmem:[#allocation166_spill] sm:$0xff] %v6727_v20 }
 0x2db   :  { %2158 = vperm.xlu0 %5589, %v6179_v53   ;;  %11163 = vst [vmem:[#allocation169_spill] sm:$0xff] %v6740_v38 }
 0x2e0   :  { %1884 = vperm.xlu2 %5583, %v6076_v29   ;;  %v6734_v54 = vpop.permute.xlu2 %1626 }
 0x2e1   :  { %11161 = vst [vmem:[#allocation167_spill] sm:$0xff] %v6734_v54  ;;  %1880 = vperm.xlu1 %5585, %v6241_v10   ;;  %v6738_v8 = vpop.permute.xlu1 %1590  ;;  %v6750_v0 = vpop.permute.xlu0 %1765 }
 0x2e2   :  { %11162 = vst [vmem:[#allocation168_spill] sm:$0xff] %v6738_v8  ;;  %v11167_v8 = vmov 13  }
 0x2e3   :  { %5593 = vset.pattern.permute.xlu0 %v10885_v41  ;;  %11166 = vst [vmem:[#allocation172_spill] sm:$0xff] %v6750_v0 }
 0x2e4   :  { %2237 = vperm.xlu0 %5593, %v6091_v33  }
 0x2e8   :  { %1896 = vperm.xlu2 %5583, %v6179_v53   ;;  %v6745_v20 = vpop.permute.xlu2 %1638 }
 0x2e9   :  { %11164 = vst [vmem:[#allocation170_spill] sm:$0xff] %v6745_v20  ;;  %1892 = vperm.xlu1 %5585, %v6139_v43   ;;  %v6748_v54 = vpop.permute.xlu1 %1598  ;;  %v6762_v20 = vpop.permute.xlu0 %1844 }
 0x2ea   :  { %11165 = vst [vmem:[#allocation171_spill] sm:$0xff] %v6748_v54 }
 0x2eb   :  { %11170 = vst [vmem:[#allocation175_spill] sm:$0xff] %v6762_v20 }
 0x2ec   :  { %2257 = vperm.xlu0 %5593, %v6082_v31  }
 0x2f0   :  { %5587 = vset.pattern.permute.xlu2 %v11167_v8 }
 0x2f1   :  { %1975 = vperm.xlu2 %5587, %v6091_v33   ;;  %v6755_v38 = vpop.permute.xlu2 %1717  ;;  %5586 = vset.pattern.permute.xlu1 %v11167_v8  ;;  %v6758_v41 = vpop.permute.xlu1 %1610 }
 0x2f2   :  { %11168 = vst [vmem:[#allocation173_spill] sm:$0xff] %v6755_v38  ;;  %1971 = vperm.xlu1 %5586, %v6062_v24   ;;  %v6771_v38 = vpop.permute.xlu0 %1864 }
 0x2f3   :  { %11169 = vst [vmem:[#allocation174_spill] sm:$0xff] %v6758_v41 }
 0x2f4   :  { %2269 = vperm.xlu0 %5593, %v6182_v55   ;;  %11173 = vst [vmem:[#allocation178_spill] sm:$0xff] %v6771_v38  ;;  %v10887_v38 = vmov 16  }
 0x2f9   :  { %1987 = vperm.xlu2 %5587, %v6221_v2   ;;  %v6765_v0 = vpop.permute.xlu2 %1725  ;;  %v6767_v54 = vpop.permute.xlu1 %1622 }
 0x2fa   :  { %11171 = vst [vmem:[#allocation176_spill] sm:$0xff] %v6765_v0  ;;  %1983 = vperm.xlu1 %5586, %v6165_v48   ;;  %v6786_v20 = vpop.permute.xlu0 %1876 }
 0x2fb   :  { %11172 = vst [vmem:[#allocation177_spill] sm:$0xff] %v6767_v54 }
 0x2fc   :  { %2281 = vperm.xlu0 %5593, %v6108_v37   ;;  %11178 = vst [vmem:[#allocation183_spill] sm:$0xff] %v6786_v20 }
 0x301   :  { %1995 = vperm.xlu2 %5587, %v6082_v31   ;;  %v6774_v8 = vpop.permute.xlu2 %1737  ;;  %v6776_v41 = vpop.permute.xlu1 %1634 }
 0x302   :  { %11174 = vst [vmem:[#allocation179_spill] sm:$0xff] %v6774_v8  ;;  %1991 = vperm.xlu1 %5586, %v6065_v25  }
 0x303   :  { %11175 = vst [vmem:[#allocation180_spill] sm:$0xff] %v6776_v41 }
 0x304   :  { %2293 = vperm.xlu0 %5593, %v6226_v5  }
 0x309   :  { %2007 = vperm.xlu2 %5587, %v6182_v55   ;;  %v6781_v0 = vpop.permute.xlu2 %1749 }
 0x30a   :  { %11176 = vst [vmem:[#allocation181_spill] sm:$0xff] %v6781_v0  ;;  %2003 = vperm.xlu1 %5586, %v6136_v42   ;;  %v6784_v54 = vpop.permute.xlu1 %1713  ;;  %v6796_v0 = vpop.permute.xlu0 %1888 }
 0x30b   :  { %11177 = vst [vmem:[#allocation182_spill] sm:$0xff] %v6784_v54 }
 0x30c   :  { %5597 = vset.pattern.permute.xlu0 %v10887_v38  ;;  %11181 = vst [vmem:[#allocation186_spill] sm:$0xff] %v6796_v0 }
 0x30d   :  { %2372 = vperm.xlu0 %5597, %v6122_v39  }
 0x311   :  { %2019 = vperm.xlu2 %5587, %v6108_v37   ;;  %v6791_v8 = vpop.permute.xlu2 %1761 }
 0x312   :  { %11179 = vst [vmem:[#allocation184_spill] sm:$0xff] %v6791_v8  ;;  %2015 = vperm.xlu1 %5586, %v6076_v29   ;;  %v6794_v41 = vpop.permute.xlu1 %1721  ;;  %v6806_v20 = vpop.permute.xlu0 %1900  ;;  %v11185_v8 = vmov 14  }
 0x313   :  { %11180 = vst [vmem:[#allocation185_spill] sm:$0xff] %v6794_v41 }
 0x314   :  { %11184 = vst [vmem:[#allocation189_spill] sm:$0xff] %v6806_v20 }
 0x315   :  { %2392 = vperm.xlu0 %5597, %v6099_v35  }
 0x319   :  { %2031 = vperm.xlu2 %5587, %v6226_v5  }
 0x31a   :  { %v6800_v54 = vpop.permute.xlu2 %1840  ;;  %2027 = vperm.xlu1 %5586, %v6179_v53   ;;  %v6803_v38 = vpop.permute.xlu1 %1733 }
 0x31b   :  { %11182 = vst [vmem:[#allocation187_spill] sm:$0xff] %v6800_v54  ;;  %v6817_v54 = vpop.permute.xlu0 %1979 }
 0x31c   :  { %11183 = vst [vmem:[#allocation188_spill] sm:$0xff] %v6803_v38 }
 0x31d   :  { %2404 = vperm.xlu0 %5597, %v6241_v10   ;;  %11188 = vst [vmem:[#allocation192_spill] sm:$0xff] %v6817_v54  ;;  %v10891_v54 = vmov 18  }
 0x321   :  { %5591 = vset.pattern.permute.xlu2 %v11185_v8 }
 0x322   :  { %2110 = vperm.xlu2 %5591, %v6122_v39   ;;  %v6810_v41 = vpop.permute.xlu2 %1852  ;;  %5590 = vset.pattern.permute.xlu1 %v11185_v8  ;;  %v6813_v0 = vpop.permute.xlu1 %1745 }
 0x323   :  { %11186 = vst [vmem:[#allocation190_spill] sm:$0xff] %v6810_v41  ;;  %2106 = vperm.xlu1 %5590, %v6091_v33  }
 0x324   :  { %11187 = vst [vmem:[#allocation191_spill] sm:$0xff] %v6813_v0  ;;  %v6833_v0 = vpop.permute.xlu0 %1999 }
 0x325   :  { %2416 = vperm.xlu0 %5597, %v6139_v43   ;;  %11193 = vst [vmem:[#allocation197_spill] sm:$0xff] %v6833_v0 }
 0x32a   :  { %2118 = vperm.xlu2 %5591, %v6221_v2   ;;  %v6820_v38 = vpop.permute.xlu2 %1860  ;;  %v6822_v20 = vpop.permute.xlu1 %1757 }
 0x32b   :  { %11189 = vst [vmem:[#allocation193_spill] sm:$0xff] %v6820_v38  ;;  %2114 = vperm.xlu1 %5590, %v6165_v48  }
 0x32c   :  { %11190 = vst [vmem:[#allocation194_spill] sm:$0xff] %v6822_v20  ;;  %v6842_v20 = vpop.permute.xlu0 %2011 }
 0x32d   :  { %5598 = vset.pattern.permute.xlu0 %v10889_v46  ;;  %11196 = vst [vmem:[#allocation200_spill] sm:$0xff] %v6842_v20 }
 0x32e   :  { %2495 = vperm.xlu0 %5598, %v6062_v24  }
 0x332   :  { %2130 = vperm.xlu2 %5591, %v6099_v35   ;;  %v6828_v8 = vpop.permute.xlu2 %1872  ;;  %v6830_v41 = vpop.permute.xlu1 %1769 }
 0x333   :  { %11191 = vst [vmem:[#allocation195_spill] sm:$0xff] %v6828_v8  ;;  %2126 = vperm.xlu1 %5590, %v6082_v31  }
 0x334   :  { %11192 = vst [vmem:[#allocation196_spill] sm:$0xff] %v6830_v41  ;;  %v6852_v0 = vpop.permute.xlu0 %2023 }
 0x335   :  { %11199 = vst [vmem:[#allocation203_spill] sm:$0xff] %v6852_v0 }
 0x336   :  { %2515 = vperm.xlu0 %5598, %v6065_v25  }
 0x33a   :  { %2142 = vperm.xlu2 %5591, %v6241_v10   ;;  %v6837_v38 = vpop.permute.xlu2 %1884 }
 0x33b   :  { %11194 = vst [vmem:[#allocation198_spill] sm:$0xff] %v6837_v38  ;;  %2138 = vperm.xlu1 %5590, %v6182_v55   ;;  %v6840_v46 = vpop.permute.xlu1 %1848  ;;  %v11200_v38 = vmov 15  }
 0x33c   :  { %11195 = vst [vmem:[#allocation199_spill] sm:$0xff] %v6840_v46 }
 0x33e   :  { %2527 = vperm.xlu0 %5598, %v6136_v42  }
 0x342   :  { %2154 = vperm.xlu2 %5591, %v6139_v43   ;;  %v6846_v41 = vpop.permute.xlu2 %1896 }
 0x343   :  { %11197 = vst [vmem:[#allocation201_spill] sm:$0xff] %v6846_v41  ;;  %2150 = vperm.xlu1 %5590, %v6108_v37   ;;  %v6849_v8 = vpop.permute.xlu1 %1856  ;;  %v6862_v41 = vpop.permute.xlu0 %2102 }
 0x344   :  { %11198 = vst [vmem:[#allocation202_spill] sm:$0xff] %v6849_v8 }
 0x345   :  { %11203 = vst [vmem:[#allocation206_spill] sm:$0xff] %v6862_v41 }
 0x346   :  { %2539 = vperm.xlu0 %5598, %v6076_v29  }
 0x34a   :  { %5592 = vset.pattern.permute.xlu2 %v11200_v38 }
 0x34b   :  { %2233 = vperm.xlu2 %5592, %v6062_v24   ;;  %v6856_v46 = vpop.permute.xlu2 %1975  ;;  %2162 = vperm.xlu1 %5590, %v6226_v5   ;;  %v6859_v20 = vpop.permute.xlu1 %1868 }
 0x34c   :  { %11201 = vst [vmem:[#allocation204_spill] sm:$0xff] %v6856_v46 }
 0x34d   :  { %11202 = vst [vmem:[#allocation205_spill] sm:$0xff] %v6859_v20 }
 0x34e   :  { %2551 = vperm.xlu0 %5598, %v6179_v53  }
 0x353   :  { %2245 = vperm.xlu2 %5592, %v6165_v48   ;;  %v6865_v8 = vpop.permute.xlu2 %1987  ;;  %5594 = vset.pattern.permute.xlu1 %v11200_v38  ;;  %v6868_v0 = vpop.permute.xlu1 %1880 }
 0x354   :  { %11204 = vst [vmem:[#allocation207_spill] sm:$0xff] %v6865_v8  ;;  %2241 = vperm.xlu1 %5594, %v6122_v39   ;;  %v6879_v8 = vpop.permute.xlu0 %2122 }
 0x355   :  { %11205 = vst [vmem:[#allocation208_spill] sm:$0xff] %v6868_v0 }
 0x356   :  { %5602 = vset.pattern.permute.xlu0 %v10891_v54  ;;  %11208 = vst [vmem:[#allocation211_spill] sm:$0xff] %v6879_v8 }
 0x357   :  { %2630 = vperm.xlu0 %5602, %v6091_v33  }
 0x35b   :  { %2253 = vperm.xlu2 %5592, %v6065_v25   ;;  %v6874_v46 = vpop.permute.xlu2 %1995  ;;  %v6876_v20 = vpop.permute.xlu1 %1892 }
 0x35c   :  { %11206 = vst [vmem:[#allocation209_spill] sm:$0xff] %v6874_v46  ;;  %2249 = vperm.xlu1 %5594, %v6221_v2   ;;  %v6888_v0 = vpop.permute.xlu0 %2134 }
 0x35d   :  { %11207 = vst [vmem:[#allocation210_spill] sm:$0xff] %v6876_v20 }
 0x35e   :  { %11211 = vst [vmem:[#allocation214_spill] sm:$0xff] %v6888_v0 }
 0x35f   :  { %2650 = vperm.xlu0 %5602, %v6082_v31  }
 0x363   :  { %2265 = vperm.xlu2 %5592, %v6136_v42   ;;  %v6883_v38 = vpop.permute.xlu2 %2007 }
 0x364   :  { %11209 = vst [vmem:[#allocation212_spill] sm:$0xff] %v6883_v38  ;;  %2261 = vperm.xlu1 %5594, %v6099_v35   ;;  %v6886_v54 = vpop.permute.xlu1 %1971  ;;  %v6898_v8 = vpop.permute.xlu0 %2146 }
 0x365   :  { %11210 = vst [vmem:[#allocation213_spill] sm:$0xff] %v6886_v54 }
 0x366   :  { %11214 = vst [vmem:[#allocation217_spill] sm:$0xff] %v6898_v8 }
 0x367   :  { %2662 = vperm.xlu0 %5602, %v6182_v55  }
 0x36b   :  { %2277 = vperm.xlu2 %5592, %v6076_v29   ;;  %v6892_v20 = vpop.permute.xlu2 %2019 }
 0x36c   :  { %11212 = vst [vmem:[#allocation215_spill] sm:$0xff] %v6892_v20  ;;  %2273 = vperm.xlu1 %5594, %v6241_v10   ;;  %v6895_v46 = vpop.permute.xlu1 %1983  ;;  %v6907_v0 = vpop.permute.xlu0 %2158  ;;  %v11218_v20 = vmov 16  }
 0x36d   :  { %11213 = vst [vmem:[#allocation216_spill] sm:$0xff] %v6895_v46 }
 0x36e   :  { %11217 = vst [vmem:[#allocation220_spill] sm:$0xff] %v6907_v0 }
 0x36f   :  { %2674 = vperm.xlu0 %5602, %v6108_v37  }
 0x373   :  { %2289 = vperm.xlu2 %5592, %v6179_v53   ;;  %v6901_v38 = vpop.permute.xlu2 %2031 }
 0x374   :  { %11215 = vst [vmem:[#allocation218_spill] sm:$0xff] %v6901_v38  ;;  %2285 = vperm.xlu1 %5594, %v6139_v43   ;;  %v6904_v54 = vpop.permute.xlu1 %1991  ;;  %v10893_v38 = vmov 19  }
 0x375   :  { %11216 = vst [vmem:[#allocation219_spill] sm:$0xff] %v6904_v54 }
 0x377   :  { %2686 = vperm.xlu0 %5602, %v6226_v5  }
 0x37b   :  { %5596 = vset.pattern.permute.xlu2 %v11218_v20 }
 0x37c   :  { %2368 = vperm.xlu2 %5596, %v6091_v33   ;;  %v6911_v46 = vpop.permute.xlu2 %2110  ;;  %5595 = vset.pattern.permute.xlu1 %v11218_v20  ;;  %v6914_v8 = vpop.permute.xlu1 %2003 }
 0x37d   :  { %11219 = vst [vmem:[#allocation221_spill] sm:$0xff] %v6911_v46  ;;  %2364 = vperm.xlu1 %5595, %v6062_v24   ;;  %v6925_v46 = vpop.permute.xlu0 %2237 }
 0x37e   :  { %11220 = vst [vmem:[#allocation222_spill] sm:$0xff] %v6914_v8 }
 0x37f   :  { %5606 = vset.pattern.permute.xlu0 %v10893_v38  ;;  %11223 = vst [vmem:[#allocation225_spill] sm:$0xff] %v6925_v46 }
 0x380   :  { %2765 = vperm.xlu0 %5606, %v6122_v39  }
 0x384   :  { %2380 = vperm.xlu2 %5596, %v6221_v2   ;;  %v6920_v54 = vpop.permute.xlu2 %2118  ;;  %v6922_v0 = vpop.permute.xlu1 %2015 }
 0x385   :  { %11221 = vst [vmem:[#allocation223_spill] sm:$0xff] %v6920_v54  ;;  %2376 = vperm.xlu1 %5595, %v6165_v48   ;;  %v6934_v38 = vpop.permute.xlu0 %2257 }
 0x386   :  { %11222 = vst [vmem:[#allocation224_spill] sm:$0xff] %v6922_v0 }
 0x387   :  { %11226 = vst [vmem:[#allocation228_spill] sm:$0xff] %v6934_v38  ;;  %v10895_v38 = vmov 20  }
 0x388   :  { %2785 = vperm.xlu0 %5606, %v6099_v35  }
 0x38c   :  { %2388 = vperm.xlu2 %5596, %v6082_v31   ;;  %v6929_v20 = vpop.permute.xlu2 %2130  ;;  %v6931_v8 = vpop.permute.xlu1 %2027 }
 0x38d   :  { %11224 = vst [vmem:[#allocation226_spill] sm:$0xff] %v6929_v20  ;;  %2384 = vperm.xlu1 %5595, %v6065_v25   ;;  %v6944_v46 = vpop.permute.xlu0 %2269 }
 0x38e   :  { %11225 = vst [vmem:[#allocation227_spill] sm:$0xff] %v6931_v8 }
 0x38f   :  { %11229 = vst [vmem:[#allocation231_spill] sm:$0xff] %v6944_v46 }
 0x390   :  { %2797 = vperm.xlu0 %5606, %v6241_v10  }
 0x394   :  { %2400 = vperm.xlu2 %5596, %v6182_v55   ;;  %v6938_v54 = vpop.permute.xlu2 %2142 }
 0x395   :  { %11227 = vst [vmem:[#allocation229_spill] sm:$0xff] %v6938_v54  ;;  %2396 = vperm.xlu1 %5595, %v6136_v42   ;;  %v6941_v0 = vpop.permute.xlu1 %2106  ;;  %v6954_v54 = vpop.permute.xlu0 %2281 }
 0x396   :  { %11228 = vst [vmem:[#allocation230_spill] sm:$0xff] %v6941_v0 }
 0x397   :  { %11232 = vst [vmem:[#allocation234_spill] sm:$0xff] %v6954_v54 }
 0x398   :  { %2809 = vperm.xlu0 %5606, %v6139_v43  }
 0x39c   :  { %2412 = vperm.xlu2 %5596, %v6108_v37   ;;  %v6947_v20 = vpop.permute.xlu2 %2154 }
 0x39d   :  { %11230 = vst [vmem:[#allocation232_spill] sm:$0xff] %v6947_v20  ;;  %2408 = vperm.xlu1 %5595, %v6076_v29   ;;  %v6950_v8 = vpop.permute.xlu1 %2114  ;;  %v11235_v20 = vmov 17   ;;  %v6971_v54 = vpop.permute.xlu0 %2293 }
 0x39e   :  { %11231 = vst [vmem:[#allocation233_spill] sm:$0xff] %v6950_v8 }
 0x39f   :  { %11238 = vst [vmem:[#allocation239_spill] sm:$0xff] %v6971_v54 }
 0x3a0   :  { %5607 = vset.pattern.permute.xlu0 %v10895_v38 }
 0x3a1   :  { %2888 = vperm.xlu0 %5607, %v6062_v24  }
 0x3a4   :  { %2424 = vperm.xlu2 %5596, %v6226_v5  }
 0x3a5   :  { %v6957_v0 = vpop.permute.xlu2 %2233  ;;  %2420 = vperm.xlu1 %5595, %v6179_v53   ;;  %v6960_v46 = vpop.permute.xlu1 %2126 }
 0x3a6   :  { %11233 = vst [vmem:[#allocation235_spill] sm:$0xff] %v6957_v0  ;;  %v6980_v41 = vpop.permute.xlu0 %2372 }
 0x3a7   :  { %11234 = vst [vmem:[#allocation236_spill] sm:$0xff] %v6960_v46 }
 0x3a8   :  { %11241 = vst [vmem:[#allocation242_spill] sm:$0xff] %v6980_v41  ;;  %v10897_v41 = vmov 21  }
 0x3a9   :  { %2908 = vperm.xlu0 %5607, %v6065_v25  }
 0x3ac   :  { %5600 = vset.pattern.permute.xlu2 %v11235_v20 }
 0x3ad   :  { %2503 = vperm.xlu2 %5600, %v6122_v39   ;;  %v6965_v8 = vpop.permute.xlu2 %2245  ;;  %5599 = vset.pattern.permute.xlu1 %v11235_v20  ;;  %v6968_v38 = vpop.permute.xlu1 %2138 }
 0x3ae   :  { %11236 = vst [vmem:[#allocation237_spill] sm:$0xff] %v6965_v8  ;;  %2499 = vperm.xlu1 %5599, %v6091_v33  }
 0x3af   :  { %11237 = vst [vmem:[#allocation238_spill] sm:$0xff] %v6968_v38  ;;  %v6990_v38 = vpop.permute.xlu0 %2392 }
 0x3b0   :  { %11244 = vst [vmem:[#allocation245_spill] sm:$0xff] %v6990_v38 }
 0x3b1   :  { %2920 = vperm.xlu0 %5607, %v6136_v42  }
 0x3b5   :  { %2511 = vperm.xlu2 %5600, %v6221_v2   ;;  %v6975_v0 = vpop.permute.xlu2 %2253  ;;  %v6977_v46 = vpop.permute.xlu1 %2150 }
 0x3b6   :  { %11239 = vst [vmem:[#allocation240_spill] sm:$0xff] %v6975_v0  ;;  %2507 = vperm.xlu1 %5599, %v6165_v48  }
 0x3b7   :  { %11240 = vst [vmem:[#allocation241_spill] sm:$0xff] %v6977_v46 }
 0x3b9   :  { %2932 = vperm.xlu0 %5607, %v6076_v29  }
 0x3bd   :  { %2523 = vperm.xlu2 %5600, %v6099_v35   ;;  %v6984_v20 = vpop.permute.xlu2 %2265  ;;  %v6986_v8 = vpop.permute.xlu1 %2162 }
 0x3be   :  { %11242 = vst [vmem:[#allocation243_spill] sm:$0xff] %v6984_v20  ;;  %2519 = vperm.xlu1 %5599, %v6082_v31   ;;  %v7000_v20 = vpop.permute.xlu0 %2404 }
 0x3bf   :  { %11243 = vst [vmem:[#allocation244_spill] sm:$0xff] %v6986_v8 }
 0x3c0   :  { %11247 = vst [vmem:[#allocation248_spill] sm:$0xff] %v7000_v20 }
 0x3c1   :  { %2944 = vperm.xlu0 %5607, %v6179_v53  }
 0x3c5   :  { %2535 = vperm.xlu2 %5600, %v6241_v10   ;;  %v6993_v0 = vpop.permute.xlu2 %2277 }
 0x3c6   :  { %11245 = vst [vmem:[#allocation246_spill] sm:$0xff] %v6993_v0  ;;  %2531 = vperm.xlu1 %5599, %v6182_v55   ;;  %v6996_v46 = vpop.permute.xlu1 %2241  ;;  %v11250_v0 = vmov 18   ;;  %v7016_v20 = vpop.permute.xlu0 %2416 }
 0x3c7   :  { %11246 = vst [vmem:[#allocation247_spill] sm:$0xff] %v6996_v46 }
 0x3c8   :  { %11253 = vst [vmem:[#allocation253_spill] sm:$0xff] %v7016_v20  ;;  %v238_v20 = vpop.f32.mrf.mxu1 }
 0x3c9   :  { %5611 = vset.pattern.permute.xlu0 %v10897_v41 }
 0x3ca   :  { %3023 = vperm.xlu0 %5611, %v6091_v33  }
 0x3cd   :  { %2547 = vperm.xlu2 %5600, %v6139_v43   ;;  %v7003_v8 = vpop.permute.xlu2 %2289 }
 0x3ce   :  { %11248 = vst [vmem:[#allocation249_spill] sm:$0xff] %v7003_v8  ;;  %2543 = vperm.xlu1 %5599, %v6108_v37   ;;  %v7006_v38 = vpop.permute.xlu1 %2249  ;;  %v7026_v54 = vpop.permute.xlu0 %2495 }
 0x3cf   :  { %11249 = vst [vmem:[#allocation250_spill] sm:$0xff] %v7006_v38 }
 0x3d0   :  { %11256 = vst [vmem:[#allocation256_spill] sm:$0xff] %v7026_v54 }
 0x3d2   :  { %3043 = vperm.xlu0 %5611, %v6082_v31   ;;  %v10911_v31 = vmov 22  }
 0x3d5   :  { %5601 = vset.pattern.permute.xlu2 %v11250_v0 }
 0x3d6   :  { %2626 = vperm.xlu2 %5601, %v6062_v24   ;;  %v7011_v46 = vpop.permute.xlu2 %2368  ;;  %2555 = vperm.xlu1 %5599, %v6226_v5   ;;  %v7014_v41 = vpop.permute.xlu1 %2261 }
 0x3d7   :  { %11251 = vst [vmem:[#allocation251_spill] sm:$0xff] %v7011_v46  ;;  %v7042_v54 = vpop.permute.xlu0 %2515 }
 0x3d8   :  { %11252 = vst [vmem:[#allocation252_spill] sm:$0xff] %v7014_v41 }
 0x3d9   :  { %11259 = vst [vmem:[#allocation259_spill] sm:$0xff] %v7042_v54 }
 0x3da   :  { %3055 = vperm.xlu0 %5611, %v6182_v55   ;;  %v7053_v55 = vperm.slane %v238_v20, 3 }
 0x3de   :  { %2638 = vperm.xlu2 %5601, %v6165_v48   ;;  %v7020_v8 = vpop.permute.xlu2 %2380  ;;  %5603 = vset.pattern.permute.xlu1 %v11250_v0  ;;  %v7023_v38 = vpop.permute.xlu1 %2273  ;;  %v7037_v0 = vperm.slane %v238_v20, 0 }
 0x3df   :  { %11254 = vst [vmem:[#allocation254_spill] sm:$0xff] %v7020_v8  ;;  %2634 = vperm.xlu1 %5603, %v6122_v39   ;;  %v7035_v8 = vperm.slane %v238_v20, 1 }
 0x3e0   :  { %11255 = vst [vmem:[#allocation255_spill] sm:$0xff] %v7023_v38  ;;  %v7039_v38 = vperm.slane %v238_v20, 2  ;;  %v343_v48 = vadd.f32 %v7037_v0, %v6176_v52 }
 0x3e2   :  { %3067 = vperm.xlu0 %5611, %v6108_v37   ;;  %v594_v36 = vadd.f32 %v7039_v38, %v6191_v57  ;;  %v337_v57 = vadd.f32 %v7037_v0, %v6147_v44  ;;  %v7078_v44 = vperm.slane %v238_v20, 4 }
 0x3e4   :  { %11262 = vst [vmem:[#allocation262_spill] sm:$0xff] %v7078_v44  ;;  %v353_v44 = vmax.f32 %v337_v57, 0.0 }
 0x3e6   :  { %2646 = vperm.xlu2 %5601, %v6065_v25   ;;  %v7030_v46 = vpop.permute.xlu2 %2388  ;;  %v7032_v41 = vpop.permute.xlu1 %2285  ;;  %v7062_v25 = vstv %s5284_s14  ;;  %s9240_s14 = sld [smem:[#allocation7 + $0x18]] }
 0x3e7   :  { %11257 = vst [vmem:[#allocation257_spill] sm:$0xff] %v7030_v46  ;;  %2642 = vperm.xlu1 %5603, %v6221_v2   ;;  %v463_v46 = vadd.f32 %v7035_v8, %v6170_v49 }
 0x3e8   :  { %11258 = vst [vmem:[#allocation258_spill] sm:$0xff] %v7032_v41  ;;  %v332_v41 = vadd.f32 %v7037_v0, %v6173_v50  ;;  %v468_v50 = vadd.f32 %v7035_v8, %v6187_v56  ;;  %v474_v56 = vadd.f32 %v7035_v8, %v6197_v59  ;;  %v338_v59 = vadd.f32 %v7037_v0, %v6213_v63 }
 0x3e9   :  { %v479_v54 = vmax.f32 %v463_v46, 0.0  ;;  %v7071_v46 = vstv %s250_s3  ;;  %v736_v63 = vadd.f32 %v7053_v55, %v6206_v61  ;;  %s9410_s3 = sld [smem:[#allocation7 + $0x19]] }
 0x3ea   :  { %3079 = vperm.xlu0 %5611, %v6226_v5   ;;  %v348_v49 = vmax.f32 %v332_v41, 0.0  ;;  %v7073_v41 = vstv %s5285_s15  ;;  %v484_v3 = vmax.f32 %v468_v50, 0.0  ;;  %v490_v52 = vmax.f32 %v474_v56, 0.0  ;;  %s9575_s15 = sld [smem:[#allocation7 + $0x1a]] }
 0x3eb   :  { %v354_v56 = vmax.f32 %v338_v59, 0.0  ;;  %v595_v59 = vadd.f32 %v7039_v38, %v6223_v4 }
 0x3ee   :  { %2658 = vperm.xlu2 %5601, %v6136_v42   ;;  %v7051_v37 = vpop.permute.xlu2 %2400  ;;  %v610_v42 = vmax.f32 %v594_v36, 0.0  ;;  %v496_v36 = vmul.f32 %v7062_v25, %v479_v54 }
 0x3ef   :  { %11260 = vst [vmem:[#allocation260_spill] sm:$0xff] %v7051_v37  ;;  %2654 = vperm.xlu1 %5603, %v6099_v35   ;;  %v7056_v5 = vpop.permute.xlu1 %2364  ;;  %v599_v37 = vadd.f32 %v7039_v38, %v6201_v60  ;;  %v365_v60 = vmul.f32 %v7071_v46, %v348_v49  ;;  %v469_v49 = vadd.f32 %v7035_v8, %v6194_v58 }
 0x3f0   :  { %11261 = vst [vmem:[#allocation261_spill] sm:$0xff] %v7056_v5  ;;  %v725_v5 = vadd.f32 %v7053_v55, %v6155_v45  ;;  %v730_v45 = vadd.f32 %v7053_v55, %v6162_v47  ;;  %v627_v54 = vmul.f32 %v7073_v41, %v610_v42  ;;  %v7098_v47 = vperm.slane %v238_v20, 6 }
 0x3f1   :  { %v615_v50 = vmax.f32 %v599_v37, 0.0  ;;  %v7106_v42 = vstv %s7058_s16  ;;  %v501_v37 = vmul.f32 %v7062_v25, %v484_v3  ;;  %v605_v58 = vadd.f32 %v7039_v38, %v6231_v6  ;;  %s5310_s16 = sld [smem:[#allocation7 + $0x1b]] }
 0x3f2   :  { %5615 = vset.pattern.permute.xlu0 %v10911_v31  ;;  %v7082_v31 = vperm.slane %v238_v20, 5  ;;  %11266 = vst [vmem:[#allocation266_spill] sm:$0xff] %v7098_v47  ;;  %v741_v2 = vmax.f32 %v725_v5, 0.0  ;;  %v746_v47 = vmax.f32 %v730_v45, 0.0  ;;  %v359_v5 = vmax.f32 %v343_v48, 0.0 }
 0x3f3   :  { %3158 = vperm.xlu0 %5615, %v6122_v39   ;;  %v7090_v39 = vpop.permute.xlu0 %2527  ;;  %v485_v51 = vmax.f32 %v469_v49, 0.0  ;;  %v632_v34 = vmul.f32 %v7073_v41, %v615_v50  ;;  %v600_v3 = vadd.f32 %v7039_v38, %v6209_v62  ;;  %v464_v48 = vadd.f32 %v7035_v8, %v6218_v1 }
 0x3f4   :  { %11263 = vst [vmem:[#allocation263_spill] sm:$0xff] %v7082_v31  ;;  %v371_v45 = vmul.f32 %v7071_v46, %v354_v56 }
 0x3f5   :  { %11264 = vst [vmem:[#allocation264_spill] sm:$0xff] %v7090_v39  ;;  %v512_v39 = vadd.f32 %v496_v36, %v365_v60  ;;  %v507_v36 = vmul.f32 %v7062_v25, %v490_v52  ;;  %v752_v60 = vmax.f32 %v736_v63, 0.0  ;;  %v502_v62 = vmul.f32 %v7062_v25, %v485_v51 }
 0x3f6   :  { %2670 = vperm.xlu2 %5601, %v6076_v29   ;;  %v7096_v31 = vpop.permute.xlu2 %2412  ;;  %v370_v29 = vmul.f32 %v7071_v46, %v353_v44  ;;  %v763_v44 = vmul.f32 %v7106_v42, %v746_v47  ;;  %v616_v47 = vmax.f32 %v600_v3, 0.0  ;;  %v475_v52 = vadd.f32 %v7035_v8, %v6235_v7 }
 0x3f7   :  { %11265 = vst [vmem:[#allocation265_spill] sm:$0xff] %v7096_v31  ;;  %2666 = vperm.xlu1 %5603, %v6241_v10   ;;  %v7103_v57 = vpop.permute.xlu1 %2376  ;;  %v7111_v31 = vperm.slane %v238_v20, 7  ;;  %v643_v61 = vadd.f32 %v627_v54, %v512_v39  ;;  %v621_v20 = vmax.f32 %v605_v58, 0.0  ;;  %v333_v39 = vadd.f32 %v7037_v0, %v6258_v14 }
 0x3f8   :  { %11267 = vst [vmem:[#allocation267_spill] sm:$0xff] %v7103_v57  ;;  %v758_v57 = vmul.f32 %v7106_v42, %v741_v2  ;;  %v517_v6 = vadd.f32 %v501_v37, %v370_v29  ;;  %v376_v2 = vmul.f32 %v7071_v46, %v359_v5  ;;  %v731_v29 = vadd.f32 %v7053_v55, %v6246_v11 }
 0x3f9   :  { %v769_v50 = vmul.f32 %v7106_v42, %v752_v60  ;;  %v480_v11 = vmax.f32 %v464_v48, 0.0  ;;  %v638_v51 = vmul.f32 %v7073_v41, %v621_v20  ;;  %v339_v63 = vadd.f32 %v7037_v0, %v6238_v9 }
 0x3fa   :  { %v648_v54 = vadd.f32 %v632_v34, %v517_v6  ;;  %v7132_v1 = vadd.f32 %v758_v57, %v643_v61  ;;  %v523_v49 = vadd.f32 %v507_v36, %v376_v2  ;;  %v349_v57 = vmax.f32 %v333_v39, 0.0 }
 0x3fb   :  { %3178 = vperm.xlu0 %5615, %v6099_v35   ;;  %v7140_v4 = vpop.permute.xlu0 %2539  ;;  %v518_v37 = vadd.f32 %v502_v62, %v371_v45  ;;  %v611_v58 = vmax.f32 %v595_v59, 0.0  ;;  %v601_v5 = vadd.f32 %v7039_v38, %v6250_v12  ;;  %v470_v7 = vadd.f32 %v7035_v8, %v6291_v27 }
 0x3fc   :  { %11269 = vst [vmem:[#allocation269_spill] sm:$0xff] %v7140_v4  ;;  %v747_v56 = vmax.f32 %v731_v29, 0.0  ;;  %v606_v61 = vadd.f32 %v7039_v38, %v6253_v13  ;;  %v596_v36 = vadd.f32 %v7039_v38, %v6261_v15  ;;  %v7156_v60 = vadd.f32 %v763_v44, %v648_v54 }
 0x3fd   :  { %v633_v9 = vmul.f32 %v7073_v41, %v616_v47  ;;  %v491_v3 = vmax.f32 %v475_v52, 0.0  ;;  %v726_v6 = vadd.f32 %v7053_v55, %v6270_v19  ;;  %v344_v12 = vadd.f32 %v7037_v0, %v6281_v16 }
 0x3fe   :  { %2682 = vperm.xlu2 %5601, %v6179_v53   ;;  %v7135_v14 = vpop.permute.xlu2 %2424  ;;  %v497_v27 = vmul.f32 %v7062_v25, %v480_v11  ;;  %v654_v48 = vadd.f32 %v638_v51, %v523_v49  ;;  %v355_v13 = vmax.f32 %v339_v63, 0.0  ;;  %v366_v20 = vmul.f32 %v7071_v46, %v349_v57 }
 0x3ff   :  { %11268 = vst [vmem:[#allocation268_spill] sm:$0xff] %v7135_v14  ;;  %2678 = vperm.xlu1 %5603, %v6139_v43   ;;  %v7143_v34 = vpop.permute.xlu1 %2384  ;;  %v628_v15 = vmul.f32 %v7073_v41, %v611_v58  ;;  %v649_v39 = vadd.f32 %v633_v9, %v518_v37  ;;  %v617_v44 = vmax.f32 %v601_v5, 0.0  ;;  %v486_v2 = vmax.f32 %v470_v7, 0.0 }
 0x400   :  { %11270 = vst [vmem:[#allocation270_spill] sm:$0xff] %v7143_v34  ;;  %v764_v45 = vmul.f32 %v7106_v42, %v747_v56  ;;  %v622_v59 = vmax.f32 %v606_v61, 0.0  ;;  %v612_v19 = vmax.f32 %v596_v36, 0.0  ;;  %v732_v16 = vadd.f32 %v7053_v55, %v6265_v18 }
 0x401   :  { %v11271_v62 = vmov 19   ;;  %v508_v54 = vmul.f32 %v7062_v25, %v491_v3  ;;  %v742_v29 = vmax.f32 %v726_v6, 0.0  ;;  %v340_v49 = vadd.f32 %v7037_v0, %v6273_v17 }
 0x402   :  { %v360_v47 = vmax.f32 %v344_v12, 0.0  ;;  %v372_v51 = vmul.f32 %v7071_v46, %v355_v13  ;;  %v513_v18 = vadd.f32 %v497_v27, %v366_v20  ;;  %v465_v63 = vadd.f32 %v7035_v8, %v6312_v40 }
 0x403   :  { %3190 = vperm.xlu0 %5615, %v6241_v10   ;;  %v7183_v57 = vadd.f32 %v769_v50, %v654_v48  ;;  %v634_v17 = vmul.f32 %v7073_v41, %v617_v44  ;;  %v334_v37 = vadd.f32 %v7037_v0, %v6276_v21  ;;  %v607_v58 = vadd.f32 %v7039_v38, %v6283_v22  ;;  %v7192_v7 = vpop.permute.xlu0 %2551 }
 0x404   :  { %v503_v5 = vmul.f32 %v7062_v25, %v486_v2  ;;  %11274 = vst [vmem:[#allocation273_spill] sm:$0xff] %v7192_v7  ;;  %v7194_v56 = vadd.f32 %v764_v45, %v649_v39  ;;  %v639_v40 = vmul.f32 %v7073_v41, %v622_v59  ;;  %v7198_v50 = vmul.f32 %v7073_v41, %v612_v19  ;;  %v11275_v2 = vld [vmem:[#allocation32_spill] sm:$0xff] }
 0x405   :  { %v748_v61 = vmax.f32 %v732_v16, 0.0  ;;  %v759_v36 = vmul.f32 %v7106_v42, %v742_v29  ;;  %v356_v9 = vmax.f32 %v340_v49, 0.0  ;;  %v377_v21 = vmul.f32 %v7071_v46, %v360_v47  ;;  %v11276_v45 = vld [vmem:[#allocation36_spill] sm:$0xff] }
 0x406   :  { %5605 = vset.pattern.permute.xlu2 %v11271_v62  ;;  %v727_v22 = vadd.f32 %v7053_v55, %v6287_v23  ;;  %v644_v3 = vadd.f32 %v628_v15, %v513_v18  ;;  %v733_v6 = vadd.f32 %v7053_v55, %v6293_v28  ;;  %v345_v12 = vadd.f32 %v7037_v0, %v6296_v26  ;;  %v11280_v18 = vld [vmem:[#allocation26_spill] sm:$0xff] }
 0x407   :  { %2761 = vperm.xlu2 %5605, %v6091_v33   ;;  %v7175_v52 = vpop.permute.xlu2 %2503  ;;  %5604 = vset.pattern.permute.xlu1 %v11271_v62  ;;  %v7178_v11 = vpop.permute.xlu1 %2396  ;;  %v481_v27 = vmax.f32 %v465_v63, 0.0  ;;  %v350_v48 = vmax.f32 %v334_v37, 0.0  ;;  %v623_v13 = vmax.f32 %v607_v58, 0.0  ;;  %v519_v20 = vadd.f32 %v503_v5, %v372_v51  ;;  %v11277_v62 = vld [vmem:[#allocation29_spill] sm:$0xff] }
 0x408   :  { %11272 = vst [vmem:[#allocation271_spill] sm:$0xff] %v7175_v52  ;;  %2757 = vperm.xlu1 %5604, %v6062_v24   ;;  %v737_v39 = vadd.f32 %v7053_v55, %v6301_v30  ;;  %v765_v44 = vmul.f32 %v7106_v42, %v748_v61  ;;  %v728_v23 = vadd.f32 %v7053_v55, %v6303_v32  ;;  %v743_v16 = vmax.f32 %v727_v22, 0.0  ;;  %v204_v32 = vld [vmem:[%s10873_s6 + $0x18] sm:$0xff]  ;;  %s7299_s6 = sld [smem:[#allocation7 + $0x4]] }
 0x409   :  { %11273 = vst [vmem:[#allocation272_spill] sm:$0xff] %v7178_v11  ;;  %v471_v15 = vadd.f32 %v7035_v8, %v11275_v2  ;;  %v476_v28 = vadd.f32 %v7035_v8, %v11276_v45  ;;  %v7218_v59 = vadd.f32 %v759_v36, %v644_v3  ;;  %v373_v26 = vmul.f32 %v7071_v46, %v356_v9  ;;  %v11281_v9 = vld [vmem:[#allocation39_spill] sm:$0xff]  ;;  %v11286_v45 = vld [vmem:[#allocation37_spill] sm:$0xff] }
 0x40a   :  { %v524_v19 = vadd.f32 %v508_v54, %v377_v21  ;;  %v749_v49 = vmax.f32 %v733_v6, 0.0  ;;  %v361_v47 = vmax.f32 %v345_v12, 0.0  ;;  %v498_v51 = vmul.f32 %v7062_v25, %v481_v27  ;;  %5283 = vmatmul.msk.f32.gmra.mxu1 %vm83_vm1, %v204_v32  ;;  %v11282_v6 = vld [vmem:[#allocation33_spill] sm:$0xff]  ;;  %v11283_v27 = vld [vmem:[#allocation40_spill] sm:$0xff] }
 0x40b   :  { %3202 = vperm.xlu0 %5615, %v6139_v43   ;;  %v367_v54 = vmul.f32 %v7071_v46, %v350_v48  ;;  %v640_v63 = vmul.f32 %v7073_v41, %v623_v13  ;;  %v650_v37 = vadd.f32 %v634_v17, %v519_v20  ;;  %v753_v58 = vmax.f32 %v737_v39, 0.0  ;;  %v7241_v48 = vpop.permute.xlu0 %2630 }
 0x40c   :  { %v744_v5 = vmax.f32 %v728_v23, 0.0  ;;  %v487_v61 = vmax.f32 %v471_v15, 0.0  ;;  %v492_v36 = vmax.f32 %v476_v28, 0.0  ;;  %v602_v21 = vadd.f32 %v7039_v38, %v11281_v9  ;;  %11284 = vst [vmem:[#allocation39_spill] sm:$0xff] %v7241_v48  ;;  %v11285_v23 = vld [vmem:[#allocation34_spill] sm:$0xff]  ;;  %v11311_v48 = vld [vmem:[#allocation52_spill] sm:$0xff] }
 0x40d   :  { %v760_v22 = vmul.f32 %v7106_v42, %v743_v16  ;;  %v655_v3 = vadd.f32 %v639_v40, %v524_v19  ;;  %v346_v12 = vadd.f32 %v7037_v0, %v11282_v6  ;;  %v466_v2 = vadd.f32 %v7035_v8, %v11283_v27  ;;  %v11287_v19 = vld [vmem:[#allocation43_spill] sm:$0xff] }
 0x40e   :  { %v10924_v13 = vmov 23   ;;  %v7245_v17 = vmul.f32 %v7106_v42, %v749_v49  ;;  %v378_v20 = vmul.f32 %v7071_v46, %v361_v47  ;;  %v514_v39 = vadd.f32 %v498_v51, %v367_v54  ;;  %v11288_v6 = vld [vmem:[#allocation35_spill] sm:$0xff] }
 0x40f   :  { %2773 = vperm.xlu2 %5605, %v11277_v62   ;;  %v7222_v30 = vpop.permute.xlu2 %2511  ;;  %v7224_v29 = vpop.permute.xlu1 %2408  ;;  %v738_v40 = vadd.f32 %v7053_v55, %v11285_v23  ;;  %v770_v15 = vmul.f32 %v7106_v42, %v753_v58  ;;  %v335_v28 = vadd.f32 %v7037_v0, %v11286_v45  ;;  %v597_v16 = vadd.f32 %v7039_v38, %v11287_v19  ;;  %v11289_v23 = vld [vmem:[#allocation46_spill] sm:$0xff] }
 0x410   :  { %11278 = vst [vmem:[#allocation32_spill] sm:$0xff] %v7222_v30  ;;  %2769 = vperm.xlu1 %5604, %v11280_v18   ;;  %v7256_v32 = vadd.f32 %v765_v44, %v650_v37  ;;  %v7259_v49 = vmul.f32 %v7106_v42, %v744_v5  ;;  %v504_v47 = vmul.f32 %v7062_v25, %v487_v61  ;;  %v618_v54 = vmax.f32 %v602_v21, 0.0  ;;  %v11293_v19 = vld [vmem:[#allocation42_spill] sm:$0xff]  ;;  %v11294_v21 = vld [vmem:[#allocation41_spill] sm:$0xff] }
 0x411   :  { %11279 = vst [vmem:[#allocation36_spill] sm:$0xff] %v7224_v29  ;;  %v509_v51 = vmul.f32 %v7062_v25, %v492_v36  ;;  %v362_v9 = vmax.f32 %v346_v12, 0.0  ;;  %v472_v58 = vadd.f32 %v7035_v8, %v11288_v6  ;;  %v482_v27 = vmax.f32 %v466_v2, 0.0  ;;  %v11295_v6 = vld [vmem:[#allocation17_spill] sm:$0xff]  ;;  %v11296_v29 = vld [vmem:[#allocation44_spill] sm:$0xff] }
 0x412   :  { %v477_v45 = vadd.f32 %v7035_v8, %v11289_v23  ;;  %v645_v5 = vadd.f32 %v7198_v50, %v514_v39  ;;  %v754_v61 = vmax.f32 %v738_v40, 0.0  ;;  %v341_v36 = vadd.f32 %v7037_v0, %v11293_v19  ;;  %v11297_v39 = vld [vmem:[#allocation38_spill] sm:$0xff] }
 0x413   :  { %5616 = vset.pattern.permute.xlu0 %v10924_v13  ;;  %v11290_v13 = vld [vmem:[#allocation19_spill] sm:$0xff]  ;;  %v336_v12 = vadd.f32 %v7037_v0, %v11294_v21  ;;  %v7278_v2 = vadd.f32 %v770_v15, %v655_v3  ;;  %v351_v23 = vmax.f32 %v335_v28, 0.0  ;;  %v613_v30 = vmax.f32 %v597_v16, 0.0 }
 0x414   :  { %3281 = vperm.xlu0 %5616, %v6062_v24   ;;  %v520_v52 = vadd.f32 %v504_v47, %v373_v26  ;;  %v635_v50 = vmul.f32 %v7073_v41, %v618_v54  ;;  %v739_v40 = vadd.f32 %v7053_v55, %v11297_v39  ;;  %v379_v19 = vmul.f32 %v7071_v46, %v362_v9  ;;  %v11298_v47 = vld [vmem:[#allocation45_spill] sm:$0xff]  ;;  %v7295_v54 = vpop.permute.xlu0 %2650  ;;  %v11305_v39 = vld [vmem:[#allocation51_spill] sm:$0xff] }
 0x415   :  { %v488_v11 = vmax.f32 %v472_v58, 0.0  ;;  %v499_v21 = vmul.f32 %v7062_v25, %v482_v27  ;;  %v493_v14 = vmax.f32 %v477_v45, 0.0  ;;  %v771_v3 = vmul.f32 %v7106_v42, %v754_v61  ;;  %11299 = vst [vmem:[#allocation34_spill] sm:$0xff] %v7295_v54  ;;  %v11300_v45 = vld [vmem:[#allocation48_spill] sm:$0xff]  ;;  %v11309_v54 = vld [vmem:[#allocation54_spill] sm:$0xff] }
 0x416   :  { %v357_v15 = vmax.f32 %v341_v36, 0.0  ;;  %v352_v28 = vmax.f32 %v336_v12, 0.0  ;;  %v7288_v16 = vadd.f32 %v760_v22, %v645_v5  ;;  %v368_v26 = vmul.f32 %v7071_v46, %v351_v23  ;;  %v11302_v12 = vld [vmem:[#allocation28_spill] sm:$0xff] }
 0x417   :  { %2781 = vperm.xlu2 %5605, %v11290_v13   ;;  %v7268_v44 = vpop.permute.xlu2 %2523  ;;  %v7270_v37 = vpop.permute.xlu1 %2420  ;;  %v651_v58 = vadd.f32 %v635_v50, %v520_v52  ;;  %v755_v27 = vmax.f32 %v739_v40, 0.0  ;;  %v598_v61 = vadd.f32 %v7039_v38, %v11300_v45  ;;  %v505_v22 = vmul.f32 %v7062_v25, %v488_v11  ;;  %v11306_v40 = vld [vmem:[#allocation24_spill] sm:$0xff]  ;;  %v11308_v45 = vld [vmem:[#allocation47_spill] sm:$0xff] }
 0x418   :  { %11291 = vst [vmem:[#allocation33_spill] sm:$0xff] %v7268_v44  ;;  %2777 = vperm.xlu1 %5604, %v11295_v6   ;;  %v467_v44 = vadd.f32 %v7035_v8, %v11296_v29  ;;  %v630_v29 = vmul.f32 %v7073_v41, %v613_v30  ;;  %v515_v5 = vadd.f32 %v499_v21, %v368_v26  ;;  %v11301_v30 = vld [vmem:[#allocation49_spill] sm:$0xff] }
 0x419   :  { %11292 = vst [vmem:[#allocation40_spill] sm:$0xff] %v7270_v37  ;;  %v525_v37 = vadd.f32 %v509_v51, %v378_v20  ;;  %v608_v51 = vadd.f32 %v7039_v38, %v11298_v47  ;;  %v510_v36 = vmul.f32 %v7062_v25, %v493_v14  ;;  %v374_v52 = vmul.f32 %v7071_v46, %v357_v15 }
 0x41a   :  { %v483_v20 = vmax.f32 %v467_v44, 0.0  ;;  %v603_v44 = vadd.f32 %v7039_v38, %v11301_v30  ;;  %v347_v11 = vadd.f32 %v7037_v0, %v11305_v39  ;;  %v646_v21 = vadd.f32 %v630_v29, %v515_v5  ;;  %v11310_v5 = vld [vmem:[#allocation55_spill] sm:$0xff] }
 0x41b   :  { %v656_v9 = vadd.f32 %v640_v63, %v525_v37  ;;  %v369_v63 = vmul.f32 %v7071_v46, %v352_v28  ;;  %v11304_v37 = vld [vmem:[#allocation50_spill] sm:$0xff]  ;;  %v624_v47 = vmax.f32 %v608_v51, 0.0  ;;  %v734_v30 = vadd.f32 %v7053_v55, %v11308_v45 }
 0x41c   :  { %3301 = vperm.xlu0 %5616, %v11295_v6   ;;  %v478_v50 = vadd.f32 %v7035_v8, %v11304_v37  ;;  %v500_v26 = vmul.f32 %v7062_v25, %v483_v20  ;;  %v772_v15 = vmul.f32 %v7106_v42, %v755_v27  ;;  %v614_v28 = vmax.f32 %v598_v61, 0.0 }
 0x41d   :  { %v7324_v37 = vadd.f32 %v7245_v17, %v651_v58  ;;  %v526_v39 = vadd.f32 %v510_v36, %v379_v19  ;;  %v619_v34 = vmax.f32 %v603_v44, 0.0  ;;  %v473_v29 = vadd.f32 %v7035_v8, %v11309_v54  ;;  %v11313_v58 = vld [vmem:[#allocation262_spill] sm:$0xff] }
 0x41e   :  { %v342_v20 = vadd.f32 %v7037_v0, %v11310_v5  ;;  %v521_v51 = vadd.f32 %v505_v22, %v374_v52  ;;  %v363_v45 = vmax.f32 %v347_v11, 0.0  ;;  %v729_v27 = vadd.f32 %v7053_v55, %v11311_v48  ;;  %v11312_v0 = vld [vmem:[#allocation56_spill] sm:$0xff]  ;;  %v11314_v22 = vld [vmem:[#allocation58_spill] sm:$0xff] }
 0x41f   :  { %2793 = vperm.xlu2 %5605, %v11302_v12   ;;  %v7306_v23 = vpop.permute.xlu2 %2535  ;;  %v641_v17 = vmul.f32 %v7073_v41, %v624_v47  ;;  %v7335_v19 = vadd.f32 %v7259_v49, %v646_v21  ;;  %v631_v8 = vmul.f32 %v7073_v41, %v614_v28  ;;  %v7339_v54 = vstv %s7299_s6  ;;  %v11316_v11 = vld [vmem:[#allocation22_spill] sm:$0xff]  ;;  %s5313_s6 = sld [smem:[#allocation7 + $0x1e]] }
 0x420   :  { %11303 = vst [vmem:[#allocation37_spill] sm:$0xff] %v7306_v23  ;;  %2789 = vperm.xlu1 %5604, %v11306_v40   ;;  %v7315_v14 = vpop.permute.xlu1 %2499  ;;  %v7321_v23 = vadd.f32 %v771_v3, %v656_v9  ;;  %v516_v3 = vadd.f32 %v500_v26, %v369_v63  ;;  %v750_v9 = vmax.f32 %v734_v30, 0.0  ;;  %v857_v61 = vadd.f32 %v11313_v58, %v11312_v0  ;;  %v11318_v30 = vld [vmem:[#allocation53_spill] sm:$0xff]  ;;  %v11319_v5 = vld [vmem:[#allocation18_spill] sm:$0xff] }
 0x421   :  { %11307 = vst [vmem:[#allocation43_spill] sm:$0xff] %v7315_v14  ;;  %v494_v14 = vmax.f32 %v478_v50, 0.0  ;;  %v609_v36 = vadd.f32 %v7039_v38, %v11314_v22  ;;  %v657_v48 = vadd.f32 %v641_v17, %v526_v39  ;;  %v636_v44 = vmul.f32 %v7073_v41, %v619_v34  ;;  %v7346_v50 = vpop.permute.xlu0 %2662  ;;  %v11322_v17 = vld [vmem:[#allocation59_spill] sm:$0xff]  ;;  %v11323_v22 = vld [vmem:[#allocation60_spill] sm:$0xff] }
 0x422   :  { %v489_v52 = vmax.f32 %v473_v29, 0.0  ;;  %v358_v63 = vmax.f32 %v342_v20, 0.0  ;;  %11315 = vst [vmem:[#allocation35_spill] sm:$0xff] %v7346_v50  ;;  %v380_v26 = vmul.f32 %v7071_v46, %v363_v45  ;;  %v745_v47 = vmax.f32 %v729_v27, 0.0  ;;  %v11321_v29 = vld [vmem:[#allocation57_spill] sm:$0xff] }
 0x423   :  { %v511_v21 = vmul.f32 %v7062_v25, %v494_v14  ;;  %v604_v28 = vadd.f32 %v7039_v38, %v11318_v30  ;;  %v767_v34 = vmul.f32 %v7106_v42, %v750_v9  ;;  %v740_v20 = vadd.f32 %v7053_v55, %v11321_v29  ;;  %v11324_v50 = vld [vmem:[#allocation61_spill] sm:$0xff] }
 0x424   :  { %3313 = vperm.xlu0 %5616, %v11306_v40   ;;  %v860_v0 = vadd.f32 %v11313_v58, %v11322_v17  ;;  %v858_v14 = vadd.f32 %v11313_v58, %v11323_v22  ;;  %v647_v45 = vadd.f32 %v631_v8, %v516_v3  ;;  %v873_v27 = vmax.f32 %v857_v61, 0.0  ;;  %v11325_v40 = vld [vmem:[#allocation62_spill] sm:$0xff] }
 0x425   :  { %v862_v38 = vadd.f32 %v11313_v58, %v11324_v50  ;;  %v652_v30 = vadd.f32 %v636_v44, %v521_v51  ;;  %v375_v9 = vmul.f32 %v7071_v46, %v358_v63  ;;  %v7369_v7 = vadd.f32 %v772_v15, %v657_v48  ;;  %v11327_v48 = vld [vmem:[#allocation64_spill] sm:$0xff]  ;;  %v11329_v50 = vld [vmem:[#allocation66_spill] sm:$0xff] }
 0x426   :  { %v527_v29 = vadd.f32 %v511_v21, %v380_v26  ;;  %v762_v4 = vmul.f32 %v7106_v42, %v745_v47  ;;  %v620_v17 = vmax.f32 %v604_v28, 0.0  ;;  %v735_v22 = vadd.f32 %v7053_v55, %v11325_v40  ;;  %v11328_v40 = vld [vmem:[#allocation65_spill] sm:$0xff]  ;;  %v11330_v26 = vld [vmem:[#allocation30_spill] sm:$0xff] }
 0x427   :  { %2805 = vperm.xlu2 %5605, %v11316_v11   ;;  %v7349_v49 = vpop.permute.xlu2 %2547  ;;  %v756_v3 = vmax.f32 %v740_v20, 0.0  ;;  %v876_v8 = vmax.f32 %v860_v0, 0.0  ;;  %v874_v61 = vmax.f32 %v858_v14, 0.0  ;;  %v878_v15 = vmax.f32 %v862_v38, 0.0  ;;  %v11331_v0 = vld [vmem:[#allocation67_spill] sm:$0xff] }
 0x428   :  { %11317 = vst [vmem:[#allocation46_spill] sm:$0xff] %v7349_v49  ;;  %2801 = vperm.xlu1 %5604, %v11319_v5   ;;  %v7356_v39 = vpop.permute.xlu1 %2507  ;;  %v625_v49 = vmax.f32 %v609_v36, 0.0  ;;  %v11326_v36 = vld [vmem:[#allocation63_spill] sm:$0xff]  ;;  %v865_v44 = vadd.f32 %v11313_v58, %v11327_v48  ;;  %v783_v55 = vadd.f32 %v767_v34, %v652_v30  ;;  %v866_v63 = vadd.f32 %v11313_v58, %v11328_v40  ;;  %v11335_v40 = vld [vmem:[#allocation68_spill] sm:$0xff] }
 0x429   :  { %11320 = vst [vmem:[#allocation42_spill] sm:$0xff] %v7356_v39  ;;  %v506_v39 = vmul.f32 %v7062_v25, %v489_v52  ;;  %v863_v51 = vadd.f32 %v11313_v58, %v11326_v36  ;;  %v890_v25 = vmul.f32 %v7339_v54, %v873_v27  ;;  %v856_v21 = vadd.f32 %v11313_v58, %v11329_v50 }
 0x42a   :  { %v642_v46 = vmul.f32 %v7073_v41, %v625_v49  ;;  %v778_v47 = vadd.f32 %v762_v4, %v647_v45  ;;  %v637_v28 = vmul.f32 %v7073_v41, %v620_v17  ;;  %v751_v20 = vmax.f32 %v735_v22, 0.0  ;;  %v7399_v4 = vpop.permute.xlu0 %2674 }
 0x42b   :  { %v522_v52 = vadd.f32 %v506_v39, %v375_v9  ;;  %v868_v49 = vadd.f32 %v11313_v58, %v11331_v0  ;;  %v773_v34 = vmul.f32 %v7106_v42, %v756_v3  ;;  %v893_v27 = vmul.f32 %v7339_v54, %v876_v8  ;;  %11334 = vst [vmem:[#allocation38_spill] sm:$0xff] %v7399_v4  ;;  %v11337_v0 = vld [vmem:[#allocation70_spill] sm:$0xff] }
 0x42c   :  { %3325 = vperm.xlu0 %5616, %v11319_v5   ;;  %v891_v38 = vmul.f32 %v7339_v54, %v874_v61  ;;  %v879_v30 = vmax.f32 %v863_v51, 0.0  ;;  %v7402_v41 = vadd.f32 %v890_v25, %v7218_v59  ;;  %v658_v45 = vadd.f32 %v642_v46, %v527_v29  ;;  %v11336_v51 = vld [vmem:[#allocation69_spill] sm:$0xff] }
 0x42d   :  { %v895_v9 = vmul.f32 %v7339_v54, %v878_v15  ;;  %v881_v17 = vmax.f32 %v865_v44, 0.0  ;;  %v653_v22 = vadd.f32 %v637_v28, %v522_v52  ;;  %v882_v36 = vmax.f32 %v866_v63, 0.0  ;;  %v11338_v63 = vld [vmem:[#allocation71_spill] sm:$0xff] }
 0x42e   :  { %v872_v48 = vmax.f32 %v856_v21, 0.0  ;;  %v869_v3 = vadd.f32 %v11313_v58, %v11335_v40  ;;  %v768_v8 = vmul.f32 %v7106_v42, %v751_v20  ;;  %v884_v61 = vmax.f32 %v868_v49, 0.0  ;;  %v11340_v49 = vld [vmem:[#allocation263_spill] sm:$0xff] }
 0x42f   :  { %2817 = vperm.xlu2 %5605, %v11330_v26   ;;  %v859_v50 = vadd.f32 %v11313_v58, %v11336_v51  ;;  %v871_v59 = vadd.f32 %v11313_v58, %v11337_v0  ;;  %v7413_v29 = vadd.f32 %v893_v27, %v778_v47  ;;  %v7416_v25 = vadd.f32 %v891_v38, %v7288_v16  ;;  %v11339_v16 = vld [vmem:[#allocation72_spill] sm:$0xff]  ;;  %v11346_v51 = vld [vmem:[#allocation74_spill] sm:$0xff] }
 0x430   :  { %v7391_v14 = vpop.permute.xlu2 %2626  ;;  %2813 = vperm.xlu1 %5604, %v6179_v53   ;;  %v7394_v39 = vpop.permute.xlu1 %2519  ;;  %v896_v46 = vmul.f32 %v7339_v54, %v879_v30  ;;  %v7420_v15 = vstv %s7377_s0  ;;  %v7423_v42 = vadd.f32 %v895_v9, %v7194_v56  ;;  %v898_v44 = vmul.f32 %v7339_v54, %v881_v17  ;;  %v11342_v17 = vld [vmem:[#allocation23_spill] sm:$0xff]  ;;  %s5314_s0 = sld [smem:[#allocation7 + $0x1f]] }
 0x431   :  { %11332 = vst [vmem:[#allocation41_spill] sm:$0xff] %v7391_v14  ;;  %v789_v52 = vadd.f32 %v773_v34, %v658_v45  ;;  %v861_v21 = vadd.f32 %v11313_v58, %v11338_v63  ;;  %v899_v28 = vmul.f32 %v7339_v54, %v882_v36  ;;  %v889_v47 = vmul.f32 %v7339_v54, %v872_v48  ;;  %v11345_v48 = vld [vmem:[#allocation73_spill] sm:$0xff] }
 0x432   :  { %11333 = vst [vmem:[#allocation44_spill] sm:$0xff] %v7394_v39  ;;  %v885_v20 = vmax.f32 %v869_v3, 0.0  ;;  %v987_v27 = vadd.f32 %v11340_v49, %v11339_v16  ;;  %v11341_v38 = vmov 20   ;;  %v784_v30 = vadd.f32 %v768_v8, %v653_v22 }
 0x433   :  { %v901_v56 = vmul.f32 %v7339_v54, %v884_v61  ;;  %v875_v9 = vmax.f32 %v859_v50, 0.0  ;;  %v887_v40 = vmax.f32 %v871_v59, 0.0  ;;  %v7441_v36 = vadd.f32 %v896_v46, %v7256_v32  ;;  %v11347_v50 = vld [vmem:[#allocation75_spill] sm:$0xff]  ;;  %v11348_v59 = vld [vmem:[#allocation76_spill] sm:$0xff] }
 0x434   :  { %3337 = vperm.xlu0 %5616, %v6179_v53   ;;  %v989_v3 = vadd.f32 %v11340_v49, %v11345_v48  ;;  %v864_v22 = vadd.f32 %v11313_v58, %v11346_v51  ;;  %v7448_v8 = vadd.f32 %v898_v44, %v783_v55  ;;  %v877_v61 = vmax.f32 %v861_v21, 0.0  ;;  %v7458_v48 = vpop.permute.xlu0 %2686  ;;  %v11350_v21 = vld [vmem:[#allocation77_spill] sm:$0xff] }
 0x435   :  { %v992_v0 = vadd.f32 %v11340_v49, %v11347_v50  ;;  %v991_v63 = vadd.f32 %v11340_v49, %v11348_v59  ;;  %v7454_v16 = vadd.f32 %v899_v28, %v784_v30  ;;  %v905_v32 = vadd.f32 %v889_v47, %v7132_v1  ;;  %11349 = vst [vmem:[#allocation49_spill] sm:$0xff] %v7458_v48  ;;  %v11352_v30 = vld [vmem:[#allocation79_spill] sm:$0xff]  ;;  %v11353_v59 = vld [vmem:[#allocation80_spill] sm:$0xff] }
 0x436   :  { %v902_v46 = vmul.f32 %v7339_v54, %v885_v20  ;;  %v7461_v51 = vadd.f32 %v901_v56, %v7278_v2  ;;  %v892_v55 = vmul.f32 %v7339_v54, %v875_v9  ;;  %v904_v44 = vmul.f32 %v7339_v54, %v887_v40  ;;  %v11351_v20 = vld [vmem:[#allocation78_spill] sm:$0xff] }
 0x437   :  { %5609 = vset.pattern.permute.xlu2 %v11341_v38  ;;  %v867_v50 = vadd.f32 %v11313_v58, %v11350_v21  ;;  %v10927_v28 = vmov 24   ;;  %v1005_v1 = vmax.f32 %v989_v3, 0.0  ;;  %v880_v47 = vmax.f32 %v864_v22, 0.0  ;;  %v11354_v22 = vld [vmem:[#allocation81_spill] sm:$0xff] }
 0x438   :  { %2896 = vperm.xlu2 %5609, %v11342_v17   ;;  %v7435_v34 = vpop.permute.xlu2 %2638  ;;  %5608 = vset.pattern.permute.xlu1 %v11341_v38  ;;  %v7438_v45 = vpop.permute.xlu1 %2531  ;;  %v1003_v38 = vmax.f32 %v987_v27, 0.0  ;;  %v995_v27 = vadd.f32 %v11340_v49, %v11351_v20  ;;  %v994_v2 = vadd.f32 %v11340_v49, %v11352_v30  ;;  %v894_v56 = vmul.f32 %v7339_v54, %v877_v61 }
 0x439   :  { %11343 = vst [vmem:[#allocation45_spill] sm:$0xff] %v7435_v34  ;;  %2892 = vperm.xlu1 %5608, %v6091_v33   ;;  %v1008_v9 = vmax.f32 %v992_v0, 0.0  ;;  %v1007_v40 = vmax.f32 %v991_v63, 0.0  ;;  %v870_v21 = vadd.f32 %v11313_v58, %v11353_v59  ;;  %v7479_v34 = vadd.f32 %v902_v46, %v7321_v23  ;;  %v11356_v63 = vld [vmem:[#allocation83_spill] sm:$0xff] }
 0x43a   :  { %11344 = vst [vmem:[#allocation48_spill] sm:$0xff] %v7438_v45  ;;  %v1020_v3 = vmul.f32 %v7420_v15, %v1003_v38  ;;  %v998_v20 = vadd.f32 %v11340_v49, %v11354_v22  ;;  %v7487_v45 = vadd.f32 %v892_v55, %v7335_v19  ;;  %v7489_v61 = vadd.f32 %v904_v44, %v789_v52 }
 0x43b   :  { %v883_v0 = vmax.f32 %v867_v50, 0.0  ;;  %v1001_v58 = vadd.f32 %v11340_v49, %v11356_v63  ;;  %v1022_v38 = vmul.f32 %v7420_v15, %v1005_v1  ;;  %v1011_v59 = vmax.f32 %v995_v27, 0.0 }
 0x43c   :  { %5620 = vset.pattern.permute.xlu0 %v10927_v28  ;;  %v11355_v28 = vld [vmem:[#allocation82_spill] sm:$0xff]  ;;  %v1010_v19 = vmax.f32 %v994_v2, 0.0  ;;  %v910_v52 = vadd.f32 %v894_v56, %v7156_v60  ;;  %v1025_v55 = vmul.f32 %v7420_v15, %v1008_v9  ;;  %v1024_v44 = vmul.f32 %v7420_v15, %v1007_v40  ;;  %v11360_v2 = vld [vmem:[#allocation85_spill] sm:$0xff]  ;;  %v7520_v40 = vpop.permute.xlu0 %2765 }
 0x43d   :  { %3416 = vperm.xlu0 %5620, %v6091_v33   ;;  %v997_v30 = vadd.f32 %v11340_v49, %v11355_v28  ;;  %v897_v28 = vmul.f32 %v7339_v54, %v880_v47  ;;  %v886_v50 = vmax.f32 %v870_v21, 0.0  ;;  %v7504_v22 = vadd.f32 %v1020_v3, %v905_v32  ;;  %11361 = vst [vmem:[#allocation47_spill] sm:$0xff] %v7520_v40  ;;  %v11383_v40 = vld [vmem:[#allocation101_spill] sm:$0xff] }
 0x43e   :  { %v1014_v63 = vmax.f32 %v998_v20, 0.0  ;;  %v900_v47 = vmul.f32 %v7339_v54, %v883_v0  ;;  %v1017_v27 = vmax.f32 %v1001_v58, 0.0  ;;  %v1000_v14 = vadd.f32 %v11340_v49, %v11360_v2  ;;  %v11370_v2 = vld [vmem:[#allocation88_spill] sm:$0xff] }
 0x43f   :  { %v7512_v39 = vstv %s7467_s20  ;;  %v7515_v60 = vadd.f32 %v1022_v38, %v7416_v25  ;;  %v913_v56 = vadd.f32 %v897_v28, %v7324_v37  ;;  %v1028_v32 = vmul.f32 %v7420_v15, %v1011_v59  ;;  %v11364_v38 = vld [vmem:[#allocation266_spill] sm:$0xff]  ;;  %s5315_s20 = sld [smem:[#allocation7 + $0x20]] }
 0x440   :  { %2904 = vperm.xlu2 %5609, %v11277_v62   ;;  %v7494_v23 = vpop.permute.xlu2 %2646  ;;  %v7496_v46 = vpop.permute.xlu1 %2543  ;;  %v1027_v9 = vmul.f32 %v7420_v15, %v1010_v19  ;;  %v7523_v21 = vadd.f32 %v1025_v55, %v910_v52  ;;  %v7526_v3 = vadd.f32 %v1024_v44, %v7413_v29  ;;  %v903_v20 = vmul.f32 %v7339_v54, %v886_v50  ;;  %v11365_v29 = vld [vmem:[#allocation89_spill] sm:$0xff] }
 0x441   :  { %11357 = vst [vmem:[#allocation50_spill] sm:$0xff] %v7494_v23  ;;  %2900 = vperm.xlu1 %5608, %v11280_v18   ;;  %v1013_v23 = vmax.f32 %v997_v30, 0.0  ;;  %v11362_v30 = vld [vmem:[#allocation86_spill] sm:$0xff]  ;;  %v1031_v37 = vmul.f32 %v7420_v15, %v1014_v63  ;;  %v916_v59 = vadd.f32 %v900_v47, %v7183_v57  ;;  %v1034_v19 = vmul.f32 %v7420_v15, %v1017_v27  ;;  %v11368_v63 = vld [vmem:[#allocation92_spill] sm:$0xff] }
 0x442   :  { %11358 = vst [vmem:[#allocation51_spill] sm:$0xff] %v7496_v46  ;;  %v11359_v46 = vld [vmem:[#allocation84_spill] sm:$0xff]  ;;  %v990_v25 = vadd.f32 %v11340_v49, %v11362_v30  ;;  %v1016_v52 = vmax.f32 %v1000_v14, 0.0  ;;  %v993_v55 = vadd.f32 %v11340_v49, %v11365_v29  ;;  %v7544_v50 = vadd.f32 %v1028_v32, %v913_v56 }
 0x443   :  { %v988_v1 = vadd.f32 %v11340_v49, %v11359_v46  ;;  %v1030_v0 = vmul.f32 %v7420_v15, %v1013_v23  ;;  %v11363_v46 = vld [vmem:[#allocation87_spill] sm:$0xff]  ;;  %v7547_v23 = vadd.f32 %v1027_v9, %v7441_v36  ;;  %v996_v57 = vadd.f32 %v11340_v49, %v11368_v63 }
 0x444   :  { %v1119_v28 = vadd.f32 %v11364_v38, %v11363_v46  ;;  %v919_v47 = vadd.f32 %v903_v20, %v7369_v7  ;;  %v1006_v27 = vmax.f32 %v990_v25, 0.0  ;;  %v1118_v30 = vadd.f32 %v11364_v38, %v11370_v2  ;;  %v11371_v46 = vld [vmem:[#allocation98_spill] sm:$0xff]  ;;  %v11372_v20 = vld [vmem:[#allocation91_spill] sm:$0xff] }
 0x445   :  { %3436 = vperm.xlu0 %5620, %v11290_v13   ;;  %v1004_v58 = vmax.f32 %v988_v1, 0.0  ;;  %v11369_v1 = vld [vmem:[#allocation95_spill] sm:$0xff]  ;;  %v1002_v56 = vadd.f32 %v11340_v49, %v11371_v46  ;;  %v7559_v32 = vadd.f32 %v1031_v37, %v916_v59  ;;  %v7562_v36 = vadd.f32 %v1030_v0, %v7454_v16  ;;  %v11373_v2 = vld [vmem:[#allocation90_spill] sm:$0xff] }
 0x446   :  { %v999_v14 = vadd.f32 %v11340_v49, %v11369_v1  ;;  %v1135_v29 = vmax.f32 %v1119_v28, 0.0  ;;  %v7565_v63 = vadd.f32 %v1034_v19, %v919_v47  ;;  %v1033_v1 = vmul.f32 %v7420_v15, %v1016_v52  ;;  %v11374_v37 = vld [vmem:[#allocation94_spill] sm:$0xff]  ;;  %v11375_v28 = vld [vmem:[#allocation97_spill] sm:$0xff] }
 0x447   :  { %v1021_v9 = vmul.f32 %v7420_v15, %v1004_v58  ;;  %v1009_v7 = vmax.f32 %v993_v55, 0.0  ;;  %v1121_v25 = vadd.f32 %v11364_v38, %v11372_v20  ;;  %v1012_v49 = vmax.f32 %v996_v57, 0.0  ;;  %v11376_v57 = vld [vmem:[#allocation93_spill] sm:$0xff]  ;;  %v11377_v20 = vld [vmem:[#allocation96_spill] sm:$0xff] }
 0x448   :  { %2916 = vperm.xlu2 %5609, %v6099_v35   ;;  %v7540_v54 = vpop.permute.xlu2 %2658  ;;  %v7542_v44 = vpop.permute.xlu1 %2555  ;;  %v1123_v59 = vadd.f32 %v11364_v38, %v11374_v37  ;;  %v1015_v16 = vmax.f32 %v999_v14, 0.0  ;;  %v1023_v0 = vmul.f32 %v7420_v15, %v1006_v27  ;;  %v1134_v58 = vmax.f32 %v1118_v30, 0.0  ;;  %v11379_v37 = vld [vmem:[#allocation99_spill] sm:$0xff] }
 0x449   :  { %11366 = vst [vmem:[#allocation54_spill] sm:$0xff] %v7540_v54  ;;  %2912 = vperm.xlu1 %5608, %v11290_v13   ;;  %v1124_v54 = vadd.f32 %v11364_v38, %v11373_v2  ;;  %v1126_v19 = vadd.f32 %v11364_v38, %v11375_v28  ;;  %v1018_v52 = vmax.f32 %v1002_v56, 0.0  ;;  %v1037_v55 = vadd.f32 %v1021_v9, %v7402_v41  ;;  %v7586_v2 = vpop.permute.xlu0 %2785 }
 0x44a   :  { %11367 = vst [vmem:[#allocation55_spill] sm:$0xff] %v7542_v44  ;;  %v1152_v47 = vmul.f32 %v7512_v39, %v1135_v29  ;;  %v1127_v46 = vadd.f32 %v11364_v38, %v11376_v57  ;;  %v1130_v14 = vadd.f32 %v11364_v38, %v11377_v20  ;;  %v7589_v27 = vadd.f32 %v1033_v1, %v7479_v34 }
 0x44b   :  { %11378 = vst [vmem:[#allocation52_spill] sm:$0xff] %v7586_v2  ;;  %v1026_v30 = vmul.f32 %v7420_v15, %v1009_v7  ;;  %v1137_v56 = vmax.f32 %v1121_v25, 0.0  ;;  %v1133_v28 = vadd.f32 %v11364_v38, %v11379_v37  ;;  %v1140_v9 = vmax.f32 %v1124_v54, 0.0 }
 0x44c   :  { %v1029_v29 = vmul.f32 %v7420_v15, %v1012_v49  ;;  %v1139_v57 = vmax.f32 %v1123_v59, 0.0  ;;  %v1032_v20 = vmul.f32 %v7420_v15, %v1015_v16  ;;  %v1039_v1 = vadd.f32 %v1023_v0, %v7487_v45  ;;  %v11382_v49 = vld [vmem:[#allocation100_spill] sm:$0xff] }
 0x44d   :  { %3448 = vperm.xlu0 %5620, %v11302_v12   ;;  %v1151_v7 = vmul.f32 %v7512_v39, %v1134_v58  ;;  %v1142_v25 = vmax.f32 %v1126_v19, 0.0  ;;  %v1035_v37 = vmul.f32 %v7420_v15, %v1018_v52  ;;  %v7605_v44 = vadd.f32 %v1152_v47, %v1037_v55 }
 0x44e   :  { %v1143_v54 = vmax.f32 %v1127_v46, 0.0  ;;  %v1129_v59 = vadd.f32 %v11364_v38, %v11382_v49  ;;  %v1042_v16 = vadd.f32 %v1026_v30, %v7423_v42  ;;  %v1154_v2 = vmul.f32 %v7512_v39, %v1137_v56 }
 0x44f   :  { %v1120_v45 = vadd.f32 %v11364_v38, %v11383_v40  ;;  %v1157_v0 = vmul.f32 %v7512_v39, %v1140_v9  ;;  %v1045_v15 = vadd.f32 %v1029_v29, %v7448_v8  ;;  %v1156_v58 = vmul.f32 %v7512_v39, %v1139_v57 }
 0x450   :  { %2928 = vperm.xlu2 %5609, %v6241_v10   ;;  %v7595_v41 = vpop.permute.xlu2 %2670  ;;  %v1048_v19 = vadd.f32 %v1032_v20, %v7461_v51  ;;  %v7619_v52 = vadd.f32 %v1151_v7, %v7504_v22  ;;  %v1159_v42 = vmul.f32 %v7512_v39, %v1142_v25  ;;  %v1051_v55 = vadd.f32 %v1035_v37, %v7489_v61  ;;  %v241_v51 = vpop.f32.mrf.mxu1  ;;  %v11386_v20 = vld [vmem:[#allocation103_spill] sm:$0xff] }
 0x451   :  { %11380 = vst [vmem:[#allocation56_spill] sm:$0xff] %v7595_v41  ;;  %2924 = vperm.xlu1 %5608, %v11302_v12   ;;  %v7600_v34 = vpop.permute.xlu1 %2634  ;;  %v1146_v41 = vmax.f32 %v1130_v14, 0.0  ;;  %v7624_v47 = vstv %s7578_s21  ;;  %v1160_v40 = vmul.f32 %v7512_v39, %v1143_v54  ;;  %v1145_v8 = vmax.f32 %v1129_v59, 0.0  ;;  %v11384_v14 = vld [vmem:[#allocation102_spill] sm:$0xff]  ;;  %v7647_v25 = vpop.permute.xlu0 %2797  ;;  %v11389_v37 = vld [vmem:[#allocation107_spill] sm:$0xff]  ;;  %s5258_s21 = sld [smem:[#allocation4 + $0x20]] }
 0x452   :  { %11381 = vst [vmem:[#allocation262_spill] sm:$0xff] %v7600_v34  ;;  %v1149_v34 = vmax.f32 %v1133_v28, 0.0  ;;  %v1251_v30 = vadd.f32 %v7111_v31, %v11384_v14  ;;  %v7630_v56 = vadd.f32 %v1157_v0, %v1042_v16  ;;  %v7632_v28 = vadd.f32 %v1154_v2, %v1039_v1  ;;  %v11390_v16 = vld [vmem:[#allocation104_spill] sm:$0xff] }
 0x453   :  { %v1163_v46 = vmul.f32 %v7512_v39, %v1146_v41  ;;  %v1136_v9 = vmax.f32 %v1120_v45, 0.0  ;;  %v7638_v29 = vadd.f32 %v1160_v40, %v1045_v15  ;;  %v7641_v41 = vadd.f32 %v1156_v58, %v7523_v21  ;;  %11387 = vst [vmem:[#allocation53_spill] sm:$0xff] %v7647_v25  ;;  %v11391_v15 = vld [vmem:[#allocation110_spill] sm:$0xff]  ;;  %v11392_v40 = vld [vmem:[#allocation105_spill] sm:$0xff] }
 0x454   :  { %v1166_v22 = vmul.f32 %v7512_v39, %v1149_v34  ;;  %v1132_v7 = vadd.f32 %v11364_v38, %v11386_v20  ;;  %v7653_v34 = vadd.f32 %v1159_v42, %v7544_v50  ;;  %v1125_v21 = vadd.f32 %v11364_v38, %v11389_v37  ;;  %v11397_v37 = vld [vmem:[#allocation113_spill] sm:$0xff] }
 0x455   :  { %3460 = vperm.xlu0 %5620, %v11316_v11   ;;  %v7643_v57 = vadd.f32 %v1163_v46, %v1048_v19  ;;  %v7659_v54 = vperm.slane %v241_v51, 0  ;;  %v1162_v49 = vmul.f32 %v7512_v39, %v1145_v8  ;;  %v1267_v59 = vmax.f32 %v1251_v30, 0.0  ;;  %v11393_v8 = vld [vmem:[#allocation106_spill] sm:$0xff]  ;;  %v11400_v25 = vld [vmem:[#allocation109_spill] sm:$0xff] }
 0x456   :  { %v7655_v1 = vadd.f32 %v1166_v22, %v1051_v55  ;;  %v1122_v45 = vadd.f32 %v11364_v38, %v11390_v16  ;;  %v7664_v0 = vperm.slane %v241_v51, 1  ;;  %v1153_v50 = vmul.f32 %v7512_v39, %v1136_v9 }
 0x457   :  { %v1128_v58 = vadd.f32 %v11364_v38, %v11391_v15  ;;  %v7671_v19 = vperm.slane %v241_v51, 2  ;;  %v7673_v42 = vperm.slane %v241_v51, 3  ;;  %v1148_v55 = vmax.f32 %v1132_v7, 0.0 }
 0x458   :  { %2940 = vperm.xlu2 %5609, %v6139_v43   ;;  %v7636_v61 = vpop.permute.xlu2 %2682  ;;  %v1256_v46 = vadd.f32 %v7111_v31, %v11392_v40  ;;  %v1250_v14 = vadd.f32 %v7111_v31, %v11393_v8  ;;  %v7679_v30 = vperm.slane %v241_v51, 4  ;;  %v1141_v22 = vmax.f32 %v1125_v21, 0.0 }
 0x459   :  { %11385 = vst [vmem:[#allocation58_spill] sm:$0xff] %v7636_v61  ;;  %2936 = vperm.xlu1 %5608, %v11316_v11   ;;  %v7650_v2 = vpop.permute.xlu1 %2642  ;;  %v7682_v9 = vperm.slane %v241_v51, 5  ;;  %v7684_v20 = vperm.slane %v241_v51, 6  ;;  %v1131_v16 = vadd.f32 %v11364_v38, %v11397_v37  ;;  %v7689_v7 = vadd.f32 %v1162_v49, %v7559_v32  ;;  %v11399_v61 = vld [vmem:[#allocation108_spill] sm:$0xff] }
 0x45a   :  { %11388 = vst [vmem:[#allocation57_spill] sm:$0xff] %v7650_v2  ;;  %v1284_v15 = vmul.f32 %v7624_v47, %v1267_v59  ;;  %v1138_v40 = vmax.f32 %v1122_v45, 0.0  ;;  %v7692_v2 = vperm.slane %v241_v51, 7  ;;  %v1169_v8 = vadd.f32 %v1153_v50, %v7515_v60  ;;  %v11402_v59 = vld [vmem:[#allocation112_spill] sm:$0xff] }
 0x45b   :  { %11394 = vst [vmem:[#allocation59_spill] sm:$0xff] %v7679_v30  ;;  %v1259_v21 = vadd.f32 %v7111_v31, %v11399_v61  ;;  %v1253_v48 = vadd.f32 %v7111_v31, %v11400_v25  ;;  %v1144_v4 = vmax.f32 %v1128_v58, 0.0  ;;  %v1165_v38 = vmul.f32 %v7512_v39, %v1148_v55  ;;  %v11405_v50 = vld [vmem:[#allocation116_spill] sm:$0xff] }
 0x45c   :  { %11395 = vst [vmem:[#allocation60_spill] sm:$0xff] %v7682_v9  ;;  %v1272_v32 = vmax.f32 %v1256_v46, 0.0  ;;  %v1266_v49 = vmax.f32 %v1250_v14, 0.0  ;;  %v1255_v51 = vadd.f32 %v7111_v31, %v11402_v59  ;;  %v1158_v25 = vmul.f32 %v7512_v39, %v1141_v22  ;;  %v11406_v46 = vld [vmem:[#allocation111_spill] sm:$0xff] }
 0x45d   :  { %3472 = vperm.xlu0 %5620, %v11330_v26   ;;  %11396 = vst [vmem:[#allocation61_spill] sm:$0xff] %v7684_v20  ;;  %v11401_v20 = vmov 21   ;;  %v1147_v45 = vmax.f32 %v1131_v16, 0.0  ;;  %v1249_v58 = vadd.f32 %v7111_v31, %v11405_v50  ;;  %v1155_v55 = vmul.f32 %v7512_v39, %v1138_v40  ;;  %v11407_v59 = vld [vmem:[#allocation115_spill] sm:$0xff] }
 0x45e   :  { %11398 = vst [vmem:[#allocation62_spill] sm:$0xff] %v7692_v2  ;;  %v1262_v14 = vadd.f32 %v7111_v31, %v11406_v46  ;;  %v7716_v37 = vstv %s7666_s22  ;;  %v7720_v2 = vpop.permute.xlu0 %2809  ;;  %v1269_v22 = vmax.f32 %v1253_v48, 0.0  ;;  %v1161_v16 = vmul.f32 %v7512_v39, %v1144_v4  ;;  %v11409_v46 = vld [vmem:[#allocation114_spill] sm:$0xff]  ;;  %s10063_s22 = sld [smem:[#allocation4 + $0x21]] }
 0x45f   :  { %11408 = vst [vmem:[#allocation65_spill] sm:$0xff] %v7720_v2  ;;  %v7726_v50 = vadd.f32 %v1165_v38, %v7565_v63  ;;  %v1283_v40 = vmul.f32 %v7624_v47, %v1266_v49  ;;  %v1271_v11 = vmax.f32 %v1255_v51, 0.0  ;;  %v1380_v9 = vadd.f32 %v7659_v54, %v11409_v46  ;;  %v11410_v38 = vld [vmem:[#allocation118_spill] sm:$0xff] }
 0x460   :  { %5610 = vset.pattern.permute.xlu2 %v11401_v20  ;;  %v10935_v12 = vmov 25   ;;  %v1164_v48 = vmul.f32 %v7512_v39, %v1147_v45  ;;  %v1171_v4 = vadd.f32 %v1155_v55, %v7526_v3  ;;  %v1278_v63 = vmax.f32 %v1262_v14, 0.0  ;;  %v11412_v45 = vld [vmem:[#allocation122_spill] sm:$0xff] }
 0x461   :  { %3019 = vperm.xlu2 %5610, %v6062_v24   ;;  %v7704_v60 = vpop.permute.xlu2 %2761  ;;  %2948 = vperm.xlu1 %5608, %v11330_v26   ;;  %v7707_v61 = vpop.permute.xlu1 %2654  ;;  %v7722_v26 = vadd.f32 %v1284_v15, %v1169_v8  ;;  %v1174_v15 = vadd.f32 %v1158_v25, %v7547_v23  ;;  %v1265_v8 = vmax.f32 %v1249_v58, 0.0  ;;  %v1261_v49 = vadd.f32 %v7111_v31, %v11410_v38  ;;  %v11415_v58 = vld [vmem:[#allocation119_spill] sm:$0xff] }
 0x462   :  { %11403 = vst [vmem:[#allocation63_spill] sm:$0xff] %v7704_v60  ;;  %v1258_v60 = vadd.f32 %v7111_v31, %v11407_v59  ;;  %v1289_v59 = vmul.f32 %v7624_v47, %v1272_v32  ;;  %v1286_v46 = vmul.f32 %v7624_v47, %v1269_v22  ;;  %v1177_v32 = vadd.f32 %v1161_v16, %v7562_v36  ;;  %v11416_v16 = vld [vmem:[#allocation121_spill] sm:$0xff] }
 0x463   :  { %11404 = vst [vmem:[#allocation64_spill] sm:$0xff] %v7707_v61  ;;  %v1275_v61 = vmax.f32 %v1259_v21, 0.0  ;;  %v7745_v39 = vadd.f32 %v1283_v40, %v7605_v44  ;;  %v1288_v25 = vmul.f32 %v7624_v47, %v1271_v11  ;;  %v1396_v3 = vmax.f32 %v1380_v9, 0.0 }
 0x464   :  { %v1274_v21 = vmax.f32 %v1258_v60, 0.0  ;;  %v1254_v60 = vadd.f32 %v7111_v31, %v11412_v45  ;;  %v1282_v44 = vmul.f32 %v7624_v47, %v1265_v8  ;;  %v1252_v11 = vadd.f32 %v7111_v31, %v11415_v58  ;;  %v11418_v45 = vld [vmem:[#allocation128_spill] sm:$0xff]  ;;  %p4881_p0 = scmp.gt.s32.totalorder %s10063_s22, 0 }
 0x465   :  { %5624 = vset.pattern.permute.xlu0 %v10935_v12  ;;  %v1292_v51 = vmul.f32 %v7624_v47, %v1275_v61  ;;  %v11411_v12 = vld [vmem:[#allocation117_spill] sm:$0xff]  ;;  %v7762_v9 = vadd.f32 %v1289_v59, %v1174_v15  ;;  %v1295_v55 = vmul.f32 %v7624_v47, %v1278_v63  ;;  %v1277_v22 = vmax.f32 %v1261_v49, 0.0 }
 0x466   :  { %3551 = vperm.xlu0 %5624, %v11342_v17   ;;  %v1385_v23 = vadd.f32 %v7659_v54, %v11411_v12  ;;  %v1180_v12 = vadd.f32 %v1164_v48, %v7589_v27  ;;  %v1291_v14 = vmul.f32 %v7624_v47, %v1274_v21  ;;  %v7769_v40 = vadd.f32 %v1286_v46, %v1171_v4  ;;  %v11417_v48 = vld [vmem:[#allocation125_spill] sm:$0xff]  ;;  %v7781_v49 = vpop.permute.xlu0 %2888 }
 0x467   :  { %v1257_v8 = vadd.f32 %v7111_v31, %v11417_v48  ;;  %v7773_v38 = vadd.f32 %v1292_v51, %v1177_v32  ;;  %v7776_v59 = vadd.f32 %v1288_v25, %v7630_v56  ;;  %v1413_v15 = vmul.f32 %v7716_v37, %v1396_v3  ;;  %11419 = vst [vmem:[#allocation68_spill] sm:$0xff] %v7781_v49  ;;  %v11421_v3 = vld [vmem:[#allocation124_spill] sm:$0xff]  ;;  %v11423_v48 = vld [vmem:[#allocation131_spill] sm:$0xff] }
 0x468   :  { %v1401_v27 = vmax.f32 %v1385_v23, 0.0  ;;  %v1270_v63 = vmax.f32 %v1254_v60, 0.0  ;;  %v1260_v21 = vadd.f32 %v7111_v31, %v11418_v45  ;;  %v1298_v4 = vadd.f32 %v1282_v44, %v7619_v52  ;;  %v11420_v23 = vld [vmem:[#allocation120_spill] sm:$0xff]  ;;  %v11424_v45 = vld [vmem:[#allocation123_spill] sm:$0xff] }
 0x469   :  { %3031 = vperm.xlu2 %5610, %v11280_v18   ;;  %v7753_v61 = vpop.permute.xlu2 %2773  ;;  %5612 = vset.pattern.permute.xlu1 %v11401_v20  ;;  %v7756_v36 = vpop.permute.xlu1 %2666  ;;  %v1264_v20 = vadd.f32 %v7111_v31, %v11416_v16  ;;  %v1268_v46 = vmax.f32 %v1252_v11, 0.0  ;;  %v1388_v58 = vadd.f32 %v7659_v54, %v11420_v23  ;;  %v7786_v51 = vadd.f32 %v1295_v55, %v1180_v12  ;;  %v11422_v11 = vld [vmem:[#allocation127_spill] sm:$0xff] }
 0x46a   :  { %11413 = vst [vmem:[#allocation66_spill] sm:$0xff] %v7753_v61  ;;  %3027 = vperm.xlu1 %5612, %v11342_v17   ;;  %v7790_v56 = vadd.f32 %v1291_v14, %v7638_v29  ;;  %v1294_v32 = vmul.f32 %v7624_v47, %v1277_v22  ;;  %v1382_v60 = vadd.f32 %v7659_v54, %v11421_v3  ;;  %v1273_v44 = vmax.f32 %v1257_v8, 0.0  ;;  %v11427_v3 = vld [vmem:[#allocation126_spill] sm:$0xff] }
 0x46b   :  { %11414 = vst [vmem:[#allocation67_spill] sm:$0xff] %v7756_v36  ;;  %v1280_v25 = vmax.f32 %v1264_v20, 0.0  ;;  %v1418_v52 = vmul.f32 %v7716_v37, %v1401_v27  ;;  %v1384_v16 = vadd.f32 %v7659_v54, %v11422_v11  ;;  %v1263_v12 = vadd.f32 %v7111_v31, %v11423_v48 }
 0x46c   :  { %v1287_v55 = vmul.f32 %v7624_v47, %v1270_v63  ;;  %v1391_v29 = vadd.f32 %v7659_v54, %v11424_v45  ;;  %v1276_v14 = vmax.f32 %v1260_v21, 0.0  ;;  %v7804_v22 = vstv %s7750_s23  ;;  %v11428_v45 = vld [vmem:[#allocation130_spill] sm:$0xff]  ;;  %s10101_s23 = scalar_select %p4881_p0, 1, 0 }
 0x46d   :  { %v1285_v8 = vmul.f32 %v7624_v47, %v1268_v46  ;;  %v1404_v23 = vmax.f32 %v1388_v58, 0.0  ;;  %v1394_v31 = vadd.f32 %v7659_v54, %v11427_v3  ;;  %v7814_v11 = vadd.f32 %v1413_v15, %v1298_v4  ;;  %v11429_v58 = vld [vmem:[#allocation129_spill] sm:$0xff] }
 0x46e   :  { %3571 = vperm.xlu0 %5624, %v6099_v35   ;;  %v7818_v63 = vadd.f32 %v1294_v32, %v7643_v57  ;;  %v1297_v21 = vmul.f32 %v7624_v47, %v1280_v25  ;;  %v1398_v48 = vmax.f32 %v1382_v60, 0.0  ;;  %v1387_v61 = vadd.f32 %v7659_v54, %v11428_v45  ;;  %v11430_v57 = vld [vmem:[#allocation133_spill] sm:$0xff] }
 0x46f   :  { %v1400_v46 = vmax.f32 %v1384_v16, 0.0  ;;  %v1279_v3 = vmax.f32 %v1263_v12, 0.0  ;;  %v1303_v15 = vadd.f32 %v1287_v55, %v7641_v41  ;;  %v1407_v4 = vmax.f32 %v1391_v29, 0.0  ;;  %v11432_v29 = vld [vmem:[#allocation132_spill] sm:$0xff] }
 0x470   :  { %v1293_v36 = vmul.f32 %v7624_v47, %v1276_v14  ;;  %v1390_v32 = vadd.f32 %v7659_v54, %v11430_v57  ;;  %v7831_v25 = vadd.f32 %v1285_v8, %v7632_v28  ;;  %v1421_v60 = vmul.f32 %v7716_v37, %v1404_v23  ;;  %v11434_v57 = vld [vmem:[#allocation24_spill] sm:$0xff] }
 0x471   :  { %3039 = vperm.xlu2 %5610, %v11295_v6   ;;  %v7807_v20 = vpop.permute.xlu2 %2781  ;;  %v7809_v27 = vpop.permute.xlu1 %2678  ;;  %v1410_v45 = vmax.f32 %v1394_v31, 0.0  ;;  %v7838_v12 = vadd.f32 %v1297_v21, %v7655_v1  ;;  %v1415_v41 = vmul.f32 %v7716_v37, %v1398_v48  ;;  %v1403_v55 = vmax.f32 %v1387_v61, 0.0 }
 0x472   :  { %11425 = vst [vmem:[#allocation69_spill] sm:$0xff] %v7807_v20  ;;  %3035 = vperm.xlu1 %5612, %v11277_v62   ;;  %v1290_v20 = vmul.f32 %v7624_v47, %v1273_v44  ;;  %v11431_v44 = vld [vmem:[#allocation134_spill] sm:$0xff]  ;;  %v1517_v14 = vadd.f32 %v7664_v0, %v11432_v29  ;;  %v1417_v8 = vmul.f32 %v7716_v37, %v1400_v46  ;;  %v1406_v48 = vmax.f32 %v1390_v32, 0.0  ;;  %v11436_v46 = vld [vmem:[#allocation136_spill] sm:$0xff] }
 0x473   :  { %11426 = vst [vmem:[#allocation70_spill] sm:$0xff] %v7809_v27  ;;  %v1512_v27 = vadd.f32 %v7664_v0, %v11429_v58  ;;  %v1381_v16 = vadd.f32 %v7659_v54, %v11431_v44  ;;  %v7843_v58 = vpop.permute.xlu0 %2908  ;;  %v1296_v31 = vmul.f32 %v7624_v47, %v1279_v3  ;;  %v1424_v1 = vmul.f32 %v7716_v37, %v1407_v4  ;;  %v11437_v47 = vld [vmem:[#allocation140_spill] sm:$0xff] }
 0x474   :  { %11433 = vst [vmem:[#allocation71_spill] sm:$0xff] %v7843_v58  ;;  %v1306_v28 = vadd.f32 %v1290_v20, %v7653_v34  ;;  %v1309_v21 = vadd.f32 %v1293_v36, %v7689_v7  ;;  %v7852_v61 = vadd.f32 %v1418_v52, %v1303_v15  ;;  %v1427_v34 = vmul.f32 %v7716_v37, %v1410_v45  ;;  %v11439_v15 = vld [vmem:[#allocation135_spill] sm:$0xff]  ;;  %v11451_v58 = vld [vmem:[#allocation144_spill] sm:$0xff] }
 0x475   :  { %v1528_v23 = vmax.f32 %v1512_v27, 0.0  ;;  %v1397_v20 = vmax.f32 %v1381_v16, 0.0  ;;  %v1393_v27 = vadd.f32 %v7659_v54, %v11436_v46  ;;  %v1386_v3 = vadd.f32 %v7659_v54, %v11437_v47 }
 0x476   :  { %3583 = vperm.xlu0 %5624, %v6241_v10   ;;  %v7866_v7 = vadd.f32 %v1415_v41, %v7722_v26  ;;  %v1420_v36 = vmul.f32 %v7716_v37, %v1403_v55  ;;  %v1533_v52 = vmax.f32 %v1517_v14, 0.0  ;;  %v1520_v32 = vadd.f32 %v7664_v0, %v11439_v15  ;;  %v11440_v26 = vld [vmem:[#allocation137_spill] sm:$0xff]  ;;  %v11441_v55 = vld [vmem:[#allocation139_spill] sm:$0xff] }
 0x477   :  { %v7872_v45 = vadd.f32 %v1417_v8, %v7769_v40  ;;  %v1545_v16 = vmul.f32 %v7804_v22, %v1528_v23  ;;  %v1312_v29 = vadd.f32 %v1296_v31, %v7726_v50  ;;  %v7876_v46 = vadd.f32 %v1421_v60, %v1306_v28  ;;  %v11442_v23 = vld [vmem:[#allocation143_spill] sm:$0xff] }
 0x478   :  { %v1423_v47 = vmul.f32 %v7716_v37, %v1406_v48  ;;  %v1383_v41 = vadd.f32 %v7659_v54, %v11440_v26  ;;  %v1511_v14 = vadd.f32 %v7664_v0, %v11441_v55  ;;  %v1414_v40 = vmul.f32 %v7716_v37, %v1397_v20  ;;  %v11443_v48 = vld [vmem:[#allocation142_spill] sm:$0xff] }
 0x479   :  { %3051 = vperm.xlu2 %5610, %v11434_v57   ;;  %v7855_v44 = vpop.permute.xlu2 %2793  ;;  %v1409_v8 = vmax.f32 %v1393_v27, 0.0  ;;  %v1402_v15 = vmax.f32 %v1386_v3, 0.0  ;;  %v1389_v50 = vadd.f32 %v7659_v54, %v11442_v23  ;;  %v7890_v60 = vadd.f32 %v1420_v36, %v7762_v9  ;;  %v11445_v27 = vld [vmem:[#allocation146_spill] sm:$0xff] }
 0x47a   :  { %11435 = vst [vmem:[#allocation72_spill] sm:$0xff] %v7855_v44  ;;  %3047 = vperm.xlu1 %5612, %v6099_v35   ;;  %v7863_v4 = vpop.permute.xlu1 %2757  ;;  %v7883_v44 = vadd.f32 %v1424_v1, %v1309_v21  ;;  %v1550_v28 = vmul.f32 %v7804_v22, %v1533_v52  ;;  %v1536_v31 = vmax.f32 %v1520_v32, 0.0  ;;  %v1514_v26 = vadd.f32 %v7664_v0, %v11443_v48  ;;  %v11444_v1 = vld [vmem:[#allocation138_spill] sm:$0xff]  ;;  %v11446_v52 = vld [vmem:[#allocation141_spill] sm:$0xff] }
 0x47b   :  { %11438 = vst [vmem:[#allocation263_spill] sm:$0xff] %v7863_v4  ;;  %v1523_v21 = vadd.f32 %v7664_v0, %v11444_v1  ;;  %v7898_v20 = vstv %s7848_s24  ;;  %v1392_v3 = vadd.f32 %v7659_v54, %v11445_v27  ;;  %v7902_v55 = vadd.f32 %v1427_v34, %v1312_v29  ;;  %v7909_v4 = vpop.permute.xlu0 %2920  ;;  %s10726_s24 = smov (!%p5333_p1), 0  }
 0x47c   :  { %v7905_v23 = vadd.f32 %v1423_v47, %v7773_v38  ;;  %v1399_v9 = vmax.f32 %v1383_v41, 0.0  ;;  %v1527_v36 = vmax.f32 %v1511_v14, 0.0  ;;  %v1526_v32 = vadd.f32 %v7664_v0, %v11446_v52  ;;  %11447 = vst [vmem:[#allocation73_spill] sm:$0xff] %v7909_v4  ;;  %v11450_v14 = vld [vmem:[#allocation145_spill] sm:$0xff] }
 0x47d   :  { %v1430_v1 = vadd.f32 %v1414_v40, %v7745_v39  ;;  %v1426_v27 = vmul.f32 %v7716_v37, %v1409_v8  ;;  %v1419_v34 = vmul.f32 %v7716_v37, %v1402_v15  ;;  %v1405_v29 = vmax.f32 %v1389_v50, 0.0  ;;  %v11452_v40 = vld [vmem:[#allocation149_spill] sm:$0xff] }
 0x47e   :  { %3595 = vperm.xlu0 %5624, %v6139_v43   ;;  %v1553_v47 = vmul.f32 %v7804_v22, %v1536_v31  ;;  %v1530_v41 = vmax.f32 %v1514_v26, 0.0  ;;  %v1516_v52 = vadd.f32 %v7664_v0, %v11450_v14  ;;  %v1539_v4 = vmax.f32 %v1523_v21, 0.0  ;;  %v11455_v14 = vld [vmem:[#allocation152_spill] sm:$0xff] }
 0x47f   :  { %v1408_v39 = vmax.f32 %v1392_v3, 0.0  ;;  %v1395_v8 = vadd.f32 %v7659_v54, %v11452_v40  ;;  %v1416_v15 = vmul.f32 %v7716_v37, %v1399_v9  ;;  %v1544_v50 = vmul.f32 %v7804_v22, %v1527_v36 }
 0x480   :  { %v1542_v49 = vmax.f32 %v1526_v32, 0.0  ;;  %v7934_v26 = vadd.f32 %v1426_v27, %v7786_v51  ;;  %v1435_v21 = vadd.f32 %v1419_v34, %v7776_v59  ;;  %v7938_v3 = vadd.f32 %v1545_v16, %v1430_v1  ;;  %v11454_v32 = vld [vmem:[#allocation147_spill] sm:$0xff] }
 0x481   :  { %3063 = vperm.xlu2 %5610, %v11319_v5   ;;  %v7912_v48 = vpop.permute.xlu2 %2805  ;;  %v10937_v54 = vmov 26   ;;  %v1547_v9 = vmul.f32 %v7804_v22, %v1530_v41  ;;  %v1532_v36 = vmax.f32 %v1516_v52, 0.0  ;;  %v1513_v40 = vadd.f32 %v7664_v0, %v11455_v14  ;;  %v11457_v14 = vld [vmem:[#allocation151_spill] sm:$0xff] }
 0x482   :  { %11448 = vst [vmem:[#allocation74_spill] sm:$0xff] %v7912_v48  ;;  %3059 = vperm.xlu1 %5612, %v6241_v10   ;;  %v7918_v38 = vpop.permute.xlu1 %2769  ;;  %v1644_v48 = vadd.f32 %v7671_v19, %v11451_v58  ;;  %v1422_v58 = vmul.f32 %v7716_v37, %v1405_v29  ;;  %v1556_v59 = vmul.f32 %v7804_v22, %v1539_v4  ;;  %v1411_v1 = vmax.f32 %v1395_v8, 0.0 }
 0x483   :  { %11449 = vst [vmem:[#allocation75_spill] sm:$0xff] %v7918_v38  ;;  %v11453_v38 = vld [vmem:[#allocation148_spill] sm:$0xff]  ;;  %v1425_v16 = vmul.f32 %v7716_v37, %v1408_v39  ;;  %v1432_v27 = vadd.f32 %v1416_v15, %v7831_v25  ;;  %v7951_v34 = vadd.f32 %v1544_v50, %v7814_v11  ;;  %v1559_v29 = vmul.f32 %v7804_v22, %v1542_v49 }
 0x484   :  { %v1519_v31 = vadd.f32 %v7664_v0, %v11453_v38  ;;  %v1649_v38 = vadd.f32 %v7671_v19, %v11454_v32  ;;  %v1660_v51 = vmax.f32 %v1644_v48, 0.0  ;;  %v1438_v32 = vadd.f32 %v1422_v58, %v7790_v56  ;;  %v11458_v48 = vld [vmem:[#allocation150_spill] sm:$0xff]  ;;  %v7970_v56 = vpop.permute.xlu0 %2932 }
 0x485   :  { %v1652_v4 = vadd.f32 %v7671_v19, %v11457_v14  ;;  %v1522_v39 = vadd.f32 %v7664_v0, %v11458_v48  ;;  %v7962_v25 = vadd.f32 %v1550_v28, %v1435_v21  ;;  %v7967_v49 = vadd.f32 %v1547_v9, %v1432_v27  ;;  %11461 = vst [vmem:[#allocation79_spill] sm:$0xff] %v7970_v56  ;;  %v11462_v28 = vld [vmem:[#allocation153_spill] sm:$0xff]  ;;  %v11512_v56 = vld [vmem:[#allocation184_spill] sm:$0xff] }
 0x486   :  { %5625 = vset.pattern.permute.xlu0 %v10937_v54  ;;  %v1535_v41 = vmax.f32 %v1519_v31, 0.0  ;;  %v1549_v8 = vmul.f32 %v7804_v22, %v1532_v36  ;;  %v1665_v15 = vmax.f32 %v1649_v38, 0.0  ;;  %v1529_v50 = vmax.f32 %v1513_v40, 0.0  ;;  %v11463_v54 = vld [vmem:[#allocation154_spill] sm:$0xff]  ;;  %v11465_v36 = vld [vmem:[#allocation157_spill] sm:$0xff] }
 0x487   :  { %3674 = vperm.xlu0 %5625, %v6062_v24   ;;  %11460 = vst [vmem:[#allocation78_spill] sm:$0xff] %v7967_v49  ;;  %v1677_v31 = vmul.f32 %v7898_v20, %v1660_v51  ;;  %v1441_v58 = vadd.f32 %v1425_v16, %v7818_v63  ;;  %v1428_v14 = vmul.f32 %v7716_v37, %v1411_v1  ;;  %v7981_v27 = vstv %s7931_s4  ;;  %v11466_v51 = vld [vmem:[#allocation156_spill] sm:$0xff] }
 0x488   :  { %v1525_v21 = vadd.f32 %v7664_v0, %v11462_v28  ;;  %v1552_v48 = vmul.f32 %v7804_v22, %v1535_v41  ;;  %v1515_v9 = vadd.f32 %v7664_v0, %v11463_v54  ;;  %11464 = vst [vmem:[#allocation80_spill] sm:$0xff] %v7981_v27  ;;  %v1518_v38 = vadd.f32 %v7664_v0, %v11465_v36  ;;  %v11467_v41 = vld [vmem:[#allocation155_spill] sm:$0xff]  ;;  %v11468_v36 = vld [vmem:[#allocation160_spill] sm:$0xff] }
 0x489   :  { %3075 = vperm.xlu2 %5610, %v6179_v53   ;;  %v7955_v52 = vpop.permute.xlu2 %2817  ;;  %v1668_v40 = vmax.f32 %v1652_v4, 0.0  ;;  %v1538_v49 = vmax.f32 %v1522_v39, 0.0  ;;  %v1643_v63 = vadd.f32 %v7671_v19, %v11466_v51  ;;  %v7987_v16 = vadd.f32 %v1553_v47, %v1438_v32 }
 0x48a   :  { %11456 = vst [vmem:[#allocation76_spill] sm:$0xff] %v7955_v52  ;;  %3071 = vperm.xlu1 %5612, %v6139_v43   ;;  %v7965_v11 = vpop.permute.xlu1 %2777  ;;  %v7990_v37 = vadd.f32 %v1549_v8, %v7852_v61  ;;  %v7993_v1 = vmul.f32 %v7898_v20, %v1665_v15  ;;  %v1546_v54 = vmul.f32 %v7804_v22, %v1529_v50  ;;  %v1541_v39 = vmax.f32 %v1525_v21, 0.0  ;;  %v11469_v15 = vld [vmem:[#allocation158_spill] sm:$0xff]  ;;  %v11471_v21 = vld [vmem:[#allocation159_spill] sm:$0xff] }
 0x48b   :  { %11459 = vst [vmem:[#allocation77_spill] sm:$0xff] %v7965_v11  ;;  %v1655_v28 = vadd.f32 %v7671_v19, %v11467_v41  ;;  %v1444_v4 = vadd.f32 %v1428_v14, %v7838_v12  ;;  %v1521_v47 = vadd.f32 %v7664_v0, %v11468_v36  ;;  %v8002_v32 = vadd.f32 %v1556_v59, %v1441_v58  ;;  %v11475_v36 = vld [vmem:[#allocation163_spill] sm:$0xff] }
 0x48c   :  { %v8005_v61 = vadd.f32 %v1552_v48, %v7876_v46  ;;  %v1531_v8 = vmax.f32 %v1515_v9, 0.0  ;;  %v1773_v50 = vadd.f32 %v7673_v42, %v11469_v15  ;;  %v1534_v51 = vmax.f32 %v1518_v38, 0.0  ;;  %v11474_v38 = vld [vmem:[#allocation161_spill] sm:$0xff] }
 0x48d   :  { %v11470_v52 = vmov 22   ;;  %v8011_v41 = vmul.f32 %v7898_v20, %v1668_v40  ;;  %v1555_v12 = vmul.f32 %v7804_v22, %v1538_v49  ;;  %v1659_v14 = vmax.f32 %v1643_v63, 0.0 }
 0x48e   :  { %v1646_v59 = vadd.f32 %v7671_v19, %v11471_v21  ;;  %v1562_v48 = vadd.f32 %v1546_v54, %v7866_v7  ;;  %v1671_v9 = vmax.f32 %v1655_v28, 0.0  ;;  %v1778_v40 = vadd.f32 %v7673_v42, %v11474_v38  ;;  %v11476_v21 = vld [vmem:[#allocation162_spill] sm:$0xff] }
 0x48f   :  { %3694 = vperm.xlu0 %5625, %v11295_v6   ;;  %v1524_v49 = vadd.f32 %v7664_v0, %v11475_v36  ;;  %v1558_v63 = vmul.f32 %v7804_v22, %v1541_v39  ;;  %v1537_v15 = vmax.f32 %v1521_v47, 0.0  ;;  %v1548_v7 = vmul.f32 %v7804_v22, %v1531_v8  ;;  %v11477_v38 = vld [vmem:[#allocation166_spill] sm:$0xff]  ;;  %v8039_v36 = vpop.permute.xlu0 %2944 }
 0x490   :  { %v1789_v54 = vmax.f32 %v1773_v50, 0.0  ;;  %v1551_v28 = vmul.f32 %v7804_v22, %v1534_v51  ;;  %v1642_v0 = vadd.f32 %v7671_v19, %v11477_v38  ;;  %11478 = vst [vmem:[#allocation83_spill] sm:$0xff] %v8039_v36  ;;  %v8042_v39 = vadd.f32 %v1555_v12, %v7883_v44  ;;  %v11480_v38 = vld [vmem:[#allocation165_spill] sm:$0xff] }
 0x491   :  { %5614 = vset.pattern.permute.xlu2 %v11470_v52  ;;  %v1676_v47 = vmul.f32 %v7898_v20, %v1659_v14  ;;  %v1794_v8 = vmax.f32 %v1778_v40, 0.0  ;;  %v1540_v50 = vmax.f32 %v1524_v49, 0.0  ;;  %v8048_v11 = vadd.f32 %v1677_v31, %v1562_v48  ;;  %v11481_v49 = vld [vmem:[#allocation169_spill] sm:$0xff] }
 0x492   :  { %3154 = vperm.xlu2 %5614, %v6091_v33   ;;  %v8017_v46 = vpop.permute.xlu2 %2896  ;;  %5613 = vset.pattern.permute.xlu1 %v11470_v52  ;;  %v8020_v58 = vpop.permute.xlu1 %2789  ;;  %v8033_v52 = vadd.f32 %v1559_v29, %v1444_v4  ;;  %v1688_v4 = vmul.f32 %v7898_v20, %v1671_v9  ;;  %v8052_v51 = vadd.f32 %v1558_v63, %v7902_v55  ;;  %v1658_v40 = vmax.f32 %v1642_v0, 0.0 }
 0x493   :  { %11472 = vst [vmem:[#allocation81_spill] sm:$0xff] %v8017_v46  ;;  %3150 = vperm.xlu1 %5613, %v6062_v24   ;;  %v1648_v46 = vadd.f32 %v7671_v19, %v11476_v21  ;;  %v1662_v21 = vmax.f32 %v1646_v59, 0.0  ;;  %v1554_v44 = vmul.f32 %v7804_v22, %v1537_v15  ;;  %v1651_v14 = vadd.f32 %v7671_v19, %v11480_v38  ;;  %v11487_v38 = vld [vmem:[#allocation172_spill] sm:$0xff] }
 0x494   :  { %11473 = vst [vmem:[#allocation82_spill] sm:$0xff] %v8020_v58  ;;  %v11479_v58 = vld [vmem:[#allocation164_spill] sm:$0xff]  ;;  %v1564_v59 = vadd.f32 %v1548_v7, %v7872_v45  ;;  %v1567_v9 = vadd.f32 %v1551_v28, %v7890_v60  ;;  %v8061_v31 = vadd.f32 %v1676_v47, %v7938_v3  ;;  %v8072_v15 = vmul.f32 %v7981_v27, %v1794_v8  ;;  %v11484_v7 = vld [vmem:[#allocation167_spill] sm:$0xff] }
 0x495   :  { %v1781_v29 = vadd.f32 %v7673_v42, %v11479_v58  ;;  %v1664_v12 = vmax.f32 %v1648_v46, 0.0  ;;  %v1806_v58 = vmul.f32 %v7981_v27, %v1789_v54  ;;  %v1679_v55 = vmul.f32 %v7898_v20, %v1662_v21  ;;  %v11485_v54 = vld [vmem:[#allocation171_spill] sm:$0xff] }
 0x496   :  { %v1784_v46 = vadd.f32 %v7673_v42, %v11481_v49  ;;  %v1557_v60 = vmul.f32 %v7804_v22, %v1540_v50  ;;  %v1654_v3 = vadd.f32 %v7671_v19, %v11484_v7  ;;  %v1647_v28 = vadd.f32 %v7671_v19, %v11485_v54  ;;  %v11488_v50 = vld [vmem:[#allocation170_spill] sm:$0xff] }
 0x497   :  { %3706 = vperm.xlu0 %5625, %v11434_v57   ;;  %v1797_v48 = vmax.f32 %v1781_v29, 0.0  ;;  %v1570_v0 = vadd.f32 %v1554_v44, %v7905_v23  ;;  %v1681_v47 = vmul.f32 %v7898_v20, %v1664_v12  ;;  %v1667_v21 = vmax.f32 %v1651_v14, 0.0  ;;  %v11489_v12 = vld [vmem:[#allocation168_spill] sm:$0xff] }
 0x498   :  { %v8083_v29 = vstv %s8031_s25  ;;  %v1675_v8 = vmul.f32 %v7898_v20, %v1658_v40  ;;  %v1787_v22 = vadd.f32 %v7673_v42, %v11487_v38  ;;  %v1657_v49 = vadd.f32 %v7671_v19, %v11488_v50  ;;  %v11490_v38 = vld [vmem:[#allocation174_spill] sm:$0xff]  ;;  %v8103_v50 = vpop.permute.xlu0 %3023 }
 0x499   :  { %11486 = vst [vmem:[#allocation86_spill] sm:$0xff] %v8083_v29  ;;  %v8091_v7 = vadd.f32 %v7993_v1, %v1567_v9  ;;  %v8093_v54 = vadd.f32 %v1679_v55, %v1564_v59  ;;  %v8096_v23 = vmul.f32 %v7981_v27, %v1797_v48  ;;  %v1800_v44 = vmax.f32 %v1784_v46, 0.0  ;;  %v11492_v9 = vld [vmem:[#allocation175_spill] sm:$0xff] }
 0x49a   :  { %3166 = vperm.xlu2 %5614, %v11277_v62   ;;  %v8067_v63 = vpop.permute.xlu2 %2904  ;;  %v8069_v45 = vpop.permute.xlu1 %2801  ;;  %v1645_v14 = vadd.f32 %v7671_v19, %v11489_v12  ;;  %v1573_v40 = vadd.f32 %v1557_v60, %v7934_v26  ;;  %v1650_v36 = vadd.f32 %v7671_v19, %v11490_v38  ;;  %11491 = vst [vmem:[#allocation87_spill] sm:$0xff] %v8103_v50  ;;  %v1803_v46 = vmax.f32 %v1787_v22, 0.0  ;;  %v11495_v38 = vld [vmem:[#allocation177_spill] sm:$0xff] }
 0x49b   :  { %11482 = vst [vmem:[#allocation84_spill] sm:$0xff] %v8067_v63  ;;  %3162 = vperm.xlu1 %5613, %v11280_v18   ;;  %v1670_v63 = vmax.f32 %v1654_v3, 0.0  ;;  %v8107_v1 = vadd.f32 %v1681_v47, %v7962_v25  ;;  %v1684_v59 = vmul.f32 %v7898_v20, %v1667_v21  ;;  %v1905_v55 = vadd.f32 %v7679_v30, %v11492_v9  ;;  %v11493_v3 = vld [vmem:[#allocation178_spill] sm:$0xff]  ;;  %v11494_v47 = vld [vmem:[#allocation173_spill] sm:$0xff] }
 0x49c   :  { %11483 = vst [vmem:[#allocation85_spill] sm:$0xff] %v8069_v45  ;;  %v1663_v45 = vmax.f32 %v1647_v28, 0.0  ;;  %v8113_v48 = vadd.f32 %v8011_v41, %v1570_v0  ;;  %v1691_v26 = vadd.f32 %v1675_v8, %v7951_v34  ;;  %v1673_v60 = vmax.f32 %v1657_v49, 0.0 }
 0x49d   :  { %v1910_v28 = vadd.f32 %v7679_v30, %v11493_v3  ;;  %v8119_v12 = vmul.f32 %v7981_v27, %v1800_v44  ;;  %v1661_v25 = vmax.f32 %v1645_v14, 0.0  ;;  %v1775_v21 = vadd.f32 %v7673_v42, %v11494_v47  ;;  %v11498_v3 = vld [vmem:[#allocation176_spill] sm:$0xff] }
 0x49e   :  { %v1653_v9 = vadd.f32 %v7671_v19, %v11495_v38  ;;  %v1687_v0 = vmul.f32 %v7898_v20, %v1670_v63  ;;  %v1680_v8 = vmul.f32 %v7898_v20, %v1663_v45  ;;  %v1666_v22 = vmax.f32 %v1650_v36, 0.0  ;;  %v11499_v38 = vld [vmem:[#allocation180_spill] sm:$0xff] }
 0x49f   :  { %3718 = vperm.xlu0 %5625, %v11319_v5   ;;  %v8134_v49 = vadd.f32 %v1688_v4, %v1573_v40  ;;  %v8138_v44 = vadd.f32 %v1684_v59, %v7987_v16  ;;  %v1921_v14 = vmax.f32 %v1905_v55, 0.0  ;;  %v1777_v47 = vadd.f32 %v7673_v42, %v11498_v3  ;;  %v11501_v40 = vld [vmem:[#allocation183_spill] sm:$0xff] }
 0x4a0   :  { %v1690_v63 = vmul.f32 %v7898_v20, %v1673_v60  ;;  %v1926_v36 = vmax.f32 %v1910_v28, 0.0  ;;  %v8148_v4 = vadd.f32 %v1806_v58, %v1691_v26  ;;  %v8151_v45 = vmul.f32 %v7898_v20, %v1661_v25  ;;  %v11502_v60 = vld [vmem:[#allocation179_spill] sm:$0xff] }
 0x4a1   :  { %v1791_v16 = vmax.f32 %v1775_v21, 0.0  ;;  %v1913_v59 = vadd.f32 %v7679_v30, %v11501_v40  ;;  %v1669_v55 = vmax.f32 %v1653_v9, 0.0  ;;  %v8156_v3 = vadd.f32 %v1687_v0, %v8002_v32  ;;  %v11503_v21 = vld [vmem:[#allocation182_spill] sm:$0xff]  ;;  %v8178_v40 = vpop.permute.xlu0 %3043 }
 0x4a2   :  { %3174 = vperm.xlu2 %5614, %v11290_v13   ;;  %v8128_v34 = vpop.permute.xlu2 %2916  ;;  %v8130_v41 = vpop.permute.xlu1 %2813  ;;  %11500 = vst [vmem:[#allocation92_spill] sm:$0xff] %v8151_v45  ;;  %v1780_v58 = vadd.f32 %v7673_v42, %v11502_v60  ;;  %v8164_v26 = vmul.f32 %v8083_v29, %v1921_v14  ;;  %v1793_v28 = vmax.f32 %v1777_v47, 0.0  ;;  %v1774_v9 = vadd.f32 %v7673_v42, %v11503_v21  ;;  %v11504_v0 = vld [vmem:[#allocation186_spill] sm:$0xff] }
 0x4a3   :  { %11496 = vst [vmem:[#allocation266_spill] sm:$0xff] %v8128_v34  ;;  %3170 = vperm.xlu1 %5613, %v11295_v6   ;;  %v1656_v34 = vadd.f32 %v7671_v19, %v11499_v38  ;;  %v1696_v19 = vadd.f32 %v1680_v8, %v7990_v37  ;;  %v8169_v32 = vadd.f32 %v1690_v63, %v8033_v52  ;;  %v8183_v60 = vstv %s8125_s26  ;;  %v11508_v52 = vld [vmem:[#allocation28_spill] sm:$0xff]  ;;  %v11556_v6 = vld [vmem:[#allocation209_spill] sm:$0xff] }
 0x4a4   :  { %11497 = vst [vmem:[#allocation89_spill] sm:$0xff] %v8130_v41  ;;  %v8145_v41 = vmul.f32 %v7981_v27, %v1803_v46  ;;  %v1683_v46 = vmul.f32 %v7898_v20, %v1666_v22  ;;  %v8172_v37 = vmul.f32 %v8083_v29, %v1926_v36  ;;  %v1916_v8 = vadd.f32 %v7679_v30, %v11504_v0  ;;  %v11505_v22 = vld [vmem:[#allocation181_spill] sm:$0xff] }
 0x4a5   :  { %v1672_v25 = vmax.f32 %v1656_v34, 0.0  ;;  %v1783_v38 = vadd.f32 %v7673_v42, %v11505_v22  ;;  %11506 = vst [vmem:[#allocation95_spill] sm:$0xff] %v8178_v40  ;;  %v1808_v14 = vmul.f32 %v7981_v27, %v1791_v16  ;;  %v1929_v34 = vmax.f32 %v1913_v59, 0.0  ;;  %v11510_v0 = vld [vmem:[#allocation189_spill] sm:$0xff] }
 0x4a6   :  { %v1686_v47 = vmul.f32 %v7898_v20, %v1669_v55  ;;  %11507 = vst [vmem:[#allocation88_spill] sm:$0xff] %v8183_v60  ;;  %v1699_v36 = vadd.f32 %v1683_v46, %v8005_v61  ;;  %v1796_v21 = vmax.f32 %v1780_v58, 0.0  ;;  %v1919_v45 = vadd.f32 %v7679_v30, %v11510_v0  ;;  %v11513_v46 = vld [vmem:[#allocation188_spill] sm:$0xff] }
 0x4a7   :  { %3730 = vperm.xlu0 %5625, %v6179_v53   ;;  %v8192_v22 = vadd.f32 %v8072_v15, %v1696_v19  ;;  %v1810_v59 = vmul.f32 %v7981_v27, %v1793_v28  ;;  %v1689_v55 = vmul.f32 %v7898_v20, %v1672_v25  ;;  %v1790_v40 = vmax.f32 %v1774_v9, 0.0  ;;  %v11514_v28 = vld [vmem:[#allocation192_spill] sm:$0xff] }
 0x4a8   :  { %v1932_v50 = vmax.f32 %v1916_v8, 0.0  ;;  %v1786_v61 = vadd.f32 %v7673_v42, %v11512_v56  ;;  %v1779_v58 = vadd.f32 %v7673_v42, %v11513_v46  ;;  %v8204_v15 = vadd.f32 %v1808_v14, %v8048_v11  ;;  %v11516_v8 = vld [vmem:[#allocation187_spill] sm:$0xff] }
 0x4a9   :  { %v8207_v19 = vmul.f32 %v8083_v29, %v1929_v34  ;;  %v1702_v0 = vadd.f32 %v1686_v47, %v8042_v39  ;;  %v1813_v25 = vmul.f32 %v7981_v27, %v1796_v21  ;;  %v1935_v9 = vmax.f32 %v1919_v45, 0.0 }
 0x4aa   :  { %3186 = vperm.xlu2 %5614, %v11508_v52   ;;  %v8186_v63 = vpop.permute.xlu2 %2928  ;;  %v1904_v56 = vadd.f32 %v7679_v30, %v11516_v8  ;;  %v10939_v2 = vmov 27   ;;  %v8219_v11 = vadd.f32 %v1810_v59, %v8093_v54  ;;  %v1705_v39 = vadd.f32 %v1689_v55, %v8052_v51  ;;  %v11518_v59 = vld [vmem:[#allocation197_spill] sm:$0xff]  ;;  %v11519_v55 = vld [vmem:[#allocation194_spill] sm:$0xff] }
 0x4ab   :  { %11509 = vst [vmem:[#allocation98_spill] sm:$0xff] %v8186_v63  ;;  %3182 = vperm.xlu1 %5613, %v11434_v57   ;;  %v8195_v16 = vpop.permute.xlu1 %2892  ;;  %v1799_v63 = vmax.f32 %v1783_v38, 0.0  ;;  %v11517_v38 = vld [vmem:[#allocation191_spill] sm:$0xff]  ;;  %v1807_v14 = vmul.f32 %v7981_v27, %v1790_v40  ;;  %v8226_v45 = vadd.f32 %v8096_v23, %v1699_v36  ;;  %v8230_v34 = vmul.f32 %v8083_v29, %v1932_v50  ;;  %v11520_v23 = vld [vmem:[#allocation22_spill] sm:$0xff]  ;;  %v11549_v57 = vld [vmem:[#allocation217_spill] sm:$0xff] }
 0x4ac   :  { %11511 = vst [vmem:[#allocation91_spill] sm:$0xff] %v8195_v16  ;;  %v11515_v16 = vld [vmem:[#allocation60_spill] sm:$0xff]  ;;  %v1782_v46 = vadd.f32 %v7673_v42, %v11517_v38  ;;  %v1802_v21 = vmax.f32 %v1786_v61, 0.0  ;;  %v1785_v40 = vadd.f32 %v7673_v42, %v11519_v55  ;;  %v8238_v8 = vadd.f32 %v8119_v12, %v1702_v0  ;;  %v11525_v55 = vld [vmem:[#allocation193_spill] sm:$0xff] }
 0x4ad   :  { %v2037_v20 = vadd.f32 %v11515_v16, %v11514_v28  ;;  %v1816_v47 = vmul.f32 %v7981_v27, %v1799_v63  ;;  %v1795_v28 = vmax.f32 %v1779_v58, 0.0  ;;  %v2042_v51 = vadd.f32 %v11515_v16, %v11518_v59  ;;  %v11524_v0 = vld [vmem:[#allocation200_spill] sm:$0xff] }
 0x4ae   :  { %v8244_v50 = vadd.f32 %v1813_v25, %v8091_v7  ;;  %v8247_v63 = vmul.f32 %v8083_v29, %v1935_v9  ;;  %v1920_v61 = vmax.f32 %v1904_v56, 0.0  ;;  %v1798_v58 = vmax.f32 %v1782_v46, 0.0  ;;  %v11526_v46 = vld [vmem:[#allocation185_spill] sm:$0xff] }
 0x4af   :  { %5629 = vset.pattern.permute.xlu0 %v10939_v2  ;;  %v2053_v54 = vmax.f32 %v2037_v20, 0.0  ;;  %v8249_v20 = vpop.permute.xlu0 %3055  ;;  %v1823_v12 = vadd.f32 %v1807_v14, %v8061_v31  ;;  %v2045_v59 = vadd.f32 %v11515_v16, %v11524_v0  ;;  %v1909_v7 = vadd.f32 %v7679_v30, %v11525_v55  ;;  %v11528_v55 = vld [vmem:[#allocation203_spill] sm:$0xff] }
 0x4b0   :  { %3809 = vperm.xlu0 %5629, %v6091_v33   ;;  %11522 = vst [vmem:[#allocation94_spill] sm:$0xff] %v8249_v20  ;;  %v8260_v25 = vadd.f32 %v8145_v41, %v1705_v39  ;;  %v8263_v9 = vadd.f32 %v1816_v47, %v8113_v48  ;;  %v1819_v56 = vmul.f32 %v7981_v27, %v1802_v21  ;;  %v2058_v0 = vmax.f32 %v2042_v51, 0.0  ;;  %v11529_v47 = vld [vmem:[#allocation195_spill] sm:$0xff] }
 0x4b1   :  { %v8268_v2 = vadd.f32 %v7673_v42, %v11526_v46  ;;  %v1812_v31 = vmul.f32 %v7981_v27, %v1795_v28  ;;  %v8272_v14 = vmul.f32 %v8183_v60, %v2053_v54  ;;  %v1801_v41 = vmax.f32 %v1785_v40, 0.0 }
 0x4b2   :  { %3198 = vperm.xlu2 %5614, %v11520_v23   ;;  %v8241_v36 = vpop.permute.xlu2 %2940  ;;  %v1937_v39 = vmul.f32 %v8083_v29, %v1920_v61  ;;  %v1815_v48 = vmul.f32 %v7981_v27, %v1798_v58  ;;  %v1912_v21 = vadd.f32 %v7679_v30, %v11529_v47  ;;  %v2061_v20 = vmax.f32 %v2045_v59, 0.0  ;;  %v11532_v58 = vld [vmem:[#allocation206_spill] sm:$0xff] }
 0x4b3   :  { %11521 = vst [vmem:[#allocation90_spill] sm:$0xff] %v8241_v36  ;;  %3194 = vperm.xlu1 %5613, %v11319_v5   ;;  %v8252_v38 = vpop.permute.xlu1 %2900  ;;  %v11530_v36 = vld [vmem:[#allocation196_spill] sm:$0xff]  ;;  %v1925_v28 = vmax.f32 %v1909_v7, 0.0  ;;  %v8283_v5 = vstv %s8223_s27  ;;  %v8286_v54 = vadd.f32 %v8164_v26, %v1823_v12  ;;  %v8290_v51 = vadd.f32 %v1819_v56, %v8134_v49  ;;  %v11534_v26 = vld [vmem:[#allocation199_spill] sm:$0xff]  ;;  %v11535_v7 = vld [vmem:[#allocation30_spill] sm:$0xff] }
 0x4b4   :  { %11523 = vst [vmem:[#allocation97_spill] sm:$0xff] %v8252_v38  ;;  %v2048_v38 = vadd.f32 %v11515_v16, %v11528_v55  ;;  %v1788_v46 = vadd.f32 %v7673_v42, %v11530_v36  ;;  %v1828_v61 = vadd.f32 %v1812_v31, %v8107_v1  ;;  %v11533_v55 = vld [vmem:[#allocation61_spill] sm:$0xff]  ;;  %v8297_v42 = vmul.f32 %v8183_v60, %v2058_v0 }
 0x4b5   :  { %11527 = vst [vmem:[#allocation93_spill] sm:$0xff] %v8268_v2  ;;  %v2166_v47 = vadd.f32 %v11533_v55, %v11532_v58  ;;  %v1818_v59 = vmul.f32 %v7981_v27, %v1801_v41  ;;  %v1906_v12 = vadd.f32 %v7679_v30, %v11534_v26  ;;  %v8304_v49 = vadd.f32 %v1937_v39, %v8148_v4  ;;  %v11538_v58 = vld [vmem:[#allocation211_spill] sm:$0xff]  ;;  %v11539_v4 = vld [vmem:[#allocation198_spill] sm:$0xff] }
 0x4b6   :  { %11531 = vst [vmem:[#allocation96_spill] sm:$0xff] %v8283_v5  ;;  %v2064_v36 = vmax.f32 %v2048_v38, 0.0  ;;  %v1831_v56 = vadd.f32 %v1815_v48, %v8138_v44  ;;  %v1928_v1 = vmax.f32 %v1912_v21, 0.0  ;;  %v1804_v31 = vmax.f32 %v1788_v46, 0.0  ;;  %v11540_v48 = vld [vmem:[#allocation205_spill] sm:$0xff]  ;;  %v11541_v46 = vld [vmem:[#allocation208_spill] sm:$0xff] }
 0x4b7   :  { %v8313_v38 = vmul.f32 %v8183_v60, %v2061_v20  ;;  %v1942_v41 = vmul.f32 %v8083_v29, %v1925_v28  ;;  %v2171_v26 = vadd.f32 %v11533_v55, %v11538_v58  ;;  %v1915_v39 = vadd.f32 %v7679_v30, %v11539_v4  ;;  %v8327_v20 = vpop.permute.xlu0 %3067 }
 0x4b8   :  { %3829 = vperm.xlu0 %5629, %v11290_v13   ;;  %v2182_v44 = vmax.f32 %v2166_v47, 0.0  ;;  %v1911_v21 = vadd.f32 %v7679_v30, %v11540_v48  ;;  %v1914_v2 = vadd.f32 %v7679_v30, %v11541_v46  ;;  %11542 = vst [vmem:[#allocation101_spill] sm:$0xff] %v8327_v20  ;;  %v8330_v28 = vmul.f32 %v8183_v60, %v2064_v36  ;;  %v11544_v46 = vld [vmem:[#allocation202_spill] sm:$0xff] }
 0x4b9   :  { %v1834_v58 = vadd.f32 %v1818_v59, %v8156_v3  ;;  %v1945_v4 = vmul.f32 %v8083_v29, %v1928_v1  ;;  %v1821_v48 = vmul.f32 %v7981_v27, %v1804_v31  ;;  %v8345_v36 = vadd.f32 %v1942_v41, %v8192_v22  ;;  %v11546_v27 = vld [vmem:[#allocation207_spill] sm:$0xff] }
 0x4ba   :  { %3210 = vperm.xlu2 %5614, %v11535_v7   ;;  %v2187_v3 = vmax.f32 %v2171_v26, 0.0  ;;  %v1931_v59 = vmax.f32 %v1915_v39, 0.0  ;;  %v8351_v1 = vmul.f32 %v8283_v5, %v2182_v44  ;;  %v1927_v31 = vmax.f32 %v1911_v21, 0.0 }
 0x4bb   :  { %v8307_v40 = vpop.permute.xlu2 %3019  ;;  %3206 = vperm.xlu1 %5613, %v6179_v53   ;;  %v8310_v0 = vpop.permute.xlu1 %2912  ;;  %v11543_v53 = vld [vmem:[#allocation201_spill] sm:$0xff]  ;;  %v1930_v20 = vmax.f32 %v1914_v2, 0.0  ;;  %v8359_v26 = vadd.f32 %v8230_v34, %v1834_v58  ;;  %v11548_v39 = vmov 23   ;;  %v1837_v44 = vadd.f32 %v1821_v48, %v8169_v32  ;;  %v11552_v32 = vld [vmem:[#allocation220_spill] sm:$0xff] }
 0x4bc   :  { %11536 = vst [vmem:[#allocation99_spill] sm:$0xff] %v8307_v40  ;;  %v8325_v40 = vadd.f32 %v8172_v37, %v1828_v61  ;;  %v1918_v47 = vadd.f32 %v7679_v30, %v11543_v53  ;;  %v1908_v37 = vadd.f32 %v7679_v30, %v11544_v46  ;;  %v8342_v61 = vadd.f32 %v8207_v19, %v1831_v56  ;;  %v11547_v56 = vld [vmem:[#allocation214_spill] sm:$0xff] }
 0x4bd   :  { %11537 = vst [vmem:[#allocation100_spill] sm:$0xff] %v8310_v0  ;;  %v1922_v0 = vmax.f32 %v1906_v12, 0.0  ;;  %v11545_v12 = vld [vmem:[#allocation204_spill] sm:$0xff]  ;;  %v2039_v46 = vadd.f32 %v11515_v16, %v11546_v27  ;;  %v2174_v22 = vadd.f32 %v11533_v55, %v11547_v56  ;;  %v2177_v2 = vadd.f32 %v11533_v55, %v11549_v57  ;;  %v11554_v56 = vld [vmem:[#allocation62_spill] sm:$0xff] }
 0x4be   :  { %v2036_v53 = vadd.f32 %v11515_v16, %v11545_v12  ;;  %v1934_v41 = vmax.f32 %v1918_v47, 0.0  ;;  %v8363_v12 = vadd.f32 %v1945_v4, %v8226_v45  ;;  %v1924_v21 = vmax.f32 %v1908_v37, 0.0  ;;  %v11553_v37 = vld [vmem:[#allocation225_spill] sm:$0xff] }
 0x4bf   :  { %v1939_v19 = vmul.f32 %v8083_v29, %v1922_v0  ;;  %v8375_v0 = vmul.f32 %v8283_v5, %v2187_v3  ;;  %v1948_v45 = vmul.f32 %v8083_v29, %v1931_v59  ;;  %v2180_v47 = vadd.f32 %v11533_v55, %v11552_v32 }
 0x4c0   :  { %3841 = vperm.xlu0 %5629, %v11508_v52   ;;  %v2052_v58 = vmax.f32 %v2036_v53, 0.0  ;;  %v1944_v57 = vmul.f32 %v8083_v29, %v1927_v31  ;;  %v2055_v4 = vmax.f32 %v2039_v46, 0.0  ;;  %v1947_v48 = vmul.f32 %v8083_v29, %v1930_v20  ;;  %v11557_v31 = vld [vmem:[#allocation210_spill] sm:$0xff]  ;;  %v8395_v20 = vpop.permute.xlu0 %3079 }
 0x4c1   :  { %v2190_v3 = vmax.f32 %v2174_v22, 0.0  ;;  %v8388_v59 = vstv %s8335_s28  ;;  %v1941_v53 = vmul.f32 %v8083_v29, %v1924_v21  ;;  %v2193_v32 = vmax.f32 %v2177_v2, 0.0  ;;  %11558 = vst [vmem:[#allocation104_spill] sm:$0xff] %v8395_v20 }
 0x4c2   :  { %5618 = vset.pattern.permute.xlu2 %v11548_v39  ;;  %11555 = vst [vmem:[#allocation107_spill] sm:$0xff] %v8388_v59  ;;  %v1917_v46 = vadd.f32 %v7679_v30, %v11557_v31  ;;  %v8402_v22 = vadd.f32 %v8247_v63, %v1837_v44  ;;  %v1963_v21 = vadd.f32 %v1947_v48, %v8263_v9  ;;  %v244_v63 = vpop.f32.mrf.mxu1 }
 0x4c3   :  { %3289 = vperm.xlu2 %5618, %v11342_v17   ;;  %v8369_v27 = vpop.permute.xlu2 %3031  ;;  %5617 = vset.pattern.permute.xlu1 %v11548_v39  ;;  %v8372_v34 = vpop.permute.xlu1 %2924  ;;  %v2298_v39 = vadd.f32 %v11554_v56, %v11553_v37  ;;  %v8398_v37 = vadd.f32 %v1948_v45, %v8238_v8  ;;  %v8409_v31 = vmul.f32 %v8283_v5, %v2190_v3  ;;  %v11559_v45 = vld [vmem:[#allocation213_spill] sm:$0xff]  ;;  %v8471_v30 = vperm.slane %v244_v63, 5 }
 0x4c4   :  { %11550 = vst [vmem:[#allocation102_spill] sm:$0xff] %v8369_v27  ;;  %3285 = vperm.xlu1 %5617, %v6091_v33   ;;  %v1955_v27 = vadd.f32 %v1939_v19, %v8204_v15  ;;  %v2041_v33 = vadd.f32 %v11515_v16, %v11556_v6  ;;  %v2069_v15 = vmul.f32 %v8183_v60, %v2052_v58  ;;  %v2196_v19 = vmax.f32 %v2180_v47, 0.0 }
 0x4c5   :  { %11551 = vst [vmem:[#allocation103_spill] sm:$0xff] %v8372_v34  ;;  %v1951_v34 = vmul.f32 %v8083_v29, %v1934_v41  ;;  %v1960_v41 = vadd.f32 %v1944_v57, %v8244_v50  ;;  %v2072_v6 = vmul.f32 %v8183_v60, %v2055_v4  ;;  %v2314_v2 = vmax.f32 %v2298_v39, 0.0 }
 0x4c6   :  { %v2035_v58 = vadd.f32 %v11515_v16, %v11559_v45  ;;  %v8417_v44 = vadd.f32 %v8272_v14, %v1955_v27  ;;  %v1957_v50 = vadd.f32 %v1941_v53, %v8219_v11  ;;  %v8421_v47 = vmul.f32 %v8283_v5, %v2193_v32  ;;  %v11562_v14 = vld [vmem:[#allocation228_spill] sm:$0xff]  ;;  %11572 = vst [vmem:[#allocation116_spill] sm:$0xff] %v8471_v30 }
 0x4c7   :  { %v8412_v8 = vadd.f32 %v1951_v34, %v8260_v25  ;;  %v2057_v9 = vmax.f32 %v2041_v33, 0.0  ;;  %v1933_v57 = vmax.f32 %v1917_v46, 0.0  ;;  %v8429_v34 = vadd.f32 %v2069_v15, %v8286_v54  ;;  %v11563_v27 = vld [vmem:[#allocation212_spill] sm:$0xff]  ;;  %v11564_v46 = vld [vmem:[#allocation219_spill] sm:$0xff] }
 0x4c8   :  { %3853 = vperm.xlu0 %5629, %v11520_v23   ;;  %v8432_v48 = vmul.f32 %v8283_v5, %v2196_v19  ;;  %v2303_v11 = vadd.f32 %v11554_v56, %v11562_v14  ;;  %v2044_v39 = vadd.f32 %v11515_v16, %v11563_v27  ;;  %v8441_v33 = vadd.f32 %v2072_v6, %v1957_v50  ;;  %v11571_v27 = vld [vmem:[#allocation218_spill] sm:$0xff] }
 0x4c9   :  { %v8444_v3 = vmul.f32 %v8388_v59, %v2314_v2  ;;  %v8447_v54 = vadd.f32 %v8297_v42, %v1960_v41  ;;  %v8450_v53 = vadd.f32 %v8313_v38, %v1963_v21  ;;  %v2051_v32 = vmax.f32 %v2035_v58, 0.0  ;;  %v11567_v2 = vld [vmem:[#allocation215_spill] sm:$0xff] }
 0x4ca   :  { %v2040_v15 = vadd.f32 %v11515_v16, %v11564_v46  ;;  %v8454_v19 = vperm.slane %v244_v63, 0  ;;  %v8456_v45 = vperm.slane %v244_v63, 1  ;;  %v2074_v6 = vmul.f32 %v8183_v60, %v2057_v9 }
 0x4cb   :  { %3297 = vperm.xlu2 %5618, %v11277_v62   ;;  %v8424_v4 = vpop.permute.xlu2 %3039  ;;  %v8426_v25 = vpop.permute.xlu1 %2936  ;;  %v1950_v50 = vmul.f32 %v8083_v29, %v1933_v57  ;;  %v2047_v14 = vadd.f32 %v11515_v16, %v11567_v2  ;;  %v8462_v42 = vperm.slane %v244_v63, 2  ;;  %v2319_v41 = vmax.f32 %v2303_v11, 0.0  ;;  %v11585_v62 = vld [vmem:[#allocation223_spill] sm:$0xff] }
 0x4cc   :  { %11560 = vst [vmem:[#allocation110_spill] sm:$0xff] %v8424_v4  ;;  %3293 = vperm.xlu1 %5617, %v11280_v18   ;;  %v2060_v38 = vmax.f32 %v2044_v39, 0.0  ;;  %v8464_v21 = vperm.slane %v244_v63, 3  ;;  %v8466_v58 = vperm.slane %v244_v63, 4  ;;  %v2050_v46 = vadd.f32 %v11515_v16, %v11571_v27  ;;  %v8477_v2 = vpop.permute.xlu0 %3158  ;;  %v11576_v39 = vld [vmem:[#allocation231_spill] sm:$0xff] }
 0x4cd   :  { %11561 = vst [vmem:[#allocation105_spill] sm:$0xff] %v8426_v25  ;;  %v8473_v9 = vperm.slane %v244_v63, 6  ;;  %v8475_v57 = vperm.slane %v244_v63, 7  ;;  %v2068_v11 = vmul.f32 %v8183_v60, %v2051_v32  ;;  %v2306_v29 = vadd.f32 %v11554_v56, %v11576_v39  ;;  %v11577_v25 = vld [vmem:[#allocation222_spill] sm:$0xff]  ;;  %v11578_v63 = vld [vmem:[#allocation221_spill] sm:$0xff] }
 0x4ce   :  { %11565 = vst [vmem:[#allocation106_spill] sm:$0xff] %v8454_v19  ;;  %v2056_v4 = vmax.f32 %v2040_v15, 0.0  ;;  %v2043_v20 = vadd.f32 %v11515_v16, %v11577_v25  ;;  %v8485_v27 = vadd.f32 %v2074_v6, %v8325_v40  ;;  %v1966_v30 = vadd.f32 %v1950_v50, %v8290_v51  ;;  %v11581_v39 = vld [vmem:[#allocation234_spill] sm:$0xff]  ;;  %v11583_v50 = vld [vmem:[#allocation239_spill] sm:$0xff] }
 0x4cf   :  { %11566 = vst [vmem:[#allocation113_spill] sm:$0xff] %v8456_v45  ;;  %v8496_v15 = vmul.f32 %v8388_v59, %v2319_v41  ;;  %v2077_v25 = vmul.f32 %v8183_v60, %v2060_v38  ;;  %v2309_v40 = vadd.f32 %v11554_v56, %v11581_v39  ;;  %v8502_v6 = vstv %s8438_s29 }
 0x4d0   :  { %11568 = vst [vmem:[#allocation108_spill] sm:$0xff] %v8462_v42  ;;  %3865 = vperm.xlu0 %5629, %v11535_v7   ;;  %v2066_v51 = vmax.f32 %v2050_v46, 0.0  ;;  %v2322_v41 = vmax.f32 %v2306_v29, 0.0  ;;  %v2059_v38 = vmax.f32 %v2043_v20, 0.0  ;;  %v2170_v18 = vadd.f32 %v11533_v55, %v11585_v62  ;;  %v11587_v29 = vld [vmem:[#allocation227_spill] sm:$0xff] }
 0x4d1   :  { %11569 = vst [vmem:[#allocation109_spill] sm:$0xff] %v8464_v21  ;;  %v8515_v46 = vadd.f32 %v8330_v28, %v1966_v30  ;;  %v10960_v20 = vmov 28  }
 0x4d2   :  { %11570 = vst [vmem:[#allocation112_spill] sm:$0xff] %v8466_v58  ;;  %v2073_v58 = vmul.f32 %v8183_v60, %v2056_v4  ;;  %v2049_v4 = vadd.f32 %v11515_v16, %v11587_v29  ;;  %v8532_v28 = vmul.f32 %v8388_v59, %v2322_v41 }
 0x4d3   :  { %11573 = vst [vmem:[#allocation111_spill] sm:$0xff] %v8473_v9  ;;  %v2063_v9 = vmax.f32 %v2047_v14, 0.0  ;;  %3309 = vperm.xlu2 %5618, %v6099_v35   ;;  %v8493_v32 = vpop.permute.xlu1 %2948  ;;  %v2312_v14 = vadd.f32 %v11554_v56, %v11583_v50  ;;  %v8518_v50 = vadd.f32 %v2077_v25, %v8342_v61  ;;  %v2076_v25 = vmul.f32 %v8183_v60, %v2059_v38 }
 0x4d4   :  { %11574 = vst [vmem:[#allocation115_spill] sm:$0xff] %v8475_v57  ;;  %v2168_v57 = vadd.f32 %v11533_v55, %v11578_v63  ;;  %3305 = vperm.xlu1 %5617, %v11290_v13   ;;  %v11584_v63 = vld [vmem:[#allocation224_spill] sm:$0xff]  ;;  %v2325_v13 = vmax.f32 %v2309_v40, 0.0  ;;  %v2089_v61 = vadd.f32 %v2073_v58, %v8345_v36  ;;  %v11591_v58 = vld [vmem:[#allocation245_spill] sm:$0xff] }
 0x4d5   :  { %11575 = vst [vmem:[#allocation114_spill] sm:$0xff] %v8477_v2  ;;  %v8491_v2 = vpop.permute.xlu2 %3051  ;;  %v2080_v21 = vmul.f32 %v8183_v60, %v2063_v9  ;;  %v2083_v9 = vmul.f32 %v8183_v60, %v2066_v51 }
 0x4d6   :  { %11579 = vst [vmem:[#allocation118_spill] sm:$0xff] %v8491_v2  ;;  %v2046_v2 = vadd.f32 %v11515_v16, %v11584_v63  ;;  %v2184_v39 = vmax.f32 %v2168_v57, 0.0  ;;  %v11586_v63 = vld [vmem:[#allocation242_spill] sm:$0xff]  ;;  %v2328_v57 = vmax.f32 %v2312_v14, 0.0  ;;  %v2186_v14 = vmax.f32 %v2170_v18, 0.0 }
 0x4d7   :  { %11580 = vst [vmem:[#allocation117_spill] sm:$0xff] %v8493_v32  ;;  %v2084_v32 = vadd.f32 %v2068_v11, %v8304_v49  ;;  %v2430_v49 = vadd.f32 %v8454_v19, %v11586_v63  ;;  %v11588_v11 = vld [vmem:[#allocation226_spill] sm:$0xff]  ;;  %v8540_v51 = vadd.f32 %v2080_v21, %v8359_v26  ;;  %v8551_v36 = vmul.f32 %v8388_v59, %v2325_v13 }
 0x4d8   :  { %11582 = vst [vmem:[#allocation122_spill] sm:$0xff] %v8502_v6  ;;  %5633 = vset.pattern.permute.xlu0 %v10960_v20  ;;  %v2062_v62 = vmax.f32 %v2046_v2, 0.0  ;;  %v2173_v30 = vadd.f32 %v11533_v55, %v11588_v11  ;;  %v2201_v2 = vmul.f32 %v8283_v5, %v2184_v39  ;;  %v11589_v63 = vld [vmem:[#allocation230_spill] sm:$0xff]  ;;  %v8545_v11 = vpop.permute.xlu0 %3178  ;;  %v2435_v26 = vadd.f32 %v8454_v19, %v11591_v58 }
 0x4d9   :  { %3944 = vperm.xlu0 %5633, %v11342_v17   ;;  %v8537_v40 = vadd.f32 %v8351_v1, %v2084_v32  ;;  %v2167_v29 = vadd.f32 %v11533_v55, %v11589_v63  ;;  %v2446_v1 = vmax.f32 %v2430_v49, 0.0  ;;  %v2065_v21 = vmax.f32 %v2049_v4, 0.0  ;;  %v11593_v63 = vld [vmem:[#allocation248_spill] sm:$0xff]  ;;  %v11594_v4 = vld [vmem:[#allocation229_spill] sm:$0xff] }
 0x4da   :  { %v8559_v32 = vadd.f32 %v2083_v9, %v8402_v22  ;;  %v8562_v38 = vmul.f32 %v8388_v59, %v2328_v57  ;;  %v2079_v39 = vmul.f32 %v8183_v60, %v2062_v62  ;;  %v2189_v13 = vmax.f32 %v2173_v30, 0.0  ;;  %v11595_v62 = vld [vmem:[#allocation232_spill] sm:$0xff] }
 0x4db   :  { %3321 = vperm.xlu2 %5618, %v6241_v10   ;;  %v2092_v49 = vadd.f32 %v2076_v25, %v8363_v12  ;;  %v2438_v58 = vadd.f32 %v8454_v19, %v11593_v63  ;;  %v2176_v20 = vadd.f32 %v11533_v55, %v11594_v4  ;;  %v8571_v16 = vadd.f32 %v8375_v0, %v2089_v61 }
 0x4dc   :  { %3317 = vperm.xlu1 %5617, %v11508_v52   ;;  %v8556_v18 = vpop.permute.xlu1 %3027  ;;  %v8574_v22 = vadd.f32 %v2201_v2, %v8417_v44  ;;  %v2203_v9 = vmul.f32 %v8283_v5, %v2186_v14  ;;  %v2183_v57 = vmax.f32 %v2167_v29, 0.0  ;;  %v2179_v30 = vadd.f32 %v11533_v55, %v11595_v62  ;;  %v11598_v2 = vld [vmem:[#allocation235_spill] sm:$0xff]  ;;  %v11599_v62 = vld [vmem:[#allocation238_spill] sm:$0xff]  ;;  %v11621_v52 = vld [vmem:[#allocation252_spill] sm:$0xff] }
 0x4dd   :  { %v8548_v41 = vpop.permute.xlu2 %3063  ;;  %11592 = vst [vmem:[#allocation121_spill] sm:$0xff] %v8556_v18  ;;  %v8580_v12 = vmul.f32 %v8502_v6, %v2446_v1  ;;  %v2451_v25 = vmax.f32 %v2435_v26, 0.0  ;;  %v2082_v63 = vmul.f32 %v8183_v60, %v2065_v21  ;;  %v11596_v18 = vld [vmem:[#allocation236_spill] sm:$0xff]  ;;  %v2095_v0 = vadd.f32 %v2079_v39, %v8398_v37  ;;  %v11600_v39 = vld [vmem:[#allocation253_spill] sm:$0xff] }
 0x4de   :  { %11590 = vst [vmem:[#allocation119_spill] sm:$0xff] %v8548_v41  ;;  %v2172_v4 = vadd.f32 %v11533_v55, %v11596_v18  ;;  %v2206_v44 = vmul.f32 %v8283_v5, %v2189_v13  ;;  %v8588_v61 = vstv %s8528_s30  ;;  %v2297_v14 = vadd.f32 %v11554_v56, %v11598_v2  ;;  %v11608_v41 = vld [vmem:[#allocation244_spill] sm:$0xff] }
 0x4df   :  { %11597 = vst [vmem:[#allocation125_spill] sm:$0xff] %v8588_v61  ;;  %v2454_v29 = vmax.f32 %v2438_v58, 0.0  ;;  %v2192_v1 = vmax.f32 %v2176_v20, 0.0  ;;  %v2175_v26 = vadd.f32 %v11533_v55, %v11599_v62  ;;  %v8596_v21 = vadd.f32 %v8409_v31, %v2092_v49  ;;  %v11602_v31 = vld [vmem:[#allocation256_spill] sm:$0xff]  ;;  %v11604_v62 = vld [vmem:[#allocation241_spill] sm:$0xff] }
 0x4e0   :  { %v8599_v18 = vadd.f32 %v2203_v9, %v8441_v33  ;;  %v2200_v37 = vmul.f32 %v8283_v5, %v2183_v57  ;;  %v2441_v13 = vadd.f32 %v8454_v19, %v11600_v39  ;;  %v2195_v60 = vmax.f32 %v2179_v30, 0.0 }
 0x4e1   :  { %3964 = vperm.xlu0 %5633, %v6099_v35   ;;  %v8608_v20 = vmul.f32 %v8502_v6, %v2451_v25  ;;  %v2098_v58 = vadd.f32 %v2082_v63, %v8412_v8  ;;  %v2559_v49 = vadd.f32 %v8456_v45, %v11602_v31  ;;  %v2188_v33 = vmax.f32 %v2172_v4, 0.0  ;;  %v11606_v4 = vld [vmem:[#allocation259_spill] sm:$0xff] }
 0x4e2   :  { %v8617_v57 = vadd.f32 %v2206_v44, %v8447_v54  ;;  %v2313_v30 = vmax.f32 %v2297_v14, 0.0  ;;  %v2178_v39 = vadd.f32 %v11533_v55, %v11604_v62  ;;  %v8622_v25 = vadd.f32 %v8421_v47, %v2095_v0  ;;  %v11607_v62 = vld [vmem:[#allocation240_spill] sm:$0xff] }
 0x4e3   :  { %3333 = vperm.xlu2 %5618, %v6139_v43   ;;  %v8627_v8 = vmul.f32 %v8502_v6, %v2454_v29  ;;  %v2209_v63 = vmul.f32 %v8283_v5, %v2192_v1  ;;  %v2564_v31 = vadd.f32 %v8456_v45, %v11606_v4  ;;  %v2216_v54 = vadd.f32 %v2200_v37, %v8429_v34  ;;  %v11609_v34 = vld [vmem:[#allocation264_spill] sm:$0xff] }
 0x4e4   :  { %3329 = vperm.xlu1 %5617, %v11520_v23   ;;  %v8614_v9 = vpop.permute.xlu1 %3035  ;;  %v2457_v44 = vmax.f32 %v2441_v13, 0.0  ;;  %v2212_v14 = vmul.f32 %v8283_v5, %v2195_v60  ;;  %v2302_v47 = vadd.f32 %v11554_v56, %v11607_v62  ;;  %v2575_v0 = vmax.f32 %v2559_v49, 0.0  ;;  %v11610_v13 = vld [vmem:[#allocation243_spill] sm:$0xff] }
 0x4e5   :  { %v8605_v2 = vpop.permute.xlu2 %3075  ;;  %11603 = vst [vmem:[#allocation120_spill] sm:$0xff] %v8614_v9  ;;  %v2191_v9 = vmax.f32 %v2175_v26, 0.0  ;;  %v2205_v29 = vmul.f32 %v8283_v5, %v2188_v33  ;;  %v2181_v1 = vadd.f32 %v11533_v55, %v11608_v41  ;;  %v8642_v23 = vadd.f32 %v8432_v48, %v2098_v58  ;;  %v11611_v62 = vld [vmem:[#allocation247_spill] sm:$0xff] }
 0x4e6   :  { %11601 = vst [vmem:[#allocation128_spill] sm:$0xff] %v8605_v2  ;;  %v8624_v2 = vpop.permute.xlu0 %3190  ;;  %v2330_v26 = vmul.f32 %v8388_v59, %v2313_v30  ;;  %v2567_v37 = vadd.f32 %v8456_v45, %v11609_v34  ;;  %v2194_v60 = vmax.f32 %v2178_v39, 0.0  ;;  %v2305_v4 = vadd.f32 %v11554_v56, %v11610_v13 }
 0x4e7   :  { %11605 = vst [vmem:[#allocation124_spill] sm:$0xff] %v8624_v2  ;;  %v8651_v49 = vadd.f32 %v2209_v63, %v8450_v53  ;;  %v2580_v33 = vmax.f32 %v2564_v31, 0.0  ;;  %v2208_v41 = vmul.f32 %v8283_v5, %v2191_v9  ;;  %v2299_v48 = vadd.f32 %v11554_v56, %v11611_v62  ;;  %v11613_v63 = vld [vmem:[#allocation269_spill] sm:$0xff]  ;;  %v11625_v2 = vld [vmem:[#allocation26_spill] sm:$0xff] }
 0x4e8   :  { %v8657_v58 = vmul.f32 %v8502_v6, %v2457_v44  ;;  %v8660_v30 = vadd.f32 %v2212_v14, %v8515_v46  ;;  %v2318_v39 = vmax.f32 %v2302_v47, 0.0  ;;  %v8663_v34 = vadd.f32 %v8444_v3, %v2216_v54 }
 0x4e9   :  { %3976 = vperm.xlu0 %5633, %v6241_v10   ;;  %v11612_v13 = vmov 24   ;;  %v8667_v53 = vmul.f32 %v8588_v61, %v2575_v0  ;;  %v2221_v9 = vadd.f32 %v2205_v29, %v8485_v27  ;;  %v2570_v31 = vadd.f32 %v8456_v45, %v11613_v63 }
 0x4ea   :  { %v2197_v44 = vmax.f32 %v2181_v1, 0.0  ;;  %v8679_v54 = vadd.f32 %v2330_v26, %v8537_v40  ;;  %v2583_v14 = vmax.f32 %v2567_v37, 0.0  ;;  %v2211_v47 = vmul.f32 %v8283_v5, %v2194_v60  ;;  %v11615_v1 = vld [vmem:[#allocation246_spill] sm:$0xff]  ;;  %v11618_v26 = vld [vmem:[#allocation249_spill] sm:$0xff] }
 0x4eb   :  { %5619 = vset.pattern.permute.xlu2 %v11612_v13  ;;  %v2321_v27 = vmax.f32 %v2305_v4, 0.0  ;;  %v8683_v0 = vmul.f32 %v8588_v61, %v2580_v33  ;;  %v2224_v29 = vadd.f32 %v2208_v41, %v8518_v50  ;;  %v2308_v62 = vadd.f32 %v11554_v56, %v11615_v1  ;;  %v11620_v50 = vld [vmem:[#allocation250_spill] sm:$0xff] }
 0x4ec   :  { %3412 = vperm.xlu2 %5619, %v6062_v24   ;;  %3341 = vperm.xlu1 %5617, %v11535_v7   ;;  %v8676_v3 = vpop.permute.xlu1 %3047  ;;  %v2315_v63 = vmax.f32 %v2299_v48, 0.0  ;;  %v2335_v55 = vmul.f32 %v8388_v59, %v2318_v39  ;;  %v8692_v40 = vstv %s8636_s10  ;;  %v2311_v37 = vadd.f32 %v11554_v56, %v11618_v26 }
 0x4ed   :  { %v8673_v46 = vpop.permute.xlu2 %3154  ;;  %11617 = vst [vmem:[#allocation131_spill] sm:$0xff] %v8692_v40  ;;  %v2586_v4 = vmax.f32 %v2570_v31, 0.0  ;;  %v2214_v33 = vmul.f32 %v8283_v5, %v2197_v44  ;;  %v2301_v41 = vadd.f32 %v11554_v56, %v11620_v50  ;;  %v8702_v48 = vadd.f32 %v8496_v15, %v2221_v9  ;;  %v11622_v5 = vld [vmem:[#allocation39_spill] sm:$0xff] }
 0x4ee   :  { %11614 = vst [vmem:[#allocation127_spill] sm:$0xff] %v8673_v46  ;;  %v11616_v46 = vld [vmem:[#allocation273_spill] sm:$0xff]  ;;  %v8696_v60 = vpop.permute.xlu0 %3202  ;;  %v8705_v39 = vmul.f32 %v8588_v61, %v2583_v14  ;;  %v2338_v1 = vmul.f32 %v8388_v59, %v2321_v27  ;;  %v2304_v26 = vadd.f32 %v11554_v56, %v11621_v52  ;;  %v2324_v31 = vmax.f32 %v2308_v62, 0.0 }
 0x4ef   :  { %v2573_v7 = vadd.f32 %v8456_v45, %v11616_v46  ;;  %11619 = vst [vmem:[#allocation123_spill] sm:$0xff] %v8696_v60  ;;  %v2227_v46 = vadd.f32 %v2211_v47, %v8540_v51  ;;  %v2332_v44 = vmul.f32 %v8388_v59, %v2315_v63  ;;  %v2691_v50 = vadd.f32 %v8462_v42, %v11622_v5  ;;  %v11623_v47 = vld [vmem:[#allocation251_spill] sm:$0xff] }
 0x4f0   :  { %v8716_v15 = vadd.f32 %v8532_v28, %v2224_v29  ;;  %v8719_v9 = vadd.f32 %v2335_v55, %v8571_v16  ;;  %v2327_v14 = vmax.f32 %v2311_v37, 0.0  ;;  %v2429_v27 = vadd.f32 %v8454_v19, %v11623_v47  ;;  %v11624_v60 = vld [vmem:[#allocation255_spill] sm:$0xff] }
 0x4f1   :  { %3988 = vperm.xlu0 %5633, %v6139_v43   ;;  %v2589_v51 = vmax.f32 %v2573_v7, 0.0  ;;  %v8724_v52 = vmul.f32 %v8588_v61, %v2586_v4  ;;  %v2230_v62 = vadd.f32 %v2214_v33, %v8559_v32  ;;  %v2317_v63 = vmax.f32 %v2301_v41, 0.0  ;;  %v11628_v7 = vld [vmem:[#allocation34_spill] sm:$0xff] }
 0x4f2   :  { %v2307_v5 = vadd.f32 %v11554_v56, %v11624_v60  ;;  %v8736_v55 = vadd.f32 %v2338_v1, %v8596_v21  ;;  %v2696_v29 = vadd.f32 %v8462_v42, %v11628_v7  ;;  %v2320_v37 = vmax.f32 %v2304_v26, 0.0  ;;  %v11629_v1 = vld [vmem:[#allocation258_spill] sm:$0xff] }
 0x4f3   :  { %v8741_v32 = vadd.f32 %v8551_v36, %v2227_v46  ;;  %v2341_v60 = vmul.f32 %v8388_v59, %v2324_v31  ;;  %v2348_v4 = vadd.f32 %v2332_v44, %v8574_v22  ;;  %v2707_v33 = vmax.f32 %v2691_v50, 0.0  ;;  %v11630_v46 = vld [vmem:[#allocation35_spill] sm:$0xff] }
 0x4f4   :  { %3424 = vperm.xlu2 %5619, %v11625_v2   ;;  %5621 = vset.pattern.permute.xlu1 %v11612_v13  ;;  %v8733_v16 = vpop.permute.xlu1 %3059  ;;  %v8749_v13 = vmul.f32 %v8588_v61, %v2589_v51  ;;  %v2344_v21 = vmul.f32 %v8388_v59, %v2327_v14  ;;  %v2445_v41 = vmax.f32 %v2429_v27, 0.0  ;;  %v2310_v26 = vadd.f32 %v11554_v56, %v11629_v1  ;;  %v11631_v51 = vld [vmem:[#allocation254_spill] sm:$0xff]  ;;  %v11632_v14 = vld [vmem:[#allocation257_spill] sm:$0xff] }
 0x4f5   :  { %v8730_v28 = vpop.permute.xlu2 %3166  ;;  %11627 = vst [vmem:[#allocation130_spill] sm:$0xff] %v8733_v16  ;;  %3420 = vperm.xlu1 %5621, %v11342_v17   ;;  %v2334_v36 = vmul.f32 %v8388_v59, %v2317_v63  ;;  %v2699_v47 = vadd.f32 %v8462_v42, %v11630_v46  ;;  %v2323_v31 = vmax.f32 %v2307_v5, 0.0  ;;  %v8758_v22 = vadd.f32 %v8562_v38, %v2230_v62  ;;  %v11634_v62 = vld [vmem:[#allocation261_spill] sm:$0xff] }
 0x4f6   :  { %11626 = vst [vmem:[#allocation126_spill] sm:$0xff] %v8730_v28  ;;  %v2712_v44 = vmax.f32 %v2696_v29, 0.0  ;;  %v2337_v50 = vmul.f32 %v8388_v59, %v2320_v37  ;;  %v2432_v7 = vadd.f32 %v8454_v19, %v11631_v51  ;;  %v2434_v27 = vadd.f32 %v8454_v19, %v11632_v14  ;;  %v8765_v28 = vpop.permute.xlu0 %3281  ;;  %v11635_v14 = vld [vmem:[#allocation260_spill] sm:$0xff] }
 0x4f7   :  { %11633 = vst [vmem:[#allocation129_spill] sm:$0xff] %v8765_v28  ;;  %v10969_v1 = vmov 29   ;;  %v8769_v63 = vadd.f32 %v2341_v60, %v8622_v25  ;;  %v8772_v38 = vmul.f32 %v8692_v40, %v2707_v33  ;;  %v2428_v5 = vadd.f32 %v8454_v19, %v11634_v62 }
 0x4f8   :  { %v8777_v29 = vadd.f32 %v8580_v12, %v2348_v4  ;;  %v8781_v37 = vadd.f32 %v2344_v21, %v8642_v23  ;;  %v2462_v46 = vmul.f32 %v8502_v6, %v2445_v41  ;;  %v2326_v51 = vmax.f32 %v2310_v26, 0.0  ;;  %v11637_v12 = vld [vmem:[#allocation38_spill] sm:$0xff] }
 0x4f9   :  { %5634 = vset.pattern.permute.xlu0 %v10969_v1  ;;  %v2437_v25 = vadd.f32 %v8454_v19, %v11635_v14  ;;  %v8787_v60 = vadd.f32 %v2334_v36, %v8599_v18  ;;  %v2715_v33 = vmax.f32 %v2699_v47, 0.0  ;;  %v2340_v62 = vmul.f32 %v8388_v59, %v2323_v31  ;;  %v11638_v1 = vld [vmem:[#allocation17_spill] sm:$0xff] }
 0x4fa   :  { %4067 = vperm.xlu0 %5634, %v6062_v24   ;;  %v2702_v4 = vadd.f32 %v8462_v42, %v11637_v12  ;;  %v8798_v41 = vmul.f32 %v8692_v40, %v2712_v44  ;;  %v2353_v26 = vadd.f32 %v2337_v50, %v8617_v57  ;;  %v2448_v14 = vmax.f32 %v2432_v7, 0.0  ;;  %v11641_v36 = vld [vmem:[#allocation29_spill] sm:$0xff] }
 0x4fb   :  { %11636 = vst [vmem:[#allocation133_spill] sm:$0xff] %v8787_v60  ;;  %v2450_v18 = vmax.f32 %v2434_v27, 0.0  ;;  %v11642_v47 = vld [vmem:[#allocation49_spill] sm:$0xff]  ;;  %v2444_v56 = vmax.f32 %v2428_v5, 0.0  ;;  %v8805_v12 = vstv %s8746_s11  ;;  %v11643_v60 = vld [vmem:[#allocation270_spill] sm:$0xff]  ;;  %v2343_v44 = vmul.f32 %v8388_v59, %v2326_v51  ;;  %v11647_v51 = vld [vmem:[#allocation272_spill] sm:$0xff] }
 0x4fc   :  { %3432 = vperm.xlu2 %5619, %v11638_v1   ;;  %v8795_v21 = vpop.permute.xlu1 %3071  ;;  %v2705_v31 = vadd.f32 %v8462_v42, %v11642_v47  ;;  %v2433_v17 = vadd.f32 %v8454_v19, %v11643_v60  ;;  %v2453_v28 = vmax.f32 %v2437_v25, 0.0  ;;  %v11644_v57 = vld [vmem:[#allocation265_spill] sm:$0xff]  ;;  %v8816_v7 = vmul.f32 %v8692_v40, %v2715_v33  ;;  %v11645_v47 = vld [vmem:[#allocation268_spill] sm:$0xff] }
 0x4fd   :  { %v8793_v23 = vpop.permute.xlu2 %3174  ;;  %11640 = vst [vmem:[#allocation132_spill] sm:$0xff] %v8795_v21  ;;  %3428 = vperm.xlu1 %5621, %v11641_v36   ;;  %v2440_v50 = vadd.f32 %v8454_v19, %v11644_v57  ;;  %v2356_v27 = vadd.f32 %v2340_v62, %v8651_v49  ;;  %v2718_v5 = vmax.f32 %v2702_v4, 0.0  ;;  %v2443_v21 = vadd.f32 %v8454_v19, %v11645_v47  ;;  %v11648_v62 = vld [vmem:[#allocation47_spill] sm:$0xff]  ;;  %v11649_v4 = vld [vmem:[#allocation109_spill] sm:$0xff] }
 0x4fe   :  { %11639 = vst [vmem:[#allocation134_spill] sm:$0xff] %v8793_v23  ;;  %v8810_v23 = vadd.f32 %v2462_v46, %v8663_v34  ;;  %v8824_v34 = vmul.f32 %v8502_v6, %v2448_v14  ;;  %v2467_v46 = vmul.f32 %v8502_v6, %v2450_v18  ;;  %v2436_v25 = vadd.f32 %v8454_v19, %v11647_v51  ;;  %v8840_v16 = vpop.permute.xlu0 %3301 }
 0x4ff   :  { %v8830_v60 = vadd.f32 %v8608_v20, %v2353_v26  ;;  %v2721_v33 = vmax.f32 %v2705_v31, 0.0  ;;  %v2461_v49 = vmul.f32 %v8502_v6, %v2444_v56  ;;  %v2823_v57 = vadd.f32 %v11649_v4, %v11648_v62  ;;  %11651 = vst [vmem:[#allocation140_spill] sm:$0xff] %v8840_v16  ;;  %v11652_v26 = vld [vmem:[#allocation271_spill] sm:$0xff]  ;;  %v11653_v62 = vld [vmem:[#allocation24_spill] sm:$0xff] }
 0x500   :  { %11646 = vst [vmem:[#allocation136_spill] sm:$0xff] %v8824_v34  ;;  %v2449_v47 = vmax.f32 %v2433_v17, 0.0  ;;  %v2359_v14 = vadd.f32 %v2343_v44, %v8660_v30  ;;  %v2470_v59 = vmul.f32 %v8502_v6, %v2453_v28  ;;  %v2456_v18 = vmax.f32 %v2440_v50, 0.0  ;;  %v11650_v34 = vld [vmem:[#allocation52_spill] sm:$0xff]  ;;  %v11655_v44 = vld [vmem:[#allocation53_spill] sm:$0xff] }
 0x501   :  { %v2828_v51 = vadd.f32 %v11649_v4, %v11650_v34  ;;  %v8843_v20 = vmul.f32 %v8692_v40, %v2718_v5  ;;  %v2459_v56 = vmax.f32 %v2443_v21, 0.0  ;;  %v2561_v31 = vadd.f32 %v8456_v45, %v11652_v26  ;;  %v11656_v34 = vld [vmem:[#allocation36_spill] sm:$0xff] }
 0x502   :  { %4087 = vperm.xlu0 %5634, %v11638_v1   ;;  %v8848_v17 = vadd.f32 %v8627_v8, %v2356_v27  ;;  %v8854_v28 = vadd.f32 %v2467_v46, %v8702_v48  ;;  %v2831_v50 = vadd.f32 %v11649_v4, %v11655_v44  ;;  %v2452_v5 = vmax.f32 %v2436_v25, 0.0 }
 0x503   :  { %v2439_v21 = vadd.f32 %v8454_v19, %v11656_v34  ;;  %v8864_v8 = vmul.f32 %v8692_v40, %v2721_v33  ;;  %v2477_v27 = vadd.f32 %v2461_v49, %v8679_v54  ;;  %v2466_v48 = vmul.f32 %v8502_v6, %v2449_v47  ;;  %v11658_v33 = vld [vmem:[#allocation40_spill] sm:$0xff]  ;;  %v11659_v47 = vld [vmem:[#allocation65_spill] sm:$0xff] }
 0x504   :  { %3444 = vperm.xlu2 %5619, %v11653_v62   ;;  %v8869_v46 = vadd.f32 %v2470_v59, %v8716_v15  ;;  %v2473_v25 = vmul.f32 %v8502_v6, %v2456_v18  ;;  %v2844_v44 = vmax.f32 %v2828_v51, 0.0  ;;  %v8873_v34 = vadd.f32 %v8657_v58, %v2359_v14  ;;  %v11660_v14 = vld [vmem:[#allocation33_spill] sm:$0xff] }
 0x505   :  { %v8851_v30 = vpop.permute.xlu2 %3186  ;;  %3440 = vperm.xlu1 %5621, %v6099_v35   ;;  %v8861_v26 = vpop.permute.xlu1 %3150  ;;  %v2476_v35 = vmul.f32 %v8502_v6, %v2459_v56  ;;  %v2577_v16 = vmax.f32 %v2561_v31, 0.0  ;;  %v2442_v54 = vadd.f32 %v8454_v19, %v11658_v33  ;;  %v2847_v49 = vmax.f32 %v2831_v50, 0.0  ;;  %v11663_v33 = vld [vmem:[#allocation43_spill] sm:$0xff] }
 0x506   :  { %11654 = vst [vmem:[#allocation135_spill] sm:$0xff] %v8851_v30  ;;  %v2839_v30 = vmax.f32 %v2823_v57, 0.0  ;;  %v2469_v57 = vmul.f32 %v8502_v6, %v2452_v5  ;;  %v2834_v59 = vadd.f32 %v11649_v4, %v11659_v47  ;;  %v2455_v15 = vmax.f32 %v2439_v21, 0.0  ;;  %v11661_v5 = vld [vmem:[#allocation68_spill] sm:$0xff]  ;;  %v11664_v47 = vld [vmem:[#allocation37_spill] sm:$0xff] }
 0x507   :  { %11657 = vst [vmem:[#allocation137_spill] sm:$0xff] %v8861_v26  ;;  %v8877_v26 = vstv %s8821_s2  ;;  %v2482_v58 = vadd.f32 %v2466_v48, %v8719_v9  ;;  %v2566_v51 = vadd.f32 %v8456_v45, %v11660_v14  ;;  %v8891_v56 = vadd.f32 %v8667_v53, %v2477_v27  ;;  %v11662_v21 = vld [vmem:[#allocation112_spill] sm:$0xff] }
 0x508   :  { %v8885_v18 = vmul.f32 %v8805_v12, %v2839_v30  ;;  %v8895_v31 = vadd.f32 %v2473_v25, %v8741_v32  ;;  %v8898_v50 = vmul.f32 %v8805_v12, %v2844_v44  ;;  %v2952_v30 = vadd.f32 %v11662_v21, %v11661_v5  ;;  %v11665_v32 = vld [vmem:[#allocation18_spill] sm:$0xff] }
 0x509   :  { %v2560_v9 = vadd.f32 %v8456_v45, %v11663_v33  ;;  %v8905_v48 = vadd.f32 %v2476_v35, %v8758_v22  ;;  %v2594_v53 = vmul.f32 %v8588_v61, %v2577_v16  ;;  %v2458_v27 = vmax.f32 %v2442_v54, 0.0  ;;  %v8918_v35 = vpop.permute.xlu0 %3313  ;;  %v11670_v22 = vld [vmem:[#allocation32_spill] sm:$0xff] }
 0x50a   :  { %4099 = vperm.xlu0 %5634, %v11653_v62   ;;  %v2569_v14 = vadd.f32 %v8456_v45, %v11664_v47  ;;  %v8914_v44 = vmul.f32 %v8805_v12, %v2847_v49  ;;  %v2485_v5 = vadd.f32 %v2469_v57, %v8736_v55  ;;  %v2850_v19 = vmax.f32 %v2834_v59, 0.0  ;;  %11668 = vst [vmem:[#allocation142_spill] sm:$0xff] %v8918_v35  ;;  %v11673_v59 = vld [vmem:[#allocation71_spill] sm:$0xff]  ;;  %v11674_v35 = vld [vmem:[#allocation46_spill] sm:$0xff] }
 0x50b   :  { %v2472_v33 = vmul.f32 %v8502_v6, %v2455_v15  ;;  %v8925_v54 = vadd.f32 %v8456_v45, %v11670_v22  ;;  %v2582_v47 = vmax.f32 %v2566_v51, 0.0  ;;  %v8932_v55 = vadd.f32 %v8683_v0, %v2482_v58 }
 0x50c   :  { %3456 = vperm.xlu2 %5619, %v11665_v32   ;;  %11667 = vst [vmem:[#allocation143_spill] sm:$0xff] %v8914_v44  ;;  %v2968_v57 = vmax.f32 %v2952_v30, 0.0  ;;  %v2957_v15 = vadd.f32 %v11662_v21, %v11673_v59  ;;  %v8939_v22 = vadd.f32 %v2594_v53, %v8777_v29  ;;  %v2475_v51 = vmul.f32 %v8502_v6, %v2458_v27  ;;  %v11676_v30 = vld [vmem:[#allocation48_spill] sm:$0xff]  ;;  %v11677_v27 = vld [vmem:[#allocation73_spill] sm:$0xff]  ;;  %v11681_v6 = vld [vmem:[#allocation83_spill] sm:$0xff] }
 0x50d   :  { %v8911_v25 = vpop.permute.xlu2 %3198  ;;  %3452 = vperm.xlu1 %5621, %v6241_v10   ;;  %v8921_v16 = vpop.permute.xlu1 %3162  ;;  %11671 = vst [vmem:[#allocation146_spill] sm:$0xff] %v8925_v54  ;;  %v2576_v10 = vmax.f32 %v2560_v9, 0.0  ;;  %v2585_v62 = vmax.f32 %v2569_v14, 0.0  ;;  %v8945_v0 = vmul.f32 %v8805_v12, %v2850_v19  ;;  %v2488_v58 = vadd.f32 %v2472_v33, %v8769_v63  ;;  %v11682_v54 = vld [vmem:[#allocation51_spill] sm:$0xff] }
 0x50e   :  { %11666 = vst [vmem:[#allocation139_spill] sm:$0xff] %v8911_v25  ;;  %v11672_v25 = vld [vmem:[#allocation44_spill] sm:$0xff]  ;;  %v2568_v9 = vadd.f32 %v8456_v45, %v11676_v30  ;;  %v8951_v59 = vadd.f32 %v8705_v39, %v2485_v5  ;;  %v2599_v53 = vmul.f32 %v8588_v61, %v2582_v47  ;;  %v2960_v14 = vadd.f32 %v11662_v21, %v11677_v27  ;;  %v11678_v30 = vld [vmem:[#allocation79_spill] sm:$0xff] }
 0x50f   :  { %11669 = vst [vmem:[#allocation138_spill] sm:$0xff] %v8921_v16  ;;  %v2565_v49 = vadd.f32 %v8456_v45, %v11672_v25  ;;  %v2572_v16 = vadd.f32 %v8456_v45, %v11674_v35  ;;  %v11675_v25 = vld [vmem:[#allocation41_spill] sm:$0xff]  ;;  %v8959_v19 = vmul.f32 %v8877_v26, %v2968_v57  ;;  %v2973_v63 = vmax.f32 %v2957_v15, 0.0  ;;  %v11679_v27 = vld [vmem:[#allocation27_spill] sm:$0xff] }
 0x510   :  { %v2690_v44 = vadd.f32 %v8462_v42, %v11675_v25  ;;  %v2593_v33 = vmul.f32 %v8588_v61, %v2576_v10  ;;  %v2491_v39 = vadd.f32 %v2475_v51, %v8781_v37  ;;  %v2602_v5 = vmul.f32 %v8588_v61, %v2585_v62 }
 0x511   :  { %v2581_v35 = vmax.f32 %v2565_v49, 0.0  ;;  %v2588_v25 = vmax.f32 %v2572_v16, 0.0  ;;  %v2963_v47 = vadd.f32 %v11662_v21, %v11678_v30  ;;  %v2966_v57 = vadd.f32 %v11662_v21, %v11681_v6 }
 0x512   :  { %4111 = vperm.xlu0 %5634, %v11665_v32   ;;  %v2706_v29 = vmax.f32 %v2690_v44, 0.0  ;;  %v2584_v15 = vmax.f32 %v2568_v9, 0.0  ;;  %v2571_v10 = vadd.f32 %v8456_v45, %v11682_v54  ;;  %v8974_v16 = vadd.f32 %v8724_v52, %v2488_v58  ;;  %v11683_v58 = vld [vmem:[#allocation50_spill] sm:$0xff] }
 0x513   :  { %v8980_v62 = vadd.f32 %v2599_v53, %v8830_v60  ;;  %v2976_v44 = vmax.f32 %v2960_v14, 0.0  ;;  %v2598_v51 = vmul.f32 %v8588_v61, %v2581_v35  ;;  %v8984_v30 = vstv %s8929_s5 }
 0x514   :  { %3468 = vperm.xlu2 %5619, %v11679_v27   ;;  %v8987_v6 = vmul.f32 %v8877_v26, %v2973_v63  ;;  %v2609_v54 = vadd.f32 %v2593_v33, %v8810_v23  ;;  %v2605_v52 = vmul.f32 %v8588_v61, %v2588_v25  ;;  %v2695_v9 = vadd.f32 %v8462_v42, %v11683_v58  ;;  %v11685_v33 = vld [vmem:[#allocation55_spill] sm:$0xff] }
 0x515   :  { %v8967_v49 = vpop.permute.xlu2 %3210  ;;  %3464 = vperm.xlu1 %5621, %v6139_v43   ;;  %v8977_v37 = vpop.permute.xlu1 %3170  ;;  %v8996_v60 = vadd.f32 %v2602_v5, %v8848_v17  ;;  %v2979_v53 = vmax.f32 %v2963_v47, 0.0  ;;  %v2723_v14 = vmul.f32 %v8692_v40, %v2706_v29  ;;  %v9000_v35 = vadd.f32 %v8749_v13, %v2491_v39  ;;  %v11686_v17 = vld [vmem:[#allocation54_spill] sm:$0xff]  ;;  %v11687_v47 = vld [vmem:[#allocation64_spill] sm:$0xff] }
 0x516   :  { %11680 = vst [vmem:[#allocation141_spill] sm:$0xff] %v8967_v49  ;;  %v8993_v43 = vpop.permute.xlu0 %3325  ;;  %v2982_v63 = vmax.f32 %v2966_v57, 0.0  ;;  %v2601_v49 = vmul.f32 %v8588_v61, %v2584_v15  ;;  %v2587_v23 = vmax.f32 %v2571_v10, 0.0  ;;  %v2574_v25 = vadd.f32 %v8456_v45, %v11685_v33  ;;  %v11688_v57 = vld [vmem:[#allocation262_spill] sm:$0xff]  ;;  %v11692_v33 = vld [vmem:[#allocation116_spill] sm:$0xff] }
 0x517   :  { %11684 = vst [vmem:[#allocation145_spill] sm:$0xff] %v8993_v43  ;;  %v9006_v58 = vmul.f32 %v8877_v26, %v2976_v44  ;;  %v2614_v43 = vadd.f32 %v2598_v51, %v8854_v28  ;;  %v2698_v5 = vadd.f32 %v8462_v42, %v11686_v17  ;;  %v2697_v29 = vadd.f32 %v8462_v42, %v11687_v47  ;;  %v11691_v51 = vld [vmem:[#allocation87_spill] sm:$0xff] }
 0x518   :  { %v9015_v13 = vadd.f32 %v2605_v52, %v8873_v34  ;;  %v2711_v39 = vmax.f32 %v2695_v9, 0.0  ;;  %v2692_v15 = vadd.f32 %v8462_v42, %v11688_v57  ;;  %v9020_v10 = vadd.f32 %v8772_v38, %v2609_v54  ;;  %v11694_v47 = vld [vmem:[#allocation95_spill] sm:$0xff] }
 0x519   :  { %v9023_v28 = vmul.f32 %v8877_v26, %v2979_v53  ;;  %v9026_v44 = vadd.f32 %v2723_v14, %v8891_v56  ;;  %v9030_v17 = vadd.f32 %v11692_v33, %v11691_v51  ;;  %v3089_v34 = vadd.f32 %v11692_v33, %v11694_v47  ;;  %v11697_v53 = vld [vmem:[#allocation20_spill] sm:$0xff] }
 0x51a   :  { %4123 = vperm.xlu0 %5634, %v11679_v27   ;;  %11689 = vst [vmem:[#allocation144_spill] sm:$0xff] %v9020_v10  ;;  %v11695_v52 = vmov 25   ;;  %v9038_v38 = vmul.f32 %v8877_v26, %v2982_v63  ;;  %v2617_v54 = vadd.f32 %v2601_v49, %v8869_v46  ;;  %v2604_v9 = vmul.f32 %v8588_v61, %v2587_v23  ;;  %v11699_v47 = vld [vmem:[#allocation56_spill] sm:$0xff]  ;;  %v11700_v49 = vld [vmem:[#allocation94_spill] sm:$0xff] }
 0x51b   :  { %11690 = vst [vmem:[#allocation149_spill] sm:$0xff] %v9023_v28  ;;  %v2590_v56 = vmax.f32 %v2574_v25, 0.0  ;;  %v2714_v51 = vmax.f32 %v2698_v5, 0.0  ;;  %v2701_v45 = vadd.f32 %v8462_v42, %v11699_v47  ;;  %v2713_v10 = vmax.f32 %v2697_v29, 0.0  ;;  %v11701_v28 = vld [vmem:[#allocation58_spill] sm:$0xff]  ;;  %v11703_v47 = vld [vmem:[#allocation67_spill] sm:$0xff] }
 0x51c   :  { %11693 = vst [vmem:[#allocation148_spill] sm:$0xff] %v9030_v17  ;;  %5623 = vset.pattern.permute.xlu2 %v11695_v52  ;;  %v9051_v63 = vadd.f32 %v8798_v41, %v2614_v43  ;;  %v2728_v46 = vmul.f32 %v8692_v40, %v2711_v39  ;;  %v3092_v23 = vadd.f32 %v11692_v33, %v11700_v49  ;;  %v2708_v25 = vmax.f32 %v2692_v15, 0.0  ;;  %v11712_v17 = vld [vmem:[#allocation70_spill] sm:$0xff] }
 0x51d   :  { %11696 = vst [vmem:[#allocation147_spill] sm:$0xff] %v9038_v38  ;;  %3547 = vperm.xlu2 %5623, %v11697_v53   ;;  %v9043_v14 = vpop.permute.xlu2 %3289  ;;  %5622 = vset.pattern.permute.xlu1 %v11695_v52  ;;  %v9046_v57 = vpop.permute.xlu1 %3182  ;;  %v3105_v38 = vmax.f32 %v3089_v34, 0.0  ;;  %v2704_v5 = vadd.f32 %v8462_v42, %v11701_v28  ;;  %v2620_v43 = vadd.f32 %v2604_v9, %v8895_v31  ;;  %v2717_v52 = vmax.f32 %v2701_v45, 0.0 }
 0x51e   :  { %11698 = vst [vmem:[#allocation152_spill] sm:$0xff] %v9043_v14  ;;  %3543 = vperm.xlu1 %5622, %v6062_v24   ;;  %v11702_v14 = vld [vmem:[#allocation266_spill] sm:$0xff]  ;;  %v2607_v41 = vmul.f32 %v8588_v61, %v2590_v56  ;;  %v2700_v39 = vadd.f32 %v8462_v42, %v11703_v47  ;;  %v9067_v49 = vadd.f32 %v8816_v7, %v2617_v54  ;;  %v9069_v15 = vpop.permute.xlu0 %3337  ;;  %v10985_v31 = vmov 30   ;;  %v11705_v54 = vld [vmem:[#allocation101_spill] sm:$0xff]  ;;  %v11706_v24 = vld [vmem:[#allocation104_spill] sm:$0xff] }
 0x51f   :  { %v2959_v29 = vadd.f32 %v11662_v21, %v11702_v14  ;;  %11704 = vst [vmem:[#allocation151_spill] sm:$0xff] %v9069_v15  ;;  %v2731_v34 = vmul.f32 %v8692_v40, %v2714_v51  ;;  %v2730_v28 = vmul.f32 %v8692_v40, %v2713_v10  ;;  %v3090_v14 = vadd.f32 %v11692_v33, %v8676_v3 }
 0x520   :  { %v9077_v9 = vadd.f32 %v2728_v46, %v8932_v55  ;;  %v3108_v56 = vmax.f32 %v3092_v23, 0.0  ;;  %v2725_v7 = vmul.f32 %v8692_v40, %v2708_v25  ;;  %v3095_v47 = vadd.f32 %v11692_v33, %v11705_v54 }
 0x521   :  { %v9084_v45 = vmul.f32 %v8984_v30, %v3105_v38  ;;  %v2720_v10 = vmax.f32 %v2704_v5, 0.0  ;;  %v9087_v51 = vstv %s9034_s12  ;;  %v2975_v3 = vmax.f32 %v2959_v29, 0.0 }
 0x522   :  { %5638 = vset.pattern.permute.xlu0 %v10985_v31  ;;  %v2623_v31 = vadd.f32 %v2607_v41, %v8905_v48  ;;  %v3098_v55 = vadd.f32 %v11692_v33, %v11706_v24  ;;  %v2716_v46 = vmax.f32 %v2700_v39, 0.0  ;;  %v9093_v23 = vadd.f32 %v8843_v20, %v2620_v43  ;;  %v11708_v41 = vld [vmem:[#allocation57_spill] sm:$0xff] }
 0x523   :  { %4202 = vperm.xlu0 %5638, %v11697_v53   ;;  %v9101_v38 = vadd.f32 %v2731_v34, %v8951_v59  ;;  %v2734_v5 = vmul.f32 %v8692_v40, %v2717_v52  ;;  %v2746_v48 = vadd.f32 %v2730_v28, %v8980_v62  ;;  %v3106_v29 = vmax.f32 %v3090_v14, 0.0  ;;  %v11710_v34 = vld [vmem:[#allocation111_spill] sm:$0xff]  ;;  %v11711_v28 = vld [vmem:[#allocation98_spill] sm:$0xff] }
 0x524   :  { %v9107_v24 = vmul.f32 %v8984_v30, %v3108_v56  ;;  %v2741_v20 = vadd.f32 %v2725_v7, %v8939_v22  ;;  %v3111_v43 = vmax.f32 %v3095_v47, 0.0  ;;  %v9112_v39 = vadd.f32 %v8462_v42, %v11708_v41  ;;  %v11714_v41 = vld [vmem:[#allocation69_spill] sm:$0xff] }
 0x525   :  { %3559 = vperm.xlu2 %5623, %v11641_v36   ;;  %v9096_v25 = vpop.permute.xlu2 %3297  ;;  %v9098_v54 = vpop.permute.xlu1 %3194  ;;  %v2737_v59 = vmul.f32 %v8692_v40, %v2720_v10  ;;  %v3221_v52 = vadd.f32 %v11710_v34, %v8545_v11  ;;  %v2992_v62 = vmul.f32 %v8877_v26, %v2975_v3  ;;  %v2962_v14 = vadd.f32 %v11662_v21, %v11711_v28  ;;  %v11713_v3 = vld [vmem:[#allocation130_spill] sm:$0xff] }
 0x526   :  { %11707 = vst [vmem:[#allocation150_spill] sm:$0xff] %v9096_v25  ;;  %3555 = vperm.xlu1 %5622, %v11625_v2   ;;  %v3114_v25 = vmax.f32 %v3098_v55, 0.0  ;;  %v2733_v56 = vmul.f32 %v8692_v40, %v2716_v46  ;;  %v2703_v22 = vadd.f32 %v8462_v42, %v11712_v17  ;;  %v9126_v7 = vadd.f32 %v8864_v8, %v2623_v31  ;;  %v11716_v31 = vld [vmem:[#allocation19_spill] sm:$0xff] }
 0x527   :  { %11709 = vst [vmem:[#allocation153_spill] sm:$0xff] %v9112_v39  ;;  %v9129_v47 = vadd.f32 %v2734_v5, %v8974_v16  ;;  %v2877_v11 = vadd.f32 %v8898_v50, %v2746_v48  ;;  %v3123_v10 = vmul.f32 %v8984_v30, %v3106_v29  ;;  %v3093_v55 = vadd.f32 %v11692_v33, %v11713_v3  ;;  %v9144_v16 = vpop.permute.xlu0 %3416 }
 0x528   :  { %v9136_v46 = vmul.f32 %v8984_v30, %v3111_v43  ;;  %v2827_v28 = vadd.f32 %v11649_v4, %v11714_v41  ;;  %v9142_v8 = vadd.f32 %v8885_v18, %v2741_v20  ;;  %11715 = vst [vmem:[#allocation154_spill] sm:$0xff] %v9144_v16  ;;  %v9148_v50 = vadd.f32 %v2737_v59, %v9000_v35  ;;  %v11719_v41 = vld [vmem:[#allocation263_spill] sm:$0xff] }
 0x529   :  { %v3237_v5 = vmax.f32 %v3221_v52, 0.0  ;;  %v3008_v48 = vadd.f32 %v2992_v62, %v2877_v11  ;;  %v2978_v29 = vmax.f32 %v2962_v14, 0.0  ;;  %v9151_v43 = vmul.f32 %v8984_v30, %v3114_v25  ;;  %v11721_v16 = vld [vmem:[#allocation63_spill] sm:$0xff] }
 0x52a   :  { %11717 = vst [vmem:[#allocation157_spill] sm:$0xff] %v9148_v50  ;;  %v2749_v3 = vadd.f32 %v2733_v56, %v8996_v60  ;;  %v2719_v17 = vmax.f32 %v2703_v22, 0.0  ;;  %v2821_v18 = vadd.f32 %v11649_v4, %v11719_v41  ;;  %v9161_v35 = vadd.f32 %v11649_v4, %v11721_v16  ;;  %v11722_v25 = vld [vmem:[#allocation115_spill] sm:$0xff]  ;;  %v11723_v60 = vld [vmem:[#allocation114_spill] sm:$0xff]  ;;  %v11724_v22 = vld [vmem:[#allocation124_spill] sm:$0xff] }
 0x52b   :  { %4222 = vperm.xlu0 %5638, %v11716_v31   ;;  %11718 = vst [vmem:[#allocation156_spill] sm:$0xff] %v9151_v43  ;;  %v3139_v59 = vadd.f32 %v3123_v10, %v3008_v48  ;;  %v3109_v52 = vmax.f32 %v3093_v55, 0.0  ;;  %v9167_v14 = vadd.f32 %v11710_v34, %v11723_v60  ;;  %v2843_v56 = vmax.f32 %v2827_v28, 0.0  ;;  %v11725_v41 = vld [vmem:[#allocation72_spill] sm:$0xff]  ;;  %v11726_v55 = vld [vmem:[#allocation90_spill] sm:$0xff]  ;;  %v11727_v28 = vld [vmem:[#allocation143_spill] sm:$0xff] }
 0x52c   :  { %v3224_v11 = vadd.f32 %v11710_v34, %v11724_v22  ;;  %v2830_v39 = vadd.f32 %v11649_v4, %v11725_v41  ;;  %v3254_v16 = vmul.f32 %v9087_v51, %v3237_v5  ;;  %v2995_v10 = vmul.f32 %v8877_v26, %v2978_v29  ;;  %v11728_v50 = vld [vmem:[#allocation132_spill] sm:$0xff]  ;;  %v11733_v29 = vld [vmem:[#allocation77_spill] sm:$0xff] }
 0x52d   :  { %3567 = vperm.xlu2 %5623, %v11716_v31   ;;  %v3310_v20 = vpop.permute.xlu2 %3309  ;;  %v9157_v42 = vpop.permute.xlu1 %3206  ;;  %v2965_v48 = vadd.f32 %v11662_v21, %v11726_v55  ;;  %v2837_v61 = vmax.f32 %v2821_v18, 0.0  ;;  %v9179_v60 = vstv %s9123_s13  ;;  %v2880_v15 = vadd.f32 %v11727_v28, %v2749_v3  ;;  %v11730_v18 = vld [vmem:[#allocation74_spill] sm:$0xff] }
 0x52e   :  { %11720 = vst [vmem:[#allocation155_spill] sm:$0xff] %v9157_v42  ;;  %v3352_v62 = vadd.f32 %v11722_v25, %v3310_v20  ;;  %3563 = vperm.xlu1 %5622, %v11638_v1   ;;  %v2736_v1 = vmul.f32 %v8692_v40, %v2719_v17  ;;  %v3126_v22 = vmul.f32 %v8984_v30, %v3109_v52  ;;  %v2846_v43 = vmax.f32 %v2830_v39, 0.0  ;;  %v11729_v17 = vld [vmem:[#allocation28_spill] sm:$0xff] }
 0x52f   :  { %v3096_v41 = vadd.f32 %v11692_v33, %v11728_v50  ;;  %v3270_v42 = vadd.f32 %v3254_v16, %v3139_v59  ;;  %v2860_v55 = vmul.f32 %v8805_v12, %v2843_v56  ;;  %v2833_v40 = vadd.f32 %v11649_v4, %v11730_v18  ;;  %v11732_v16 = vld [vmem:[#allocation123_spill] sm:$0xff]  ;;  %v9199_v39 = vpop.permute.xlu0 %3436 }
 0x530   :  { %v3368_v20 = vmax.f32 %v3352_v62, 0.0  ;;  %v3240_v62 = vmax.f32 %v3224_v11, 0.0  ;;  %v3011_v3 = vadd.f32 %v2995_v10, %v2880_v15  ;;  %v2981_v28 = vmax.f32 %v2965_v48, 0.0 }
 0x531   :  { %v2752_v59 = vadd.f32 %v2736_v1, %v9015_v13  ;;  %v2826_v56 = vadd.f32 %v11649_v4, %v11733_v29  ;;  %v2854_v15 = vmul.f32 %v8805_v12, %v2837_v61  ;;  %v9208_v13 = vadd.f32 %v2860_v55, %v9051_v63  ;;  %v11738_v63 = vld [vmem:[#allocation99_spill] sm:$0xff] }
 0x532   :  { %v3385_v5 = vmul.f32 %v9179_v60, %v3368_v20  ;;  %v3227_v20 = vadd.f32 %v11710_v34, %v11732_v16  ;;  %v3142_v10 = vadd.f32 %v3126_v22, %v3011_v3  ;;  %v3257_v29 = vmul.f32 %v9087_v51, %v3240_v62  ;;  %v11736_v16 = vld [vmem:[#allocation76_spill] sm:$0xff] }
 0x533   :  { %4234 = vperm.xlu0 %5638, %v11729_v17   ;;  %v2863_v18 = vmul.f32 %v8805_v12, %v2846_v43  ;;  %v2836_v50 = vadd.f32 %v11649_v4, %v11736_v16  ;;  %v2998_v61 = vmul.f32 %v8877_v26, %v2981_v28  ;;  %v11737_v22 = vld [vmem:[#allocation100_spill] sm:$0xff]  ;;  %v3083_v55 = vadd.f32 %v11692_v33, %v11738_v63  ;;  %v11739_v16 = vld [vmem:[#allocation129_spill] sm:$0xff] }
 0x534   :  { %v9191_v52 = vadd.f32 %v3385_v5, %v3270_v42  ;;  %v3112_v42 = vmax.f32 %v3096_v41, 0.0  ;;  %v11734_v5 = vld [vmem:[#allocation24_spill] sm:$0xff]  ;;  %v2958_v41 = vadd.f32 %v11662_v21, %v11737_v22  ;;  %v2870_v62 = vadd.f32 %v2854_v15, %v9026_v44 }
 0x535   :  { %3579 = vperm.xlu2 %5623, %v11729_v17   ;;  %v3322_v11 = vpop.permute.xlu2 %3321  ;;  %v3273_v17 = vadd.f32 %v3257_v29, %v3142_v10  ;;  %v9224_v28 = vadd.f32 %v2863_v18, %v9067_v49  ;;  %v11743_v29 = vld [vmem:[#allocation140_spill] sm:$0xff] }
 0x536   :  { %11731 = vst [vmem:[#allocation160_spill] sm:$0xff] %v9191_v52  ;;  %v3355_v48 = vadd.f32 %v11722_v25, %v3322_v11  ;;  %3575 = vperm.xlu1 %5622, %v11734_v5   ;;  %v9205_v1 = vpop.permute.xlu1 %3285  ;;  %v2849_v52 = vmax.f32 %v2833_v40, 0.0  ;;  %v3243_v11 = vmax.f32 %v3227_v20, 0.0  ;;  %v2842_v5 = vmax.f32 %v2826_v56, 0.0  ;;  %v11740_v56 = vld [vmem:[#allocation137_spill] sm:$0xff] }
 0x537   :  { %11735 = vst [vmem:[#allocation158_spill] sm:$0xff] %v9205_v1  ;;  %v2883_v1 = vadd.f32 %v8945_v0, %v2752_v59  ;;  %v3129_v43 = vmul.f32 %v8984_v30, %v3112_v42  ;;  %v2852_v20 = vmax.f32 %v2836_v50, 0.0  ;;  %v3214_v0 = vadd.f32 %v11710_v34, %v11740_v56  ;;  %v11741_v59 = vld [vmem:[#allocation22_spill] sm:$0xff]  ;;  %v3449_v56 = vpop.permute.xlu0 %3448 }
 0x538   :  { %v3371_v3 = vmax.f32 %v3355_v48, 0.0  ;;  %v3345_v48 = vadd.f32 %v11722_v25, %v11739_v16  ;;  %v2866_v22 = vmul.f32 %v8805_v12, %v2849_v52  ;;  %v2974_v15 = vmax.f32 %v2958_v41, 0.0  ;;  %v11747_v16 = vld [vmem:[#allocation82_spill] sm:$0xff] }
 0x539   :  { %v3014_v44 = vadd.f32 %v2998_v61, %v2883_v1  ;;  %v3260_v10 = vmul.f32 %v9087_v51, %v3243_v11  ;;  %v2859_v49 = vmul.f32 %v8805_v12, %v2842_v5  ;;  %v3350_v18 = vadd.f32 %v11722_v25, %v11743_v29  ;;  %v11745_v1 = vld [vmem:[#allocation134_spill] sm:$0xff] }
 0x53a   :  { %v3388_v40 = vmul.f32 %v9179_v60, %v3371_v3  ;;  %v9238_v3 = vpop.f32.mrf.mxu1  ;;  %v3099_v50 = vmax.f32 %v3083_v55, 0.0  ;;  %v3001_v52 = vadd.f32 %v8959_v19, %v2870_v62  ;;  %v3361_v11 = vmax.f32 %v3345_v48, 0.0 }
 0x53b   :  { %4246 = vperm.xlu0 %5638, %v11741_v59   ;;  %11744 = vst [vmem:[#allocation161_spill] sm:$0xff] %v9238_v3  ;;  %v3145_v61 = vadd.f32 %v3129_v43, %v3014_v44  ;;  %v2829_v55 = vadd.f32 %v11649_v4, %v11747_v16  ;;  %v3230_v29 = vmax.f32 %v3214_v0, 0.0  ;;  %v9254_v19 = vadd.f32 %v2866_v22, %v9093_v23 }
 0x53c   :  { %v9232_v42 = vadd.f32 %v3388_v40, %v3273_v17  ;;  %v3220_v17 = vadd.f32 %v11710_v34, %v11745_v1  ;;  %v2869_v40 = vmul.f32 %v8805_v12, %v2852_v20  ;;  %v9257_v62 = vperm.slane %v9238_v3, 0  ;;  %v11748_v20 = vld [vmem:[#allocation103_spill] sm:$0xff] }
 0x53d   :  { %3591 = vperm.xlu2 %5623, %v11741_v59   ;;  %v3334_v63 = vpop.permute.xlu2 %3333  ;;  %v2991_v43 = vmul.f32 %v8877_v26, %v2974_v15  ;;  %v3366_v1 = vmax.f32 %v3350_v18, 0.0  ;;  %v3116_v48 = vmul.f32 %v8984_v30, %v3099_v50  ;;  %v2961_v16 = vadd.f32 %v11662_v21, %v11748_v20  ;;  %v11750_v18 = vld [vmem:[#allocation30_spill] sm:$0xff] }
 0x53e   :  { %11742 = vst [vmem:[#allocation159_spill] sm:$0xff] %v9232_v42  ;;  %v3358_v41 = vadd.f32 %v11722_v25, %v3334_v63  ;;  %3587 = vperm.xlu1 %5622, %v11665_v32   ;;  %v9248_v5 = vpop.permute.xlu1 %3293  ;;  %v2875_v63 = vadd.f32 %v2859_v49, %v9077_v9  ;;  %v11749_v32 = vld [vmem:[#allocation81_spill] sm:$0xff]  ;;  %v3236_v23 = vmax.f32 %v3220_v17, 0.0  ;;  %v3276_v22 = vadd.f32 %v3260_v10, %v3145_v61 }
 0x53f   :  { %11746 = vst [vmem:[#allocation163_spill] sm:$0xff] %v9248_v5  ;;  %v2954_v0 = vadd.f32 %v11662_v21, %v11749_v32  ;;  %v3378_v42 = vmul.f32 %v9179_v60, %v3361_v11  ;;  %v9269_v15 = vadd.f32 %v2869_v40, %v9126_v7  ;;  %v2845_v9 = vmax.f32 %v2829_v55, 0.0 }
 0x540   :  { %v3374_v44 = vmax.f32 %v3358_v41, 0.0  ;;  %v3247_v49 = vmul.f32 %v9087_v51, %v3230_v29  ;;  %v9274_v50 = vperm.slane %v9238_v3, 1  ;;  %v3482_v32 = vadd.f32 %v9257_v62, %v9199_v39  ;;  %v11752_v39 = vld [vmem:[#allocation135_spill] sm:$0xff] }
 0x541   :  { %v3007_v10 = vadd.f32 %v2991_v43, %v9208_v13  ;;  %v9282_v61 = vmul.f32 %v9179_v60, %v3366_v1  ;;  %v9285_v7 = vstv %s9240_s14  ;;  %v3132_v41 = vadd.f32 %v3116_v48, %v3001_v52 }
 0x542   :  { %v3391_v5 = vmul.f32 %v9179_v60, %v3374_v44  ;;  %v2977_v11 = vmax.f32 %v2961_v16, 0.0  ;;  %v2970_v40 = vmax.f32 %v2954_v0, 0.0  ;;  %v9289_v55 = vadd.f32 %v8987_v6, %v2875_v63  ;;  %v11753_v16 = vld [vmem:[#allocation105_spill] sm:$0xff] }
 0x543   :  { %4258 = vperm.xlu0 %5638, %v11750_v18   ;;  %v3253_v29 = vmul.f32 %v9087_v51, %v3236_v23  ;;  %v3223_v13 = vadd.f32 %v11710_v34, %v11752_v39  ;;  %v2862_v44 = vmul.f32 %v8805_v12, %v2845_v9  ;;  %v3263_v1 = vadd.f32 %v3247_v49, %v3132_v41  ;;  %v3461_v23 = vpop.permute.xlu0 %3460  ;;  %v11755_v9 = vld [vmem:[#allocation142_spill] sm:$0xff]  ;;  %v11756_v41 = vld [vmem:[#allocation85_spill] sm:$0xff] }
 0x544   :  { %v9279_v17 = vadd.f32 %v3391_v5, %v3276_v22  ;;  %v3498_v20 = vmax.f32 %v3482_v32, 0.0  ;;  %v2964_v6 = vadd.f32 %v11662_v21, %v11753_v16  ;;  %v3138_v63 = vadd.f32 %v9084_v45, %v3007_v10  ;;  %v11754_v22 = vld [vmem:[#allocation110_spill] sm:$0xff] }
 0x545   :  { %3603 = vperm.xlu2 %5623, %v11750_v18   ;;  %v2994_v0 = vmul.f32 %v8877_v26, %v2977_v11  ;;  %v3088_v39 = vadd.f32 %v11692_v33, %v11754_v22  ;;  %v3353_v49 = vadd.f32 %v11722_v25, %v11755_v9  ;;  %v3219_v16 = vadd.f32 %v11710_v34, %v8977_v37 }
 0x546   :  { %11751 = vst [vmem:[#allocation162_spill] sm:$0xff] %v9279_v17  ;;  %v3413_v5 = vpop.permute.xlu2 %3412  ;;  %3599 = vperm.xlu1 %5622, %v11679_v27   ;;  %v3306_v43 = vpop.permute.xlu1 %3305  ;;  %v3269_v32 = vadd.f32 %v3253_v29, %v3138_v63  ;;  %v3394_v45 = vadd.f32 %v3378_v42, %v3263_v1  ;;  %v11002_v3 = vmov 31   ;;  %v3485_v22 = vadd.f32 %v9257_v62, %v3449_v56  ;;  %v11757_v29 = vld [vmem:[#allocation23_spill] sm:$0xff] }
 0x547   :  { %v3476_v52 = vadd.f32 %v9257_v62, %v3413_v5  ;;  %v3351_v48 = vadd.f32 %v11722_v25, %v3306_v43  ;;  %v2832_v5 = vadd.f32 %v11649_v4, %v11756_v41  ;;  %v3239_v43 = vmax.f32 %v3223_v13, 0.0 }
 0x548   :  { %v2980_v9 = vmax.f32 %v2964_v6, 0.0  ;;  %v3010_v13 = vadd.f32 %v2994_v0, %v9224_v28  ;;  %v3104_v37 = vmax.f32 %v3088_v39, 0.0  ;;  %v11758_v1 = vmov 26  }
 0x549   :  { %v3492_v27 = vmax.f32 %v3476_v52, 0.0  ;;  %v3367_v17 = vmax.f32 %v3351_v48, 0.0  ;;  %v2987_v52 = vmul.f32 %v8877_v26, %v2970_v40  ;;  %v3515_v48 = vmul.f32 %v9285_v7, %v3498_v20  ;;  %v11759_v40 = vld [vmem:[#allocation139_spill] sm:$0xff] }
 0x54a   :  { %v3369_v63 = vmax.f32 %v3353_v49, 0.0  ;;  %v2848_v41 = vmax.f32 %v2832_v5, 0.0  ;;  %v3226_v20 = vadd.f32 %v11710_v34, %v11759_v40  ;;  %v3256_v6 = vmul.f32 %v9087_v51, %v3239_v43  ;;  %v11760_v5 = vld [vmem:[#allocation118_spill] sm:$0xff] }
 0x54b   :  { %v3509_v10 = vmul.f32 %v9285_v7, %v3492_v27  ;;  %v3384_v11 = vmul.f32 %v9179_v60, %v3367_v17  ;;  %5642 = vset.pattern.permute.xlu0 %v11002_v3  ;;  %v2878_v17 = vadd.f32 %v2862_v44, %v9101_v38  ;;  %v3235_v0 = vmax.f32 %v3219_v16, 0.0 }
 0x54c   :  { %4337 = vperm.xlu0 %5642, %v11757_v29   ;;  %v9334_v44 = vadd.f32 %v2987_v52, %v9142_v8  ;;  %v2997_v49 = vmul.f32 %v8877_v26, %v2980_v9  ;;  %v3121_v43 = vmul.f32 %v8984_v30, %v3104_v37  ;;  %v3141_v16 = vadd.f32 %v9107_v24, %v3010_v13 }
 0x54d   :  { %v9318_v42 = vadd.f32 %v3509_v10, %v3394_v45  ;;  %v3400_v27 = vadd.f32 %v3384_v11, %v3269_v32  ;;  %5627 = vset.pattern.permute.xlu2 %v11758_v1  ;;  %v3091_v32 = vadd.f32 %v11692_v33, %v11760_v5  ;;  %v11761_v45 = vld [vmem:[#allocation117_spill] sm:$0xff]  ;;  %v3501_v11 = vmax.f32 %v3485_v22, 0.0 }
 0x54e   :  { %3682 = vperm.xlu2 %5627, %v11757_v29   ;;  %v9325_v56 = vpop.permute.xlu2 %3424  ;;  %5626 = vset.pattern.permute.xlu1 %v11758_v1  ;;  %v3318_v28 = vpop.permute.xlu1 %3317  ;;  %v2967_v10 = vadd.f32 %v11662_v21, %v11761_v45  ;;  %v2865_v8 = vmul.f32 %v8805_v12, %v2848_v41  ;;  %v3242_v52 = vmax.f32 %v3226_v20, 0.0  ;;  %v3222_v9 = vadd.f32 %v11710_v34, %v9046_v57  ;;  %v11762_v5 = vld [vmem:[#allocation145_spill] sm:$0xff] }
 0x54f   :  { %v3354_v39 = vadd.f32 %v11722_v25, %v3318_v28  ;;  %3678 = vperm.xlu1 %5626, %v11697_v53   ;;  %v9331_v38 = vadd.f32 %v3515_v48, %v3400_v27  ;;  %v9344_v48 = vmul.f32 %v9179_v60, %v3369_v63  ;;  %v3473_v27 = vpop.permute.xlu0 %3472  ;;  %v3009_v40 = vadd.f32 %v9006_v58, %v2878_v17  ;;  %v11763_v20 = vld [vmem:[#allocation21_spill] sm:$0xff] }
 0x550   :  { %v3272_v28 = vadd.f32 %v3256_v6, %v3141_v16  ;;  %v3252_v22 = vmul.f32 %v9087_v51, %v3235_v0  ;;  %v9354_v24 = vadd.f32 %v11722_v25, %v11762_v5  ;;  %v3013_v13 = vadd.f32 %v2997_v49, %v9254_v19  ;;  %v11764_v45 = vld [vmem:[#allocation141_spill] sm:$0xff] }
 0x551   :  { %v3370_v1 = vmax.f32 %v3354_v39, 0.0  ;;  %v3107_v63 = vmax.f32 %v3091_v32, 0.0  ;;  %v2983_v41 = vmax.f32 %v2967_v10, 0.0  ;;  %v3518_v57 = vmul.f32 %v9285_v7, %v3501_v11 }
 0x552   :  { %v3488_v39 = vadd.f32 %v9257_v62, %v3461_v23  ;;  %v3137_v58 = vadd.f32 %v3121_v43, %v9289_v55  ;;  %v2881_v6 = vadd.f32 %v2865_v8, %v9129_v47  ;;  %v3259_v0 = vmul.f32 %v9087_v51, %v3242_v52  ;;  %v11765_v47 = vld [vmem:[#allocation89_spill] sm:$0xff] }
 0x553   :  { %v3387_v37 = vmul.f32 %v9179_v60, %v3370_v1  ;;  %v3229_v16 = vadd.f32 %v11710_v34, %v11764_v45  ;;  %v3238_v1 = vmax.f32 %v3222_v9, 0.0  ;;  %v2835_v11 = vadd.f32 %v11649_v4, %v11765_v47  ;;  %v11768_v47 = vld [vmem:[#allocation31_spill] sm:$0xff] }
 0x554   :  { %4357 = vperm.xlu0 %5642, %v11763_v20   ;;  %v3268_v32 = vadd.f32 %v3252_v22, %v3137_v58  ;;  %v3124_v43 = vmul.f32 %v8984_v30, %v3107_v63  ;;  %v3000_v8 = vmul.f32 %v8877_v26, %v2983_v41  ;;  %v3144_v52 = vadd.f32 %v9136_v46, %v3013_v13  ;;  %v11767_v58 = vld [vmem:[#allocation121_spill] sm:$0xff] }
 0x555   :  { %v3403_v17 = vadd.f32 %v3387_v37, %v3272_v28  ;;  %v3504_v9 = vmax.f32 %v3488_v39, 0.0  ;;  %v11766_v28 = vld [vmem:[#allocation119_spill] sm:$0xff]  ;;  %v3085_v45 = vadd.f32 %v11692_v33, %v11767_v58  ;;  %v3225_v63 = vadd.f32 %v11710_v34, %v9098_v54  ;;  %v11771_v58 = vld [vmem:[#allocation152_spill] sm:$0xff] }
 0x556   :  { %3690 = vperm.xlu2 %5627, %v11641_v36   ;;  %v3433_v19 = vpop.permute.xlu2 %3432  ;;  %v3330_v49 = vpop.permute.xlu1 %3329  ;;  %v3094_v22 = vadd.f32 %v11692_v33, %v11766_v28  ;;  %v3399_v41 = vadd.f32 %v9282_v61, %v3268_v32  ;;  %v2851_v39 = vmax.f32 %v2835_v11, 0.0  ;;  %v3372_v61 = vmax.f32 %v9354_v24, 0.0 }
 0x557   :  { %v3481_v10 = vadd.f32 %v9257_v62, %v3433_v19  ;;  %v3357_v23 = vadd.f32 %v11722_v25, %v3330_v49  ;;  %3686 = vperm.xlu1 %5626, %v11625_v2   ;;  %v9369_v55 = vadd.f32 %v3518_v57, %v3403_v17  ;;  %v3275_v57 = vadd.f32 %v3259_v0, %v3144_v52 }
 0x558   :  { %v3245_v17 = vmax.f32 %v3229_v16, 0.0  ;;  %v3255_v19 = vmul.f32 %v9087_v51, %v3238_v1  ;;  %v3491_v49 = vadd.f32 %v9257_v62, %v3473_v27  ;;  %v3521_v0 = vmul.f32 %v9285_v7, %v3504_v9  ;;  %v3552_v16 = vpop.permute.xlu0 %3551 }
 0x559   :  { %v3497_v37 = vmax.f32 %v3481_v10, 0.0  ;;  %v3373_v5 = vmax.f32 %v3357_v23, 0.0  ;;  %v3140_v10 = vadd.f32 %v3124_v43, %v3009_v40  ;;  %v3016_v23 = vadd.f32 %v3000_v8, %v9269_v15 }
 0x55a   :  { %v3110_v1 = vmax.f32 %v3094_v22, 0.0  ;;  %v3101_v32 = vmax.f32 %v3085_v45, 0.0  ;;  %v3262_v28 = vmul.f32 %v9087_v51, %v3245_v17  ;;  %v3241_v15 = vmax.f32 %v3225_v63, 0.0  ;;  %v11772_v17 = vld [vmem:[#allocation128_spill] sm:$0xff] }
 0x55b   :  { %v3514_v46 = vmul.f32 %v9285_v7, %v3497_v37  ;;  %v3390_v13 = vmul.f32 %v9179_v60, %v3373_v5  ;;  %v3271_v11 = vadd.f32 %v3255_v19, %v3140_v10  ;;  %v2868_v22 = vmul.f32 %v8805_v12, %v2851_v39  ;;  %v11770_v37 = vld [vmem:[#allocation156_spill] sm:$0xff] }
 0x55c   :  { %4369 = vperm.xlu0 %5642, %v11768_v47   ;;  %v3507_v24 = vmax.f32 %v3491_v49, 0.0  ;;  %v3147_v5 = vadd.f32 %v11770_v37, %v3016_v23  ;;  %v3347_v45 = vadd.f32 %v11722_v25, %v11771_v58  ;;  %v3097_v19 = vadd.f32 %v11692_v33, %v11772_v17  ;;  %v11774_v23 = vld [vmem:[#allocation155_spill] sm:$0xff] }
 0x55d   :  { %v9390_v52 = vadd.f32 %v3514_v46, %v3399_v41  ;;  %v3406_v54 = vadd.f32 %v3390_v13, %v3275_v57  ;;  %v3127_v57 = vmul.f32 %v8984_v30, %v3110_v1  ;;  %v11773_v46 = vld [vmem:[#allocation149_spill] sm:$0xff]  ;;  %v3118_v10 = vmul.f32 %v8984_v30, %v3101_v32 }
 0x55e   :  { %3702 = vperm.xlu2 %5627, %v11763_v20   ;;  %v3445_v27 = vpop.permute.xlu2 %3444  ;;  %v3342_v40 = vpop.permute.xlu1 %3341  ;;  %v3012_v13 = vadd.f32 %v11773_v46, %v2881_v6  ;;  %v3402_v39 = vadd.f32 %v9344_v48, %v3271_v11  ;;  %v3258_v49 = vmul.f32 %v9087_v51, %v3241_v15  ;;  %v3524_v32 = vmul.f32 %v9285_v7, %v3507_v24  ;;  %v11777_v48 = vld [vmem:[#allocation25_spill] sm:$0xff] }
 0x55f   :  { %11769 = vst [vmem:[#allocation166_spill] sm:$0xff] %v9390_v52  ;;  %v3484_v43 = vadd.f32 %v9257_v62, %v3445_v27  ;;  %v3360_v8 = vadd.f32 %v11722_v25, %v3342_v40  ;;  %3698 = vperm.xlu1 %5626, %v11716_v31   ;;  %v9398_v9 = vadd.f32 %v3521_v0, %v3406_v54  ;;  %v11775_v40 = vld [vmem:[#allocation157_spill] sm:$0xff]  ;;  %v3113_v37 = vmax.f32 %v3097_v19, 0.0 }
 0x560   :  { %v3278_v0 = vadd.f32 %v3262_v28, %v3147_v5  ;;  %v3228_v54 = vadd.f32 %v11710_v34, %v11774_v23  ;;  %v3363_v28 = vmax.f32 %v3347_v45, 0.0  ;;  %v3143_v11 = vadd.f32 %v3127_v57, %v3012_v13  ;;  %v9433_v57 = vpop.permute.xlu0 %3571  ;;  %v11782_v23 = vld [vmem:[#allocation151_spill] sm:$0xff] }
 0x561   :  { %v3500_v63 = vmax.f32 %v3484_v43, 0.0  ;;  %v3376_v41 = vmax.f32 %v3360_v8, 0.0  ;;  %v2884_v43 = vadd.f32 %v2868_v22, %v11775_v40  ;;  %v11776_v8 = vld [vmem:[#allocation91_spill] sm:$0xff]  ;;  %v11779_v58 = vmax.f32 %v9161_v35, 0.0  ;;  %v11781_v35 = vld [vmem:[#allocation28_spill] sm:$0xff] }
 0x562   :  { %v2953_v6 = vadd.f32 %v11662_v21, %v11776_v8  ;;  %v3134_v24 = vadd.f32 %v3118_v10, %v9334_v44  ;;  %v3274_v19 = vadd.f32 %v3258_v49, %v3143_v11  ;;  %v3244_v46 = vmax.f32 %v3228_v54, 0.0  ;;  %v11783_v49 = vld [vmem:[#allocation147_spill] sm:$0xff] }
 0x563   :  { %v3517_v1 = vmul.f32 %v9285_v7, %v3500_v63  ;;  %v3393_v27 = vmul.f32 %v9179_v60, %v3376_v41  ;;  %v2855_v17 = vmul.f32 %v8805_v12, %v11779_v58  ;;  %v11780_v63 = vmax.f32 %v9167_v14, 0.0  ;;  %v11784_v11 = vld [vmem:[#allocation127_spill] sm:$0xff] }
 0x564   :  { %4381 = vperm.xlu0 %5642, %v11777_v48   ;;  %v3609_v41 = vadd.f32 %v9274_v50, %v3552_v16  ;;  %v2969_v16 = vmax.f32 %v2953_v6, 0.0  ;;  %v3380_v44 = vmul.f32 %v9179_v60, %v3363_v28  ;;  %v3015_v54 = vadd.f32 %v11783_v49, %v2884_v43  ;;  %v11785_v43 = vld [vmem:[#allocation158_spill] sm:$0xff]  ;;  %v11788_v49 = vld [vmem:[#allocation144_spill] sm:$0xff] }
 0x565   :  { %v9422_v15 = vadd.f32 %v3517_v1, %v3402_v39  ;;  %v3409_v5 = vadd.f32 %v3393_v27, %v3278_v0  ;;  %v3249_v22 = vmul.f32 %v9087_v51, %v11780_v63  ;;  %v3389_v39 = vmul.f32 %v9179_v60, %v3372_v61 }
 0x566   :  { %3714 = vperm.xlu2 %5627, %v11768_v47   ;;  %v3457_v45 = vpop.permute.xlu2 %3456  ;;  %v3359_v1 = vadd.f32 %v11722_v25, %v11782_v23  ;;  %v3130_v27 = vmul.f32 %v8984_v30, %v3113_v37  ;;  %v3625_v8 = vmax.f32 %v3609_v41, 0.0  ;;  %v9449_v61 = vstv %s9410_s3 }
 0x567   :  { %11778 = vst [vmem:[#allocation164_spill] sm:$0xff] %v9422_v15  ;;  %v3487_v13 = vadd.f32 %v9257_v62, %v3457_v45  ;;  %3710 = vperm.xlu1 %5626, %v11781_v35   ;;  %v3421_v0 = vpop.permute.xlu1 %3420  ;;  %v9437_v14 = vadd.f32 %v3524_v32, %v3409_v5  ;;  %v3215_v32 = vadd.f32 %v11710_v34, %v11784_v11  ;;  %v11790_v11 = vld [vmem:[#allocation136_spill] sm:$0xff]  ;;  %v11801_v35 = vld [vmem:[#allocation131_spill] sm:$0xff] }
 0x568   :  { %v3478_v10 = vadd.f32 %v9257_v62, %v3421_v0  ;;  %v3265_v5 = vadd.f32 %v3249_v22, %v3134_v24  ;;  %v3261_v6 = vmul.f32 %v9087_v51, %v3244_v46  ;;  %v3405_v28 = vadd.f32 %v3389_v39, %v3274_v19 }
 0x569   :  { %v3503_v40 = vmax.f32 %v3487_v13, 0.0  ;;  %v2986_v45 = vmul.f32 %v8877_v26, %v2969_v16  ;;  %v3346_v37 = vadd.f32 %v11722_v25, %v11785_v43  ;;  %v11786_v13 = vld [vmem:[#allocation66_spill] sm:$0xff]  ;;  %v3375_v22 = vmax.f32 %v3359_v1, 0.0 }
 0x56a   :  { %v3494_v58 = vmax.f32 %v3478_v10, 0.0  ;;  %v3396_v0 = vadd.f32 %v3380_v44, %v3265_v5  ;;  %v2825_v23 = vadd.f32 %v11649_v4, %v11786_v13  ;;  %v3146_v24 = vadd.f32 %v3130_v27, %v3015_v54  ;;  %v11789_v44 = vld [vmem:[#allocation133_spill] sm:$0xff] }
 0x56b   :  { %v3520_v63 = vmul.f32 %v9285_v7, %v3503_v40  ;;  %v2871_v46 = vadd.f32 %v2855_v17, %v11788_v49  ;;  %v3642_v19 = vmul.f32 %v9449_v61, %v3625_v8  ;;  %v3231_v39 = vmax.f32 %v3215_v32, 0.0  ;;  %v11792_v17 = vld [vmem:[#allocation146_spill] sm:$0xff]  ;;  %v11794_v8 = vld [vmem:[#allocation125_spill] sm:$0xff] }
 0x56c   :  { %v3511_v41 = vmul.f32 %v9285_v7, %v3494_v58  ;;  %v2481_v5 = vadd.f32 %v11790_v11, %v11789_v44  ;;  %v11791_v58 = vld [vmem:[#allocation84_spill] sm:$0xff]  ;;  %v3277_v13 = vadd.f32 %v3261_v6, %v3146_v24  ;;  %v11793_v27 = vmax.f32 %v11792_v17, 0.0  ;;  %v3584_v6 = vpop.permute.xlu0 %3583 }
 0x56d   :  { %v9459_v10 = vadd.f32 %v3520_v63, %v3405_v28  ;;  %v2956_v43 = vadd.f32 %v11662_v21, %v11791_v58  ;;  %v3002_v28 = vadd.f32 %v2986_v45, %v2871_v46  ;;  %v3362_v63 = vmax.f32 %v3346_v37, 0.0  ;;  %v11796_v44 = vld [vmem:[#allocation120_spill] sm:$0xff]  ;;  %v11802_v45 = vld [vmem:[#allocation154_spill] sm:$0xff] }
 0x56e   :  { %v3527_v40 = vadd.f32 %v3511_v41, %v3396_v0  ;;  %3726 = vperm.xlu2 %5627, %v11777_v48   ;;  %v3469_v16 = vpop.permute.xlu2 %3468  ;;  %v2596_v32 = vmul.f32 %v11794_v8, %v11793_v27  ;;  %v2841_v41 = vmax.f32 %v2825_v23, 0.0  ;;  %v3392_v49 = vmul.f32 %v9179_v60, %v3375_v22  ;;  %v11803_v22 = vld [vmem:[#allocation126_spill] sm:$0xff] }
 0x56f   :  { %11787 = vst [vmem:[#allocation165_spill] sm:$0xff] %v9459_v10  ;;  %v3490_v1 = vadd.f32 %v9257_v62, %v3469_v16  ;;  %3722 = vperm.xlu1 %5626, %v11741_v59   ;;  %v3429_v54 = vpop.permute.xlu1 %3428  ;;  %v3087_v11 = vadd.f32 %v11692_v33, %v11796_v44  ;;  %v11797_v16 = vld [vmem:[#allocation148_spill] sm:$0xff]  ;;  %v11799_v59 = vld [vmem:[#allocation153_spill] sm:$0xff]  ;;  %v3477_v37 = vadd.f32 %v9257_v62, %v11802_v45  ;;  %v2972_v46 = vmax.f32 %v2956_v43, 0.0  ;;  %v11804_v44 = vld [vmem:[#allocation78_spill] sm:$0xff] }
 0x570   :  { %v9473_v0 = vadd.f32 %v3642_v19, %v3527_v40  ;;  %v11798_v58 = vmax.f32 %v11797_v16, 0.0  ;;  %v11800_v17 = vmax.f32 %v11799_v59, 0.0  ;;  %v3248_v23 = vmul.f32 %v9087_v51, %v3231_v39  ;;  %v11805_v16 = vld [vmem:[#allocation92_spill] sm:$0xff] }
 0x571   :  { %v3506_v24 = vmax.f32 %v3490_v1, 0.0  ;;  %v3218_v19 = vadd.f32 %v11710_v34, %v11803_v22  ;;  %v3408_v40 = vadd.f32 %v3392_v49, %v3277_v13  ;;  %v9492_v31 = vadd.f32 %v11805_v16, %v11804_v44  ;;  %v11807_v22 = vld [vmem:[#allocation93_spill] sm:$0xff]  ;;  %v11809_v49 = vld [vmem:[#allocation80_spill] sm:$0xff]  ;;  %v11810_v44 = vld [vmem:[#allocation150_spill] sm:$0xff] }
 0x572   :  { %11795 = vst [vmem:[#allocation169_spill] sm:$0xff] %v9473_v0  ;;  %v3117_v3 = vmul.f32 %v8984_v30, %v11798_v58  ;;  %v2727_v27 = vmul.f32 %v11801_v35, %v11800_v17  ;;  %v2612_v58 = vadd.f32 %v2596_v32, %v2481_v5  ;;  %v3379_v17 = vmul.f32 %v9179_v60, %v3362_v63  ;;  %v11812_v32 = vld [vmem:[#allocation190_spill] sm:$0xff] }
 0x573   :  { %v3523_v1 = vmul.f32 %v9285_v7, %v3506_v24  ;;  %v2858_v10 = vmul.f32 %v8805_v12, %v2841_v41  ;;  %v3614_v39 = vadd.f32 %v9274_v50, %v9433_v57  ;;  %v3103_v43 = vmax.f32 %v3087_v11, 0.0 }
 0x574   :  { %v3133_v59 = vadd.f32 %v3117_v3, %v3002_v28  ;;  %v11808_v13 = vmax.f32 %v11807_v22, 0.0  ;;  %v3493_v15 = vmax.f32 %v3477_v37, 0.0  ;;  %v3349_v5 = vadd.f32 %v11722_v25, %v11810_v44  ;;  %v11813_v28 = vld [vmem:[#allocation59_spill] sm:$0xff] }
 0x575   :  { %v9498_v45 = vadd.f32 %v3523_v1, %v3408_v40  ;;  %v11811_v3 = vmov 27   ;;  %v1907_v63 = vadd.f32 %v11813_v28, %v11812_v32  ;;  %v2743_v41 = vadd.f32 %v2727_v27, %v2612_v58  ;;  %v11814_v40 = vld [vmem:[#allocation16_spill] sm:$0xff] }
 0x576   :  { %v1809_v24 = vmul.f32 %v11809_v49, %v11808_v13  ;;  %v3264_v0 = vadd.f32 %v3248_v23, %v3133_v59  ;;  %5628 = vset.pattern.permute.xlu2 %v11811_v3  ;;  %v2989_v57 = vmul.f32 %v8877_v26, %v2972_v46  ;;  %v3234_v11 = vmax.f32 %v3218_v19, 0.0  ;;  %v11815_v13 = vld [vmem:[#allocation216_spill] sm:$0xff] }
 0x577   :  { %11806 = vst [vmem:[#allocation167_spill] sm:$0xff] %v9498_v45  ;;  %3805 = vperm.xlu2 %5628, %v11814_v40   ;;  %v3548_v1 = vpop.permute.xlu2 %3547  ;;  %3734 = vperm.xlu1 %5626, %v11750_v18   ;;  %v3441_v16 = vpop.permute.xlu1 %3440  ;;  %v3480_v23 = vadd.f32 %v9257_v62, %v3429_v54  ;;  %v11816_v49 = vld [vmem:[#allocation60_spill] sm:$0xff]  ;;  %v2874_v27 = vadd.f32 %v2858_v10, %v2743_v41  ;;  %v3630_v58 = vmax.f32 %v3614_v39, 0.0  ;;  %v3365_v32 = vmax.f32 %v3349_v5, 0.0  ;;  %v11819_v41 = vld [vmem:[#allocation237_spill] sm:$0xff] }
 0x578   :  { %v3395_v37 = vadd.f32 %v3379_v17, %v3264_v0  ;;  %v3608_v59 = vadd.f32 %v9274_v50, %v3548_v1  ;;  %v3483_v22 = vadd.f32 %v9257_v62, %v3441_v16  ;;  %v2038_v44 = vadd.f32 %v11816_v49, %v11815_v13  ;;  %v11817_v0 = vld [vmem:[#allocation233_spill] sm:$0xff]  ;;  %v3596_v1 = vpop.permute.xlu0 %3595 }
 0x579   :  { %v3120_v46 = vmul.f32 %v8984_v30, %v3103_v43  ;;  %v3510_v19 = vmul.f32 %v9285_v7, %v3493_v15  ;;  %v1923_v45 = vmax.f32 %v1907_v63, 0.0  ;;  %v11818_v17 = vld [vmem:[#allocation61_spill] sm:$0xff]  ;;  %v3005_v40 = vadd.f32 %v2989_v57, %v2874_v27  ;;  %v11820_v15 = vld [vmem:[#allocation62_spill] sm:$0xff] }
 0x57a   :  { %v3624_v28 = vmax.f32 %v3608_v59, 0.0  ;;  %v3499_v18 = vmax.f32 %v3483_v22, 0.0  ;;  %v2169_v54 = vadd.f32 %v11818_v17, %v11817_v0  ;;  %v3251_v16 = vmul.f32 %v9087_v51, %v3234_v11  ;;  %v11821_v11 = vld [vmem:[#allocation160_spill] sm:$0xff] }
 0x57b   :  { %v3496_v53 = vmax.f32 %v3480_v23, 0.0  ;;  %v3526_v52 = vadd.f32 %v3510_v19, %v3395_v37  ;;  %v2054_v43 = vmax.f32 %v2038_v44, 0.0  ;;  %v2300_v5 = vadd.f32 %v11820_v15, %v11819_v41  ;;  %v11822_v37 = vld [vmem:[#allocation86_spill] sm:$0xff]  ;;  %v11823_v19 = vld [vmem:[#allocation267_spill] sm:$0xff] }
 0x57c   :  { %v3641_v10 = vmul.f32 %v9449_v61, %v3624_v28  ;;  %v3516_v39 = vmul.f32 %v9285_v7, %v3499_v18  ;;  %v3647_v59 = vmul.f32 %v9449_v61, %v3630_v58  ;;  %v3136_v63 = vadd.f32 %v3120_v46, %v3005_v40  ;;  %v11824_v18 = vld [vmem:[#allocation106_spill] sm:$0xff] }
 0x57d   :  { %v3617_v22 = vadd.f32 %v9274_v50, %v3584_v6  ;;  %v3382_v57 = vmul.f32 %v9179_v60, %v3365_v32  ;;  %v1940_v49 = vmul.f32 %v11822_v37, %v1923_v45  ;;  %v2185_v27 = vmax.f32 %v2169_v54, 0.0  ;;  %v11825_v32 = vld [vmem:[#allocation88_spill] sm:$0xff] }
 0x57e   :  { %v9528_v13 = vadd.f32 %v3641_v10, %v3526_v52  ;;  %v3532_v23 = vadd.f32 %v3516_v39, %v11821_v11  ;;  %v2431_v44 = vadd.f32 %v11824_v18, %v11823_v19  ;;  %v3267_v28 = vadd.f32 %v3251_v16, %v3136_v63  ;;  %v11826_v16 = vld [vmem:[#allocation42_spill] sm:$0xff]  ;;  %v11827_v10 = vld [vmem:[#allocation113_spill] sm:$0xff]  ;;  %v11828_v11 = vld [vmem:[#allocation96_spill] sm:$0xff] }
 0x57f   :  { %3817 = vperm.xlu2 %5628, %v11625_v2   ;;  %v3560_v0 = vpop.permute.xlu2 %3559  ;;  %5630 = vset.pattern.permute.xlu1 %v11811_v3  ;;  %v3453_v40 = vpop.permute.xlu1 %3452  ;;  %v3513_v6 = vmul.f32 %v9285_v7, %v3496_v53  ;;  %v1825_v46 = vadd.f32 %v1809_v24, %v9492_v31  ;;  %v2071_v17 = vmul.f32 %v11825_v32, %v2054_v43  ;;  %v2316_v54 = vmax.f32 %v2300_v5, 0.0  ;;  %v11829_v18 = vld [vmem:[#allocation45_spill] sm:$0xff]  ;;  %v11831_v5 = vld [vmem:[#allocation107_spill] sm:$0xff] }
 0x580   :  { %v3611_v52 = vadd.f32 %v9274_v50, %v3560_v0  ;;  %v3486_v58 = vadd.f32 %v9257_v62, %v3453_v40  ;;  %3813 = vperm.xlu1 %5630, %v11757_v29   ;;  %v9540_v45 = vadd.f32 %v3647_v59, %v3532_v23  ;;  %v2562_v39 = vadd.f32 %v11827_v10, %v11826_v16  ;;  %v11830_v0 = vld [vmem:[#allocation108_spill] sm:$0xff]  ;;  %v11835_v10 = vld [vmem:[#allocation17_spill] sm:$0xff] }
 0x581   :  { %v3633_v3 = vmax.f32 %v3617_v22, 0.0  ;;  %v3398_v41 = vadd.f32 %v3382_v57, %v3267_v28  ;;  %v1956_v63 = vadd.f32 %v1940_v49, %v1825_v46  ;;  %v2202_v37 = vmul.f32 %v11828_v11, %v2185_v27  ;;  %v11832_v22 = vld [vmem:[#allocation75_spill] sm:$0xff]  ;;  %v3675_v28 = vpop.permute.xlu0 %3674  ;;  %v11834_v46 = vld [vmem:[#allocation122_spill] sm:$0xff] }
 0x582   :  { %v3627_v15 = vmax.f32 %v3611_v52, 0.0  ;;  %v3502_v53 = vmax.f32 %v3486_v58, 0.0  ;;  %v2447_v19 = vmax.f32 %v2431_v44, 0.0  ;;  %v2693_v59 = vadd.f32 %v11830_v0, %v11829_v18  ;;  %v11833_v52 = vld [vmem:[#allocation159_spill] sm:$0xff] }
 0x583   :  { %v3529_v23 = vadd.f32 %v3513_v6, %v3398_v41  ;;  %v2087_v43 = vadd.f32 %v2071_v17, %v1956_v63  ;;  %v2333_v40 = vmul.f32 %v11831_v5, %v2316_v54  ;;  %v2578_v32 = vmax.f32 %v2562_v39, 0.0 }
 0x584   :  { %v3644_v31 = vmul.f32 %v9449_v61, %v3627_v15  ;;  %v3519_v24 = vmul.f32 %v9285_v7, %v3502_v53  ;;  %v2824_v57 = vadd.f32 %v11649_v4, %v11832_v22  ;;  %v3650_v49 = vmul.f32 %v9449_v61, %v3633_v3  ;;  %v11836_v53 = vld [vmem:[#allocation97_spill] sm:$0xff] }
 0x585   :  { %v3620_v27 = vadd.f32 %v9274_v50, %v3596_v1  ;;  %v2218_v58 = vadd.f32 %v2202_v37, %v2087_v43  ;;  %v2464_v16 = vmul.f32 %v11834_v46, %v2447_v19  ;;  %v2709_v39 = vmax.f32 %v2693_v59, 0.0  ;;  %v11837_v59 = vld [vmem:[#allocation161_spill] sm:$0xff]  ;;  %v11841_v46 = vld [vmem:[#allocation163_spill] sm:$0xff] }
 0x586   :  { %v9556_v44 = vadd.f32 %v3644_v31, %v3529_v23  ;;  %v3535_v6 = vadd.f32 %v3519_v24, %v11833_v52  ;;  %v2595_v15 = vmul.f32 %v11794_v8, %v2578_v32  ;;  %v2955_v63 = vadd.f32 %v11662_v21, %v11836_v53  ;;  %v11838_v31 = vld [vmem:[#allocation102_spill] sm:$0xff] }
 0x587   :  { %3825 = vperm.xlu2 %5628, %v11835_v10   ;;  %v3568_v17 = vpop.permute.xlu2 %3567  ;;  %v3465_v54 = vpop.permute.xlu1 %3464  ;;  %v2349_v1 = vadd.f32 %v2333_v40, %v2218_v58  ;;  %v2840_v11 = vmax.f32 %v2824_v57, 0.0  ;;  %v3636_v37 = vmax.f32 %v3620_v27, 0.0  ;;  %v9570_v23 = vperm.slane %v11837_v59, 2  ;;  %v11839_v32 = vld [vmem:[#allocation138_spill] sm:$0xff] }
 0x588   :  { %v3613_v41 = vadd.f32 %v9274_v50, %v3568_v17  ;;  %v3489_v4 = vadd.f32 %v9257_v62, %v3465_v54  ;;  %3821 = vperm.xlu1 %5630, %v11641_v36   ;;  %v9564_v3 = vadd.f32 %v3650_v49, %v3535_v6  ;;  %v3086_v24 = vadd.f32 %v11692_v33, %v11838_v31  ;;  %v11840_v33 = vld [vmem:[#allocation162_spill] sm:$0xff]  ;;  %v11842_v17 = vld [vmem:[#allocation24_spill] sm:$0xff] }
 0x589   :  { %v2480_v0 = vadd.f32 %v2464_v16, %v2349_v1  ;;  %v2726_v43 = vmul.f32 %v11801_v35, %v2709_v39  ;;  %v2971_v40 = vmax.f32 %v2955_v63, 0.0  ;;  %v3217_v22 = vadd.f32 %v11710_v34, %v11839_v32  ;;  %v3695_v58 = vpop.permute.xlu0 %3694 }
 0x58a   :  { %v3629_v19 = vmax.f32 %v3613_v41, 0.0  ;;  %v3505_v18 = vmax.f32 %v3489_v4, 0.0  ;;  %v2857_v57 = vmul.f32 %v8805_v12, %v2840_v11  ;;  %v3653_v49 = vmul.f32 %v9449_v61, %v3636_v37 }
 0x58b   :  { %v2611_v21 = vadd.f32 %v2595_v15, %v2480_v0  ;;  %v3102_v52 = vmax.f32 %v3086_v24, 0.0  ;;  %v3738_v6 = vadd.f32 %v9570_v23, %v3675_v28  ;;  %v3348_v16 = vadd.f32 %v11722_v25, %v11841_v46 }
 0x58c   :  { %v3646_v8 = vmul.f32 %v9449_v61, %v3629_v19  ;;  %v3522_v5 = vmul.f32 %v9285_v7, %v3505_v18  ;;  %v2988_v41 = vmul.f32 %v8877_v26, %v2971_v40  ;;  %v3233_v4 = vmax.f32 %v3217_v22, 0.0 }
 0x58d   :  { %v2742_v34 = vadd.f32 %v2726_v43, %v2611_v21  ;;  %v3479_v28 = vadd.f32 %v9257_v62, %v9325_v56  ;;  %v3119_v53 = vmul.f32 %v8984_v30, %v3102_v52  ;;  %v3754_v63 = vmax.f32 %v3738_v6, 0.0 }
 0x58e   :  { %v9584_v27 = vadd.f32 %v3646_v8, %v9331_v38  ;;  %v3538_v35 = vadd.f32 %v3522_v5, %v11840_v33  ;;  %v3364_v11 = vmax.f32 %v3348_v16, 0.0  ;;  %v9601_v19 = vstv %s9575_s15  ;;  %v11843_v5 = vld [vmem:[#allocation18_spill] sm:$0xff] }
 0x58f   :  { %3837 = vperm.xlu2 %5628, %v11842_v17   ;;  %v3580_v54 = vpop.permute.xlu2 %3579  ;;  %v2873_v1 = vadd.f32 %v2857_v57, %v2742_v34  ;;  %v3250_v26 = vmul.f32 %v9087_v51, %v3233_v4  ;;  %v3495_v31 = vmax.f32 %v3479_v28, 0.0  ;;  %v3771_v43 = vmul.f32 %v9601_v19, %v3754_v63 }
 0x590   :  { %v3616_v12 = vadd.f32 %v9274_v50, %v3580_v54  ;;  %3833 = vperm.xlu1 %5630, %v11763_v20   ;;  %v3544_v38 = vpop.permute.xlu1 %3543  ;;  %v9593_v39 = vadd.f32 %v3653_v49, %v3538_v35  ;;  %v3381_v30 = vmul.f32 %v9179_v60, %v3364_v11  ;;  %v3743_v16 = vadd.f32 %v9570_v23, %v3695_v58  ;;  %v11845_v11 = vld [vmem:[#allocation166_spill] sm:$0xff] }
 0x591   :  { %v3607_v25 = vadd.f32 %v9274_v50, %v3544_v38  ;;  %v3004_v0 = vadd.f32 %v2988_v41, %v2873_v1  ;;  %v3707_v32 = vpop.permute.xlu0 %3706 }
 0x592   :  { %v3632_v15 = vmax.f32 %v3616_v12, 0.0  ;;  %v3759_v28 = vmax.f32 %v3743_v16, 0.0  ;;  %v3746_v63 = vadd.f32 %v9570_v23, %v3707_v32 }
 0x593   :  { %v3623_v37 = vmax.f32 %v3607_v25, 0.0  ;;  %v3135_v56 = vadd.f32 %v3119_v53, %v3004_v0  ;;  %v11847_v0 = vld [vmem:[#allocation20_spill] sm:$0xff] }
 0x594   :  { %v3649_v18 = vmul.f32 %v9449_v61, %v3632_v15  ;;  %v3776_v53 = vmul.f32 %v9601_v19, %v3759_v28 }
 0x595   :  { %v3640_v24 = vmul.f32 %v9449_v61, %v3623_v37  ;;  %v3266_v22 = vadd.f32 %v3250_v26, %v3135_v56 }
 0x596   :  { %v9607_v62 = vadd.f32 %v3649_v18, %v9369_v55  ;;  %v3512_v55 = vmul.f32 %v9285_v7, %v3495_v31  ;;  %v11844_v7 = vld [vmem:[#allocation27_spill] sm:$0xff]  ;;  %v11846_v18 = vmov 28  }
 0x597   :  { %v3656_v8 = vadd.f32 %v3640_v24, %v9318_v42  ;;  %3849 = vperm.xlu2 %5628, %v11843_v5   ;;  %v3592_v21 = vpop.permute.xlu2 %3591  ;;  %v3397_v60 = vadd.f32 %v3381_v30, %v3266_v22  ;;  %v3762_v30 = vmax.f32 %v3746_v63, 0.0 }
 0x598   :  { %v3619_v40 = vadd.f32 %v9274_v50, %v3592_v21  ;;  %3845 = vperm.xlu1 %5630, %v11768_v47   ;;  %v3556_v51 = vpop.permute.xlu1 %3555 }
 0x599   :  { %v3610_v57 = vadd.f32 %v9274_v50, %v3556_v51  ;;  %v9617_v49 = vadd.f32 %v3771_v43, %v3656_v8  ;;  %v3528_v52 = vadd.f32 %v3512_v55, %v3397_v60  ;;  %v3719_v25 = vpop.permute.xlu0 %3718  ;;  %v3779_v22 = vmul.f32 %v9601_v19, %v3762_v30  ;;  %v11850_v60 = vld [vmem:[#allocation164_spill] sm:$0xff] }
 0x59a   :  { %v3635_v33 = vmax.f32 %v3619_v40, 0.0  ;;  %v3749_v55 = vadd.f32 %v9570_v23, %v3719_v25 }
 0x59b   :  { %v3626_v35 = vmax.f32 %v3610_v57, 0.0  ;;  %v11849_v57 = vld [vmem:[#allocation169_spill] sm:$0xff] }
 0x59c   :  { %v3652_v42 = vmul.f32 %v9449_v61, %v3635_v33 }
 0x59d   :  { %v3643_v6 = vmul.f32 %v9449_v61, %v3626_v35 }
 0x59e   :  { %v9622_v46 = vadd.f32 %v3652_v42, %v9398_v9 }
 0x59f   :  { %v9625_v54 = vadd.f32 %v3643_v6, %v3528_v52  ;;  %3861 = vperm.xlu2 %5628, %v11844_v7   ;;  %v3604_v34 = vpop.permute.xlu2 %3603 }
 0x5a0   :  { %v3622_v12 = vadd.f32 %v9274_v50, %v3604_v34  ;;  %3857 = vperm.xlu1 %5630, %v11777_v48   ;;  %v3564_v38 = vpop.permute.xlu1 %3563 }
 0x5a1   :  { %v3612_v41 = vadd.f32 %v9274_v50, %v3564_v38  ;;  %v3731_v40 = vpop.permute.xlu0 %3730 }
 0x5a2   :  { %v3638_v4 = vmax.f32 %v3622_v12, 0.0  ;;  %v3765_v12 = vmax.f32 %v3749_v55, 0.0 }
 0x5a3   :  { %v3628_v1 = vmax.f32 %v3612_v41, 0.0 }
 0x5a4   :  { %v3655_v9 = vmul.f32 %v9449_v61, %v3638_v4  ;;  %v3782_v25 = vmul.f32 %v9601_v19, %v3765_v12 }
 0x5a5   :  { %v3645_v58 = vmul.f32 %v9449_v61, %v3628_v1  ;;  %v3752_v1 = vadd.f32 %v9570_v23, %v3731_v40 }
 0x5a6   :  { %v9634_v15 = vadd.f32 %v3655_v9, %v9437_v14  ;;  %v11848_v14 = vld [vmem:[#allocation16_spill] sm:$0xff] }
 0x5a7   :  { %v3661_v37 = vadd.f32 %v3645_v58, %v11845_v11  ;;  %5632 = vset.pattern.permute.xlu2 %v11846_v18  ;;  %v11852_v11 = vld [vmem:[#allocation19_spill] sm:$0xff] }
 0x5a8   :  { %3940 = vperm.xlu2 %5632, %v11847_v0   ;;  %v3683_v26 = vpop.permute.xlu2 %3682  ;;  %5631 = vset.pattern.permute.xlu1 %v11846_v18  ;;  %v3576_v31 = vpop.permute.xlu1 %3575 }
 0x5a9   :  { %v3740_v24 = vadd.f32 %v9570_v23, %v3683_v26  ;;  %v3615_v56 = vadd.f32 %v9274_v50, %v3576_v31  ;;  %3936 = vperm.xlu1 %5631, %v11848_v14   ;;  %v9645_v43 = vadd.f32 %v3776_v53, %v3661_v37  ;;  %v3810_v9 = vpop.permute.xlu0 %3809  ;;  %v11851_v53 = vld [vmem:[#allocation165_spill] sm:$0xff] }
 0x5ab   :  { %v3756_v8 = vmax.f32 %v3740_v24, 0.0  ;;  %v3631_v21 = vmax.f32 %v3615_v56, 0.0  ;;  %v3768_v56 = vmax.f32 %v3752_v1, 0.0 }
 0x5ad   :  { %v3773_v51 = vmul.f32 %v9601_v19, %v3756_v8  ;;  %v3648_v32 = vmul.f32 %v9449_v61, %v3631_v21 }
 0x5af   :  { %v9652_v33 = vadd.f32 %v3773_v51, %v11849_v57  ;;  %v3664_v35 = vadd.f32 %v3648_v32, %v11850_v60  ;;  %v3785_v51 = vmul.f32 %v9601_v19, %v3768_v56  ;;  %v11854_v57 = vld [vmem:[#allocation28_spill] sm:$0xff] }
 0x5b0   :  { %3952 = vperm.xlu2 %5632, %v11641_v36   ;;  %v3691_v42 = vpop.permute.xlu2 %3690  ;;  %v3588_v52 = vpop.permute.xlu1 %3587 }
 0x5b1   :  { %v3742_v6 = vadd.f32 %v9570_v23, %v3691_v42  ;;  %v3618_v16 = vadd.f32 %v9274_v50, %v3588_v52  ;;  %3948 = vperm.xlu1 %5631, %v11625_v2   ;;  %v9659_v34 = vadd.f32 %v3779_v22, %v3664_v35 }
 0x5b3   :  { %v3758_v38 = vmax.f32 %v3742_v6, 0.0  ;;  %v3634_v41 = vmax.f32 %v3618_v16, 0.0 }
 0x5b5   :  { %v3775_v4 = vmul.f32 %v9601_v19, %v3758_v38  ;;  %v3651_v28 = vmul.f32 %v9449_v61, %v3634_v41  ;;  %v9692_v38 = vstv %s5310_s16 }
 0x5b7   :  { %v9666_v58 = vadd.f32 %v3775_v4, %v9556_v44  ;;  %v3667_v63 = vadd.f32 %v3651_v28, %v11851_v53  ;;  %v9676_v44 = vperm.slane %v11837_v59, 3 }
 0x5b8   :  { %3960 = vperm.xlu2 %5632, %v11852_v11   ;;  %v3703_v37 = vpop.permute.xlu2 %3702  ;;  %v3600_v18 = vpop.permute.xlu1 %3599 }
 0x5b9   :  { %v3745_v26 = vadd.f32 %v9570_v23, %v3703_v37  ;;  %v3621_v31 = vadd.f32 %v9274_v50, %v3600_v18  ;;  %3956 = vperm.xlu1 %5631, %v11835_v10   ;;  %v9673_v24 = vadd.f32 %v3782_v25, %v3667_v63  ;;  %v11853_v50 = vld [vmem:[#allocation167_spill] sm:$0xff]  ;;  %v3870_v55 = vadd.f32 %v9676_v44, %v3810_v9  ;;  %v11855_v9 = vld [vmem:[#allocation22_spill] sm:$0xff] }
 0x5bb   :  { %v3761_v30 = vmax.f32 %v3745_v26, 0.0  ;;  %v3637_v8 = vmax.f32 %v3621_v31, 0.0 }
 0x5bd   :  { %v3778_v21 = vmul.f32 %v9601_v19, %v3761_v30  ;;  %v3654_v40 = vmul.f32 %v9449_v61, %v3637_v8  ;;  %v3830_v61 = vpop.permute.xlu0 %3829 }
 0x5bf   :  { %v9682_v32 = vadd.f32 %v3778_v21, %v9540_v45  ;;  %v3670_v22 = vadd.f32 %v3654_v40, %v11853_v50  ;;  %v3886_v45 = vmax.f32 %v3870_v55, 0.0  ;;  %v3875_v21 = vadd.f32 %v9676_v44, %v3830_v61 }
 0x5c0   :  { %3972 = vperm.xlu2 %5632, %v11854_v57   ;;  %v3715_v60 = vpop.permute.xlu2 %3714 }
 0x5c1   :  { %v3748_v35 = vadd.f32 %v9570_v23, %v3715_v60  ;;  %3968 = vperm.xlu1 %5631, %v11842_v17   ;;  %v3679_v42 = vpop.permute.xlu1 %3678  ;;  %v9689_v52 = vadd.f32 %v3785_v51, %v3670_v22  ;;  %v3903_v25 = vmul.f32 %v9692_v38, %v3886_v45  ;;  %v11856_v51 = vld [vmem:[#allocation30_spill] sm:$0xff] }
 0x5c2   :  { %v3739_v6 = vadd.f32 %v9570_v23, %v3679_v42 }
 0x5c3   :  { %v3764_v16 = vmax.f32 %v3748_v35, 0.0  ;;  %v3891_v35 = vmax.f32 %v3875_v21, 0.0 }
 0x5c4   :  { %v3755_v12 = vmax.f32 %v3739_v6, 0.0 }
 0x5c5   :  { %v3781_v41 = vmul.f32 %v9601_v19, %v3764_v16  ;;  %v3842_v56 = vpop.permute.xlu0 %3841 }
 0x5c6   :  { %v3772_v4 = vmul.f32 %v9601_v19, %v3755_v12  ;;  %v3878_v45 = vadd.f32 %v9676_v44, %v3842_v56 }
 0x5c7   :  { %v9697_v28 = vadd.f32 %v3781_v41, %v9564_v3 }
 0x5c8   :  { %v3788_v1 = vadd.f32 %v3772_v4, %v9528_v13  ;;  %3984 = vperm.xlu2 %5632, %v11855_v9   ;;  %v3727_v53 = vpop.permute.xlu2 %3726  ;;  %v11857_v4 = vmov 29  }
 0x5c9   :  { %v3751_v63 = vadd.f32 %v9570_v23, %v3727_v53  ;;  %3980 = vperm.xlu1 %5631, %v11843_v5   ;;  %v3687_v37 = vpop.permute.xlu1 %3686 }
 0x5ca   :  { %v3741_v18 = vadd.f32 %v9570_v23, %v3687_v37  ;;  %v9705_v26 = vadd.f32 %v3903_v25, %v3788_v1 }
 0x5cb   :  { %v3767_v31 = vmax.f32 %v3751_v63, 0.0 }
 0x5cc   :  { %v3757_v3 = vmax.f32 %v3741_v18, 0.0 }
 0x5cd   :  { %v3784_v30 = vmul.f32 %v9601_v19, %v3767_v31  ;;  %v3854_v16 = vpop.permute.xlu0 %3853 }
 0x5ce   :  { %v3774_v8 = vmul.f32 %v9601_v19, %v3757_v3 }
 0x5cf   :  { %v9710_v13 = vadd.f32 %v3784_v30, %v9593_v39  ;;  %v3881_v30 = vadd.f32 %v9676_v44, %v3854_v16 }
 0x5d0   :  { %v3790_v40 = vadd.f32 %v3774_v8, %v9625_v54  ;;  %3996 = vperm.xlu2 %5632, %v11856_v51   ;;  %v3908_v54 = vmul.f32 %v9692_v38, %v3891_v35 }
 0x5d1   :  { %v3806_v50 = vpop.permute.xlu2 %3805  ;;  %3992 = vperm.xlu1 %5631, %v11844_v7   ;;  %v3699_v22 = vpop.permute.xlu1 %3698 }
 0x5d2   :  { %v3869_v55 = vadd.f32 %v9676_v44, %v3806_v50  ;;  %v3744_v60 = vadd.f32 %v9570_v23, %v3699_v22 }
 0x5d4   :  { %v3885_v42 = vmax.f32 %v3869_v55, 0.0  ;;  %v3760_v6 = vmax.f32 %v3744_v60, 0.0 }
 0x5d5   :  { %v3866_v8 = vpop.permute.xlu0 %3865 }
 0x5d6   :  { %v3902_v39 = vmul.f32 %v9692_v38, %v3885_v42  ;;  %v3777_v61 = vmul.f32 %v9601_v19, %v3760_v6  ;;  %v3897_v6 = vmax.f32 %v3881_v30, 0.0 }
 0x5d8   :  { %v9723_v12 = vadd.f32 %v3902_v39, %v9617_v49  ;;  %v3793_v41 = vadd.f32 %v3777_v61, %v9584_v27  ;;  %5636 = vset.pattern.permute.xlu2 %v11857_v4  ;;  %v3894_v49 = vmax.f32 %v3878_v45, 0.0 }
 0x5d9   :  { %4075 = vperm.xlu2 %5636, %v11757_v29   ;;  %v3818_v25 = vpop.permute.xlu2 %3817  ;;  %5635 = vset.pattern.permute.xlu1 %v11857_v4  ;;  %v3711_v1 = vpop.permute.xlu1 %3710 }
 0x5da   :  { %v3872_v53 = vadd.f32 %v9676_v44, %v3818_v25  ;;  %v3747_v63 = vadd.f32 %v9570_v23, %v3711_v1  ;;  %4071 = vperm.xlu1 %5635, %v11847_v0   ;;  %v9732_v37 = vadd.f32 %v3908_v54, %v3793_v41  ;;  %v3911_v3 = vmul.f32 %v9692_v38, %v3894_v49 }
 0x5db   :  { %v3884_v54 = vadd.f32 %v9676_v44, %v3866_v8 }
 0x5dc   :  { %v3888_v18 = vmax.f32 %v3872_v53, 0.0  ;;  %v3763_v31 = vmax.f32 %v3747_v63, 0.0 }
 0x5dd   :  { %v3945_v49 = vpop.permute.xlu0 %3944 }
 0x5de   :  { %v3905_v27 = vmul.f32 %v9692_v38, %v3888_v18  ;;  %v3780_v56 = vmul.f32 %v9601_v19, %v3763_v31  ;;  %v3900_v18 = vmax.f32 %v3884_v54, 0.0 }
 0x5e0   :  { %v9738_v21 = vadd.f32 %v3905_v27, %v3790_v40  ;;  %v3796_v50 = vadd.f32 %v3780_v56, %v9607_v62  ;;  %v3914_v62 = vmul.f32 %v9692_v38, %v3897_v6 }
 0x5e1   :  { %4083 = vperm.xlu2 %5636, %v11641_v36   ;;  %v3826_v22 = vpop.permute.xlu2 %3825  ;;  %v3723_v55 = vpop.permute.xlu1 %3722 }
 0x5e2   :  { %v3874_v60 = vadd.f32 %v9676_v44, %v3826_v22  ;;  %v3750_v35 = vadd.f32 %v9570_v23, %v3723_v55  ;;  %4079 = vperm.xlu1 %5635, %v11625_v2   ;;  %v9745_v42 = vadd.f32 %v3911_v3, %v3796_v50  ;;  %v3917_v3 = vmul.f32 %v9692_v38, %v3900_v18 }
 0x5e4   :  { %v3890_v39 = vmax.f32 %v3874_v60, 0.0  ;;  %v3766_v16 = vmax.f32 %v3750_v35, 0.0 }
 0x5e6   :  { %v3907_v40 = vmul.f32 %v9692_v38, %v3890_v39  ;;  %v3783_v61 = vmul.f32 %v9601_v19, %v3766_v16  ;;  %v9778_v16 = vstv %s5311_s18 }
 0x5e8   :  { %v9752_v45 = vadd.f32 %v3907_v40, %v9645_v43  ;;  %v3799_v41 = vadd.f32 %v3783_v61, %v9622_v46  ;;  %v9762_v43 = vperm.slane %v11837_v59, 4 }
 0x5e9   :  { %4095 = vperm.xlu2 %5636, %v11763_v20   ;;  %v3838_v4 = vpop.permute.xlu2 %3837  ;;  %v3735_v25 = vpop.permute.xlu1 %3734 }
 0x5ea   :  { %v3877_v1 = vadd.f32 %v9676_v44, %v3838_v4  ;;  %v3753_v53 = vadd.f32 %v9570_v23, %v3735_v25  ;;  %4091 = vperm.xlu1 %5635, %v11852_v11   ;;  %v9759_v63 = vadd.f32 %v3914_v62, %v3799_v41  ;;  %v4002_v8 = vadd.f32 %v9762_v43, %v3945_v49 }
 0x5ec   :  { %v3893_v31 = vmax.f32 %v3877_v1, 0.0  ;;  %v3769_v27 = vmax.f32 %v3753_v53, 0.0  ;;  %v4018_v6 = vmax.f32 %v4002_v8, 0.0 }
 0x5ee   :  { %v3910_v46 = vmul.f32 %v9692_v38, %v3893_v31  ;;  %v3786_v56 = vmul.f32 %v9601_v19, %v3769_v27  ;;  %v4035_v62 = vmul.f32 %v9778_v16, %v4018_v6 }
 0x5f0   :  { %v9768_v23 = vadd.f32 %v3910_v46, %v9659_v34  ;;  %v3802_v30 = vadd.f32 %v3786_v56, %v9634_v15  ;;  %v3965_v34 = vpop.permute.xlu0 %3964 }
 0x5f1   :  { %4107 = vperm.xlu2 %5636, %v11768_v47   ;;  %v3850_v50 = vpop.permute.xlu2 %3849  ;;  %v4007_v46 = vadd.f32 %v9762_v43, %v3965_v34 }
 0x5f2   :  { %v3880_v22 = vadd.f32 %v9676_v44, %v3850_v50  ;;  %4103 = vperm.xlu1 %5635, %v11854_v57   ;;  %v3814_v55 = vpop.permute.xlu1 %3813  ;;  %v9775_v60 = vadd.f32 %v3917_v3, %v3802_v30  ;;  %v11858_v3 = vmov 30  }
 0x5f3   :  { %v3871_v19 = vadd.f32 %v9676_v44, %v3814_v55  ;;  %v4023_v55 = vmax.f32 %v4007_v46, 0.0 }
 0x5f4   :  { %v3896_v35 = vmax.f32 %v3880_v22, 0.0 }
 0x5f5   :  { %v3887_v39 = vmax.f32 %v3871_v19, 0.0 }
 0x5f6   :  { %v3913_v15 = vmul.f32 %v9692_v38, %v3896_v35 }
 0x5f7   :  { %v3904_v40 = vmul.f32 %v9692_v38, %v3887_v39 }
 0x5f8   :  { %v9783_v61 = vadd.f32 %v3913_v15, %v9673_v24  ;;  %v3977_v31 = vpop.permute.xlu0 %3976 }
 0x5f9   :  { %v3920_v54 = vadd.f32 %v3904_v40, %v9652_v33  ;;  %4119 = vperm.xlu2 %5636, %v11777_v48   ;;  %v3862_v41 = vpop.permute.xlu2 %3861  ;;  %v4010_v34 = vadd.f32 %v9762_v43, %v3977_v31 }
 0x5fa   :  { %v3883_v4 = vadd.f32 %v9676_v44, %v3862_v41  ;;  %4115 = vperm.xlu1 %5635, %v11855_v9   ;;  %v3822_v25 = vpop.permute.xlu1 %3821 }
 0x5fb   :  { %v3873_v1 = vadd.f32 %v9676_v44, %v3822_v25  ;;  %v9791_v53 = vadd.f32 %v4035_v62, %v3920_v54 }
 0x5fc   :  { %v3899_v49 = vmax.f32 %v3883_v4, 0.0 }
 0x5fd   :  { %v3889_v18 = vmax.f32 %v3873_v1, 0.0  ;;  %v4026_v1 = vmax.f32 %v4010_v34, 0.0 }
 0x5fe   :  { %v3916_v24 = vmul.f32 %v9692_v38, %v3899_v49 }
 0x5ff   :  { %v3906_v27 = vmul.f32 %v9692_v38, %v3889_v18 }
 0x600   :  { %v9796_v33 = vadd.f32 %v3916_v24, %v9689_v52  ;;  %v3989_v39 = vpop.permute.xlu0 %3988  ;;  %v4043_v24 = vmul.f32 %v9778_v16, %v4026_v1 }
 0x601   :  { %v3922_v56 = vadd.f32 %v3906_v27, %v9666_v58  ;;  %5637 = vset.pattern.permute.xlu2 %v11858_v3  ;;  %v4040_v58 = vmul.f32 %v9778_v16, %v4023_v55  ;;  %v4013_v31 = vadd.f32 %v9762_v43, %v3989_v39 }
 0x602   :  { %4198 = vperm.xlu2 %5637, %v11848_v14   ;;  %v3941_v30 = vpop.permute.xlu2 %3940  ;;  %4127 = vperm.xlu1 %5635, %v11856_v51   ;;  %v3834_v8 = vpop.permute.xlu1 %3833 }
 0x603   :  { %v4001_v50 = vadd.f32 %v9762_v43, %v3941_v30  ;;  %v3876_v22 = vadd.f32 %v9676_v44, %v3834_v8  ;;  %v4029_v55 = vmax.f32 %v4013_v31, 0.0 }
 0x605   :  { %v4017_v19 = vmax.f32 %v4001_v50, 0.0  ;;  %v3892_v52 = vmax.f32 %v3876_v22, 0.0 }
 0x607   :  { %v4034_v35 = vmul.f32 %v9778_v16, %v4017_v19  ;;  %v3909_v6 = vmul.f32 %v9692_v38, %v3892_v52 }
 0x608   :  { %v4068_v22 = vpop.permute.xlu0 %4067 }
 0x609   :  { %v9810_v15 = vadd.f32 %v4034_v35, %v9705_v26  ;;  %v3925_v40 = vadd.f32 %v3909_v6, %v9682_v32  ;;  %v4046_v6 = vmul.f32 %v9778_v16, %v4029_v55 }
 0x60a   :  { %4210 = vperm.xlu2 %5637, %v11625_v2   ;;  %v3953_v62 = vpop.permute.xlu2 %3952  ;;  %5639 = vset.pattern.permute.xlu1 %v11858_v3  ;;  %v3846_v54 = vpop.permute.xlu1 %3845 }
 0x60b   :  { %v4004_v41 = vadd.f32 %v9762_v43, %v3953_v62  ;;  %v3879_v4 = vadd.f32 %v9676_v44, %v3846_v54  ;;  %4206 = vperm.xlu1 %5639, %v11757_v29   ;;  %v9818_v25 = vadd.f32 %v4040_v58, %v3925_v40 }
 0x60d   :  { %v4020_v49 = vmax.f32 %v4004_v41, 0.0  ;;  %v3895_v26 = vmax.f32 %v3879_v4, 0.0 }
 0x60f   :  { %v4037_v18 = vmul.f32 %v9778_v16, %v4020_v49  ;;  %v3912_v32 = vmul.f32 %v9692_v38, %v3895_v26  ;;  %v9850_v49 = vstv %s5312_s19 }
 0x611   :  { %v9824_v27 = vadd.f32 %v4037_v18, %v3922_v56  ;;  %v3928_v46 = vadd.f32 %v3912_v32, %v9697_v28  ;;  %v9834_v56 = vperm.slane %v11837_v59, 5 }
 0x612   :  { %4218 = vperm.xlu2 %5637, %v11835_v10   ;;  %v3961_v29 = vpop.permute.xlu2 %3960  ;;  %v3858_v3 = vpop.permute.xlu1 %3857 }
 0x613   :  { %v4006_v30 = vadd.f32 %v9762_v43, %v3961_v29  ;;  %v3882_v8 = vadd.f32 %v9676_v44, %v3858_v3  ;;  %4214 = vperm.xlu1 %5639, %v11641_v36   ;;  %v9831_v50 = vadd.f32 %v4043_v24, %v3928_v46  ;;  %v4131_v34 = vadd.f32 %v9834_v56, %v4068_v22 }
 0x615   :  { %v4022_v19 = vmax.f32 %v4006_v30, 0.0  ;;  %v3898_v52 = vmax.f32 %v3882_v8, 0.0  ;;  %v4147_v4 = vmax.f32 %v4131_v34, 0.0 }
 0x617   :  { %v4039_v28 = vmul.f32 %v9778_v16, %v4022_v19  ;;  %v3915_v35 = vmul.f32 %v9692_v38, %v3898_v52 }
 0x619   :  { %v9840_v44 = vadd.f32 %v4039_v28, %v9732_v37  ;;  %v3931_v58 = vadd.f32 %v3915_v35, %v9710_v13  ;;  %v4088_v37 = vpop.permute.xlu0 %4087 }
 0x61a   :  { %4230 = vperm.xlu2 %5637, %v11842_v17   ;;  %v3973_v39 = vpop.permute.xlu2 %3972  ;;  %v4136_v19 = vadd.f32 %v9834_v56, %v4088_v37 }
 0x61b   :  { %v4009_v40 = vadd.f32 %v9762_v43, %v3973_v39  ;;  %4226 = vperm.xlu1 %5639, %v11763_v20   ;;  %v3937_v62 = vpop.permute.xlu1 %3936  ;;  %v9847_v54 = vadd.f32 %v4046_v6, %v3931_v58  ;;  %v4164_v20 = vmul.f32 %v9850_v49, %v4147_v4  ;;  %v11859_v4 = vmov 31  }
 0x61c   :  { %v4000_v38 = vadd.f32 %v9762_v43, %v3937_v62  ;;  %v4152_v34 = vmax.f32 %v4136_v19, 0.0 }
 0x61d   :  { %v4025_v41 = vmax.f32 %v4009_v40, 0.0 }
 0x61e   :  { %v4016_v1 = vmax.f32 %v4000_v38, 0.0  ;;  %v4169_v62 = vmul.f32 %v9850_v49, %v4152_v34 }
 0x61f   :  { %v4042_v13 = vmul.f32 %v9778_v16, %v4025_v41 }
 0x620   :  { %v4033_v26 = vmul.f32 %v9778_v16, %v4016_v1 }
 0x621   :  { %v9855_v18 = vadd.f32 %v4042_v13, %v9745_v42  ;;  %v4100_v22 = vpop.permute.xlu0 %4099 }
 0x622   :  { %v4049_v32 = vadd.f32 %v4033_v26, %v9723_v12  ;;  %4242 = vperm.xlu2 %5637, %v11843_v5   ;;  %v3985_v24 = vpop.permute.xlu2 %3984  ;;  %v4139_v38 = vadd.f32 %v9834_v56, %v4100_v22 }
 0x623   :  { %v4012_v31 = vadd.f32 %v9762_v43, %v3985_v24  ;;  %4238 = vperm.xlu1 %5639, %v11768_v47   ;;  %v3949_v46 = vpop.permute.xlu1 %3948 }
 0x624   :  { %v4003_v29 = vadd.f32 %v9762_v43, %v3949_v46  ;;  %v9863_v3 = vadd.f32 %v4164_v20, %v4049_v32  ;;  %v4155_v20 = vmax.f32 %v4139_v38, 0.0 }
 0x625   :  { %v4028_v30 = vmax.f32 %v4012_v31, 0.0 }
 0x626   :  { %v4019_v8 = vmax.f32 %v4003_v29, 0.0 }
 0x627   :  { %v4045_v42 = vmul.f32 %v9778_v16, %v4028_v30 }
 0x628   :  { %v4036_v55 = vmul.f32 %v9778_v16, %v4019_v8 }
 0x629   :  { %v9868_v12 = vadd.f32 %v4045_v42, %v9759_v63  ;;  %v4112_v41 = vpop.permute.xlu0 %4111 }
 0x62a   :  { %v9872_v52 = vadd.f32 %v4036_v55, %v9738_v21  ;;  %4254 = vperm.xlu2 %5637, %v11844_v7   ;;  %v3997_v47 = vpop.permute.xlu2 %3996  ;;  %v4142_v46 = vadd.f32 %v9834_v56, %v4112_v41 }
 0x62b   :  { %v4015_v28 = vadd.f32 %v9762_v43, %v3997_v47  ;;  %4250 = vperm.xlu1 %5639, %v11777_v48   ;;  %v3957_v35 = vpop.permute.xlu1 %3956 }
 0x62c   :  { %v4005_v6 = vadd.f32 %v9762_v43, %v3957_v35  ;;  %v4158_v47 = vmax.f32 %v4142_v46, 0.0 }
 0x62d   :  { %v4031_v58 = vmax.f32 %v4015_v28, 0.0 }
 0x62e   :  { %v4021_v39 = vmax.f32 %v4005_v6, 0.0 }
 0x62f   :  { %v4048_v63 = vmul.f32 %v9778_v16, %v4031_v58 }
 0x630   :  { %v4038_v40 = vmul.f32 %v9778_v16, %v4021_v39 }
 0x631   :  { %v9881_v21 = vadd.f32 %v4048_v63, %v9775_v60  ;;  %v4124_v19 = vpop.permute.xlu0 %4123 }
 0x632   :  { %v4054_v48 = vadd.f32 %v4038_v40, %v9752_v45  ;;  %5641 = vset.pattern.permute.xlu2 %v11859_v4  ;;  %v4145_v6 = vadd.f32 %v9834_v56, %v4124_v19 }
 0x633   :  { %4333 = vperm.xlu2 %5641, %v11847_v0   ;;  %v4076_v37 = vpop.permute.xlu2 %4075  ;;  %5640 = vset.pattern.permute.xlu1 %v11859_v4  ;;  %v3969_v1 = vpop.permute.xlu1 %3968  ;;  %v4172_v0 = vmul.f32 %v9850_v49, %v4155_v20 }
 0x634   :  { %v4133_v13 = vadd.f32 %v9834_v56, %v4076_v37  ;;  %v4008_v60 = vadd.f32 %v9762_v43, %v3969_v1  ;;  %4329 = vperm.xlu1 %5640, %v11848_v14   ;;  %v9892_v26 = vadd.f32 %v4169_v62, %v4054_v48  ;;  %v4161_v38 = vmax.f32 %v4145_v6, 0.0 }
 0x636   :  { %v4149_v32 = vmax.f32 %v4133_v13, 0.0  ;;  %v4024_v24 = vmax.f32 %v4008_v60, 0.0 }
 0x638   :  { %v4166_v45 = vmul.f32 %v9850_v49, %v4149_v32  ;;  %v4041_v31 = vmul.f32 %v9778_v16, %v4024_v24 }
 0x639   :  { %v9922_v4 = vpop.permute.xlu0 %4202 }
 0x63a   :  { %v9899_v29 = vadd.f32 %v4166_v45, %v9791_v53  ;;  %v4057_v30 = vadd.f32 %v4041_v31, %v9768_v23 }
 0x63b   :  { %4345 = vperm.xlu2 %5641, %v11641_v36   ;;  %v4084_v14 = vpop.permute.xlu2 %4083  ;;  %v3981_v8 = vpop.permute.xlu1 %3980  ;;  %v4175_v36 = vmul.f32 %v9850_v49, %v4158_v47 }
 0x63c   :  { %v4135_v42 = vadd.f32 %v9834_v56, %v4084_v14  ;;  %v4011_v22 = vadd.f32 %v9762_v43, %v3981_v8  ;;  %4341 = vperm.xlu1 %5640, %v11625_v2   ;;  %v9906_v55 = vadd.f32 %v4172_v0, %v4057_v30 }
 0x63e   :  { %v4151_v28 = vmax.f32 %v4135_v42, 0.0  ;;  %v4027_v35 = vmax.f32 %v4011_v22, 0.0 }
 0x640   :  { %v4168_v53 = vmul.f32 %v9850_v49, %v4151_v28  ;;  %v4044_v23 = vmul.f32 %v9778_v16, %v4027_v35  ;;  %v9960_v35 = vstv %s5313_s6 }
 0x641   :  { %v4223_v32 = vpop.permute.xlu0 %4222 }
 0x642   :  { %v9913_v58 = vadd.f32 %v4168_v53, %v9824_v27  ;;  %v4060_v34 = vadd.f32 %v4044_v23, %v9783_v61 }
 0x643   :  { %4353 = vperm.xlu2 %5641, %v11852_v11   ;;  %v4096_v2 = vpop.permute.xlu2 %4095  ;;  %v3993_v39 = vpop.permute.xlu1 %3992  ;;  %v4178_v11 = vmul.f32 %v9850_v49, %v4161_v38 }
 0x644   :  { %v4138_v63 = vadd.f32 %v9834_v56, %v4096_v2  ;;  %v4014_v40 = vadd.f32 %v9762_v43, %v3993_v39  ;;  %4349 = vperm.xlu1 %5640, %v11835_v10   ;;  %v9920_v62 = vadd.f32 %v4175_v36, %v4060_v34  ;;  %v4780_v36 = vlaneseq }
 0x646   :  { %v4154_v41 = vmax.f32 %v4138_v63, 0.0  ;;  %v4030_v48 = vmax.f32 %v4014_v40, 0.0  ;;  %v9973_v38 = vand.u32 127, %v4780_v36 }
 0x648   :  { %v4171_v27 = vmul.f32 %v9850_v49, %v4154_v41  ;;  %v4047_v61 = vmul.f32 %v9778_v16, %v4030_v48  ;;  %v5910_v41 = vmov 0.0   ;;  %vm4965_vm2 = vcmp.lt.s32.totalorder %v9973_v38, 60 }
 0x649   :  { %v4235_v30 = vpop.permute.xlu0 %4234  ;;  %4968 = vst [vmem:[#allocation3] sm:$0x1] %v5910_v41 }
 0x64a   :  { %v9928_v37 = vadd.f32 %v4171_v27, %v9818_v25  ;;  %v4063_v43 = vadd.f32 %v4047_v61, %v9796_v33  ;;  %4969 = vst [vmem:[#allocation3 + $0x1] sm:$0x1] %v5910_v41  ;;  %v9982_v61 = vsel %vm4965_vm2, 1.0, %v5910_v41 }
 0x64b   :  { %4365 = vperm.xlu2 %5641, %v11854_v57   ;;  %v4108_v10 = vpop.permute.xlu2 %4107  ;;  %4970 = vst [vmem:[#allocation3 + $0x2] sm:$0x1] %v5910_v41 }
 0x64c   :  { %v4141_v1 = vadd.f32 %v9834_v56, %v4108_v10  ;;  %4361 = vperm.xlu1 %5640, %v11842_v17   ;;  %v9934_v13 = vpop.permute.xlu1 %4071  ;;  %v9936_v60 = vadd.f32 %v4178_v11, %v4063_v43  ;;  %4971 = vst [vmem:[#allocation3 + $0x3] sm:$0x1] %v5910_v41 }
 0x64d   :  { %4972 = vst [vmem:[#allocation3 + $0x4] sm:$0x1] %v5910_v41 }
 0x64e   :  { %v4157_v20 = vmax.f32 %v4141_v1, 0.0  ;;  %4973 = vst [vmem:[#allocation3 + $0x5] sm:$0x1] %v5910_v41 }
 0x64f   :  { %4974 = vst [vmem:[#allocation3 + $0x6] sm:$0x1] %v5910_v41 }
 0x650   :  { %v4174_v16 = vmul.f32 %v9850_v49, %v4157_v20  ;;  %4975 = vst [vmem:[#allocation3 + $0x7] sm:$0x1] %v5910_v41 }
 0x651   :  { %v4247_v39 = vpop.permute.xlu0 %4246  ;;  %4976 = vst [vmem:[#allocation3 + $0x8] sm:$0x1] %v5910_v41 }
 0x652   :  { %v9940_v25 = vadd.f32 %v4174_v16, %v9831_v50  ;;  %v9949_v50 = vperm.slane %v11837_v59, 6  ;;  %4977 = vst [vmem:[#allocation3 + $0x9] sm:$0x1] %v5910_v41 }
 0x653   :  { %4377 = vperm.xlu2 %5641, %v11855_v9   ;;  %v4120_v33 = vpop.permute.xlu2 %4119  ;;  %4978 = vst [vmem:[#allocation3 + $0xa] sm:$0x1] %v5910_v41 }
 0x654   :  { %v4144_v57 = vadd.f32 %v9834_v56, %v4120_v33  ;;  %4373 = vperm.xlu1 %5640, %v11843_v5   ;;  %v4080_v24 = vpop.permute.xlu1 %4079  ;;  %v4268_v5 = vadd.f32 %v9949_v50, %v4223_v32  ;;  %v4274_v1 = vadd.f32 %v9949_v50, %v4247_v39  ;;  %4979 = vst [vmem:[#allocation3 + $0xb] sm:$0x1] %v5910_v41 }
 0x655   :  { %v4134_v17 = vadd.f32 %v9834_v56, %v4080_v24  ;;  %4980 = vst [vmem:[#allocation3 + $0xc] sm:$0x1] %v5910_v41 }
 0x656   :  { %v4160_v45 = vmax.f32 %v4144_v57, 0.0  ;;  %4981 = vst [vmem:[#allocation3 + $0xd] sm:$0x1] %v5910_v41 }
 0x657   :  { %v4150_v31 = vmax.f32 %v4134_v17, 0.0  ;;  %4982 = vst [vmem:[#allocation3 + $0xe] sm:$0x1] %v5910_v41 }
 0x658   :  { %v4177_v0 = vmul.f32 %v9850_v49, %v4160_v45  ;;  %v4290_v45 = vmax.f32 %v4274_v1, 0.0  ;;  %4983 = vst [vmem:[#allocation3 + $0xf] sm:$0x1] %v5910_v41  ;;  %v10035_v1 = vstv %s5314_s0 }
 0x659   :  { %v4167_v46 = vmul.f32 %v9850_v49, %v4150_v31  ;;  %v4259_v31 = vpop.permute.xlu0 %4258 }
 0x65a   :  { %v9952_v9 = vadd.f32 %v4177_v0, %v9847_v54  ;;  %v4284_v54 = vmax.f32 %v4268_v5, 0.0  ;;  %v4277_v5 = vadd.f32 %v9949_v50, %v4259_v31 }
 0x65b   :  { %v4183_v14 = vadd.f32 %v4167_v46, %v9872_v52  ;;  %4389 = vperm.xlu2 %5641, %v11856_v51   ;;  %v4271_v51 = vadd.f32 %v9949_v50, %v4235_v30 }
 0x65c   :  { %v4199_v8 = vpop.permute.xlu2 %4198  ;;  %4385 = vperm.xlu1 %5640, %v11844_v7   ;;  %v4092_v42 = vpop.permute.xlu1 %4091  ;;  %v4301_v6 = vmul.f32 %v9960_v35, %v4284_v54 }
 0x65d   :  { %v4262_v22 = vadd.f32 %v9949_v50, %v4199_v8  ;;  %v4137_v19 = vadd.f32 %v9834_v56, %v4092_v42 }
 0x65f   :  { %v4278_v47 = vmax.f32 %v4262_v22, 0.0  ;;  %v4153_v28 = vmax.f32 %v4137_v19, 0.0 }
 0x661   :  { %v4295_v53 = vmul.f32 %v9960_v35, %v4278_v47  ;;  %v4170_v52 = vmul.f32 %v9850_v49, %v4153_v28 }
 0x663   :  { %v9966_v23 = vadd.f32 %v4295_v53, %v9863_v3  ;;  %v4186_v7 = vadd.f32 %v4170_v52, %v9840_v44  ;;  %v4287_v44 = vmax.f32 %v4271_v51, 0.0  ;;  %v4293_v53 = vmax.f32 %v4277_v5, 0.0 }
 0x664   :  { %v4211_v34 = vpop.permute.xlu2 %4210  ;;  %v4104_v2 = vpop.permute.xlu1 %4103 }
 0x665   :  { %v4265_v63 = vadd.f32 %v9949_v50, %v4211_v34  ;;  %v4140_v40 = vadd.f32 %v9834_v56, %v4104_v2  ;;  %v9977_v3 = vadd.f32 %v4301_v6, %v4186_v7  ;;  %v4304_v10 = vmul.f32 %v9960_v35, %v4287_v44 }
 0x666   :  { %v4310_v34 = vmul.f32 %v9960_v35, %v4293_v53 }
 0x667   :  { %v4281_v48 = vmax.f32 %v4265_v63, 0.0  ;;  %v4156_v27 = vmax.f32 %v4140_v40, 0.0 }
 0x669   :  { %v4298_v11 = vmul.f32 %v9960_v35, %v4281_v48  ;;  %v4173_v43 = vmul.f32 %v9850_v49, %v4156_v27 }
 0x66b   :  { %v9991_v20 = vadd.f32 %v4298_v11, %v4183_v14  ;;  %v4189_v16 = vadd.f32 %v4173_v43, %v9855_v18  ;;  %v4307_v14 = vmul.f32 %v9960_v35, %v4290_v45  ;;  %v10046_v45 = vstv %s5315_s20 }
 0x66c   :  { %v4219_v32 = vpop.permute.xlu2 %4218  ;;  %v4116_v33 = vpop.permute.xlu1 %4115 }
 0x66d   :  { %v4267_v57 = vadd.f32 %v9949_v50, %v4219_v32  ;;  %v4143_v24 = vadd.f32 %v9834_v56, %v4116_v33  ;;  %v9999_v17 = vadd.f32 %v4304_v10, %v4189_v16 }
 0x66f   :  { %v4283_v0 = vmax.f32 %v4267_v57, 0.0  ;;  %v4159_v18 = vmax.f32 %v4143_v24, 0.0 }
 0x671   :  { %v4300_v46 = vmul.f32 %v9960_v35, %v4283_v0  ;;  %v4176_v30 = vmul.f32 %v9850_v49, %v4159_v18 }
 0x673   :  { %v10011_v8 = vadd.f32 %v4300_v46, %v9892_v26  ;;  %v4192_v42 = vadd.f32 %v4176_v30, %v9868_v12  ;;  %v10021_v26 = vperm.slane %v11837_v59, 7  ;;  %v4338_v12 = vpop.permute.xlu0 %4337 }
 0x674   :  { %v4231_v22 = vpop.permute.xlu2 %4230  ;;  %v4128_v19 = vpop.permute.xlu1 %4127 }
 0x675   :  { %v4270_v47 = vadd.f32 %v9949_v50, %v4231_v22  ;;  %v4146_v28 = vadd.f32 %v9834_v56, %v4128_v19  ;;  %v10018_v54 = vadd.f32 %v4307_v14, %v4192_v42  ;;  %v4395_v63 = vadd.f32 %v10021_v26, %v4338_v12 }
 0x677   :  { %v4286_v52 = vmax.f32 %v4270_v47, 0.0  ;;  %v4162_v51 = vmax.f32 %v4146_v28, 0.0  ;;  %v4411_v43 = vmax.f32 %v4395_v63, 0.0 }
 0x679   :  { %v4303_v7 = vmul.f32 %v9960_v35, %v4286_v52  ;;  %v4179_v6 = vmul.f32 %v9850_v49, %v4162_v51  ;;  %v4428_v33 = vmul.f32 %v10035_v1, %v4411_v43 }
 0x67b   :  { %v10027_v2 = vadd.f32 %v4303_v7, %v9906_v55  ;;  %v4195_v39 = vadd.f32 %v4179_v6, %v9881_v21  ;;  %v4132_v21 = vadd.f32 %v9834_v56, %v9934_v13  ;;  %v4358_v18 = vpop.permute.xlu0 %4357  ;;  %v4263_v56 = vadd.f32 %v9949_v50, %v9922_v4 }
 0x67c   :  { %v4243_v40 = vpop.permute.xlu2 %4242  ;;  %v4400_v19 = vadd.f32 %v10021_v26, %v4358_v18 }
 0x67d   :  { %v4273_v44 = vadd.f32 %v9949_v50, %v4243_v40  ;;  %v4207_v59 = vpop.permute.xlu1 %4206  ;;  %v10032_v48 = vadd.f32 %v4310_v34, %v4195_v39  ;;  %v4148_v46 = vmax.f32 %v4132_v21, 0.0  ;;  %v4279_v22 = vmax.f32 %v4263_v56, 0.0 }
 0x67e   :  { %v4264_v27 = vadd.f32 %v9949_v50, %v4207_v59  ;;  %v4416_v12 = vmax.f32 %v4400_v19, 0.0  ;;  %v10082_v56 = vstv %s5258_s21 }
 0x67f   :  { %v4289_v11 = vmax.f32 %v4273_v44, 0.0  ;;  %v4165_v5 = vmul.f32 %v9850_v49, %v4148_v46  ;;  %v4296_v49 = vmul.f32 %v9960_v35, %v4279_v22  ;;  %vm10095_vm4 = vcmp.lt.s32.totalorder %v9973_v38, %v10082_v56 }
 0x680   :  { %v4280_v10 = vmax.f32 %v4264_v27, 0.0  ;;  %v4433_v59 = vmul.f32 %v10035_v1, %v4416_v12 }
 0x681   :  { %v4306_v55 = vmul.f32 %v9960_v35, %v4289_v11  ;;  %v4181_v53 = vadd.f32 %v4165_v5, %v9810_v15 }
 0x682   :  { %v4297_v16 = vmul.f32 %v9960_v35, %v4280_v10  ;;  %v10073_v10 = vshrl.u32 %v4780_v36, 7 }
 0x683   :  { %v10042_v32 = vadd.f32 %v4306_v55, %v9920_v62  ;;  %v4370_v7 = vpop.permute.xlu0 %4369  ;;  %v4312_v39 = vadd.f32 %v4296_v49, %v4181_v53 }
 0x684   :  { %v4313_v57 = vadd.f32 %v4297_v16, %v9899_v29  ;;  %v4255_v24 = vpop.permute.xlu2 %4254  ;;  %v4403_v27 = vadd.f32 %v10021_v26, %v4370_v7  ;;  %v4783_v36 = vadd.s32 16, %v10073_v10 }
 0x685   :  { %v4276_v31 = vadd.f32 %v9949_v50, %v4255_v24  ;;  %v4215_v0 = vpop.permute.xlu1 %4214 }
 0x686   :  { %v4444_v30 = vadd.f32 %v4428_v33, %v4313_v57  ;;  %v4266_v51 = vadd.f32 %v9949_v50, %v4215_v0  ;;  %v4419_v0 = vmax.f32 %v4403_v27, 0.0  ;;  %vm4802_vm3 = vcmp.lt.s32.totalorder %v4783_v36, %v10082_v56 }
 0x687   :  { %v4292_v14 = vmax.f32 %v4276_v31, 0.0  ;;  %vm4835_vm5 = vcmp.ne.s32.totalorder %v4783_v36, %v9973_v38  ;;  %vm10113_vm7 = vmand %vm4802_vm3, %vm10095_vm4  ;;  %v10143_v36 = vadd.s32 56, %v10073_v10 }
 0x688   :  { %v4462_v62 = vadd.f32 %v10046_v45, %v4444_v30  ;;  %v4282_v44 = vmax.f32 %v4266_v51, 0.0  ;;  %v4436_v19 = vmul.f32 %v10035_v1, %v4419_v0  ;;  %vm10128_vm11 = vmand %vm10113_vm7, %vm4835_vm5 }
 0x689   :  { %v4309_v13 = vmul.f32 %v9960_v35, %v4292_v14  ;;  %vm4840_vm1 = vcmp.ne.s32.totalorder %v10143_v36, %v9973_v38  ;;  %vm4807_vm2 = vcmp.lt.s32.totalorder %v10143_v36, %v10082_v56 }
 0x68a   :  { %v5318_v29 = vmul.f32 -1.442695, %v4462_v62  ;;  %v4299_v57 = vmul.f32 %v9960_v35, %v4282_v44 }
 0x68b   :  { %v10055_v42 = vadd.f32 %v4309_v13, %v9936_v60  ;;  %v4382_v14 = vpop.permute.xlu0 %4381 }
 0x68c   :  { %5644 = vpow2.f32 %v5318_v29  ;;  %v4315_v5 = vadd.f32 %v4299_v57, %v9913_v58 }
 0x68d   :  { %v4334_v47 = vpop.permute.xlu2 %4333  ;;  %v4227_v28 = vpop.permute.xlu1 %4226 }
 0x68e   :  { %v4394_v4 = vadd.f32 %v10021_v26, %v4334_v47  ;;  %v4269_v52 = vadd.f32 %v9949_v50, %v4227_v28  ;;  %v4406_v28 = vadd.f32 %v10021_v26, %v4382_v14 }
 0x690   :  { %v4410_v60 = vmax.f32 %v4394_v4, 0.0  ;;  %v4285_v6 = vmax.f32 %v4269_v52, 0.0 }
 0x692   :  { %v5645_v34 = vpop.eup %5644  ;;  %v4427_v63 = vmul.f32 %v10035_v1, %v4410_v60  ;;  %v4302_v15 = vmul.f32 %v9960_v35, %v4285_v6 }
 0x693   :  { %v10067_v40 = vadd.f32 1.0, %v5645_v34 }
 0x694   :  { %v4443_v11 = vadd.f32 %v4427_v63, %v4312_v39  ;;  %v4318_v43 = vadd.f32 %v4302_v15, %v9928_v37 }
 0x695   :  { %5646 = vrcp.f32 %v10067_v40  ;;  %v4346_v55 = vpop.permute.xlu2 %4345  ;;  %v4239_v21 = vpop.permute.xlu1 %4238  ;;  %v4579_v60 = vand.u32 2147483647, %v10067_v40  ;;  %vm4575_vm8 = vweird.f32 %v10067_v40 }
 0x696   :  { %v4461_v16 = vadd.f32 %v10046_v45, %v4443_v11  ;;  %v4449_v33 = vadd.f32 %v4433_v59, %v4318_v43  ;;  %v4397_v24 = vadd.f32 %v10021_v26, %v4346_v55  ;;  %v4272_v31 = vadd.f32 %v9949_v50, %v4239_v21 }
 0x697   :  { %v4422_v55 = vmax.f32 %v4406_v28, 0.0  ;;  %vm4580_vm10 = vcmp.eq.f32.partialorder %v4579_v60, 8.507059e+37 }
 0x698   :  { %v5317_v18 = vmul.f32 -1.442695, %v4461_v16  ;;  %v4467_v37 = vadd.f32 %v10046_v45, %v4449_v33  ;;  %v4413_v46 = vmax.f32 %v4397_v24, 0.0  ;;  %v4288_v30 = vmax.f32 %v4272_v31, 0.0 }
 0x699   :  { %v4931_v16 = vstv %s10101_s23  ;;  %v4439_v14 = vmul.f32 %v10035_v1, %v4422_v55 }
 0x69a   :  { %5648 = vpow2.f32 %v5317_v18  ;;  %v5323_v62 = vmul.f32 -1.442695, %v4467_v37  ;;  %v4430_v29 = vmul.f32 %v10035_v1, %v4413_v46  ;;  %v4305_v22 = vmul.f32 %v9960_v35, %v4288_v30 }
 0x69b   :  { %v5647_v13 = vpop.eup %5646  ;;  %v10135_v37 = vadd.s32 8, %v10073_v10  ;;  %vm10138_vm13 = vcmp.eq.s32.totalorder %v4931_v16, 1 }
 0x69c   :  { %v4571_v47 = vmul.f32 %v5647_v13, %v10067_v40  ;;  %5650 = vpow2.f32 %v5323_v62  ;;  %v4446_v53 = vadd.f32 %v4430_v29, %v4315_v5  ;;  %v4321_v4 = vadd.f32 %v4305_v22, %v9940_v25 }
 0x69d   :  { %v4354_v52 = vpop.permute.xlu2 %4353  ;;  %v4251_v51 = vpop.permute.xlu1 %4250  ;;  %v4581_v25 = vand.u32 2147483648, %v10067_v40  ;;  %vm4576_vm6 = vweird.f32 %v5647_v13  ;;  %vm4834_vm15 = vcmp.ne.s32.totalorder %v10135_v37, %v9973_v38  ;;  %vm4801_vm0 = vcmp.lt.s32.totalorder %v10135_v37, %v10082_v56 }
 0x69e   :  { %v4572_v49 = vsub.f32 1.0, %v4571_v47  ;;  %v4399_v12 = vadd.f32 %v10021_v26, %v4354_v52  ;;  %v4275_v7 = vadd.f32 %v9949_v50, %v4251_v51  ;;  %v4464_v6 = vadd.f32 %v10046_v45, %v4446_v53  ;;  %vm4577_vm9 = vmor %vm4575_vm8, %vm4576_vm6 }
 0x69f   :  { %v4452_v34 = vadd.f32 %v4436_v19, %v4321_v4  ;;  %v4582_v33 = vor.u32 1.1754944e-38, %v4581_v25  ;;  %vm10190_vm7 = vmand %vm4801_vm0, %vm10095_vm4 }
 0x6a0   :  { %v5649_v39 = vpop.eup %5648  ;;  %v4573_v63 = vmul.f32 %v5647_v13, %v4572_v49  ;;  %v4415_v15 = vmax.f32 %v4399_v12, 0.0  ;;  %v5320_v59 = vmul.f32 -1.442695, %v4464_v6  ;;  %v4291_v11 = vmax.f32 %v4275_v7, 0.0 }
 0x6a1   :  { %v10117_v44 = vadd.f32 1.0, %v5649_v39  ;;  %v4470_v27 = vadd.f32 %v10046_v45, %v4452_v34 }
 0x6a2   :  { %v5651_v43 = vpop.eup %5650  ;;  %v4574_v21 = vadd.f32 %v5647_v13, %v4573_v63  ;;  %v4432_v57 = vmul.f32 %v10035_v1, %v4415_v15  ;;  %v4308_v46 = vmul.f32 %v9960_v35, %v4291_v11 }
 0x6a3   :  { %5652 = vrcp.f32 %v10117_v44  ;;  %v10132_v0 = vadd.f32 1.0, %v5651_v43  ;;  %v5326_v40 = vmul.f32 -1.442695, %v4470_v27  ;;  %v4564_v7 = vand.u32 2147483647, %v10117_v44 }
 0x6a4   :  { %v4578_v24 = vsel %vm4577_vm9, %v5647_v13, %v4574_v21  ;;  %5654 = vpow2.f32 %v5320_v59  ;;  %v4448_v13 = vadd.f32 %v4432_v57, %v9977_v3  ;;  %v4324_v22 = vadd.f32 %v4308_v46, %v9952_v9 }
 0x6a5   :  { %v4583_v18 = vsel %vm4580_vm10, %v4582_v33, %v4578_v24  ;;  %5656 = vrcp.f32 %v10132_v0  ;;  %v10164_v3 = vadd.s32 32, %v10073_v10  ;;  %v10172_v9 = vadd.s32 80, %v10073_v10  ;;  %v4366_v51 = vpop.permute.xlu2 %4365  ;;  %vm10207_vm10 = vmand %vm4807_vm2, %vm10095_vm4 }
 0x6a6   :  { %vm4884_vm12 = vcmp.ge.f32.partialorder %v4583_v18, 0.1  ;;  %5658 = vpow2.f32 %v5326_v40  ;;  %v4867_v62 = vsel %vm10128_vm11, %v4583_v18, 0.0  ;;  %v4466_v28 = vadd.f32 %v10046_v45, %v4448_v13  ;;  %v4330_v53 = vpop.permute.xlu1 %4329  ;;  %vm10226_vm2 = vmand %vm10190_vm7, %vm4834_vm15 }
 0x6a7   :  { %vm4900_vm14 = vmand %vm10128_vm11, %vm4884_vm12  ;;  %v4455_v52 = vadd.f32 %v4439_v14, %v4324_v22  ;;  %v4566_v60 = vand.u32 2147483648, %v10117_v44  ;;  %vm4560_vm3 = vweird.f32 %v10117_v44  ;;  %v4654_v39 = vand.u32 2147483647, %v10132_v0 }
 0x6a8   :  { %v4916_v35 = vsel %vm4900_vm14, 1.0, %v5910_v41  ;;  %v5322_v25 = vmul.f32 -1.442695, %v4466_v28  ;;  %vm4804_vm6 = vcmp.lt.s32.totalorder %v10164_v3, %v10082_v56  ;;  %v4402_v50 = vadd.f32 %v10021_v26, %v4366_v51  ;;  %vm10246_vm15 = vmand %vm10207_vm10, %vm4840_vm1 }
 0x6a9   :  { %v5653_v5 = vpop.eup %5652  ;;  %v4935_v29 = vsel %vm10138_vm13, %v4916_v35, %v4867_v62  ;;  %v4656_v11 = vand.u32 2147483648, %v10132_v0  ;;  %vm4810_vm8 = vcmp.lt.s32.totalorder %v10172_v9, %v10082_v56  ;;  %v4473_v43 = vadd.f32 %v10046_v45, %v4455_v52 }
 0x6aa   :  { %v5655_v19 = vpop.eup %5654  ;;  %4951 = vst [vmem:[#allocation2 + $0x58] sm:$0xff] %v4935_v29  ;;  %v4556_v47 = vmul.f32 %v5653_v5, %v10117_v44  ;;  %vm4561_vm5 = vweird.f32 %v5653_v5  ;;  %vm10198_vm9 = vcmp.eq.f32.partialorder %v4564_v7, 8.507059e+37  ;;  %v4567_v16 = vor.u32 1.1754944e-38, %v4566_v60 }
 0x6ab   :  { %v10169_v4 = vadd.f32 1.0, %v5655_v19  ;;  %v5657_v49 = vpop.eup %5656  ;;  %vm4562_vm11 = vmor %vm4560_vm3, %vm4561_vm5  ;;  %vm4650_vm12 = vweird.f32 %v10132_v0  ;;  %vm4837_vm0 = vcmp.ne.s32.totalorder %v10164_v3, %v9973_v38  ;;  %v10219_v24 = vadd.s32 48, %v10073_v10 }
 0x6ac   :  { %v4557_v12 = vsub.f32 1.0, %v4556_v47  ;;  %v5659_v6 = vpop.eup %5658  ;;  %v4646_v34 = vmul.f32 %v5657_v49, %v10132_v0  ;;  %vm4651_vm14 = vweird.f32 %v5657_v49  ;;  %vm4843_vm3 = vcmp.ne.s32.totalorder %v10172_v9, %v9973_v38 }
 0x6ad   :  { %5660 = vrcp.f32 %v10169_v4  ;;  %v10182_v15 = vadd.f32 1.0, %v5659_v6  ;;  %v10233_v44 = vadd.s32 104, %v10073_v10  ;;  %v5329_v18 = vmul.f32 -1.442695, %v4473_v43 }
 0x6ae   :  { %v4558_v63 = vmul.f32 %v5653_v5, %v4557_v12  ;;  %v4647_v27 = vsub.f32 1.0, %v4646_v34  ;;  %5662 = vpow2.f32 %v5322_v25  ;;  %v4418_v46 = vmax.f32 %v4402_v50, 0.0  ;;  %v10256_v19 = vpop.permute.xlu1 %4341 }
 0x6af   :  { %5664 = vrcp.f32 %v10182_v15  ;;  %vm10237_vm5 = vcmp.eq.f32.partialorder %v4654_v39, 8.507059e+37  ;;  %v4657_v13 = vor.u32 1.1754944e-38, %v4656_v11  ;;  %v4393_v22 = vadd.f32 %v10021_v26, %v4330_v53  ;;  %v4378_v11 = vpop.permute.xlu2 %4377 }
 0x6b0   :  { %v4559_v55 = vadd.f32 %v5653_v5, %v4558_v63  ;;  %v4648_v57 = vmul.f32 %v5657_v49, %v4647_v27  ;;  %5666 = vpow2.f32 %v5329_v18  ;;  %v4435_v0 = vmul.f32 %v10035_v1, %v4418_v46 }
 0x6b1   :  { %v4611_v25 = vand.u32 2147483648, %v10169_v4  ;;  %v4609_v34 = vand.u32 2147483647, %v10169_v4  ;;  %v4699_v27 = vand.u32 2147483647, %v10182_v15  ;;  %v4701_v21 = vand.u32 2147483648, %v10182_v15 }
 0x6b2   :  { %v4563_v31 = vsel %vm4562_vm11, %v5653_v5, %v4559_v55  ;;  %v4649_v35 = vadd.f32 %v5657_v49, %v4648_v57  ;;  %vm4605_vm11 = vweird.f32 %v10169_v4  ;;  %v4451_v33 = vadd.f32 %v4435_v0, %v9999_v17 }
 0x6b3   :  { %v5661_v14 = vpop.eup %5660  ;;  %v4568_v62 = vsel %vm10198_vm9, %v4567_v16, %v4563_v31  ;;  %vm4652_vm9 = vmor %vm4650_vm12, %vm4651_vm14  ;;  %v4612_v31 = vor.u32 1.1754944e-38, %v4611_v25  ;;  %v4409_v18 = vmax.f32 %v4393_v22, 0.0  ;;  %v4702_v5 = vor.u32 1.1754944e-38, %v4701_v21 }
 0x6b4   :  { %vm4883_vm7 = vcmp.ge.f32.partialorder %v4568_v62, 0.1  ;;  %v4601_v29 = vmul.f32 %v5661_v14, %v10169_v4  ;;  %v5663_v36 = vpop.eup %5662  ;;  %v4866_v47 = vsel %vm10226_vm2, %v4568_v62, 0.0  ;;  %v4653_v28 = vsel %vm4652_vm9, %v5657_v49, %v4649_v35 }
 0x6b5   :  { %vm4899_vm1 = vmand %vm10226_vm2, %vm4883_vm7  ;;  %v5665_v52 = vpop.eup %5664  ;;  %v4658_v12 = vsel %vm10237_vm5, %v4657_v13, %v4653_v28  ;;  %v10266_v7 = vadd.f32 1.0, %v5663_v36  ;;  %vm4606_vm14 = vweird.f32 %v5661_v14  ;;  %vm4806_vm5 = vcmp.lt.s32.totalorder %v10219_v24, %v10082_v56 }
 0x6b6   :  { %v4915_v51 = vsel %vm4899_vm1, 1.0, %v5910_v41  ;;  %v4602_v53 = vsub.f32 1.0, %v4601_v29  ;;  %vm4889_vm10 = vcmp.ge.f32.partialorder %v4658_v12, 0.1  ;;  %v4691_v49 = vmul.f32 %v5665_v52, %v10182_v15  ;;  %vm10284_vm2 = vmand %vm4804_vm6, %vm10095_vm4  ;;  %v5667_v57 = vpop.eup %5666  ;;  %v10338_v29 = vpop.permute.xlu1 %4349 }
 0x6b7   :  { %v4934_v60 = vsel %vm10138_vm13, %v4915_v51, %v4866_v47  ;;  %vm4905_vm12 = vmand %vm10246_vm15, %vm4889_vm10  ;;  %5668 = vrcp.f32 %v10266_v7  ;;  %v4872_v39 = vsel %vm10246_vm15, %v4658_v12, 0.0  ;;  %vm4696_vm7 = vweird.f32 %v5665_v52 }
 0x6b8   :  { %4950 = vst [vmem:[#allocation2] sm:$0xff] %v4934_v60  ;;  %v4603_v6 = vmul.f32 %v5661_v14, %v4602_v53  ;;  %v4921_v63 = vsel %vm4905_vm12, 1.0, %v5910_v41  ;;  %v4692_v59 = vsub.f32 1.0, %v4691_v49  ;;  %vm10299_vm6 = vmand %vm4810_vm8, %vm10095_vm4  ;;  %vm4610_vm9 = vcmp.eq.f32.partialorder %v4609_v34, 8.507059e+37 }
 0x6b9   :  { %v4940_v43 = vsel %vm10138_vm13, %v4921_v63, %v4872_v39  ;;  %vm4607_vm15 = vmor %vm4605_vm11, %vm4606_vm14  ;;  %vm4839_vm1 = vcmp.ne.s32.totalorder %v10219_v24, %v9973_v38  ;;  %v10318_v17 = vadd.f32 1.0, %v5667_v57  ;;  %v4469_v4 = vadd.f32 %v10046_v45, %v4451_v33  ;;  %v4390_v63 = vpop.permute.xlu2 %4389 }
 0x6ba   :  { %v4604_v55 = vadd.f32 %v5661_v14, %v4603_v6  ;;  %4956 = vst [vmem:[#allocation2 + $0x48] sm:$0xff] %v4940_v43  ;;  %v4693_v40 = vmul.f32 %v5665_v52, %v4692_v59  ;;  %vm10312_vm8 = vmand %vm10284_vm2, %vm4837_vm0  ;;  %vm4695_vm11 = vweird.f32 %v10182_v15  ;;  %vm10322_vm10 = vcmp.eq.f32.partialorder %v4699_v27, 8.507059e+37 }
 0x6bb   :  { %vm10331_vm0 = vmand %vm10299_vm6, %vm4843_vm3  ;;  %5670 = vrcp.f32 %v10318_v17  ;;  %v4426_v15 = vmul.f32 %v10035_v1, %v4409_v18  ;;  %v4639_v36 = vand.u32 2147483647, %v10266_v7  ;;  %v4405_v47 = vadd.f32 %v10021_v26, %v4378_v11 }
 0x6bc   :  { %v4608_v46 = vsel %vm4607_vm15, %v5661_v14, %v4604_v55  ;;  %v4694_v37 = vadd.f32 %v5665_v52, %v4693_v40  ;;  %vm4697_vm14 = vmor %vm4695_vm11, %vm4696_vm7  ;;  %v5325_v12 = vmul.f32 -1.442695, %v4469_v4  ;;  %v4641_v60 = vand.u32 2147483648, %v10266_v7 }
 0x6bd   :  { %v4613_v35 = vsel %vm4610_vm9, %v4612_v31, %v4608_v46  ;;  %v5669_v13 = vpop.eup %5668  ;;  %vm4846_vm7 = vcmp.ne.s32.totalorder %v10233_v44, %v9973_v38  ;;  %vm4813_vm9 = vcmp.lt.s32.totalorder %v10233_v44, %v10082_v56  ;;  %v4442_v25 = vadd.f32 %v4426_v15, %v9966_v23  ;;  %vm4823_vm11 = vmand %vm4806_vm5, %vm10095_vm4 }
 0x6be   :  { %vm4886_vm12 = vcmp.ge.f32.partialorder %v4613_v35, 0.1  ;;  %v4698_v9 = vsel %vm4697_vm14, %v5665_v52, %v4694_v37  ;;  %v4631_v22 = vmul.f32 %v5669_v13, %v10266_v7  ;;  %v4869_v28 = vsel %vm10312_vm8, %v4613_v35, 0.0  ;;  %vm10381_vm5 = vmand %vm4823_vm11, %vm4839_vm1  ;;  %v4362_v37 = vpop.permute.xlu1 %4361 }
 0x6bf   :  { %vm4902_vm2 = vmand %vm10312_vm8, %vm4886_vm12  ;;  %v4703_v51 = vsel %vm10322_vm10, %v4702_v5, %v4698_v9  ;;  %vm4636_vm15 = vweird.f32 %v5669_v13  ;;  %5672 = vpow2.f32 %v5325_v12  ;;  %v4421_v39 = vmax.f32 %v4405_v47, 0.0 }
 0x6c0   :  { %v4918_v0 = vsel %vm4902_vm2, 1.0, %v5910_v41  ;;  %vm4892_vm3 = vcmp.ge.f32.partialorder %v4703_v51, 0.1  ;;  %v4632_v52 = vsub.f32 1.0, %v4631_v22  ;;  %v4875_v49 = vsel %vm10331_vm0, %v4703_v51, 0.0  ;;  %vm10394_vm1 = vmand %vm4813_vm9, %vm10095_vm4 }
 0x6c1   :  { %v4937_v53 = vsel %vm10138_vm13, %v4918_v0, %v4869_v28  ;;  %vm4908_vm6 = vmand %vm10331_vm0, %vm4892_vm3  ;;  %v5671_v50 = vpop.eup %5670  ;;  %vm4635_vm8 = vweird.f32 %v10266_v7  ;;  %v4460_v23 = vadd.f32 %v10046_v45, %v4442_v25  ;;  %v4396_v27 = vadd.f32 %v10021_v26, %v10256_v19 }
 0x6c2   :  { %4953 = vst [vmem:[#allocation2 + $0x50] sm:$0xff] %v4937_v53  ;;  %v4924_v6 = vsel %vm4908_vm6, 1.0, %v5910_v41  ;;  %v4633_v34 = vmul.f32 %v5669_v13, %v4632_v52  ;;  %vm4640_vm10 = vcmp.eq.f32.partialorder %v4639_v36, 8.507059e+37  ;;  %v4642_v43 = vor.u32 1.1754944e-38, %v4641_v60  ;;  %vm4637_vm0 = vmor %vm4635_vm8, %vm4636_vm15 }
 0x6c3   :  { %v4943_v59 = vsel %vm10138_vm13, %v4924_v6, %v4875_v49  ;;  %v4736_v55 = vmul.f32 %v5671_v50, %v10318_v17  ;;  %v5316_v7 = vmul.f32 -1.442695, %v4460_v23  ;;  %v4438_v21 = vmul.f32 %v10035_v1, %v4421_v39  ;;  %vm10416_vm9 = vmand %vm10394_vm1, %vm4846_vm7 }
 0x6c4   :  { %4959 = vst [vmem:[#allocation2 + $0x10] sm:$0xff] %v4943_v59  ;;  %v4634_v11 = vadd.f32 %v5669_v13, %v4633_v34  ;;  %v4412_v16 = vmax.f32 %v4396_v27, 0.0  ;;  %v4408_v33 = vadd.f32 %v10021_v26, %v4390_v63  ;;  %v4744_v40 = vand.u32 2147483647, %v10318_v17 }
 0x6c5   :  { %v4737_v31 = vsub.f32 1.0, %v4736_v55  ;;  %v4746_v18 = vand.u32 2147483648, %v10318_v17  ;;  %v5673_v46 = vpop.eup %5672  ;;  %5674 = vpow2.f32 %v5316_v7  ;;  %v4454_v4 = vadd.f32 %v4438_v21, %v10018_v54 }
 0x6c6   :  { %v4638_v57 = vsel %vm4637_vm0, %v5669_v13, %v4634_v11  ;;  %v4429_v35 = vmul.f32 %v10035_v1, %v4412_v16  ;;  %vm4741_vm14 = vweird.f32 %v5671_v50  ;;  %v10398_v3 = vadd.f32 1.0, %v5673_v46  ;;  %v4374_v23 = vpop.permute.xlu1 %4373 }
 0x6c7   :  { %v4643_v62 = vsel %vm4640_vm10, %v4642_v43, %v4638_v57  ;;  %v4738_v14 = vmul.f32 %v5671_v50, %v4737_v31  ;;  %vm4740_vm3 = vweird.f32 %v10318_v17  ;;  %v4472_v54 = vadd.f32 %v10046_v45, %v4454_v4 }
 0x6c8   :  { %vm4888_vm12 = vcmp.ge.f32.partialorder %v4643_v62, 0.1  ;;  %v4445_v13 = vadd.f32 %v4429_v35, %v9991_v20  ;;  %v4424_v5 = vmax.f32 %v4408_v33, 0.0  ;;  %v4871_v15 = vsel %vm10381_vm5, %v4643_v62, 0.0  ;;  %vm4742_vm6 = vmor %vm4740_vm3, %vm4741_vm14 }
 0x6c9   :  { %vm4904_vm2 = vmand %vm10381_vm5, %vm4888_vm12  ;;  %v4739_v22 = vadd.f32 %v5671_v50, %v4738_v14  ;;  %5676 = vrcp.f32 %v10398_v3  ;;  %v4747_v47 = vor.u32 1.1754944e-38, %v4746_v18  ;;  %v5328_v28 = vmul.f32 -1.442695, %v4472_v54 }
 0x6ca   :  { %v4920_v9 = vsel %vm4904_vm2, 1.0, %v5910_v41  ;;  %vm4745_vm15 = vcmp.eq.f32.partialorder %v4744_v40, 8.507059e+37  ;;  %v4463_v0 = vadd.f32 %v10046_v45, %v4445_v13  ;;  %v4441_v51 = vmul.f32 %v10035_v1, %v4424_v5 }
 0x6cb   :  { %v4939_v36 = vsel %vm10138_vm13, %v4920_v9, %v4871_v15  ;;  %v4743_v17 = vsel %vm4742_vm6, %v5671_v50, %v4739_v22  ;;  %v5675_v12 = vpop.eup %5674  ;;  %5678 = vpow2.f32 %v5328_v28  ;;  %v4790_v52 = vadd.s32 72, %v10073_v10 }
 0x6cc   :  { %4955 = vst [vmem:[#allocation2 + $0x8] sm:$0xff] %v4939_v36  ;;  %v4748_v53 = vsel %vm4745_vm15, %v4747_v47, %v4743_v17  ;;  %v10423_v60 = vadd.f32 1.0, %v5675_v12  ;;  %v5319_v25 = vmul.f32 -1.442695, %v4463_v0  ;;  %v4457_v49 = vadd.f32 %v4441_v51, %v10032_v48 }
 0x6cd   :  { %vm4895_vm8 = vcmp.ge.f32.partialorder %v4748_v53, 0.1  ;;  %v4878_v44 = vsel %vm10416_vm9, %v4748_v53, 0.0  ;;  %v4398_v39 = vadd.f32 %v10021_v26, %v10338_v29  ;;  %v4401_v63 = vadd.f32 %v10021_v26, %v4362_v37 }
 0x6ce   :  { %vm4911_vm7 = vmand %vm10416_vm9, %vm4895_vm8  ;;  %5680 = vrcp.f32 %v10423_v60  ;;  %vm4842_vm11 = vcmp.ne.s32.totalorder %v4790_v52, %v9973_v38  ;;  %v10440_v48 = vadd.s32 96, %v10073_v10  ;;  %v4475_v27 = vadd.f32 %v10046_v45, %v4457_v49  ;;  %v4386_v17 = vpop.permute.xlu1 %4385 }
 0x6cf   :  { %v5677_v6 = vpop.eup %5676  ;;  %v4927_v34 = vsel %vm4911_vm7, 1.0, %v5910_v41  ;;  %5682 = vpow2.f32 %v5319_v25  ;;  %v4684_v29 = vand.u32 2147483647, %v10398_v3  ;;  %v4686_v55 = vand.u32 2147483648, %v10398_v3 }
 0x6d0   :  { %v4946_v50 = vsel %vm10138_vm13, %v4927_v34, %v4878_v44  ;;  %v4676_v59 = vmul.f32 %v5677_v6, %v10398_v3  ;;  %vm4809_vm10 = vcmp.lt.s32.totalorder %v4790_v52, %v10082_v56  ;;  %vm4833_vm0 = vcmp.ne.s32.totalorder %v10073_v10, %v9973_v38 }
 0x6d1   :  { %4962 = vst [vmem:[#allocation2 + $0x70] sm:$0xff] %v4946_v50  ;;  %v5679_v11 = vpop.eup %5678  ;;  %v5331_v21 = vmul.f32 -1.442695, %v4475_v27  ;;  %v4414_v16 = vmax.f32 %v4398_v39, 0.0  ;;  %v4417_v33 = vmax.f32 %v4401_v63, 0.0  ;;  %vm4681_vm5 = vweird.f32 %v5677_v6  ;;  %vm10458_vm1 = vmand %vm4809_vm10, %vm10095_vm4 }
 0x6d2   :  { %v4677_v43 = vsub.f32 1.0, %v4676_v59  ;;  %v10448_v7 = vadd.f32 1.0, %v5679_v11  ;;  %vm4800_vm12 = vcmp.lt.s32.totalorder %v10073_v10, %v10082_v56  ;;  %v10453_v19 = vadd.s32 24, %v10073_v10  ;;  %vm10474_vm15 = vmand %vm10458_vm1, %vm4842_vm11 }
 0x6d3   :  { %vm4680_vm14 = vweird.f32 %v10398_v3  ;;  %v4549_v18 = vand.u32 2147483647, %v10423_v60  ;;  %vm4812_vm2 = vcmp.lt.s32.totalorder %v10440_v48, %v10082_v56  ;;  %vm4685_vm3 = vcmp.eq.f32.partialorder %v4684_v29, 8.507059e+37 }
 0x6d4   :  { %v4678_v57 = vmul.f32 %v5677_v6, %v4677_v43  ;;  %v5681_v31 = vpop.eup %5680  ;;  %5684 = vrcp.f32 %v10448_v7  ;;  %vm4682_vm6 = vmor %vm4680_vm14, %vm4681_vm5  ;;  %v4687_v35 = vor.u32 1.1754944e-38, %v4686_v55  ;;  %v4551_v37 = vand.u32 2147483648, %v10423_v60 }
 0x6d5   :  { %v4541_v62 = vmul.f32 %v5681_v31, %v10423_v60  ;;  %5686 = vpow2.f32 %v5331_v21  ;;  %v5683_v4 = vpop.eup %5682  ;;  %v4431_v14 = vmul.f32 %v10035_v1, %v4414_v16  ;;  %v4434_v24 = vmul.f32 %v10035_v1, %v4417_v33  ;;  %vm10496_vm5 = vmand %vm4800_vm12, %vm10095_vm4 }
 0x6d6   :  { %v4679_v46 = vadd.f32 %v5677_v6, %v4678_v57  ;;  %v10478_v5 = vadd.f32 1.0, %v5683_v4  ;;  %v10481_v15 = vadd.s32 120, %v10073_v10  ;;  %vm4545_vm9 = vweird.f32 %v10423_v60 }
 0x6d7   :  { %v4542_v13 = vsub.f32 1.0, %v4541_v62  ;;  %vm10484_vm8 = vcmp.eq.f32.partialorder %v4549_v18, 8.507059e+37  ;;  %vm4845_vm7 = vcmp.ne.s32.totalorder %v10440_v48, %v9973_v38  ;;  %v4447_v36 = vadd.f32 %v4431_v14, %v10011_v8 }
 0x6d8   :  { %v4683_v3 = vsel %vm4682_vm6, %v5677_v6, %v4679_v46  ;;  %vm4546_vm10 = vweird.f32 %v5681_v31  ;;  %5688 = vrcp.f32 %v10478_v5  ;;  %v4552_v8 = vor.u32 1.1754944e-38, %v4551_v37 }
 0x6d9   :  { %v4688_v9 = vsel %vm4685_vm3, %v4687_v35, %v4683_v3  ;;  %v4543_v47 = vmul.f32 %v5681_v31, %v4542_v13  ;;  %vm4803_vm1 = vcmp.lt.s32.totalorder %v10453_v19, %v10082_v56  ;;  %v4465_v0 = vadd.f32 %v10046_v45, %v4447_v36  ;;  %vm4547_vm12 = vmor %vm4545_vm9, %vm4546_vm10 }
 0x6da   :  { %vm4891_vm11 = vcmp.ge.f32.partialorder %v4688_v9, 0.1  ;;  %v5685_v20 = vpop.eup %5684  ;;  %v4450_v51 = vadd.f32 %v4434_v24, %v10027_v2  ;;  %v4404_v12 = vadd.f32 %v10021_v26, %v4374_v23  ;;  %v4874_v52 = vsel %vm10474_vm15, %v4688_v9, 0.0  ;;  %vm10528_vm3 = vmand %vm10496_vm5, %vm4833_vm0 }
 0x6db   :  { %vm4907_vm14 = vmand %vm10474_vm15, %vm4891_vm11  ;;  %v5687_v53 = vpop.eup %5686  ;;  %v4544_v44 = vadd.f32 %v5681_v31, %v4543_v47  ;;  %v4721_v49 = vmul.f32 %v5685_v20, %v10448_v7  ;;  %v4729_v2 = vand.u32 2147483647, %v10448_v7  ;;  %v10521_v39 = vadd.f32 %v10021_v26, %v4386_v17 }
 0x6dc   :  { %v4923_v25 = vsel %vm4907_vm14, 1.0, %v5910_v41  ;;  %v10518_v34 = vadd.f32 1.0, %v5687_v53  ;;  %v4731_v59 = vand.u32 2147483648, %v10448_v7  ;;  %vm4836_vm6 = vcmp.ne.s32.totalorder %v10453_v19, %v9973_v38  ;;  %vm10544_vm9 = vmand %vm4812_vm2, %vm10095_vm4 }
 0x6dd   :  { %v4942_v6 = vsel %vm10138_vm13, %v4923_v25, %v4874_v52  ;;  %v4548_v63 = vsel %vm4547_vm12, %v5681_v31, %v4544_v44  ;;  %v4722_v60 = vsub.f32 1.0, %v4721_v49  ;;  %v5321_v23 = vmul.f32 -1.442695, %v4465_v0  ;;  %vm10570_vm14 = vmand %vm10544_vm9, %vm4845_vm7 }
 0x6de   :  { %4958 = vst [vmem:[#allocation2 + $0x20] sm:$0xff] %v4942_v6  ;;  %v4553_v26 = vsel %vm10484_vm8, %v4552_v8, %v4548_v63  ;;  %5690 = vrcp.f32 %v10518_v34  ;;  %v4468_v27 = vadd.f32 %v10046_v45, %v4450_v51  ;;  %v4420_v11 = vmax.f32 %v4404_v12, 0.0  ;;  %v5689_v43 = vpop.eup %5688  ;;  %vm10587_vm7 = vmand %vm4803_vm1, %vm10095_vm4 }
 0x6df   :  { %vm4882_vm0 = vcmp.ge.f32.partialorder %v4553_v26, 0.1  ;;  %v4723_v29 = vmul.f32 %v5685_v20, %v4722_v60  ;;  %vm4726_vm15 = vweird.f32 %v5685_v20  ;;  %v4594_v21 = vand.u32 2147483647, %v10478_v5 }
 0x6e0   :  { %vm4815_vm8 = vcmp.lt.s32.totalorder %v10481_v15, %v10082_v56  ;;  %vm4898_vm11 = vmand %vm10528_vm3, %vm4882_vm0  ;;  %vm4725_vm10 = vweird.f32 %v10448_v7  ;;  %vm10554_vm5 = vcmp.eq.f32.partialorder %v4729_v2, 8.507059e+37  ;;  %v4586_v33 = vmul.f32 %v5689_v43, %v10478_v5 }
 0x6e1   :  { %5692 = vpow2.f32 %v5321_v23  ;;  %v4865_v57 = vsel %vm10528_vm3, %v4553_v26, 0.0  ;;  %v4914_v31 = vsel %vm4898_vm11, 1.0, %v5910_v41  ;;  %v4724_v40 = vadd.f32 %v5685_v20, %v4723_v29  ;;  %vm4727_vm2 = vmor %vm4725_vm10, %vm4726_vm15 }
 0x6e2   :  { %v4596_v18 = vand.u32 2147483648, %v10478_v5  ;;  %v4933_v46 = vsel %vm10138_vm13, %v4914_v31, %v4865_v57  ;;  %v4732_v7 = vor.u32 1.1754944e-38, %v4731_v59  ;;  %v4587_v62 = vsub.f32 1.0, %v4586_v33  ;;  %vm10613_vm11 = vmand %vm10587_vm7, %vm4836_vm6 }
 0x6e3   :  { %v5324_v4 = vmul.f32 -1.442695, %v4468_v27  ;;  %4949 = vst [vmem:[#allocation2 + $0x30] sm:$0xff] %v4933_v46  ;;  %v4728_v35 = vsel %vm4727_vm2, %v5685_v20, %v4724_v40  ;;  %vm4590_vm12 = vweird.f32 %v10478_v5  ;;  %vm10575_vm3 = vcmp.eq.f32.partialorder %v4594_v21, 8.507059e+37 }
 0x6e4   :  { %v4437_v24 = vmul.f32 %v10035_v1, %v4420_v11  ;;  %v5691_v3 = vpop.eup %5690  ;;  %v4733_v54 = vsel %vm10554_vm5, %v4732_v7, %v4728_v35  ;;  %v4588_v13 = vmul.f32 %v5689_v43, %v4587_v62  ;;  %vm4591_vm0 = vweird.f32 %v5689_v43 }
 0x6e5   :  { %5694 = vpow2.f32 %v5324_v4  ;;  %vm4894_vm15 = vcmp.ge.f32.partialorder %v4733_v54, 0.1  ;;  %v4597_v48 = vor.u32 1.1754944e-38, %v4596_v18  ;;  %v4766_v22 = vmul.f32 %v5691_v3, %v10518_v34  ;;  %vm4592_vm1 = vmor %vm4590_vm12, %vm4591_vm0 }
 0x6e6   :  { %v4774_v36 = vand.u32 2147483647, %v10518_v34  ;;  %vm4910_vm9 = vmand %vm10570_vm14, %vm4894_vm15  ;;  %v4589_v28 = vadd.f32 %v5689_v43, %v4588_v13  ;;  %v4776_v17 = vand.u32 2147483648, %v10518_v34  ;;  %v4453_v20 = vadd.f32 %v4437_v24, %v10042_v32 }
 0x6e7   :  { %v5693_v47 = vpop.eup %5692  ;;  %v4423_v8 = vmax.f32 %v10521_v39, 0.0  ;;  %v4877_v0 = vsel %vm10570_vm14, %v4733_v54, 0.0  ;;  %v4926_v51 = vsel %vm4910_vm9, 1.0, %v5910_v41  ;;  %v4767_v12 = vsub.f32 1.0, %v4766_v22  ;;  %vm4832_vm14 = vmand %vm4815_vm8, %vm10095_vm4 }
 0x6e8   :  { %v10604_v53 = vadd.f32 1.0, %v5693_v47  ;;  %v4945_v52 = vsel %vm10138_vm13, %v4926_v51, %v4877_v0  ;;  %v4593_v25 = vsel %vm4592_vm1, %v5689_v43, %v4589_v28  ;;  %v4471_v44 = vadd.f32 %v10046_v45, %v4453_v20 }
 0x6e9   :  { %v4440_v5 = vmul.f32 %v10035_v1, %v4423_v8  ;;  %4961 = vst [vmem:[#allocation2 + $0x60] sm:$0xff] %v4945_v52  ;;  %v4598_v49 = vsel %vm10575_vm3, %v4597_v48, %v4593_v25  ;;  %v4768_v6 = vmul.f32 %v5691_v3, %v4767_v12  ;;  %vm4771_vm10 = vweird.f32 %v5691_v3 }
 0x6ea   :  { %5696 = vrcp.f32 %v10604_v53  ;;  %vm4885_vm5 = vcmp.ge.f32.partialorder %v4598_v49, 0.1  ;;  %vm4848_vm6 = vcmp.ne.s32.totalorder %v10481_v15, %v9973_v38  ;;  %vm4770_vm2 = vweird.f32 %v10518_v34 }
 0x6eb   :  { %v5695_v2 = vpop.eup %5694  ;;  %vm4901_vm12 = vmand %vm10613_vm11, %vm4885_vm5  ;;  %v4769_v1 = vadd.f32 %v5691_v3, %v4768_v6  ;;  %v5327_v39 = vmul.f32 -1.442695, %v4471_v44  ;;  %v4456_v63 = vadd.f32 %v4440_v5, %v10055_v42  ;;  %v4868_v50 = vsel %vm10613_vm11, %v4598_v49, 0.0 }
 0x6ec   :  { %v10632_v19 = vadd.f32 1.0, %v5695_v2  ;;  %v4917_v34 = vsel %vm4901_vm12, 1.0, %v5910_v41  ;;  %vm4772_vm3 = vmor %vm4770_vm2, %vm4771_vm10  ;;  %v4777_v60 = vor.u32 1.1754944e-38, %v4776_v17  ;;  %vm4775_vm8 = vcmp.eq.f32.partialorder %v4774_v36, 8.507059e+37 }
 0x6ed   :  { %v4936_v59 = vsel %vm10138_vm13, %v4917_v34, %v4868_v50  ;;  %v4773_v23 = vsel %vm4772_vm3, %v5691_v3, %v4769_v1  ;;  %vm10643_vm0 = vmand %vm4832_vm14, %vm4848_vm6  ;;  %v4786_v27 = vadd.s32 40, %v10073_v10  ;;  %v4474_v43 = vadd.f32 %v10046_v45, %v4456_v63 }
 0x6ee   :  { %5698 = vrcp.f32 %v10632_v19  ;;  %4952 = vst [vmem:[#allocation2 + $0x18] sm:$0xff] %v4936_v59  ;;  %v4778_v42 = vsel %vm4775_vm8, %v4777_v60, %v4773_v23  ;;  %v4789_v21 = vadd.s32 64, %v10073_v10  ;;  %v4626_v31 = vand.u32 2147483648, %v10604_v53 }
 0x6ef   :  { %5700 = vpow2.f32 %v5327_v39  ;;  %vm4897_vm15 = vcmp.ge.f32.partialorder %v4778_v42, 0.1  ;;  %v4880_v29 = vsel %vm10643_vm0, %v4778_v42, 0.0  ;;  %v5330_v16 = vmul.f32 -1.442695, %v4474_v43 }
 0x6f0   :  { %v5697_v11 = vpop.eup %5696  ;;  %vm4913_vm7 = vmand %vm10643_vm0, %vm4897_vm15  ;;  %vm4805_vm9 = vcmp.lt.s32.totalorder %v4786_v27, %v10082_v56  ;;  %v4624_v46 = vand.u32 2147483647, %v10604_v53  ;;  %vm4838_vm11 = vcmp.ne.s32.totalorder %v4786_v27, %v9973_v38  ;;  %vm4808_vm5 = vcmp.lt.s32.totalorder %v4789_v21, %v10082_v56 }
 0x6f1   :  { %v4616_v15 = vmul.f32 %v5697_v11, %v10604_v53  ;;  %v4929_v55 = vsel %vm4913_vm7, 1.0, %v5910_v41  ;;  %5702 = vpow2.f32 %v5330_v16  ;;  %vm4621_vm1 = vweird.f32 %v5697_v11  ;;  %vm4822_vm10 = vmand %vm4805_vm9, %vm10095_vm4 }
 0x6f2   :  { %v4948_v33 = vsel %vm10138_vm13, %v4929_v55, %v4880_v29  ;;  %vm4620_vm6 = vweird.f32 %v10604_v53  ;;  %v4627_v35 = vor.u32 1.1754944e-38, %v4626_v31  ;;  %v4669_v14 = vand.u32 2147483647, %v10632_v19  ;;  %vm10672_vm3 = vmand %vm4822_vm10, %vm4838_vm11 }
 0x6f3   :  { %v4617_v57 = vsub.f32 1.0, %v4616_v15  ;;  %4964 = vst [vmem:[#allocation2 + $0x28] sm:$0xff] %v4948_v33  ;;  %vm4622_vm2 = vmor %vm4620_vm6, %vm4621_vm1  ;;  %v4671_v24 = vand.u32 2147483648, %v10632_v19  ;;  %vm4625_vm12 = vcmp.eq.f32.partialorder %v4624_v46, 8.507059e+37  ;;  %vm4841_vm8 = vcmp.ne.s32.totalorder %v4789_v21, %v9973_v38 }
 0x6f4   :  { %v5699_v45 = vpop.eup %5698  ;;  %vm4665_vm0 = vweird.f32 %v10632_v19  ;;  %vm4825_vm15 = vmand %vm4808_vm5, %vm10095_vm4  ;;  %vm4670_vm11 = vcmp.eq.f32.partialorder %v4669_v14, 8.507059e+37  ;;  %v4792_v28 = vadd.s32 88, %v10073_v10  ;;  %v4795_v49 = vadd.s32 112, %v10073_v10 }
 0x6f5   :  { %v5701_v40 = vpop.eup %5700  ;;  %v4618_v18 = vmul.f32 %v5697_v11, %v4617_v57  ;;  %v4661_v7 = vmul.f32 %v5699_v45, %v10632_v19  ;;  %vm4666_vm14 = vweird.f32 %v5699_v45  ;;  %v4672_v47 = vor.u32 1.1754944e-38, %v4671_v24  ;;  %vm4857_vm10 = vmand %vm4825_vm15, %vm4841_vm8 }
 0x6f6   :  { %v4535_v62 = vadd.f32 1.0, %v5701_v40  ;;  %vm4667_vm9 = vmor %vm4665_vm0, %vm4666_vm14  ;;  %vm4814_vm15 = vcmp.lt.s32.totalorder %v4795_v49, %v10082_v56  ;;  %v10718_v16 = vmov 0.0   ;;  %v10720_v33 = vmov 0.0  }
 0x6f7   :  { %v4619_v4 = vadd.f32 %v5697_v11, %v4618_v18  ;;  %v4662_v37 = vsub.f32 1.0, %v4661_v7  ;;  %v5703_v48 = vpop.eup %5702 }
 0x6f8   :  { %5704 = vrcp.f32 %v4535_v62  ;;  %v4538_v36 = vadd.f32 1.0, %v5703_v48  ;;  %v4716_v5 = vand.u32 2147483648, %v4535_v62  ;;  %v4714_v1 = vand.u32 2147483647, %v4535_v62 }
 0x6f9   :  { %v4623_v3 = vsel %vm4622_vm2, %v5697_v11, %v4619_v4  ;;  %v4663_v13 = vmul.f32 %v5699_v45, %v4662_v37  ;;  %vm4811_vm2 = vcmp.lt.s32.totalorder %v4792_v28, %v10082_v56  ;;  %vm4710_vm8 = vweird.f32 %v4535_v62 }
 0x6fa   :  { %v4628_v9 = vsel %vm4625_vm12, %v4627_v35, %v4623_v3  ;;  %5706 = vrcp.f32 %v4538_v36  ;;  %vm4844_vm12 = vcmp.ne.s32.totalorder %v4792_v28, %v9973_v38  ;;  %v4717_v63 = vor.u32 1.1754944e-38, %v4716_v5 }
 0x6fb   :  { %vm4887_vm7 = vcmp.ge.f32.partialorder %v4628_v9, 0.1  ;;  %v4664_v22 = vadd.f32 %v5699_v45, %v4663_v13  ;;  %v4870_v17 = vsel %vm10672_vm3, %v4628_v9, 0.0  ;;  %v4761_v60 = vand.u32 2147483648, %v4538_v36 }
 0x6fc   :  { %vm4903_vm1 = vmand %vm10672_vm3, %vm4887_vm7  ;;  %vm4715_vm7 = vcmp.eq.f32.partialorder %v4714_v1, 8.507059e+37  ;;  %v4759_v26 = vand.u32 2147483647, %v4538_v36 }
 0x6fd   :  { %v4919_v20 = vsel %vm4903_vm1, 1.0, %v5910_v41  ;;  %v4668_v8 = vsel %vm4667_vm9, %v5699_v45, %v4664_v22  ;;  %vm4828_vm3 = vmand %vm4811_vm2, %vm10095_vm4  ;;  %vm4755_vm2 = vweird.f32 %v4538_v36  ;;  %v4762_v11 = vor.u32 1.1754944e-38, %v4761_v60 }
 0x6fe   :  { %v5705_v0 = vpop.eup %5704  ;;  %v4938_v51 = vsel %vm10138_vm13, %v4919_v20, %v4870_v17  ;;  %v4673_v12 = vsel %vm4670_vm11, %v4672_v47, %v4668_v8  ;;  %vm10700_vm9 = vmand %vm4828_vm3, %vm4844_vm12  ;;  %vm4760_vm12 = vcmp.eq.f32.partialorder %v4759_v26, 8.507059e+37 }
 0x6ff   :  { %4954 = vst [vmem:[#allocation2 + $0x68] sm:$0xff] %v4938_v51  ;;  %vm4890_vm5 = vcmp.ge.f32.partialorder %v4673_v12, 0.1  ;;  %v4706_v53 = vmul.f32 %v5705_v0, %v4535_v62  ;;  %v4873_v52 = vsel %vm4857_vm10, %v4673_v12, 0.0  ;;  %vm4711_vm14 = vweird.f32 %v5705_v0 }
 0x700   :  { %vm4906_vm6 = vmand %vm4857_vm10, %vm4890_vm5  ;;  %v5707_v6 = vpop.eup %5706  ;;  %vm4847_vm10 = vcmp.ne.s32.totalorder %v4795_v49, %v9973_v38 }
 0x701   :  { %v4922_v25 = vsel %vm4906_vm6, 1.0, %v5910_v41  ;;  %v4707_v32 = vsub.f32 1.0, %v4706_v53  ;;  %v4751_v19 = vmul.f32 %v5707_v6, %v4538_v36  ;;  %vm4712_vm0 = vmor %vm4710_vm8, %vm4711_vm14  ;;  %vm4756_vm1 = vweird.f32 %v5707_v6 }
 0x702   :  { %v4941_v44 = vsel %vm10138_vm13, %v4922_v25, %v4873_v52  ;;  %vm4831_vm5 = vmand %vm4814_vm15, %vm10095_vm4 }
 0x703   :  { %4957 = vst [vmem:[#allocation2 + $0x40] sm:$0xff] %v4941_v44  ;;  %v4708_v2 = vmul.f32 %v5705_v0, %v4707_v32  ;;  %v4752_v50 = vsub.f32 1.0, %v4751_v19  ;;  %vm4757_vm14 = vmor %vm4755_vm2, %vm4756_vm1 }
 0x704   :  { %vm4863_vm3 = vmand %vm4831_vm5, %vm4847_vm10 }
 0x705   :  { %v4709_v39 = vadd.f32 %v5705_v0, %v4708_v2  ;;  %v4753_v23 = vmul.f32 %v5707_v6, %v4752_v50 }
 0x707   :  { %v4713_v34 = vsel %vm4712_vm0, %v5705_v0, %v4709_v39  ;;  %v4754_v56 = vadd.f32 %v5707_v6, %v4753_v23 }
 0x708   :  { %v4718_v59 = vsel %vm4715_vm7, %v4717_v63, %v4713_v34 }
 0x709   :  { %vm4893_vm11 = vcmp.ge.f32.partialorder %v4718_v59, 0.1  ;;  %v4876_v42 = vsel %vm10700_vm9, %v4718_v59, 0.0  ;;  %v4758_v15 = vsel %vm4757_vm14, %v5707_v6, %v4754_v56 }
 0x70a   :  { %vm4909_vm6 = vmand %vm10700_vm9, %vm4893_vm11  ;;  %v4763_v58 = vsel %vm4760_vm12, %v4762_v11, %v4758_v15 }
 0x70b   :  { %v4925_v27 = vsel %vm4909_vm6, 1.0, %v5910_v41  ;;  %vm4896_vm4 = vcmp.ge.f32.partialorder %v4763_v58, 0.1  ;;  %v4879_v29 = vsel %vm4863_vm3, %v4763_v58, 0.0  ;;  %5251 = sbr.rel (%p5333_p1) target bundleno = 2583 (0xa17), region = 104 }
 0x70c   :  { %v4944_v43 = vsel %vm10138_vm13, %v4925_v27, %v4876_v42  ;;  %vm4912_vm8 = vmand %vm4863_vm3, %vm4896_vm4 }
 0x70d   :  { %4960 = vst [vmem:[#allocation2 + $0x38] sm:$0xff] %v4944_v43  ;;  %v4928_v55 = vsel %vm4912_vm8, 1.0, %v5910_v41 }
 0x70e   :  { %v4947_v21 = vsel %vm10138_vm13, %v4928_v55, %v4879_v29 }
 0x70f   :  { %4963 = vst [vmem:[#allocation2 + $0x78] sm:$0xff] %v4947_v21 }
 0x710   :  { %v10722_v57 = vmov 0.0   ;;  %v10724_v31 = vmov 0.0  }
 0x711 LB: > { %s10738_s4 = sld [smem:[#allocation4 + %s5842_s24]]  ;;  %s4993_s25 = sadd.s32 16, %s5842_s24  ;;  %s5842_s24 = sphi %s10726_s24, %s4987_s24   ;;  %v5838_v31 = vphi %v10724_v31, %v11928_v31   ;;  %v5834_v57 = vphi %v10722_v57, %v11927_v57  }
 0x712   : > { %s10741_s26 = sld [smem:[#allocation4 + %s4993_s25]]  ;;  %s5844_s5 = smov 0  }
 0x713   : > { %s5848_s12 = smov 0  }
 0x717   : > { %p5005_p2 = scmp.eq.s32.totalorder %s10738_s4, 5  ;;  %p5006_p3 = scmp.eq.s32.totalorder %s10738_s4, 10 }
 0x718   : > { %p4995_p4 = scmp.gt.s32.totalorder %s10741_s26, 0  ;;  %p5334_p5 = scmp.lt.s32.totalorder %s10741_s26, 15 }
 0x719   : > { %p5339_p6 = scmp.lt.s32.totalorder %s10741_s26, 7  ;;  %p10752_p7 = por %p5006_p3, %p5005_p2 }
 0x71a   : > { %s4996_s28 = scalar_select %p4995_p4, %s10741_s26, 0  ;;  %vm5011_vm13 = vcmask (%p10752_p7), 1040384  }
 0x71b   : > { %v5012_v45 = vsel (%p10752_p7), %vm5011_vm13, %v5838_v31, 0.0  ;;  %v5022_v40 = vsel (%p10752_p7), %vm5011_vm13, %v5838_v31, -inf }
 0x71c   : > { %s5349_s29 = scalar_select %p5334_p5, %s4996_s28, 15  ;;  %5013 = vadd.xlane.f32.xlu0 (%p10752_p7), %v5012_v45 }
 0x71d   : > { %s11932_s28 = smov (!%p5339_p6, %s4996_s28), 7  ;;  %5010 = sbr.rel (!%p10752_p7) target bundleno = 2006 (0x7d6), region = 52 }
 0x71e   : > { %s4999_s30 = scalar_lea.vmem [#allocation3], %s5349_s29  ;;  %s5003_s2 = scalar_lea.vmem %s10874_s7, %s11932_s28 }
 0x71f   : > { %v10757_v41 = vld [vmem:[%s4999_s30] sm:$0x1] }
 0x720   : > { %v10762_v30 = vld [vmem:[%s5003_s2] sm:$0x1] }
 0x724   : > { %5023 = vmax.xlane.f32.xlu0 %v5022_v40 }
 0x78f   : > { %v5014_v18 = vpop.xlane.xlu0 %5013 }
 0x790   : > { %v5015_v46 = vrot.slane %v5014_v18, 4 }
 0x792   : > { %v5016_v7 = vadd.f32 %v5015_v46, %v5014_v18 }
 0x794   : > { %v5017_v62 = vrot.slane %v5016_v7, 2 }
 0x796   : > { %v5018_v4 = vadd.f32 %v5017_v62, %v5016_v7 }
 0x797   : > { %v5024_v35 = vpop.xlane.xlu0 %5023 }
 0x798   : > { %v5025_v37 = vrot.slane %v5024_v35, 4  ;;  %v5019_v14 = vrot.slane %v5018_v4, 1 }
 0x79a   : > { %v5026_v24 = vmax.f32 %v5024_v35, %v5025_v37  ;;  %v5020_v3 = vadd.f32 %v5019_v14, %v5018_v4 }
 0x79c   : > { %v5027_v54 = vrot.slane %v5026_v24, 2  ;;  %5355 = vpush %v5020_v3 }
 0x79e   : > { %v5028_v13 = vmax.f32 %v5026_v24, %v5027_v54 }
 0x7a0   : > { %v5029_v48 = vrot.slane %v5028_v13, 1 }
 0x7a2   : > { %v5030_v9 = vmax.f32 %v5028_v13, %v5029_v48 }
 0x7a4   : > { %5357 = vpush %v5030_v9 }
 0x7cd   : > { %s5356_s12 = spop %5355  }
 0x7d5   : > { %s5358_s5 = spop %5357  }
 0x7d6 PF: > { %p5039_p8 = scmp.eq.s32.totalorder %s10738_s4, 4  ;;  %p5344_p9 = scmp.ne.s32.totalorder %s10738_s4, 4  ;;  %v10780_v22 = vmov 0   ;;  %s5850_s12 = sphi %s5848_s12, %s5356_s12   ;;  %s5846_s5 = sphi %s5844_s5, %s5358_s5  }
 0x7d7   : > { %s5374_s13 = scalar_select %p10752_p7, %s5850_s12, 0.0 }
 0x7d8   : > { %s5375_s14 = scalar_select %p10752_p7, %s5846_s5, 0.0 }
 0x7d9   : > { %5042 = sbr.rel (%p5344_p9) target bundleno = 2372 (0x944), region = 60  ;;  %p5043_p10 = scmp.eq.s32.totalorder (!%p5344_p9), %s10741_s26, 0 }
 0x7da   : > { %p5345_p11 = scmp.ne.s32.totalorder (!%p5344_p9), %s10741_s26, 0 }
 0x7de   : > { %v5852_v22 = vmov 0   ;;  %5046 = sbr.rel (%p5345_p11) target bundleno = 2177 (0x881), region = 64 }
 0x7e3   : > { %v5062_v36 = vld [vmem:[#allocation2 + $0x28] sm:$0xff]  ;;  %v5061_v47 = vld [vmem:[#allocation2 + $0x78] sm:$0xff]  ;;  %v5060_v28 = vld [vmem:[#allocation2 + $0x70] sm:$0xff] }
 0x7e4   : > { %5063 = vmatpush.msra.mxu0 %v5062_v36  ;;  %v5059_v17 = vld [vmem:[#allocation2 + $0x60] sm:$0xff]  ;;  %v5058_v20 = vld [vmem:[#allocation2 + $0x38] sm:$0xff]  ;;  %v5057_v8 = vld [vmem:[#allocation2 + $0x10] sm:$0xff] }
 0x7e5   : > { %v5056_v0 = vld [vmem:[#allocation2 + $0x20] sm:$0xff]  ;;  %v5054_v12 = vld [vmem:[#allocation2 + $0x48] sm:$0xff]  ;;  %v5051_v25 = vld [vmem:[#allocation2 + $0x50] sm:$0xff] }
 0x7e6   : > { %5064 = vmatpush.msra.mxu0 %v5061_v47  ;;  %v5055_v51 = vld [vmem:[#allocation2 + $0x40] sm:$0xff]  ;;  %v5053_v53 = vld [vmem:[#allocation2 + $0x8] sm:$0xff]  ;;  %v5050_v32 = vld [vmem:[#allocation2 + $0x18] sm:$0xff] }
 0x7e7   : > { %v5052_v52 = vld [vmem:[#allocation2 + $0x68] sm:$0xff]  ;;  %v5049_v44 = vld [vmem:[#allocation2 + $0x58] sm:$0xff]  ;;  %v5048_v5 = vld [vmem:[#allocation2] sm:$0xff] }
 0x7e8   : > { %5065 = vmatpush.msra.mxu0 %v5060_v28  ;;  %v5047_v49 = vld [vmem:[#allocation2 + $0x30] sm:$0xff] }
 0x7ea   : > { %5066 = vmatpush.msra.mxu0 %v5059_v17 }
 0x7ec   : > { %5067 = vmatpush.msra.mxu0 %v5058_v20 }
 0x7ee   : > { %5068 = vmatpush.msra.mxu0 %v5057_v8 }
 0x7f0   : > { %5069 = vmatpush.msra.mxu0 %v5056_v0 }
 0x7f2   : > { %5070 = vmatpush.msra.mxu0 %v5055_v51 }
 0x7f4   : > { %5071 = vmatpush.msra.mxu0 %v5054_v12 }
 0x7f6   : > { %5072 = vmatpush.msra.mxu0 %v5053_v53 }
 0x7f8   : > { %5073 = vmatpush.msra.mxu0 %v5052_v52 }
 0x7fa   : > { %5074 = vmatpush.msra.mxu0 %v5051_v25 }
 0x7fc   : > { %5075 = vmatpush.msra.mxu0 %v5050_v32 }
 0x7fe   : > { %5076 = vmatpush.msra.mxu0 %v5049_v44 }
 0x800   : > { %5077 = vmatpush.msra.mxu0 %v5048_v5 }
 0x802   : > { %5078 = vmatpush.msra.mxu0 %v5047_v49 }
 0x803   : > { %5079 = vmatmul.f32.vlgmr.msra.gmra.mxu0 %v5838_v31 }
 0x880   : > { %v5080_v22 = vpop.f32.mrf.mxu0  }
 0x881 PF: > { %5086 = sbr.rel (%p5043_p10) target bundleno = 2372 (0x944), region = 68  ;;  %v5854_v22 = vphi %v5852_v22, %v5080_v22  }
 0x886   : > { %v5102_v6 = vld [vmem:[#allocation2 + $0x28] sm:$0xff]  ;;  %v5101_v2 = vld [vmem:[#allocation2 + $0x78] sm:$0xff]  ;;  %v5100_v1 = vld [vmem:[#allocation2 + $0x70] sm:$0xff] }
 0x887   : > { %5103 = vmatpush.xpose.msra.mxu0 %v5102_v6  ;;  %v5099_v19 = vld [vmem:[#allocation2 + $0x60] sm:$0xff]  ;;  %v5098_v39 = vld [vmem:[#allocation2 + $0x38] sm:$0xff]  ;;  %v5097_v63 = vld [vmem:[#allocation2 + $0x10] sm:$0xff] }
 0x888   : > { %v5096_v50 = vld [vmem:[#allocation2 + $0x20] sm:$0xff]  ;;  %v5094_v10 = vld [vmem:[#allocation2 + $0x48] sm:$0xff]  ;;  %v5091_v23 = vld [vmem:[#allocation2 + $0x50] sm:$0xff] }
 0x889   : > { %v5095_v34 = vld [vmem:[#allocation2 + $0x40] sm:$0xff]  ;;  %v5093_v60 = vld [vmem:[#allocation2 + $0x8] sm:$0xff]  ;;  %v5090_v26 = vld [vmem:[#allocation2 + $0x18] sm:$0xff] }
 0x88a   : > { %v5092_v59 = vld [vmem:[#allocation2 + $0x68] sm:$0xff]  ;;  %v5089_v56 = vld [vmem:[#allocation2 + $0x58] sm:$0xff]  ;;  %v5088_v42 = vld [vmem:[#allocation2] sm:$0xff] }
 0x88b   : > { %5104 = vmatpush.xpose.msra.mxu0 %v5101_v2  ;;  %v5087_v27 = vld [vmem:[#allocation2 + $0x30] sm:$0xff] }
 0x88f   : > { %5105 = vmatpush.xpose.msra.mxu0 %v5100_v1 }
 0x893   : > { %5106 = vmatpush.xpose.msra.mxu0 %v5099_v19 }
 0x897   : > { %5107 = vmatpush.xpose.msra.mxu0 %v5098_v39 }
 0x89b   : > { %5108 = vmatpush.xpose.msra.mxu0 %v5097_v63 }
 0x89f   : > { %5109 = vmatpush.xpose.msra.mxu0 %v5096_v50 }
 0x8a3   : > { %5110 = vmatpush.xpose.msra.mxu0 %v5095_v34 }
 0x8a7   : > { %5111 = vmatpush.xpose.msra.mxu0 %v5094_v10 }
 0x8ab   : > { %5112 = vmatpush.xpose.msra.mxu0 %v5093_v60 }
 0x8af   : > { %5113 = vmatpush.xpose.msra.mxu0 %v5092_v59 }
 0x8b3   : > { %5114 = vmatpush.xpose.msra.mxu0 %v5091_v23 }
 0x8b7   : > { %5115 = vmatpush.xpose.msra.mxu0 %v5090_v26 }
 0x8bb   : > { %5116 = vmatpush.xpose.msra.mxu0 %v5089_v56 }
 0x8bf   : > { %5117 = vmatpush.xpose.msra.mxu0 %v5088_v42 }
 0x8c3   : > { %5118 = vmatpush.xpose.msra.mxu0 %v5087_v27 }
 0x8c6   : > { %5119 = vmatmul.f32.vlgmr.msra.gmra.mxu0 %v5838_v31 }
 0x943   : > { %v5120_v22 = vpop.f32.mrf.mxu0  }
 0x944 PF: > { %s5365_s3 = scalar_select %p5344_p9, 1, 0  ;;  %v5141_v11 = vstv %s10741_s26  ;;  %v5911_v15 = vmov 0.0   ;;  %v5154_v29 = vstv %s5374_s13  ;;  %v5135_v21 = vmul.f32 %v5838_v31, %v10762_v30  ;;  %v5858_v22 = vphi %v5854_v22, %v5120_v22   ;;  %v5862_v22 = vphi %v10780_v22, %v5858_v22  }
 0x945   : > { %p5129_p12 = scmp.eq.s32.totalorder %s10738_s4, 1  ;;  %p5134_p13 = scmp.eq.s32.totalorder %s10738_s4, 2  ;;  %vm5142_vm0 = vcmp.eq.s32.totalorder %v9973_v38, %v5141_v11  ;;  %v5155_v40 = vmul.f32 %v9982_v61, %v5154_v29  ;;  %v5160_v18 = vstv %s5375_s14  ;;  %v5169_v13 = vmin.f32 %v5838_v31, %v10757_v41 }
 0x946   : > { %v5366_v43 = vstv %s5365_s3  ;;  %p5140_p0 = scmp.eq.s32.totalorder %s10738_s4, 3  ;;  %v5346_v58 = vsel %vm5142_vm0, 1.0, %v5911_v15  ;;  %p5166_p1 = scmp.eq.s32.totalorder %s10738_s4, 6  ;;  %v5161_v24 = vmul.f32 %v9982_v61, %v5160_v18  ;;  %v5177_v9 = vmax.f32 %v5838_v31, %v10757_v41 }
 0x947   : > { %s5130_s15 = scalar_select %p5129_p12, 1, 0  ;;  %vm10805_vm15 = vcmp.ne.s32.totalorder %v5366_v43, 0  ;;  %v5145_v33 = vmul.f32 %v5838_v31, %v5346_v58  ;;  %v5864_v17 = vmov 0  }
 0x948   : > { %s5136_s16 = scalar_select %p5134_p13, 1, 0  ;;  %v5368_v30 = vsel %vm10805_vm15, 0.0, %v5862_v22 }
 0x949   : > { %v5131_v16 = vstv %s5130_s15  ;;  %s5146_s18 = scalar_select %p5140_p0, 1, 0 }
 0x94a   : > { %vm5132_vm7 = vcmp.eq.s32.totalorder %v5131_v16, 1  ;;  %v5137_v45 = vstv %s5136_s16  ;;  %s5150_s19 = scalar_select %p5039_p8, 1, 0 }
 0x94b   : > { %v5133_v46 = vsel %vm5132_vm7, %v9982_v61, %v5838_v31  ;;  %vm5138_vm9 = vcmp.eq.s32.totalorder %v5137_v45, 1  ;;  %v5147_v7 = vstv %s5146_s18  ;;  %s5156_s6 = scalar_select %p5005_p2, 1, 0 }
 0x94c   : > { %v5139_v62 = vsel %vm5138_vm9, %v5135_v21, %v5133_v46  ;;  %vm5148_vm1 = vcmp.eq.s32.totalorder %v5147_v7, 1  ;;  %v5151_v4 = vstv %s5150_s19  ;;  %s5162_s0 = scalar_select %p5006_p3, 1, 0 }
 0x94d   : > { %v5149_v35 = vsel %vm5148_vm1, %v5145_v33, %v5139_v62  ;;  %vm5152_vm11 = vcmp.eq.s32.totalorder %v5151_v4, 1  ;;  %v5157_v37 = vstv %s5156_s6  ;;  %p5167_p4 = scmp.eq.s32.totalorder %s10738_s4, 8  ;;  %p5174_p5 = scmp.eq.s32.totalorder %s10738_s4, 7 }
 0x94e   : > { %v5153_v14 = vsel %vm5152_vm11, %v5368_v30, %v5149_v35  ;;  %vm5158_vm10 = vcmp.eq.s32.totalorder %v5157_v37, 1  ;;  %v5163_v3 = vstv %s5162_s0  ;;  %p5175_p6 = scmp.eq.s32.totalorder %s10738_s4, 9  ;;  %s5182_s22 = scalar_lea.vmem [#allocation3], %s5842_s24 }
 0x94f   : > { %v5159_v54 = vsel %vm5158_vm10, %v5155_v40, %v5153_v14  ;;  %vm5164_vm5 = vcmp.eq.s32.totalorder %v5163_v3, 1  ;;  %p5168_p2 = por %p5167_p4, %p5166_p1  ;;  %p5347_p3 = scmp.le.s32.totalorder %s5978_s1, 0 }
 0x950   : > { %p5176_p7 = por %p5175_p6, %p5174_p5  ;;  %v5165_v48 = vsel %vm5164_vm5, %v5161_v24, %v5159_v54 }
 0x951   : > { %s5170_s20 = scalar_select %p5168_p2, 1, 0 }
 0x952   : > { %s5178_s21 = scalar_select %p5176_p7, 1, 0 }
 0x953   : > { %v5171_v22 = vstv %s5170_s20  ;;  %5187 = sbr.rel (%p5347_p3) target bundleno = 2574 (0xa0e), region = 76 }
 0x954   : > { %vm5172_vm6 = vcmp.eq.s32.totalorder %v5171_v22, 1  ;;  %v5179_v36 = vstv %s5178_s21 }
 0x955   : > { %v5173_v47 = vsel %vm5172_vm6, %v5169_v13, %v5165_v48  ;;  %vm5180_vm2 = vcmp.eq.s32.totalorder %v5179_v36, 1 }
 0x956   : > { %v5181_v28 = vsel %vm5180_vm2, %v5177_v9, %v5173_v47  }
 0x957   : > { %5183 = vst [vmem:[%s5182_s22] sm:$0x1] %v5181_v28 }
 0x958   : > { %vm5190_vm14 = vcmask 1040384   ;;  %v5188_v52 = vstv %s5842_s24 }
 0x959   : > { %v5191_v20 = vsel %vm5190_vm14, %v5181_v28, -inf  ;;  %vm5189_vm12 = vcmp.eq.s32.totalorder %v9973_v38, %v5188_v52 }
 0x95a   : > { %5192 = vmax.xlane.f32.xlu0 %v5191_v20 }
 0x9cd   : > { %v5193_v31 = vpop.xlane.xlu0 %5192 }
 0x9ce   : > { %v5194_v41 = vrot.slane %v5193_v31, 4 }
 0x9d0   : > { %v5195_v8 = vmax.f32 %v5193_v31, %v5194_v41 }
 0x9d2   : > { %v5196_v0 = vrot.slane %v5195_v8, 2 }
 0x9d4   : > { %v5197_v51 = vmax.f32 %v5195_v8, %v5196_v0 }
 0x9d6   : > { %v5198_v12 = vrot.slane %v5197_v51, 1 }
 0x9d8   : > { %v5199_v53 = vmax.f32 %v5197_v51, %v5198_v12 }
 0x9da   : > { %5359 = vpush %v5199_v53 }
 0xa0b   : > { %s5360_s23 = spop %5359 }
 0xa0c   : > { %v5201_v25 = vstv %s5360_s23 }
 0xa0d   : > { %v5202_v17 = vsel %vm5189_vm12, %v5201_v25, %v5834_v57  }
 0xa0e PF: > { %s5370_s4 = scalar_select %p5347_p3, 1, 0  ;;  %v11928_v31 = vmov %v5181_v28  ;;  %v5866_v17 = vphi %v5864_v17, %v5202_v17  }
 0xa0f   : > { %s4987_s24 = sadd.s32 1, %s5842_s24  }
 0xa10   : > { %v5371_v32 = vstv %s5370_s4  ;;  %p4986_p8 = scmp.ge.s32.totalorder %s4987_s24, %s5970_s17 }
 0xa11   : > { %vm5372_vm3 = vcmp.ne.s32.totalorder %v5371_v32, 0  ;;  %v11930_v33 = vmov (%p4986_p8), %v5181_v28 }
 0xa12   : > { %v5373_v44 = vsel %vm5372_vm3, %v5834_v57, %v5866_v17   ;;  %4989 = sbr.rel (!%p4986_p8) target bundleno = 1809 (0x711), region = 110 }
 0xa13   : > { %v11927_v57 = vmov %v5373_v44  ;;  %v11929_v16 = vmov (%p4986_p8), %v5373_v44 }
 0xa17 PF:  { %5208 = vst [vmem:[#allocation9] sm:$0x1] %v5874_v33  ;;  %s5217_s27 = sshll.u32 %s10875_s8, 4  ;;  %s5912_s28 = smov [#allocation9]   ;;  %v5874_v33 = vphi %v10720_v33, %v11930_v33   ;;  %v5870_v16 = vphi %v10718_v16, %v11929_v16   ;;  %s5218_s27 = int_to_ptr.hbm [resolvable:$true] %s5217_s27 }
 0xa18   :  { %5209 = vst [vmem:[#allocation10] sm:$0x1] %v5870_v16  ;;  %s5215_s29 = sshll.u32 %s5912_s28, 4  ;;  %s5913_s7 = smov [#allocation10]   ;;  %s5216_s29 = int_to_ptr.vmem [resolvable:$true] %s5215_s29 }
 0xa19   :  { %5220 = dma.vmem_to_hbm [thread:$0]  %s5216_s29, 16, %s5218_s27, [#allocation5]  }
 0xa1a   :  { %s5226_s17 = sshll.u32 %s5913_s7, 4  ;;  %s5228_s30 = sshll.u32 %s10876_s9, 4  ;;  %s5227_s17 = int_to_ptr.vmem [resolvable:$true] %s5226_s17  ;;  %s5229_s30 = int_to_ptr.hbm [resolvable:$true] %s5228_s30 }
 0xa1b   :  { %5231 = dma.vmem_to_hbm [thread:$0]  %s5227_s17, 16, %s5229_s30, [#allocation11]  }
 0xa1c   :  { %5828 = dma.done.wait [#allocation5], 16  }
 0xa1d   :  { %5829 = vsyncadd [#allocation5], 4294967280 }
 0xa1e   :  { %5830 = dma.done.wait [#allocation11], 16  }
 0xa1f   :  { %5831 = vsyncadd [#allocation11], 4294967280 }
 0xa20   :  { %5240 = vsyncpa [#allocation5], 1 }
 0xa21   :  { %5241 = vsyncpa [#allocation11], 1 }
 0xa22   :  { %5242 = vsyncpa [#allocation6], 1 }
 0xa23   :  { %5243 = vsyncpa [#allocation8], 1 }

</bundles_post_ra>
